<compile_context>
chip_gen: v7x
topology: tpu7x:2x2x1
jax: 0.10.0
libtpu: 0.0.40
codegen_flags: <defaults>
</compile_context>

<pallas_src>
import jax
import jax.numpy as jnp
from jax import lax
from jax.experimental import pallas as pl
from jax.experimental.pallas import tpu as pltpu


# ---------------------------------------------------------------------------
# Fused whole-network kernel (built once per (meta, B, L) at trace time)
# ---------------------------------------------------------------------------
def _make_kernel(meta, nb, L):
    """meta: {name: (row_offset, rows, cols)} into the packed weight slab."""

    def kernel(x_ref, w_ref, out_ref):
        def rd(name):
            off, r, c = meta[name]
            return w_ref[off:off + r, 0:c]          # static slice of the slab

        relu = lambda v: jnp.maximum(v, 0.0)

        mask_cache = {}

        def masks(lseg):
            # (M,1) float masks killing the k=3 taps that would cross a
            # per-batch segment boundary after folding batch into rows.
            if lseg not in mask_cache:
                m = nb * lseg
                pos = lax.broadcasted_iota(jnp.int32, (m, 1), 0) % lseg
                first = (pos != 0).astype(jnp.float32)         # no x[l-1] at l==0
                last = (pos != lseg - 1).astype(jnp.float32)   # no x[l+1] at l==end
                mask_cache[lseg] = (first, last)
            return mask_cache[lseg]

        def conv3(x, prefix, lseg):
            # 'same' Conv1d(k=3) as a shifted-sum of three MXU matmuls
            # (no im2col lane concat).
            fm, lm = masks(lseg)
            m = x.shape[0]
            xd = pltpu.roll(x, shift=1, axis=0) * fm           # x[l-1]
            xu = pltpu.roll(x, shift=m - 1, axis=0) * lm       # x[l+1]
            return (jnp.dot(x, rd(prefix + ".w1"), preferred_element_type=jnp.float32)
                    + jnp.dot(xd, rd(prefix + ".w0"), preferred_element_type=jnp.float32)
                    + jnp.dot(xu, rd(prefix + ".w2"), preferred_element_type=jnp.float32))

        def encode(x, name, lseg):
            h = relu(conv3(x, name + ".c1", lseg) + rd(name + ".c1.b"))
            f = relu(conv3(h, name + ".c2", lseg) + rd(name + ".c2.b"))
            m, c = f.shape
            p = jnp.max(f.reshape(m // 2, 2, c), axis=1)       # MaxPool1d(2)
            return f, p

        def decode(x, skip, name, lseg_in):
            # ConvTranspose1d(k=3, s=2, pad=1, out_pad=1), polyphase:
            #   out[2t]   = x[t]·W1 + b
            #   out[2t+1] = x[t]·W2 + x[t+1]·W0 + b
            _, lm = masks(lseg_in)
            m = x.shape[0]
            tb = rd(name + ".t.b")
            xs = pltpu.roll(x, shift=m - 1, axis=0) * lm       # x[t+1]
            te = jnp.dot(x, rd(name + ".t.w1"), preferred_element_type=jnp.float32) + tb
            to = (jnp.dot(x, rd(name + ".t.w2"), preferred_element_type=jnp.float32)
                  + jnp.dot(xs, rd(name + ".t.w0"), preferred_element_type=jnp.float32) + tb)
            co = te.shape[1]
            # One (unavoidable) even/odd interleave per resolution doubling.
            t = jnp.stack([te, to], axis=1).reshape(2 * m, co)
            lseg = 2 * lseg_in
            # conv(cat([t, skip], channels)) == conv_t(t) + conv_s(skip):
            # the channel concat is removed by splitting the weight along Cin.
            h = relu(conv3(t, name + ".c1t", lseg)
                     + conv3(skip, name + ".c1s", lseg)
                     + rd(name + ".c1t.b"))
            return relu(conv3(h, name + ".c2", lseg) + rd(name + ".c2.b"))

        x = x_ref[...]                                         # (nb*L, Cin), batch folded
        f1, p1 = encode(x, "down1", L)
        f2, p2 = encode(p1, "down2", L // 2)
        f3, p3 = encode(p2, "down3", L // 4)
        f4, p4 = encode(p3, "down4", L // 8)

        lneck = L // 16
        neck = relu(conv3(relu(conv3(p4, "neck.c1", lneck) + rd("neck.c1.b")),
                          "neck.c2", lneck) + rd("neck.c2.b"))

        u = decode(neck, f4, "up1", L // 16)
        u = decode(u, f3, "up2", L // 8)
        u = decode(u, f2, "up3", L // 4)
        u = decode(u, f1, "up4", L // 2)                       # (nb*L, filters[0])

        # Lane-dense classifier epilogue: contract channels of W^T (O, C) with
        # channels of u (M, C) -> (O, M), so the store has nb*L lanes.
        y = lax.dot_general(rd("cls.wT"), u, (((1,), (1,)), ((), ())),
                            preferred_element_type=jnp.float32) + rd("cls.b")
        out_ref[...] = y.astype(out_ref.dtype)

    return kernel


# ---------------------------------------------------------------------------
# pallas_call wrapper
# ---------------------------------------------------------------------------
def unet_forward(slab, x, meta):
    B, L, cin = x.shape
    assert L % 16 == 0 and L >= 16, "UNET needs L divisible by 16 (4 stride-2 levels)"
    out_dim = meta["cls.wT"][1]
    rows = slab.shape[0]
    x2 = x.reshape(B * L, cin)                                  # fold batch into rows
    y = pl.pallas_call(
        _make_kernel(meta, B, L),
        grid=(1,),                                              # whole net = one step
        in_specs=[pl.BlockSpec((B * L, cin), lambda i: (0, 0)),
                  pl.BlockSpec((rows, 128), lambda i: (0, 0))],
        out_specs=pl.BlockSpec((out_dim, B * L), lambda i: (0, 0)),
        out_shape=jax.ShapeDtypeStruct((out_dim, B * L), jnp.float32),
        compiler_params=pltpu.CompilerParams(
            dimension_semantics=("arbitrary",),
            vmem_limit_bytes=32 * 1024 * 1024),
    )(x2, slab)
    return y.reshape(out_dim, B, L).transpose(1, 0, 2)          # (B, out_dim, L)


# ---------------------------------------------------------------------------
# Parameters (deterministic synthetic init, PyTorch-equivalent structure)
# NOTE: synthetic conv weights are stored (K, Cin, Cout); real torch
#       checkpoints (Cout, Cin, K) / (Cin, Cout, K) would need transposing.
# ---------------------------------------------------------------------------
def init_unet_params(seed=0, input_dim=1, output_dim=4,
                     filters=(8, 16, 32, 64, 128), kernel=3):
    key = jax.random.PRNGKey(seed)
    ctr = [0]

    def nxt():
        ctr[0] += 1
        return jax.random.fold_in(key, ctr[0])

    def conv(cin, cout):
        w = 0.05 * jax.random.normal(nxt(), (kernel, cin, cout), jnp.float32)
        b = 0.05 * jax.random.normal(nxt(), (1, cout), jnp.float32)
        return w, b

    params = {}
    enc_in = [input_dim, filters[0], filters[1], filters[2]]
    for i in range(4):
        w1, b1 = conv(enc_in[i], filters[i])
        w2, b2 = conv(filters[i], filters[i])
        params[f"down{i+1}"] = dict(w1=w1, b1=b1, w2=w2, b2=b2)

    w1, b1 = conv(filters[3], filters[4])
    w2, b2 = conv(filters[4], filters[4])
    params["neck"] = dict(w1=w1, b1=b1, w2=w2, b2=b2)

    up_in = [filters[4], filters[3], filters[2], filters[1]]
    up_out = [filters[3], filters[2], filters[1], filters[0]]
    for i in range(4):
        tw, tb = conv(up_in[i], up_out[i])      # ConvTranspose1d weight (K,Cin,Cout)
        w1, b1 = conv(up_in[i], up_out[i])      # after concat: Cin = 2*Cout = up_in
        w2, b2 = conv(up_out[i], up_out[i])
        params[f"up{i+1}"] = dict(tw=tw, tb=tb, w1=w1, b1=b1, w2=w2, b2=b2)

    params["cls_w"] = 0.05 * jax.random.normal(nxt(), (filters[0], output_dim), jnp.float32)
    params["cls_b"] = 0.05 * jax.random.normal(nxt(), (1, output_dim), jnp.float32)
    return params


# ---------------------------------------------------------------------------
# One-time weight packing: everything into a single (R, 128) f32 slab with
# static 8-aligned row offsets (kernel then has only 2 operands).
# ---------------------------------------------------------------------------
def _pack(entries):
    blocks, meta, off = [], {}, 0
    for name, a in entries:
        a = jnp.asarray(a, jnp.float32)
        if a.ndim == 1:
            a = a.reshape(1, -1)
        r, c = a.shape
        assert c <= 128, (name, a.shape)
        rp = -(-r // 8) * 8                                    # align rows to 8
        blocks.append(jnp.pad(a, ((0, rp - r), (0, 128 - c))))
        meta[name] = (off, r, c)
        off += rp
    return jnp.concatenate(blocks, axis=0), meta


def pack_params(p):
    entries = []

    def add_conv3(prefix, w, b=None):                          # w: (3, Cin, Cout)
        entries.append((prefix + ".w0", w[0]))
        entries.append((prefix + ".w1", w[1]))
        entries.append((prefix + ".w2", w[2]))
        if b is not None:
            entries.append((prefix + ".b", b))

    for name in ("down1", "down2", "down3", "down4"):
        d = p[name]
        add_conv3(name + ".c1", d["w1"], d["b1"])
        add_conv3(name + ".c2", d["w2"], d["b2"])
    add_conv3("neck.c1", p["neck"]["w1"], p["neck"]["b1"])
    add_conv3("neck.c2", p["neck"]["w2"], p["neck"]["b2"])
    for name in ("up1", "up2", "up3", "up4"):
        u = p[name]
        co = u["tw"].shape[-1]
        add_conv3(name + ".t", u["tw"], u["tb"])
        add_conv3(name + ".c1t", u["w1"][:, :co, :], u["b1"])  # cat order (up, skip)
        add_conv3(name + ".c1s", u["w1"][:, co:, :])
        add_conv3(name + ".c2", u["w2"], u["b2"])
    entries.append(("cls.wT", p["cls_w"].T))                   # (out_dim, filters[0])
    entries.append(("cls.b", p["cls_b"].reshape(-1, 1)))       # (out_dim, 1)
    return _pack(entries)


if __name__ == "__main__":
    B, L, IN_DIM, OUT_DIM = 2, 32, 1, 4
    x = jax.random.normal(jax.random.PRNGKey(0), (B, L, IN_DIM), jnp.float32)
    params = init_unet_params(seed=0, input_dim=IN_DIM, output_dim=OUT_DIM)
    slab, meta = pack_params(params)            # one-time weight re-layout (eager)

    fwd = jax.jit(lambda s, xx: unet_forward(s, xx, meta))
    y = fwd(slab, x)
    jax.block_until_ready(y)
    assert y.shape == (B, OUT_DIM, L), y.shape
    assert bool(jnp.all(jnp.isfinite(y)))
    print("KERNEL_OK")
</pallas_src>

<mosaic_0001>
module attributes {stable_mosaic.version = 11 : i64} {
  func.func @kernel(%arg0: i32, %arg1: memref<64x1xf32, #tpu.memory_space<vmem>>, %arg2: memref<3120x128xf32, #tpu.memory_space<vmem>>, %arg3: memref<4x64xf32, #tpu.memory_space<vmem>>) attributes {dimension_semantics = [#tpu.dimension_semantics<arbitrary>], iteration_bounds = array<i64: 1>, scalar_prefetch = 0 : i64, scratch_operands = 0 : i64, tpu.core_type = #tpu.core_type<tc>, window_params = [{pipeline_mode = #tpu.pipeline_mode<synchronous>, transform_indices = @transform_0, window_bounds = array<i64: 64, 1>}, {pipeline_mode = #tpu.pipeline_mode<synchronous>, transform_indices = @transform_1, window_bounds = array<i64: 3120, 128>}, {pipeline_mode = #tpu.pipeline_mode<synchronous>, transform_indices = @transform_2, window_bounds = array<i64: 4, 64>}]} {
    %c0 = arith.constant 0 : index
    %c0_0 = arith.constant 0 : index
    %0 = vector.load %arg1[%c0, %c0_0] : memref<64x1xf32, #tpu.memory_space<vmem>>, vector<64x1xf32>
    %1 = tpu.iota {dimensions = array<i32: 0>} : vector<64x1xi32>
    %c32_i32 = arith.constant 32 : i32
    %c0_i32 = arith.constant 0 : i32
    %2 = arith.cmpi eq, %c32_i32, %c0_i32 : i32
    %c1_i32 = arith.constant 1 : i32
    %3 = arith.select %2, %c1_i32, %c32_i32 : i32
    %4 = vector.broadcast %3 : i32 to vector<64x1xi32>
    %5 = arith.remsi %1, %4 : vector<64x1xi32>
    %c0_i32_1 = arith.constant 0 : i32
    %6 = vector.broadcast %c0_i32_1 : i32 to vector<64x1xi32>
    %7 = arith.cmpi ne, %5, %6 : vector<64x1xi32>
    %c0_i32_2 = arith.constant 0 : i32
    %8 = vector.broadcast %c0_i32_2 : i32 to vector<64x1xi32>
    %9 = arith.cmpi slt, %5, %8 : vector<64x1xi32>
    %c0_i32_3 = arith.constant 0 : i32
    %10 = arith.cmpi slt, %3, %c0_i32_3 : i32
    %11 = vector.broadcast %10 : i1 to vector<64x1xi1>
    %12 = vector.broadcast %11 : vector<64x1xi1> to vector<64x1xi1>
    %13 = arith.xori %9, %12 : vector<64x1xi1>
    %14 = arith.andi %13, %7 : vector<64x1xi1>
    %15 = vector.broadcast %3 : i32 to vector<64x1xi32>
    %16 = arith.addi %5, %15 : vector<64x1xi32>
    %17 = arith.select %14, %16, %5 : vector<64x1xi1>, vector<64x1xi32>
    %c0_i32_4 = arith.constant 0 : i32
    %18 = vector.broadcast %c0_i32_4 : i32 to vector<64x1xi32>
    %19 = arith.cmpi ne, %17, %18 : vector<64x1xi32>
    %20 = arith.extui %19 : vector<64x1xi1> to vector<64x1xi32>
    %21 = arith.sitofp %20 : vector<64x1xi32> to vector<64x1xf32>
    %c31_i32 = arith.constant 31 : i32
    %22 = vector.broadcast %c31_i32 : i32 to vector<64x1xi32>
    %23 = arith.cmpi ne, %17, %22 : vector<64x1xi32>
    %24 = arith.extui %23 : vector<64x1xi1> to vector<64x1xi32>
    %25 = arith.sitofp %24 : vector<64x1xi32> to vector<64x1xf32>
    %c1_i32_5 = arith.constant 1 : i32
    %26 = tpu.dynamic_rotate %0 by %c1_i32_5 dim 0 : vector<64x1xf32>, i32 -> vector<64x1xf32>
    %27 = arith.mulf %26, %21 : vector<64x1xf32>
    %c63_i32 = arith.constant 63 : i32
    %28 = tpu.dynamic_rotate %0 by %c63_i32 dim 0 : vector<64x1xf32>, i32 -> vector<64x1xf32>
    %29 = arith.mulf %28, %25 : vector<64x1xf32>
    %c8 = arith.constant 8 : index
    %c0_6 = arith.constant 0 : index
    %30 = vector.load %arg2[%c8, %c0_6] : memref<3120x128xf32, #tpu.memory_space<vmem>>, vector<1x8xf32>
    %cst = arith.constant dense<0.000000e+00> : vector<64x8xf32>
    %31 = tpu.matmul %0, %30, %cst {dimension_numbers = #tpu.dot_dimension_numbers<[1], [0], [0], [1], [0, 0, 1, 1], [], []>} : vector<64x1xf32>, vector<1x8xf32>, vector<64x8xf32> -> vector<64x8xf32>
    %c0_7 = arith.constant 0 : index
    %c0_8 = arith.constant 0 : index
    %32 = vector.load %arg2[%c0_7, %c0_8] : memref<3120x128xf32, #tpu.memory_space<vmem>>, vector<1x8xf32>
    %cst_9 = arith.constant dense<0.000000e+00> : vector<64x8xf32>
    %33 = tpu.matmul %27, %32, %cst_9 {dimension_numbers = #tpu.dot_dimension_numbers<[1], [0], [0], [1], [0, 0, 1, 1], [], []>} : vector<64x1xf32>, vector<1x8xf32>, vector<64x8xf32> -> vector<64x8xf32>
    %34 = arith.addf %31, %33 : vector<64x8xf32>
    %c16 = arith.constant 16 : index
    %c0_10 = arith.constant 0 : index
    %35 = vector.load %arg2[%c16, %c0_10] : memref<3120x128xf32, #tpu.memory_space<vmem>>, vector<1x8xf32>
    %cst_11 = arith.constant dense<0.000000e+00> : vector<64x8xf32>
    %36 = tpu.matmul %29, %35, %cst_11 {dimension_numbers = #tpu.dot_dimension_numbers<[1], [0], [0], [1], [0, 0, 1, 1], [], []>} : vector<64x1xf32>, vector<1x8xf32>, vector<64x8xf32> -> vector<64x8xf32>
    %37 = arith.addf %34, %36 : vector<64x8xf32>
    %c24 = arith.constant 24 : index
    %c0_12 = arith.constant 0 : index
    %38 = vector.load %arg2[%c24, %c0_12] : memref<3120x128xf32, #tpu.memory_space<vmem>>, vector<1x8xf32>
    %39 = vector.broadcast %38 : vector<1x8xf32> to vector<64x8xf32>
    %40 = arith.addf %37, %39 : vector<64x8xf32>
    %cst_13 = arith.constant 0.000000e+00 : f32
    %41 = vector.broadcast %cst_13 : f32 to vector<64x8xf32>
    %42 = arith.maximumf %40, %41 : vector<64x8xf32>
    %c1_i32_14 = arith.constant 1 : i32
    %43 = tpu.dynamic_rotate %42 by %c1_i32_14 dim 0 : vector<64x8xf32>, i32 -> vector<64x8xf32>
    %44 = vector.broadcast %21 : vector<64x1xf32> to vector<64x8xf32>
    %45 = arith.mulf %43, %44 : vector<64x8xf32>
    %c63_i32_15 = arith.constant 63 : i32
    %46 = tpu.dynamic_rotate %42 by %c63_i32_15 dim 0 : vector<64x8xf32>, i32 -> vector<64x8xf32>
    %47 = vector.broadcast %25 : vector<64x1xf32> to vector<64x8xf32>
    %48 = arith.mulf %46, %47 : vector<64x8xf32>
    %c40 = arith.constant 40 : index
    %c0_16 = arith.constant 0 : index
    %49 = vector.load %arg2[%c40, %c0_16] : memref<3120x128xf32, #tpu.memory_space<vmem>>, vector<8x8xf32>
    %cst_17 = arith.constant dense<0.000000e+00> : vector<64x8xf32>
    %50 = tpu.matmul %42, %49, %cst_17 {dimension_numbers = #tpu.dot_dimension_numbers<[1], [0], [0], [1], [0, 0, 1, 1], [], []>} : vector<64x8xf32>, vector<8x8xf32>, vector<64x8xf32> -> vector<64x8xf32>
    %c32 = arith.constant 32 : index
    %c0_18 = arith.constant 0 : index
    %51 = vector.load %arg2[%c32, %c0_18] : memref<3120x128xf32, #tpu.memory_space<vmem>>, vector<8x8xf32>
    %cst_19 = arith.constant dense<0.000000e+00> : vector<64x8xf32>
    %52 = tpu.matmul %45, %51, %cst_19 {dimension_numbers = #tpu.dot_dimension_numbers<[1], [0], [0], [1], [0, 0, 1, 1], [], []>} : vector<64x8xf32>, vector<8x8xf32>, vector<64x8xf32> -> vector<64x8xf32>
    %53 = arith.addf %50, %52 : vector<64x8xf32>
    %c48 = arith.constant 48 : index
    %c0_20 = arith.constant 0 : index
    %54 = vector.load %arg2[%c48, %c0_20] : memref<3120x128xf32, #tpu.memory_space<vmem>>, vector<8x8xf32>
    %cst_21 = arith.constant dense<0.000000e+00> : vector<64x8xf32>
    %55 = tpu.matmul %48, %54, %cst_21 {dimension_numbers = #tpu.dot_dimension_numbers<[1], [0], [0], [1], [0, 0, 1, 1], [], []>} : vector<64x8xf32>, vector<8x8xf32>, vector<64x8xf32> -> vector<64x8xf32>
    %56 = arith.addf %53, %55 : vector<64x8xf32>
    %c56 = arith.constant 56 : index
    %c0_22 = arith.constant 0 : index
    %57 = vector.load %arg2[%c56, %c0_22] : memref<3120x128xf32, #tpu.memory_space<vmem>>, vector<1x8xf32>
    %58 = vector.broadcast %57 : vector<1x8xf32> to vector<64x8xf32>
    %59 = arith.addf %56, %58 : vector<64x8xf32>
    %cst_23 = arith.constant 0.000000e+00 : f32
    %60 = vector.broadcast %cst_23 : f32 to vector<64x8xf32>
    %61 = arith.maximumf %59, %60 : vector<64x8xf32>
    %62 = vector.shape_cast %61 : vector<64x8xf32> to vector<32x2x8xf32>
    %cst_24 = arith.constant dense<0xFF800000> : vector<32x8xf32>
    %63 = vector.multi_reduction <maximumf>, %62, %cst_24 [1] : vector<32x2x8xf32> to vector<32x8xf32>
    %64 = tpu.iota {dimensions = array<i32: 0>} : vector<32x1xi32>
    %c16_i32 = arith.constant 16 : i32
    %c0_i32_25 = arith.constant 0 : i32
    %65 = arith.cmpi eq, %c16_i32, %c0_i32_25 : i32
    %c1_i32_26 = arith.constant 1 : i32
    %66 = arith.select %65, %c1_i32_26, %c16_i32 : i32
    %67 = vector.broadcast %66 : i32 to vector<32x1xi32>
    %68 = arith.remsi %64, %67 : vector<32x1xi32>
    %c0_i32_27 = arith.constant 0 : i32
    %69 = vector.broadcast %c0_i32_27 : i32 to vector<32x1xi32>
    %70 = arith.cmpi ne, %68, %69 : vector<32x1xi32>
    %c0_i32_28 = arith.constant 0 : i32
    %71 = vector.broadcast %c0_i32_28 : i32 to vector<32x1xi32>
    %72 = arith.cmpi slt, %68, %71 : vector<32x1xi32>
    %c0_i32_29 = arith.constant 0 : i32
    %73 = arith.cmpi slt, %66, %c0_i32_29 : i32
    %74 = vector.broadcast %73 : i1 to vector<32x1xi1>
    %75 = vector.broadcast %74 : vector<32x1xi1> to vector<32x1xi1>
    %76 = arith.xori %72, %75 : vector<32x1xi1>
    %77 = arith.andi %76, %70 : vector<32x1xi1>
    %78 = vector.broadcast %66 : i32 to vector<32x1xi32>
    %79 = arith.addi %68, %78 : vector<32x1xi32>
    %80 = arith.select %77, %79, %68 : vector<32x1xi1>, vector<32x1xi32>
    %c0_i32_30 = arith.constant 0 : i32
    %81 = vector.broadcast %c0_i32_30 : i32 to vector<32x1xi32>
    %82 = arith.cmpi ne, %80, %81 : vector<32x1xi32>
    %83 = arith.extui %82 : vector<32x1xi1> to vector<32x1xi32>
    %84 = arith.sitofp %83 : vector<32x1xi32> to vector<32x1xf32>
    %c15_i32 = arith.constant 15 : i32
    %85 = vector.broadcast %c15_i32 : i32 to vector<32x1xi32>
    %86 = arith.cmpi ne, %80, %85 : vector<32x1xi32>
    %87 = arith.extui %86 : vector<32x1xi1> to vector<32x1xi32>
    %88 = arith.sitofp %87 : vector<32x1xi32> to vector<32x1xf32>
    %c1_i32_31 = arith.constant 1 : i32
    %89 = tpu.dynamic_rotate %63 by %c1_i32_31 dim 0 : vector<32x8xf32>, i32 -> vector<32x8xf32>
    %90 = vector.broadcast %84 : vector<32x1xf32> to vector<32x8xf32>
    %91 = arith.mulf %89, %90 : vector<32x8xf32>
    %c31_i32_32 = arith.constant 31 : i32
    %92 = tpu.dynamic_rotate %63 by %c31_i32_32 dim 0 : vector<32x8xf32>, i32 -> vector<32x8xf32>
    %93 = vector.broadcast %88 : vector<32x1xf32> to vector<32x8xf32>
    %94 = arith.mulf %92, %93 : vector<32x8xf32>
    %c72 = arith.constant 72 : index
    %c0_33 = arith.constant 0 : index
    %95 = vector.load %arg2[%c72, %c0_33] : memref<3120x128xf32, #tpu.memory_space<vmem>>, vector<8x16xf32>
    %cst_34 = arith.constant dense<0.000000e+00> : vector<32x16xf32>
    %96 = tpu.matmul %63, %95, %cst_34 {dimension_numbers = #tpu.dot_dimension_numbers<[1], [0], [0], [1], [0, 0, 1, 1], [], []>} : vector<32x8xf32>, vector<8x16xf32>, vector<32x16xf32> -> vector<32x16xf32>
    %c64 = arith.constant 64 : index
    %c0_35 = arith.constant 0 : index
    %97 = vector.load %arg2[%c64, %c0_35] : memref<3120x128xf32, #tpu.memory_space<vmem>>, vector<8x16xf32>
    %cst_36 = arith.constant dense<0.000000e+00> : vector<32x16xf32>
    %98 = tpu.matmul %91, %97, %cst_36 {dimension_numbers = #tpu.dot_dimension_numbers<[1], [0], [0], [1], [0, 0, 1, 1], [], []>} : vector<32x8xf32>, vector<8x16xf32>, vector<32x16xf32> -> vector<32x16xf32>
    %99 = arith.addf %96, %98 : vector<32x16xf32>
    %c80 = arith.constant 80 : index
    %c0_37 = arith.constant 0 : index
    %100 = vector.load %arg2[%c80, %c0_37] : memref<3120x128xf32, #tpu.memory_space<vmem>>, vector<8x16xf32>
    %cst_38 = arith.constant dense<0.000000e+00> : vector<32x16xf32>
    %101 = tpu.matmul %94, %100, %cst_38 {dimension_numbers = #tpu.dot_dimension_numbers<[1], [0], [0], [1], [0, 0, 1, 1], [], []>} : vector<32x8xf32>, vector<8x16xf32>, vector<32x16xf32> -> vector<32x16xf32>
    %102 = arith.addf %99, %101 : vector<32x16xf32>
    %c88 = arith.constant 88 : index
    %c0_39 = arith.constant 0 : index
    %103 = vector.load %arg2[%c88, %c0_39] : memref<3120x128xf32, #tpu.memory_space<vmem>>, vector<1x16xf32>
    %104 = vector.broadcast %103 : vector<1x16xf32> to vector<32x16xf32>
    %105 = arith.addf %102, %104 : vector<32x16xf32>
    %cst_40 = arith.constant 0.000000e+00 : f32
    %106 = vector.broadcast %cst_40 : f32 to vector<32x16xf32>
    %107 = arith.maximumf %105, %106 : vector<32x16xf32>
    %c1_i32_41 = arith.constant 1 : i32
    %108 = tpu.dynamic_rotate %107 by %c1_i32_41 dim 0 : vector<32x16xf32>, i32 -> vector<32x16xf32>
    %109 = vector.broadcast %84 : vector<32x1xf32> to vector<32x16xf32>
    %110 = arith.mulf %108, %109 : vector<32x16xf32>
    %c31_i32_42 = arith.constant 31 : i32
    %111 = tpu.dynamic_rotate %107 by %c31_i32_42 dim 0 : vector<32x16xf32>, i32 -> vector<32x16xf32>
    %112 = vector.broadcast %88 : vector<32x1xf32> to vector<32x16xf32>
    %113 = arith.mulf %111, %112 : vector<32x16xf32>
    %c112 = arith.constant 112 : index
    %c0_43 = arith.constant 0 : index
    %114 = vector.load %arg2[%c112, %c0_43] : memref<3120x128xf32, #tpu.memory_space<vmem>>, vector<16x16xf32>
    %cst_44 = arith.constant dense<0.000000e+00> : vector<32x16xf32>
    %115 = tpu.matmul %107, %114, %cst_44 {dimension_numbers = #tpu.dot_dimension_numbers<[1], [0], [0], [1], [0, 0, 1, 1], [], []>} : vector<32x16xf32>, vector<16x16xf32>, vector<32x16xf32> -> vector<32x16xf32>
    %c96 = arith.constant 96 : index
    %c0_45 = arith.constant 0 : index
    %116 = vector.load %arg2[%c96, %c0_45] : memref<3120x128xf32, #tpu.memory_space<vmem>>, vector<16x16xf32>
    %cst_46 = arith.constant dense<0.000000e+00> : vector<32x16xf32>
    %117 = tpu.matmul %110, %116, %cst_46 {dimension_numbers = #tpu.dot_dimension_numbers<[1], [0], [0], [1], [0, 0, 1, 1], [], []>} : vector<32x16xf32>, vector<16x16xf32>, vector<32x16xf32> -> vector<32x16xf32>
    %118 = arith.addf %115, %117 : vector<32x16xf32>
    %c128 = arith.constant 128 : index
    %c0_47 = arith.constant 0 : index
    %119 = vector.load %arg2[%c128, %c0_47] : memref<3120x128xf32, #tpu.memory_space<vmem>>, vector<16x16xf32>
    %cst_48 = arith.constant dense<0.000000e+00> : vector<32x16xf32>
    %120 = tpu.matmul %113, %119, %cst_48 {dimension_numbers = #tpu.dot_dimension_numbers<[1], [0], [0], [1], [0, 0, 1, 1], [], []>} : vector<32x16xf32>, vector<16x16xf32>, vector<32x16xf32> -> vector<32x16xf32>
    %121 = arith.addf %118, %120 : vector<32x16xf32>
    %c144 = arith.constant 144 : index
    %c0_49 = arith.constant 0 : index
    %122 = vector.load %arg2[%c144, %c0_49] : memref<3120x128xf32, #tpu.memory_space<vmem>>, vector<1x16xf32>
    %123 = vector.broadcast %122 : vector<1x16xf32> to vector<32x16xf32>
    %124 = arith.addf %121, %123 : vector<32x16xf32>
    %cst_50 = arith.constant 0.000000e+00 : f32
    %125 = vector.broadcast %cst_50 : f32 to vector<32x16xf32>
    %126 = arith.maximumf %124, %125 : vector<32x16xf32>
    %127 = vector.shape_cast %126 : vector<32x16xf32> to vector<16x2x16xf32>
    %cst_51 = arith.constant dense<0xFF800000> : vector<16x16xf32>
    %128 = vector.multi_reduction <maximumf>, %127, %cst_51 [1] : vector<16x2x16xf32> to vector<16x16xf32>
    %129 = tpu.iota {dimensions = array<i32: 0>} : vector<16x1xi32>
    %c8_i32 = arith.constant 8 : i32
    %c0_i32_52 = arith.constant 0 : i32
    %130 = arith.cmpi eq, %c8_i32, %c0_i32_52 : i32
    %c1_i32_53 = arith.constant 1 : i32
    %131 = arith.select %130, %c1_i32_53, %c8_i32 : i32
    %132 = vector.broadcast %131 : i32 to vector<16x1xi32>
    %133 = arith.remsi %129, %132 : vector<16x1xi32>
    %c0_i32_54 = arith.constant 0 : i32
    %134 = vector.broadcast %c0_i32_54 : i32 to vector<16x1xi32>
    %135 = arith.cmpi ne, %133, %134 : vector<16x1xi32>
    %c0_i32_55 = arith.constant 0 : i32
    %136 = vector.broadcast %c0_i32_55 : i32 to vector<16x1xi32>
    %137 = arith.cmpi slt, %133, %136 : vector<16x1xi32>
    %c0_i32_56 = arith.constant 0 : i32
    %138 = arith.cmpi slt, %131, %c0_i32_56 : i32
    %139 = vector.broadcast %138 : i1 to vector<16x1xi1>
    %140 = vector.broadcast %139 : vector<16x1xi1> to vector<16x1xi1>
    %141 = arith.xori %137, %140 : vector<16x1xi1>
    %142 = arith.andi %141, %135 : vector<16x1xi1>
    %143 = vector.broadcast %131 : i32 to vector<16x1xi32>
    %144 = arith.addi %133, %143 : vector<16x1xi32>
    %145 = arith.select %142, %144, %133 : vector<16x1xi1>, vector<16x1xi32>
    %c0_i32_57 = arith.constant 0 : i32
    %146 = vector.broadcast %c0_i32_57 : i32 to vector<16x1xi32>
    %147 = arith.cmpi ne, %145, %146 : vector<16x1xi32>
    %148 = arith.extui %147 : vector<16x1xi1> to vector<16x1xi32>
    %149 = arith.sitofp %148 : vector<16x1xi32> to vector<16x1xf32>
    %c7_i32 = arith.constant 7 : i32
    %150 = vector.broadcast %c7_i32 : i32 to vector<16x1xi32>
    %151 = arith.cmpi ne, %145, %150 : vector<16x1xi32>
    %152 = arith.extui %151 : vector<16x1xi1> to vector<16x1xi32>
    %153 = arith.sitofp %152 : vector<16x1xi32> to vector<16x1xf32>
    %c1_i32_58 = arith.constant 1 : i32
    %154 = tpu.dynamic_rotate %128 by %c1_i32_58 dim 0 : vector<16x16xf32>, i32 -> vector<16x16xf32>
    %155 = vector.broadcast %149 : vector<16x1xf32> to vector<16x16xf32>
    %156 = arith.mulf %154, %155 : vector<16x16xf32>
    %c15_i32_59 = arith.constant 15 : i32
    %157 = tpu.dynamic_rotate %128 by %c15_i32_59 dim 0 : vector<16x16xf32>, i32 -> vector<16x16xf32>
    %158 = vector.broadcast %153 : vector<16x1xf32> to vector<16x16xf32>
    %159 = arith.mulf %157, %158 : vector<16x16xf32>
    %c168 = arith.constant 168 : index
    %c0_60 = arith.constant 0 : index
    %160 = vector.load %arg2[%c168, %c0_60] : memref<3120x128xf32, #tpu.memory_space<vmem>>, vector<16x32xf32>
    %cst_61 = arith.constant dense<0.000000e+00> : vector<16x32xf32>
    %161 = tpu.matmul %128, %160, %cst_61 {dimension_numbers = #tpu.dot_dimension_numbers<[1], [0], [0], [1], [0, 0, 1, 1], [], []>} : vector<16x16xf32>, vector<16x32xf32>, vector<16x32xf32> -> vector<16x32xf32>
    %c152 = arith.constant 152 : index
    %c0_62 = arith.constant 0 : index
    %162 = vector.load %arg2[%c152, %c0_62] : memref<3120x128xf32, #tpu.memory_space<vmem>>, vector<16x32xf32>
    %cst_63 = arith.constant dense<0.000000e+00> : vector<16x32xf32>
    %163 = tpu.matmul %156, %162, %cst_63 {dimension_numbers = #tpu.dot_dimension_numbers<[1], [0], [0], [1], [0, 0, 1, 1], [], []>} : vector<16x16xf32>, vector<16x32xf32>, vector<16x32xf32> -> vector<16x32xf32>
    %164 = arith.addf %161, %163 : vector<16x32xf32>
    %c184 = arith.constant 184 : index
    %c0_64 = arith.constant 0 : index
    %165 = vector.load %arg2[%c184, %c0_64] : memref<3120x128xf32, #tpu.memory_space<vmem>>, vector<16x32xf32>
    %cst_65 = arith.constant dense<0.000000e+00> : vector<16x32xf32>
    %166 = tpu.matmul %159, %165, %cst_65 {dimension_numbers = #tpu.dot_dimension_numbers<[1], [0], [0], [1], [0, 0, 1, 1], [], []>} : vector<16x16xf32>, vector<16x32xf32>, vector<16x32xf32> -> vector<16x32xf32>
    %167 = arith.addf %164, %166 : vector<16x32xf32>
    %c200 = arith.constant 200 : index
    %c0_66 = arith.constant 0 : index
    %168 = vector.load %arg2[%c200, %c0_66] : memref<3120x128xf32, #tpu.memory_space<vmem>>, vector<1x32xf32>
    %169 = vector.broadcast %168 : vector<1x32xf32> to vector<16x32xf32>
    %170 = arith.addf %167, %169 : vector<16x32xf32>
    %cst_67 = arith.constant 0.000000e+00 : f32
    %171 = vector.broadcast %cst_67 : f32 to vector<16x32xf32>
    %172 = arith.maximumf %170, %171 : vector<16x32xf32>
    %c1_i32_68 = arith.constant 1 : i32
    %173 = tpu.dynamic_rotate %172 by %c1_i32_68 dim 0 : vector<16x32xf32>, i32 -> vector<16x32xf32>
    %174 = vector.broadcast %149 : vector<16x1xf32> to vector<16x32xf32>
    %175 = arith.mulf %173, %174 : vector<16x32xf32>
    %c15_i32_69 = arith.constant 15 : i32
    %176 = tpu.dynamic_rotate %172 by %c15_i32_69 dim 0 : vector<16x32xf32>, i32 -> vector<16x32xf32>
    %177 = vector.broadcast %153 : vector<16x1xf32> to vector<16x32xf32>
    %178 = arith.mulf %176, %177 : vector<16x32xf32>
    %c240 = arith.constant 240 : index
    %c0_70 = arith.constant 0 : index
    %179 = vector.load %arg2[%c240, %c0_70] : memref<3120x128xf32, #tpu.memory_space<vmem>>, vector<32x32xf32>
    %cst_71 = arith.constant dense<0.000000e+00> : vector<16x32xf32>
    %180 = tpu.matmul %172, %179, %cst_71 {dimension_numbers = #tpu.dot_dimension_numbers<[1], [0], [0], [1], [0, 0, 1, 1], [], []>} : vector<16x32xf32>, vector<32x32xf32>, vector<16x32xf32> -> vector<16x32xf32>
    %c208 = arith.constant 208 : index
    %c0_72 = arith.constant 0 : index
    %181 = vector.load %arg2[%c208, %c0_72] : memref<3120x128xf32, #tpu.memory_space<vmem>>, vector<32x32xf32>
    %cst_73 = arith.constant dense<0.000000e+00> : vector<16x32xf32>
    %182 = tpu.matmul %175, %181, %cst_73 {dimension_numbers = #tpu.dot_dimension_numbers<[1], [0], [0], [1], [0, 0, 1, 1], [], []>} : vector<16x32xf32>, vector<32x32xf32>, vector<16x32xf32> -> vector<16x32xf32>
    %183 = arith.addf %180, %182 : vector<16x32xf32>
    %c272 = arith.constant 272 : index
    %c0_74 = arith.constant 0 : index
    %184 = vector.load %arg2[%c272, %c0_74] : memref<3120x128xf32, #tpu.memory_space<vmem>>, vector<32x32xf32>
    %cst_75 = arith.constant dense<0.000000e+00> : vector<16x32xf32>
    %185 = tpu.matmul %178, %184, %cst_75 {dimension_numbers = #tpu.dot_dimension_numbers<[1], [0], [0], [1], [0, 0, 1, 1], [], []>} : vector<16x32xf32>, vector<32x32xf32>, vector<16x32xf32> -> vector<16x32xf32>
    %186 = arith.addf %183, %185 : vector<16x32xf32>
    %c304 = arith.constant 304 : index
    %c0_76 = arith.constant 0 : index
    %187 = vector.load %arg2[%c304, %c0_76] : memref<3120x128xf32, #tpu.memory_space<vmem>>, vector<1x32xf32>
    %188 = vector.broadcast %187 : vector<1x32xf32> to vector<16x32xf32>
    %189 = arith.addf %186, %188 : vector<16x32xf32>
    %cst_77 = arith.constant 0.000000e+00 : f32
    %190 = vector.broadcast %cst_77 : f32 to vector<16x32xf32>
    %191 = arith.maximumf %189, %190 : vector<16x32xf32>
    %192 = vector.shape_cast %191 : vector<16x32xf32> to vector<8x2x32xf32>
    %cst_78 = arith.constant dense<0xFF800000> : vector<8x32xf32>
    %193 = vector.multi_reduction <maximumf>, %192, %cst_78 [1] : vector<8x2x32xf32> to vector<8x32xf32>
    %194 = tpu.iota {dimensions = array<i32: 0>} : vector<8x1xi32>
    %c4_i32 = arith.constant 4 : i32
    %c0_i32_79 = arith.constant 0 : i32
    %195 = arith.cmpi eq, %c4_i32, %c0_i32_79 : i32
    %c1_i32_80 = arith.constant 1 : i32
    %196 = arith.select %195, %c1_i32_80, %c4_i32 : i32
    %197 = vector.broadcast %196 : i32 to vector<8x1xi32>
    %198 = arith.remsi %194, %197 : vector<8x1xi32>
    %c0_i32_81 = arith.constant 0 : i32
    %199 = vector.broadcast %c0_i32_81 : i32 to vector<8x1xi32>
    %200 = arith.cmpi ne, %198, %199 : vector<8x1xi32>
    %c0_i32_82 = arith.constant 0 : i32
    %201 = vector.broadcast %c0_i32_82 : i32 to vector<8x1xi32>
    %202 = arith.cmpi slt, %198, %201 : vector<8x1xi32>
    %c0_i32_83 = arith.constant 0 : i32
    %203 = arith.cmpi slt, %196, %c0_i32_83 : i32
    %204 = vector.broadcast %203 : i1 to vector<8x1xi1>
    %205 = vector.broadcast %204 : vector<8x1xi1> to vector<8x1xi1>
    %206 = arith.xori %202, %205 : vector<8x1xi1>
    %207 = arith.andi %206, %200 : vector<8x1xi1>
    %208 = vector.broadcast %196 : i32 to vector<8x1xi32>
    %209 = arith.addi %198, %208 : vector<8x1xi32>
    %210 = arith.select %207, %209, %198 : vector<8x1xi1>, vector<8x1xi32>
    %c0_i32_84 = arith.constant 0 : i32
    %211 = vector.broadcast %c0_i32_84 : i32 to vector<8x1xi32>
    %212 = arith.cmpi ne, %210, %211 : vector<8x1xi32>
    %213 = arith.extui %212 : vector<8x1xi1> to vector<8x1xi32>
    %214 = arith.sitofp %213 : vector<8x1xi32> to vector<8x1xf32>
    %c3_i32 = arith.constant 3 : i32
    %215 = vector.broadcast %c3_i32 : i32 to vector<8x1xi32>
    %216 = arith.cmpi ne, %210, %215 : vector<8x1xi32>
    %217 = arith.extui %216 : vector<8x1xi1> to vector<8x1xi32>
    %218 = arith.sitofp %217 : vector<8x1xi32> to vector<8x1xf32>
    %c1_i32_85 = arith.constant 1 : i32
    %219 = tpu.dynamic_rotate %193 by %c1_i32_85 dim 0 : vector<8x32xf32>, i32 -> vector<8x32xf32>
    %220 = vector.broadcast %214 : vector<8x1xf32> to vector<8x32xf32>
    %221 = arith.mulf %219, %220 : vector<8x32xf32>
    %c7_i32_86 = arith.constant 7 : i32
    %222 = tpu.dynamic_rotate %193 by %c7_i32_86 dim 0 : vector<8x32xf32>, i32 -> vector<8x32xf32>
    %223 = vector.broadcast %218 : vector<8x1xf32> to vector<8x32xf32>
    %224 = arith.mulf %222, %223 : vector<8x32xf32>
    %c344 = arith.constant 344 : index
    %c0_87 = arith.constant 0 : index
    %225 = vector.load %arg2[%c344, %c0_87] : memref<3120x128xf32, #tpu.memory_space<vmem>>, vector<32x64xf32>
    %cst_88 = arith.constant dense<0.000000e+00> : vector<8x64xf32>
    %226 = tpu.matmul %193, %225, %cst_88 {dimension_numbers = #tpu.dot_dimension_numbers<[1], [0], [0], [1], [0, 0, 1, 1], [], []>} : vector<8x32xf32>, vector<32x64xf32>, vector<8x64xf32> -> vector<8x64xf32>
    %c312 = arith.constant 312 : index
    %c0_89 = arith.constant 0 : index
    %227 = vector.load %arg2[%c312, %c0_89] : memref<3120x128xf32, #tpu.memory_space<vmem>>, vector<32x64xf32>
    %cst_90 = arith.constant dense<0.000000e+00> : vector<8x64xf32>
    %228 = tpu.matmul %221, %227, %cst_90 {dimension_numbers = #tpu.dot_dimension_numbers<[1], [0], [0], [1], [0, 0, 1, 1], [], []>} : vector<8x32xf32>, vector<32x64xf32>, vector<8x64xf32> -> vector<8x64xf32>
    %229 = arith.addf %226, %228 : vector<8x64xf32>
    %c376 = arith.constant 376 : index
    %c0_91 = arith.constant 0 : index
    %230 = vector.load %arg2[%c376, %c0_91] : memref<3120x128xf32, #tpu.memory_space<vmem>>, vector<32x64xf32>
    %cst_92 = arith.constant dense<0.000000e+00> : vector<8x64xf32>
    %231 = tpu.matmul %224, %230, %cst_92 {dimension_numbers = #tpu.dot_dimension_numbers<[1], [0], [0], [1], [0, 0, 1, 1], [], []>} : vector<8x32xf32>, vector<32x64xf32>, vector<8x64xf32> -> vector<8x64xf32>
    %232 = arith.addf %229, %231 : vector<8x64xf32>
    %c408 = arith.constant 408 : index
    %c0_93 = arith.constant 0 : index
    %233 = vector.load %arg2[%c408, %c0_93] : memref<3120x128xf32, #tpu.memory_space<vmem>>, vector<1x64xf32>
    %234 = vector.broadcast %233 : vector<1x64xf32> to vector<8x64xf32>
    %235 = arith.addf %232, %234 : vector<8x64xf32>
    %cst_94 = arith.constant 0.000000e+00 : f32
    %236 = vector.broadcast %cst_94 : f32 to vector<8x64xf32>
    %237 = arith.maximumf %235, %236 : vector<8x64xf32>
    %c1_i32_95 = arith.constant 1 : i32
    %238 = tpu.dynamic_rotate %237 by %c1_i32_95 dim 0 : vector<8x64xf32>, i32 -> vector<8x64xf32>
    %239 = vector.broadcast %214 : vector<8x1xf32> to vector<8x64xf32>
    %240 = arith.mulf %238, %239 : vector<8x64xf32>
    %c7_i32_96 = arith.constant 7 : i32
    %241 = tpu.dynamic_rotate %237 by %c7_i32_96 dim 0 : vector<8x64xf32>, i32 -> vector<8x64xf32>
    %242 = vector.broadcast %218 : vector<8x1xf32> to vector<8x64xf32>
    %243 = arith.mulf %241, %242 : vector<8x64xf32>
    %c480 = arith.constant 480 : index
    %c0_97 = arith.constant 0 : index
    %244 = vector.load %arg2[%c480, %c0_97] : memref<3120x128xf32, #tpu.memory_space<vmem>>, vector<64x64xf32>
    %cst_98 = arith.constant dense<0.000000e+00> : vector<8x64xf32>
    %245 = tpu.matmul %237, %244, %cst_98 {dimension_numbers = #tpu.dot_dimension_numbers<[1], [0], [0], [1], [0, 0, 1, 1], [], []>} : vector<8x64xf32>, vector<64x64xf32>, vector<8x64xf32> -> vector<8x64xf32>
    %c416 = arith.constant 416 : index
    %c0_99 = arith.constant 0 : index
    %246 = vector.load %arg2[%c416, %c0_99] : memref<3120x128xf32, #tpu.memory_space<vmem>>, vector<64x64xf32>
    %cst_100 = arith.constant dense<0.000000e+00> : vector<8x64xf32>
    %247 = tpu.matmul %240, %246, %cst_100 {dimension_numbers = #tpu.dot_dimension_numbers<[1], [0], [0], [1], [0, 0, 1, 1], [], []>} : vector<8x64xf32>, vector<64x64xf32>, vector<8x64xf32> -> vector<8x64xf32>
    %248 = arith.addf %245, %247 : vector<8x64xf32>
    %c544 = arith.constant 544 : index
    %c0_101 = arith.constant 0 : index
    %249 = vector.load %arg2[%c544, %c0_101] : memref<3120x128xf32, #tpu.memory_space<vmem>>, vector<64x64xf32>
    %cst_102 = arith.constant dense<0.000000e+00> : vector<8x64xf32>
    %250 = tpu.matmul %243, %249, %cst_102 {dimension_numbers = #tpu.dot_dimension_numbers<[1], [0], [0], [1], [0, 0, 1, 1], [], []>} : vector<8x64xf32>, vector<64x64xf32>, vector<8x64xf32> -> vector<8x64xf32>
    %251 = arith.addf %248, %250 : vector<8x64xf32>
    %c608 = arith.constant 608 : index
    %c0_103 = arith.constant 0 : index
    %252 = vector.load %arg2[%c608, %c0_103] : memref<3120x128xf32, #tpu.memory_space<vmem>>, vector<1x64xf32>
    %253 = vector.broadcast %252 : vector<1x64xf32> to vector<8x64xf32>
    %254 = arith.addf %251, %253 : vector<8x64xf32>
    %cst_104 = arith.constant 0.000000e+00 : f32
    %255 = vector.broadcast %cst_104 : f32 to vector<8x64xf32>
    %256 = arith.maximumf %254, %255 : vector<8x64xf32>
    %257 = vector.shape_cast %256 : vector<8x64xf32> to vector<4x2x64xf32>
    %cst_105 = arith.constant dense<0xFF800000> : vector<4x64xf32>
    %258 = vector.multi_reduction <maximumf>, %257, %cst_105 [1] : vector<4x2x64xf32> to vector<4x64xf32>
    %259 = tpu.iota {dimensions = array<i32: 0>} : vector<4x1xi32>
    %c2_i32 = arith.constant 2 : i32
    %c0_i32_106 = arith.constant 0 : i32
    %260 = arith.cmpi eq, %c2_i32, %c0_i32_106 : i32
    %c1_i32_107 = arith.constant 1 : i32
    %261 = arith.select %260, %c1_i32_107, %c2_i32 : i32
    %262 = vector.broadcast %261 : i32 to vector<4x1xi32>
    %263 = arith.remsi %259, %262 : vector<4x1xi32>
    %c0_i32_108 = arith.constant 0 : i32
    %264 = vector.broadcast %c0_i32_108 : i32 to vector<4x1xi32>
    %265 = arith.cmpi ne, %263, %264 : vector<4x1xi32>
    %c0_i32_109 = arith.constant 0 : i32
    %266 = vector.broadcast %c0_i32_109 : i32 to vector<4x1xi32>
    %267 = arith.cmpi slt, %263, %266 : vector<4x1xi32>
    %c0_i32_110 = arith.constant 0 : i32
    %268 = arith.cmpi slt, %261, %c0_i32_110 : i32
    %269 = vector.broadcast %268 : i1 to vector<4x1xi1>
    %270 = vector.broadcast %269 : vector<4x1xi1> to vector<4x1xi1>
    %271 = arith.xori %267, %270 : vector<4x1xi1>
    %272 = arith.andi %271, %265 : vector<4x1xi1>
    %273 = vector.broadcast %261 : i32 to vector<4x1xi32>
    %274 = arith.addi %263, %273 : vector<4x1xi32>
    %275 = arith.select %272, %274, %263 : vector<4x1xi1>, vector<4x1xi32>
    %c0_i32_111 = arith.constant 0 : i32
    %276 = vector.broadcast %c0_i32_111 : i32 to vector<4x1xi32>
    %277 = arith.cmpi ne, %275, %276 : vector<4x1xi32>
    %278 = arith.extui %277 : vector<4x1xi1> to vector<4x1xi32>
    %279 = arith.sitofp %278 : vector<4x1xi32> to vector<4x1xf32>
    %c1_i32_112 = arith.constant 1 : i32
    %280 = vector.broadcast %c1_i32_112 : i32 to vector<4x1xi32>
    %281 = arith.cmpi ne, %275, %280 : vector<4x1xi32>
    %282 = arith.extui %281 : vector<4x1xi1> to vector<4x1xi32>
    %283 = arith.sitofp %282 : vector<4x1xi32> to vector<4x1xf32>
    %c1_i32_113 = arith.constant 1 : i32
    %284 = tpu.dynamic_rotate %258 by %c1_i32_113 dim 0 : vector<4x64xf32>, i32 -> vector<4x64xf32>
    %285 = vector.broadcast %279 : vector<4x1xf32> to vector<4x64xf32>
    %286 = arith.mulf %284, %285 : vector<4x64xf32>
    %c3_i32_114 = arith.constant 3 : i32
    %287 = tpu.dynamic_rotate %258 by %c3_i32_114 dim 0 : vector<4x64xf32>, i32 -> vector<4x64xf32>
    %288 = vector.broadcast %283 : vector<4x1xf32> to vector<4x64xf32>
    %289 = arith.mulf %287, %288 : vector<4x64xf32>
    %c680 = arith.constant 680 : index
    %c0_115 = arith.constant 0 : index
    %290 = vector.load %arg2[%c680, %c0_115] : memref<3120x128xf32, #tpu.memory_space<vmem>>, vector<64x128xf32>
    %cst_116 = arith.constant dense<0.000000e+00> : vector<4x128xf32>
    %291 = tpu.matmul %258, %290, %cst_116 {dimension_numbers = #tpu.dot_dimension_numbers<[1], [0], [0], [1], [0, 0, 1, 1], [], []>} : vector<4x64xf32>, vector<64x128xf32>, vector<4x128xf32> -> vector<4x128xf32>
    %c616 = arith.constant 616 : index
    %c0_117 = arith.constant 0 : index
    %292 = vector.load %arg2[%c616, %c0_117] : memref<3120x128xf32, #tpu.memory_space<vmem>>, vector<64x128xf32>
    %cst_118 = arith.constant dense<0.000000e+00> : vector<4x128xf32>
    %293 = tpu.matmul %286, %292, %cst_118 {dimension_numbers = #tpu.dot_dimension_numbers<[1], [0], [0], [1], [0, 0, 1, 1], [], []>} : vector<4x64xf32>, vector<64x128xf32>, vector<4x128xf32> -> vector<4x128xf32>
    %294 = arith.addf %291, %293 : vector<4x128xf32>
    %c744 = arith.constant 744 : index
    %c0_119 = arith.constant 0 : index
    %295 = vector.load %arg2[%c744, %c0_119] : memref<3120x128xf32, #tpu.memory_space<vmem>>, vector<64x128xf32>
    %cst_120 = arith.constant dense<0.000000e+00> : vector<4x128xf32>
    %296 = tpu.matmul %289, %295, %cst_120 {dimension_numbers = #tpu.dot_dimension_numbers<[1], [0], [0], [1], [0, 0, 1, 1], [], []>} : vector<4x64xf32>, vector<64x128xf32>, vector<4x128xf32> -> vector<4x128xf32>
    %297 = arith.addf %294, %296 : vector<4x128xf32>
    %c808 = arith.constant 808 : index
    %c0_121 = arith.constant 0 : index
    %298 = vector.load %arg2[%c808, %c0_121] : memref<3120x128xf32, #tpu.memory_space<vmem>>, vector<1x128xf32>
    %299 = vector.broadcast %298 : vector<1x128xf32> to vector<4x128xf32>
    %300 = arith.addf %297, %299 : vector<4x128xf32>
    %cst_122 = arith.constant 0.000000e+00 : f32
    %301 = vector.broadcast %cst_122 : f32 to vector<4x128xf32>
    %302 = arith.maximumf %300, %301 : vector<4x128xf32>
    %c1_i32_123 = arith.constant 1 : i32
    %303 = tpu.dynamic_rotate %302 by %c1_i32_123 dim 0 : vector<4x128xf32>, i32 -> vector<4x128xf32>
    %304 = vector.broadcast %279 : vector<4x1xf32> to vector<4x128xf32>
    %305 = arith.mulf %303, %304 : vector<4x128xf32>
    %c3_i32_124 = arith.constant 3 : i32
    %306 = tpu.dynamic_rotate %302 by %c3_i32_124 dim 0 : vector<4x128xf32>, i32 -> vector<4x128xf32>
    %307 = vector.broadcast %283 : vector<4x1xf32> to vector<4x128xf32>
    %308 = arith.mulf %306, %307 : vector<4x128xf32>
    %c944 = arith.constant 944 : index
    %c0_125 = arith.constant 0 : index
    %309 = vector.load %arg2[%c944, %c0_125] : memref<3120x128xf32, #tpu.memory_space<vmem>>, vector<128x128xf32>
    %cst_126 = arith.constant dense<0.000000e+00> : vector<4x128xf32>
    %310 = tpu.matmul %302, %309, %cst_126 {dimension_numbers = #tpu.dot_dimension_numbers<[1], [0], [0], [1], [0, 0, 1, 1], [], []>} : vector<4x128xf32>, vector<128x128xf32>, vector<4x128xf32> -> vector<4x128xf32>
    %c816 = arith.constant 816 : index
    %c0_127 = arith.constant 0 : index
    %311 = vector.load %arg2[%c816, %c0_127] : memref<3120x128xf32, #tpu.memory_space<vmem>>, vector<128x128xf32>
    %cst_128 = arith.constant dense<0.000000e+00> : vector<4x128xf32>
    %312 = tpu.matmul %305, %311, %cst_128 {dimension_numbers = #tpu.dot_dimension_numbers<[1], [0], [0], [1], [0, 0, 1, 1], [], []>} : vector<4x128xf32>, vector<128x128xf32>, vector<4x128xf32> -> vector<4x128xf32>
    %313 = arith.addf %310, %312 : vector<4x128xf32>
    %c1072 = arith.constant 1072 : index
    %c0_129 = arith.constant 0 : index
    %314 = vector.load %arg2[%c1072, %c0_129] : memref<3120x128xf32, #tpu.memory_space<vmem>>, vector<128x128xf32>
    %cst_130 = arith.constant dense<0.000000e+00> : vector<4x128xf32>
    %315 = tpu.matmul %308, %314, %cst_130 {dimension_numbers = #tpu.dot_dimension_numbers<[1], [0], [0], [1], [0, 0, 1, 1], [], []>} : vector<4x128xf32>, vector<128x128xf32>, vector<4x128xf32> -> vector<4x128xf32>
    %316 = arith.addf %313, %315 : vector<4x128xf32>
    %c1200 = arith.constant 1200 : index
    %c0_131 = arith.constant 0 : index
    %317 = vector.load %arg2[%c1200, %c0_131] : memref<3120x128xf32, #tpu.memory_space<vmem>>, vector<1x128xf32>
    %318 = vector.broadcast %317 : vector<1x128xf32> to vector<4x128xf32>
    %319 = arith.addf %316, %318 : vector<4x128xf32>
    %cst_132 = arith.constant 0.000000e+00 : f32
    %320 = vector.broadcast %cst_132 : f32 to vector<4x128xf32>
    %321 = arith.maximumf %319, %320 : vector<4x128xf32>
    %c1592 = arith.constant 1592 : index
    %c0_133 = arith.constant 0 : index
    %322 = vector.load %arg2[%c1592, %c0_133] : memref<3120x128xf32, #tpu.memory_space<vmem>>, vector<1x64xf32>
    %c3_i32_134 = arith.constant 3 : i32
    %323 = tpu.dynamic_rotate %321 by %c3_i32_134 dim 0 : vector<4x128xf32>, i32 -> vector<4x128xf32>
    %324 = vector.broadcast %283 : vector<4x1xf32> to vector<4x128xf32>
    %325 = arith.mulf %323, %324 : vector<4x128xf32>
    %c1336 = arith.constant 1336 : index
    %c0_135 = arith.constant 0 : index
    %326 = vector.load %arg2[%c1336, %c0_135] : memref<3120x128xf32, #tpu.memory_space<vmem>>, vector<128x64xf32>
    %cst_136 = arith.constant dense<0.000000e+00> : vector<4x64xf32>
    %327 = tpu.matmul %321, %326, %cst_136 {dimension_numbers = #tpu.dot_dimension_numbers<[1], [0], [0], [1], [0, 0, 1, 1], [], []>} : vector<4x128xf32>, vector<128x64xf32>, vector<4x64xf32> -> vector<4x64xf32>
    %328 = vector.broadcast %322 : vector<1x64xf32> to vector<4x64xf32>
    %329 = arith.addf %327, %328 : vector<4x64xf32>
    %c1464 = arith.constant 1464 : index
    %c0_137 = arith.constant 0 : index
    %330 = vector.load %arg2[%c1464, %c0_137] : memref<3120x128xf32, #tpu.memory_space<vmem>>, vector<128x64xf32>
    %cst_138 = arith.constant dense<0.000000e+00> : vector<4x64xf32>
    %331 = tpu.matmul %321, %330, %cst_138 {dimension_numbers = #tpu.dot_dimension_numbers<[1], [0], [0], [1], [0, 0, 1, 1], [], []>} : vector<4x128xf32>, vector<128x64xf32>, vector<4x64xf32> -> vector<4x64xf32>
    %c1208 = arith.constant 1208 : index
    %c0_139 = arith.constant 0 : index
    %332 = vector.load %arg2[%c1208, %c0_139] : memref<3120x128xf32, #tpu.memory_space<vmem>>, vector<128x64xf32>
    %cst_140 = arith.constant dense<0.000000e+00> : vector<4x64xf32>
    %333 = tpu.matmul %325, %332, %cst_140 {dimension_numbers = #tpu.dot_dimension_numbers<[1], [0], [0], [1], [0, 0, 1, 1], [], []>} : vector<4x128xf32>, vector<128x64xf32>, vector<4x64xf32> -> vector<4x64xf32>
    %334 = arith.addf %331, %333 : vector<4x64xf32>
    %335 = vector.broadcast %322 : vector<1x64xf32> to vector<4x64xf32>
    %336 = arith.addf %334, %335 : vector<4x64xf32>
    %337 = vector.shape_cast %329 : vector<4x64xf32> to vector<4x1x64xf32>
    %338 = vector.shape_cast %336 : vector<4x64xf32> to vector<4x1x64xf32>
    %339 = tpu.concatenate %337, %338 in 1 : vector<4x1x64xf32>, vector<4x1x64xf32> -> vector<4x2x64xf32>
    %340 = vector.shape_cast %339 : vector<4x2x64xf32> to vector<8x64xf32>
    %c1_i32_141 = arith.constant 1 : i32
    %341 = tpu.dynamic_rotate %340 by %c1_i32_141 dim 0 : vector<8x64xf32>, i32 -> vector<8x64xf32>
    %342 = vector.broadcast %214 : vector<8x1xf32> to vector<8x64xf32>
    %343 = arith.mulf %341, %342 : vector<8x64xf32>
    %c7_i32_142 = arith.constant 7 : i32
    %344 = tpu.dynamic_rotate %340 by %c7_i32_142 dim 0 : vector<8x64xf32>, i32 -> vector<8x64xf32>
    %345 = vector.broadcast %218 : vector<8x1xf32> to vector<8x64xf32>
    %346 = arith.mulf %344, %345 : vector<8x64xf32>
    %c1664 = arith.constant 1664 : index
    %c0_143 = arith.constant 0 : index
    %347 = vector.load %arg2[%c1664, %c0_143] : memref<3120x128xf32, #tpu.memory_space<vmem>>, vector<64x64xf32>
    %cst_144 = arith.constant dense<0.000000e+00> : vector<8x64xf32>
    %348 = tpu.matmul %340, %347, %cst_144 {dimension_numbers = #tpu.dot_dimension_numbers<[1], [0], [0], [1], [0, 0, 1, 1], [], []>} : vector<8x64xf32>, vector<64x64xf32>, vector<8x64xf32> -> vector<8x64xf32>
    %c1600 = arith.constant 1600 : index
    %c0_145 = arith.constant 0 : index
    %349 = vector.load %arg2[%c1600, %c0_145] : memref<3120x128xf32, #tpu.memory_space<vmem>>, vector<64x64xf32>
    %cst_146 = arith.constant dense<0.000000e+00> : vector<8x64xf32>
    %350 = tpu.matmul %343, %349, %cst_146 {dimension_numbers = #tpu.dot_dimension_numbers<[1], [0], [0], [1], [0, 0, 1, 1], [], []>} : vector<8x64xf32>, vector<64x64xf32>, vector<8x64xf32> -> vector<8x64xf32>
    %351 = arith.addf %348, %350 : vector<8x64xf32>
    %c1728 = arith.constant 1728 : index
    %c0_147 = arith.constant 0 : index
    %352 = vector.load %arg2[%c1728, %c0_147] : memref<3120x128xf32, #tpu.memory_space<vmem>>, vector<64x64xf32>
    %cst_148 = arith.constant dense<0.000000e+00> : vector<8x64xf32>
    %353 = tpu.matmul %346, %352, %cst_148 {dimension_numbers = #tpu.dot_dimension_numbers<[1], [0], [0], [1], [0, 0, 1, 1], [], []>} : vector<8x64xf32>, vector<64x64xf32>, vector<8x64xf32> -> vector<8x64xf32>
    %354 = arith.addf %351, %353 : vector<8x64xf32>
    %c1_i32_149 = arith.constant 1 : i32
    %355 = tpu.dynamic_rotate %256 by %c1_i32_149 dim 0 : vector<8x64xf32>, i32 -> vector<8x64xf32>
    %356 = vector.broadcast %214 : vector<8x1xf32> to vector<8x64xf32>
    %357 = arith.mulf %355, %356 : vector<8x64xf32>
    %c7_i32_150 = arith.constant 7 : i32
    %358 = tpu.dynamic_rotate %256 by %c7_i32_150 dim 0 : vector<8x64xf32>, i32 -> vector<8x64xf32>
    %359 = vector.broadcast %218 : vector<8x1xf32> to vector<8x64xf32>
    %360 = arith.mulf %358, %359 : vector<8x64xf32>
    %c1864 = arith.constant 1864 : index
    %c0_151 = arith.constant 0 : index
    %361 = vector.load %arg2[%c1864, %c0_151] : memref<3120x128xf32, #tpu.memory_space<vmem>>, vector<64x64xf32>
    %cst_152 = arith.constant dense<0.000000e+00> : vector<8x64xf32>
    %362 = tpu.matmul %256, %361, %cst_152 {dimension_numbers = #tpu.dot_dimension_numbers<[1], [0], [0], [1], [0, 0, 1, 1], [], []>} : vector<8x64xf32>, vector<64x64xf32>, vector<8x64xf32> -> vector<8x64xf32>
    %c1800 = arith.constant 1800 : index
    %c0_153 = arith.constant 0 : index
    %363 = vector.load %arg2[%c1800, %c0_153] : memref<3120x128xf32, #tpu.memory_space<vmem>>, vector<64x64xf32>
    %cst_154 = arith.constant dense<0.000000e+00> : vector<8x64xf32>
    %364 = tpu.matmul %357, %363, %cst_154 {dimension_numbers = #tpu.dot_dimension_numbers<[1], [0], [0], [1], [0, 0, 1, 1], [], []>} : vector<8x64xf32>, vector<64x64xf32>, vector<8x64xf32> -> vector<8x64xf32>
    %365 = arith.addf %362, %364 : vector<8x64xf32>
    %c1928 = arith.constant 1928 : index
    %c0_155 = arith.constant 0 : index
    %366 = vector.load %arg2[%c1928, %c0_155] : memref<3120x128xf32, #tpu.memory_space<vmem>>, vector<64x64xf32>
    %cst_156 = arith.constant dense<0.000000e+00> : vector<8x64xf32>
    %367 = tpu.matmul %360, %366, %cst_156 {dimension_numbers = #tpu.dot_dimension_numbers<[1], [0], [0], [1], [0, 0, 1, 1], [], []>} : vector<8x64xf32>, vector<64x64xf32>, vector<8x64xf32> -> vector<8x64xf32>
    %368 = arith.addf %365, %367 : vector<8x64xf32>
    %369 = arith.addf %354, %368 : vector<8x64xf32>
    %c1792 = arith.constant 1792 : index
    %c0_157 = arith.constant 0 : index
    %370 = vector.load %arg2[%c1792, %c0_157] : memref<3120x128xf32, #tpu.memory_space<vmem>>, vector<1x64xf32>
    %371 = vector.broadcast %370 : vector<1x64xf32> to vector<8x64xf32>
    %372 = arith.addf %369, %371 : vector<8x64xf32>
    %cst_158 = arith.constant 0.000000e+00 : f32
    %373 = vector.broadcast %cst_158 : f32 to vector<8x64xf32>
    %374 = arith.maximumf %372, %373 : vector<8x64xf32>
    %c1_i32_159 = arith.constant 1 : i32
    %375 = tpu.dynamic_rotate %374 by %c1_i32_159 dim 0 : vector<8x64xf32>, i32 -> vector<8x64xf32>
    %376 = vector.broadcast %214 : vector<8x1xf32> to vector<8x64xf32>
    %377 = arith.mulf %375, %376 : vector<8x64xf32>
    %c7_i32_160 = arith.constant 7 : i32
    %378 = tpu.dynamic_rotate %374 by %c7_i32_160 dim 0 : vector<8x64xf32>, i32 -> vector<8x64xf32>
    %379 = vector.broadcast %218 : vector<8x1xf32> to vector<8x64xf32>
    %380 = arith.mulf %378, %379 : vector<8x64xf32>
    %c2056 = arith.constant 2056 : index
    %c0_161 = arith.constant 0 : index
    %381 = vector.load %arg2[%c2056, %c0_161] : memref<3120x128xf32, #tpu.memory_space<vmem>>, vector<64x64xf32>
    %cst_162 = arith.constant dense<0.000000e+00> : vector<8x64xf32>
    %382 = tpu.matmul %374, %381, %cst_162 {dimension_numbers = #tpu.dot_dimension_numbers<[1], [0], [0], [1], [0, 0, 1, 1], [], []>} : vector<8x64xf32>, vector<64x64xf32>, vector<8x64xf32> -> vector<8x64xf32>
    %c1992 = arith.constant 1992 : index
    %c0_163 = arith.constant 0 : index
    %383 = vector.load %arg2[%c1992, %c0_163] : memref<3120x128xf32, #tpu.memory_space<vmem>>, vector<64x64xf32>
    %cst_164 = arith.constant dense<0.000000e+00> : vector<8x64xf32>
    %384 = tpu.matmul %377, %383, %cst_164 {dimension_numbers = #tpu.dot_dimension_numbers<[1], [0], [0], [1], [0, 0, 1, 1], [], []>} : vector<8x64xf32>, vector<64x64xf32>, vector<8x64xf32> -> vector<8x64xf32>
    %385 = arith.addf %382, %384 : vector<8x64xf32>
    %c2120 = arith.constant 2120 : index
    %c0_165 = arith.constant 0 : index
    %386 = vector.load %arg2[%c2120, %c0_165] : memref<3120x128xf32, #tpu.memory_space<vmem>>, vector<64x64xf32>
    %cst_166 = arith.constant dense<0.000000e+00> : vector<8x64xf32>
    %387 = tpu.matmul %380, %386, %cst_166 {dimension_numbers = #tpu.dot_dimension_numbers<[1], [0], [0], [1], [0, 0, 1, 1], [], []>} : vector<8x64xf32>, vector<64x64xf32>, vector<8x64xf32> -> vector<8x64xf32>
    %388 = arith.addf %385, %387 : vector<8x64xf32>
    %c2184 = arith.constant 2184 : index
    %c0_167 = arith.constant 0 : index
    %389 = vector.load %arg2[%c2184, %c0_167] : memref<3120x128xf32, #tpu.memory_space<vmem>>, vector<1x64xf32>
    %390 = vector.broadcast %389 : vector<1x64xf32> to vector<8x64xf32>
    %391 = arith.addf %388, %390 : vector<8x64xf32>
    %cst_168 = arith.constant 0.000000e+00 : f32
    %392 = vector.broadcast %cst_168 : f32 to vector<8x64xf32>
    %393 = arith.maximumf %391, %392 : vector<8x64xf32>
    %c2384 = arith.constant 2384 : index
    %c0_169 = arith.constant 0 : index
    %394 = vector.load %arg2[%c2384, %c0_169] : memref<3120x128xf32, #tpu.memory_space<vmem>>, vector<1x32xf32>
    %c7_i32_170 = arith.constant 7 : i32
    %395 = tpu.dynamic_rotate %393 by %c7_i32_170 dim 0 : vector<8x64xf32>, i32 -> vector<8x64xf32>
    %396 = vector.broadcast %218 : vector<8x1xf32> to vector<8x64xf32>
    %397 = arith.mulf %395, %396 : vector<8x64xf32>
    %c2256 = arith.constant 2256 : index
    %c0_171 = arith.constant 0 : index
    %398 = vector.load %arg2[%c2256, %c0_171] : memref<3120x128xf32, #tpu.memory_space<vmem>>, vector<64x32xf32>
    %cst_172 = arith.constant dense<0.000000e+00> : vector<8x32xf32>
    %399 = tpu.matmul %393, %398, %cst_172 {dimension_numbers = #tpu.dot_dimension_numbers<[1], [0], [0], [1], [0, 0, 1, 1], [], []>} : vector<8x64xf32>, vector<64x32xf32>, vector<8x32xf32> -> vector<8x32xf32>
    %400 = vector.broadcast %394 : vector<1x32xf32> to vector<8x32xf32>
    %401 = arith.addf %399, %400 : vector<8x32xf32>
    %c2320 = arith.constant 2320 : index
    %c0_173 = arith.constant 0 : index
    %402 = vector.load %arg2[%c2320, %c0_173] : memref<3120x128xf32, #tpu.memory_space<vmem>>, vector<64x32xf32>
    %cst_174 = arith.constant dense<0.000000e+00> : vector<8x32xf32>
    %403 = tpu.matmul %393, %402, %cst_174 {dimension_numbers = #tpu.dot_dimension_numbers<[1], [0], [0], [1], [0, 0, 1, 1], [], []>} : vector<8x64xf32>, vector<64x32xf32>, vector<8x32xf32> -> vector<8x32xf32>
    %c2192 = arith.constant 2192 : index
    %c0_175 = arith.constant 0 : index
    %404 = vector.load %arg2[%c2192, %c0_175] : memref<3120x128xf32, #tpu.memory_space<vmem>>, vector<64x32xf32>
    %cst_176 = arith.constant dense<0.000000e+00> : vector<8x32xf32>
    %405 = tpu.matmul %397, %404, %cst_176 {dimension_numbers = #tpu.dot_dimension_numbers<[1], [0], [0], [1], [0, 0, 1, 1], [], []>} : vector<8x64xf32>, vector<64x32xf32>, vector<8x32xf32> -> vector<8x32xf32>
    %406 = arith.addf %403, %405 : vector<8x32xf32>
    %407 = vector.broadcast %394 : vector<1x32xf32> to vector<8x32xf32>
    %408 = arith.addf %406, %407 : vector<8x32xf32>
    %409 = vector.shape_cast %401 : vector<8x32xf32> to vector<8x1x32xf32>
    %410 = vector.shape_cast %408 : vector<8x32xf32> to vector<8x1x32xf32>
    %411 = tpu.concatenate %409, %410 in 1 : vector<8x1x32xf32>, vector<8x1x32xf32> -> vector<8x2x32xf32>
    %412 = vector.shape_cast %411 : vector<8x2x32xf32> to vector<16x32xf32>
    %c1_i32_177 = arith.constant 1 : i32
    %413 = tpu.dynamic_rotate %412 by %c1_i32_177 dim 0 : vector<16x32xf32>, i32 -> vector<16x32xf32>
    %414 = vector.broadcast %149 : vector<16x1xf32> to vector<16x32xf32>
    %415 = arith.mulf %413, %414 : vector<16x32xf32>
    %c15_i32_178 = arith.constant 15 : i32
    %416 = tpu.dynamic_rotate %412 by %c15_i32_178 dim 0 : vector<16x32xf32>, i32 -> vector<16x32xf32>
    %417 = vector.broadcast %153 : vector<16x1xf32> to vector<16x32xf32>
    %418 = arith.mulf %416, %417 : vector<16x32xf32>
    %c2424 = arith.constant 2424 : index
    %c0_179 = arith.constant 0 : index
    %419 = vector.load %arg2[%c2424, %c0_179] : memref<3120x128xf32, #tpu.memory_space<vmem>>, vector<32x32xf32>
    %cst_180 = arith.constant dense<0.000000e+00> : vector<16x32xf32>
    %420 = tpu.matmul %412, %419, %cst_180 {dimension_numbers = #tpu.dot_dimension_numbers<[1], [0], [0], [1], [0, 0, 1, 1], [], []>} : vector<16x32xf32>, vector<32x32xf32>, vector<16x32xf32> -> vector<16x32xf32>
    %c2392 = arith.constant 2392 : index
    %c0_181 = arith.constant 0 : index
    %421 = vector.load %arg2[%c2392, %c0_181] : memref<3120x128xf32, #tpu.memory_space<vmem>>, vector<32x32xf32>
    %cst_182 = arith.constant dense<0.000000e+00> : vector<16x32xf32>
    %422 = tpu.matmul %415, %421, %cst_182 {dimension_numbers = #tpu.dot_dimension_numbers<[1], [0], [0], [1], [0, 0, 1, 1], [], []>} : vector<16x32xf32>, vector<32x32xf32>, vector<16x32xf32> -> vector<16x32xf32>
    %423 = arith.addf %420, %422 : vector<16x32xf32>
    %c2456 = arith.constant 2456 : index
    %c0_183 = arith.constant 0 : index
    %424 = vector.load %arg2[%c2456, %c0_183] : memref<3120x128xf32, #tpu.memory_space<vmem>>, vector<32x32xf32>
    %cst_184 = arith.constant dense<0.000000e+00> : vector<16x32xf32>
    %425 = tpu.matmul %418, %424, %cst_184 {dimension_numbers = #tpu.dot_dimension_numbers<[1], [0], [0], [1], [0, 0, 1, 1], [], []>} : vector<16x32xf32>, vector<32x32xf32>, vector<16x32xf32> -> vector<16x32xf32>
    %426 = arith.addf %423, %425 : vector<16x32xf32>
    %c1_i32_185 = arith.constant 1 : i32
    %427 = tpu.dynamic_rotate %191 by %c1_i32_185 dim 0 : vector<16x32xf32>, i32 -> vector<16x32xf32>
    %428 = vector.broadcast %149 : vector<16x1xf32> to vector<16x32xf32>
    %429 = arith.mulf %427, %428 : vector<16x32xf32>
    %c15_i32_186 = arith.constant 15 : i32
    %430 = tpu.dynamic_rotate %191 by %c15_i32_186 dim 0 : vector<16x32xf32>, i32 -> vector<16x32xf32>
    %431 = vector.broadcast %153 : vector<16x1xf32> to vector<16x32xf32>
    %432 = arith.mulf %430, %431 : vector<16x32xf32>
    %c2528 = arith.constant 2528 : index
    %c0_187 = arith.constant 0 : index
    %433 = vector.load %arg2[%c2528, %c0_187] : memref<3120x128xf32, #tpu.memory_space<vmem>>, vector<32x32xf32>
    %cst_188 = arith.constant dense<0.000000e+00> : vector<16x32xf32>
    %434 = tpu.matmul %191, %433, %cst_188 {dimension_numbers = #tpu.dot_dimension_numbers<[1], [0], [0], [1], [0, 0, 1, 1], [], []>} : vector<16x32xf32>, vector<32x32xf32>, vector<16x32xf32> -> vector<16x32xf32>
    %c2496 = arith.constant 2496 : index
    %c0_189 = arith.constant 0 : index
    %435 = vector.load %arg2[%c2496, %c0_189] : memref<3120x128xf32, #tpu.memory_space<vmem>>, vector<32x32xf32>
    %cst_190 = arith.constant dense<0.000000e+00> : vector<16x32xf32>
    %436 = tpu.matmul %429, %435, %cst_190 {dimension_numbers = #tpu.dot_dimension_numbers<[1], [0], [0], [1], [0, 0, 1, 1], [], []>} : vector<16x32xf32>, vector<32x32xf32>, vector<16x32xf32> -> vector<16x32xf32>
    %437 = arith.addf %434, %436 : vector<16x32xf32>
    %c2560 = arith.constant 2560 : index
    %c0_191 = arith.constant 0 : index
    %438 = vector.load %arg2[%c2560, %c0_191] : memref<3120x128xf32, #tpu.memory_space<vmem>>, vector<32x32xf32>
    %cst_192 = arith.constant dense<0.000000e+00> : vector<16x32xf32>
    %439 = tpu.matmul %432, %438, %cst_192 {dimension_numbers = #tpu.dot_dimension_numbers<[1], [0], [0], [1], [0, 0, 1, 1], [], []>} : vector<16x32xf32>, vector<32x32xf32>, vector<16x32xf32> -> vector<16x32xf32>
    %440 = arith.addf %437, %439 : vector<16x32xf32>
    %441 = arith.addf %426, %440 : vector<16x32xf32>
    %c2488 = arith.constant 2488 : index
    %c0_193 = arith.constant 0 : index
    %442 = vector.load %arg2[%c2488, %c0_193] : memref<3120x128xf32, #tpu.memory_space<vmem>>, vector<1x32xf32>
    %443 = vector.broadcast %442 : vector<1x32xf32> to vector<16x32xf32>
    %444 = arith.addf %441, %443 : vector<16x32xf32>
    %cst_194 = arith.constant 0.000000e+00 : f32
    %445 = vector.broadcast %cst_194 : f32 to vector<16x32xf32>
    %446 = arith.maximumf %444, %445 : vector<16x32xf32>
    %c1_i32_195 = arith.constant 1 : i32
    %447 = tpu.dynamic_rotate %446 by %c1_i32_195 dim 0 : vector<16x32xf32>, i32 -> vector<16x32xf32>
    %448 = vector.broadcast %149 : vector<16x1xf32> to vector<16x32xf32>
    %449 = arith.mulf %447, %448 : vector<16x32xf32>
    %c15_i32_196 = arith.constant 15 : i32
    %450 = tpu.dynamic_rotate %446 by %c15_i32_196 dim 0 : vector<16x32xf32>, i32 -> vector<16x32xf32>
    %451 = vector.broadcast %153 : vector<16x1xf32> to vector<16x32xf32>
    %452 = arith.mulf %450, %451 : vector<16x32xf32>
    %c2624 = arith.constant 2624 : index
    %c0_197 = arith.constant 0 : index
    %453 = vector.load %arg2[%c2624, %c0_197] : memref<3120x128xf32, #tpu.memory_space<vmem>>, vector<32x32xf32>
    %cst_198 = arith.constant dense<0.000000e+00> : vector<16x32xf32>
    %454 = tpu.matmul %446, %453, %cst_198 {dimension_numbers = #tpu.dot_dimension_numbers<[1], [0], [0], [1], [0, 0, 1, 1], [], []>} : vector<16x32xf32>, vector<32x32xf32>, vector<16x32xf32> -> vector<16x32xf32>
    %c2592 = arith.constant 2592 : index
    %c0_199 = arith.constant 0 : index
    %455 = vector.load %arg2[%c2592, %c0_199] : memref<3120x128xf32, #tpu.memory_space<vmem>>, vector<32x32xf32>
    %cst_200 = arith.constant dense<0.000000e+00> : vector<16x32xf32>
    %456 = tpu.matmul %449, %455, %cst_200 {dimension_numbers = #tpu.dot_dimension_numbers<[1], [0], [0], [1], [0, 0, 1, 1], [], []>} : vector<16x32xf32>, vector<32x32xf32>, vector<16x32xf32> -> vector<16x32xf32>
    %457 = arith.addf %454, %456 : vector<16x32xf32>
    %c2656 = arith.constant 2656 : index
    %c0_201 = arith.constant 0 : index
    %458 = vector.load %arg2[%c2656, %c0_201] : memref<3120x128xf32, #tpu.memory_space<vmem>>, vector<32x32xf32>
    %cst_202 = arith.constant dense<0.000000e+00> : vector<16x32xf32>
    %459 = tpu.matmul %452, %458, %cst_202 {dimension_numbers = #tpu.dot_dimension_numbers<[1], [0], [0], [1], [0, 0, 1, 1], [], []>} : vector<16x32xf32>, vector<32x32xf32>, vector<16x32xf32> -> vector<16x32xf32>
    %460 = arith.addf %457, %459 : vector<16x32xf32>
    %c2688 = arith.constant 2688 : index
    %c0_203 = arith.constant 0 : index
    %461 = vector.load %arg2[%c2688, %c0_203] : memref<3120x128xf32, #tpu.memory_space<vmem>>, vector<1x32xf32>
    %462 = vector.broadcast %461 : vector<1x32xf32> to vector<16x32xf32>
    %463 = arith.addf %460, %462 : vector<16x32xf32>
    %cst_204 = arith.constant 0.000000e+00 : f32
    %464 = vector.broadcast %cst_204 : f32 to vector<16x32xf32>
    %465 = arith.maximumf %463, %464 : vector<16x32xf32>
    %c2792 = arith.constant 2792 : index
    %c0_205 = arith.constant 0 : index
    %466 = vector.load %arg2[%c2792, %c0_205] : memref<3120x128xf32, #tpu.memory_space<vmem>>, vector<1x16xf32>
    %c15_i32_206 = arith.constant 15 : i32
    %467 = tpu.dynamic_rotate %465 by %c15_i32_206 dim 0 : vector<16x32xf32>, i32 -> vector<16x32xf32>
    %468 = vector.broadcast %153 : vector<16x1xf32> to vector<16x32xf32>
    %469 = arith.mulf %467, %468 : vector<16x32xf32>
    %c2728 = arith.constant 2728 : index
    %c0_207 = arith.constant 0 : index
    %470 = vector.load %arg2[%c2728, %c0_207] : memref<3120x128xf32, #tpu.memory_space<vmem>>, vector<32x16xf32>
    %cst_208 = arith.constant dense<0.000000e+00> : vector<16x16xf32>
    %471 = tpu.matmul %465, %470, %cst_208 {dimension_numbers = #tpu.dot_dimension_numbers<[1], [0], [0], [1], [0, 0, 1, 1], [], []>} : vector<16x32xf32>, vector<32x16xf32>, vector<16x16xf32> -> vector<16x16xf32>
    %472 = vector.broadcast %466 : vector<1x16xf32> to vector<16x16xf32>
    %473 = arith.addf %471, %472 : vector<16x16xf32>
    %c2760 = arith.constant 2760 : index
    %c0_209 = arith.constant 0 : index
    %474 = vector.load %arg2[%c2760, %c0_209] : memref<3120x128xf32, #tpu.memory_space<vmem>>, vector<32x16xf32>
    %cst_210 = arith.constant dense<0.000000e+00> : vector<16x16xf32>
    %475 = tpu.matmul %465, %474, %cst_210 {dimension_numbers = #tpu.dot_dimension_numbers<[1], [0], [0], [1], [0, 0, 1, 1], [], []>} : vector<16x32xf32>, vector<32x16xf32>, vector<16x16xf32> -> vector<16x16xf32>
    %c2696 = arith.constant 2696 : index
    %c0_211 = arith.constant 0 : index
    %476 = vector.load %arg2[%c2696, %c0_211] : memref<3120x128xf32, #tpu.memory_space<vmem>>, vector<32x16xf32>
    %cst_212 = arith.constant dense<0.000000e+00> : vector<16x16xf32>
    %477 = tpu.matmul %469, %476, %cst_212 {dimension_numbers = #tpu.dot_dimension_numbers<[1], [0], [0], [1], [0, 0, 1, 1], [], []>} : vector<16x32xf32>, vector<32x16xf32>, vector<16x16xf32> -> vector<16x16xf32>
    %478 = arith.addf %475, %477 : vector<16x16xf32>
    %479 = vector.broadcast %466 : vector<1x16xf32> to vector<16x16xf32>
    %480 = arith.addf %478, %479 : vector<16x16xf32>
    %481 = vector.shape_cast %473 : vector<16x16xf32> to vector<16x1x16xf32>
    %482 = vector.shape_cast %480 : vector<16x16xf32> to vector<16x1x16xf32>
    %483 = tpu.concatenate %481, %482 in 1 : vector<16x1x16xf32>, vector<16x1x16xf32> -> vector<16x2x16xf32>
    %484 = vector.shape_cast %483 : vector<16x2x16xf32> to vector<32x16xf32>
    %c1_i32_213 = arith.constant 1 : i32
    %485 = tpu.dynamic_rotate %484 by %c1_i32_213 dim 0 : vector<32x16xf32>, i32 -> vector<32x16xf32>
    %486 = vector.broadcast %84 : vector<32x1xf32> to vector<32x16xf32>
    %487 = arith.mulf %485, %486 : vector<32x16xf32>
    %c31_i32_214 = arith.constant 31 : i32
    %488 = tpu.dynamic_rotate %484 by %c31_i32_214 dim 0 : vector<32x16xf32>, i32 -> vector<32x16xf32>
    %489 = vector.broadcast %88 : vector<32x1xf32> to vector<32x16xf32>
    %490 = arith.mulf %488, %489 : vector<32x16xf32>
    %c2816 = arith.constant 2816 : index
    %c0_215 = arith.constant 0 : index
    %491 = vector.load %arg2[%c2816, %c0_215] : memref<3120x128xf32, #tpu.memory_space<vmem>>, vector<16x16xf32>
    %cst_216 = arith.constant dense<0.000000e+00> : vector<32x16xf32>
    %492 = tpu.matmul %484, %491, %cst_216 {dimension_numbers = #tpu.dot_dimension_numbers<[1], [0], [0], [1], [0, 0, 1, 1], [], []>} : vector<32x16xf32>, vector<16x16xf32>, vector<32x16xf32> -> vector<32x16xf32>
    %c2800 = arith.constant 2800 : index
    %c0_217 = arith.constant 0 : index
    %493 = vector.load %arg2[%c2800, %c0_217] : memref<3120x128xf32, #tpu.memory_space<vmem>>, vector<16x16xf32>
    %cst_218 = arith.constant dense<0.000000e+00> : vector<32x16xf32>
    %494 = tpu.matmul %487, %493, %cst_218 {dimension_numbers = #tpu.dot_dimension_numbers<[1], [0], [0], [1], [0, 0, 1, 1], [], []>} : vector<32x16xf32>, vector<16x16xf32>, vector<32x16xf32> -> vector<32x16xf32>
    %495 = arith.addf %492, %494 : vector<32x16xf32>
    %c2832 = arith.constant 2832 : index
    %c0_219 = arith.constant 0 : index
    %496 = vector.load %arg2[%c2832, %c0_219] : memref<3120x128xf32, #tpu.memory_space<vmem>>, vector<16x16xf32>
    %cst_220 = arith.constant dense<0.000000e+00> : vector<32x16xf32>
    %497 = tpu.matmul %490, %496, %cst_220 {dimension_numbers = #tpu.dot_dimension_numbers<[1], [0], [0], [1], [0, 0, 1, 1], [], []>} : vector<32x16xf32>, vector<16x16xf32>, vector<32x16xf32> -> vector<32x16xf32>
    %498 = arith.addf %495, %497 : vector<32x16xf32>
    %c1_i32_221 = arith.constant 1 : i32
    %499 = tpu.dynamic_rotate %126 by %c1_i32_221 dim 0 : vector<32x16xf32>, i32 -> vector<32x16xf32>
    %500 = vector.broadcast %84 : vector<32x1xf32> to vector<32x16xf32>
    %501 = arith.mulf %499, %500 : vector<32x16xf32>
    %c31_i32_222 = arith.constant 31 : i32
    %502 = tpu.dynamic_rotate %126 by %c31_i32_222 dim 0 : vector<32x16xf32>, i32 -> vector<32x16xf32>
    %503 = vector.broadcast %88 : vector<32x1xf32> to vector<32x16xf32>
    %504 = arith.mulf %502, %503 : vector<32x16xf32>
    %c2872 = arith.constant 2872 : index
    %c0_223 = arith.constant 0 : index
    %505 = vector.load %arg2[%c2872, %c0_223] : memref<3120x128xf32, #tpu.memory_space<vmem>>, vector<16x16xf32>
    %cst_224 = arith.constant dense<0.000000e+00> : vector<32x16xf32>
    %506 = tpu.matmul %126, %505, %cst_224 {dimension_numbers = #tpu.dot_dimension_numbers<[1], [0], [0], [1], [0, 0, 1, 1], [], []>} : vector<32x16xf32>, vector<16x16xf32>, vector<32x16xf32> -> vector<32x16xf32>
    %c2856 = arith.constant 2856 : index
    %c0_225 = arith.constant 0 : index
    %507 = vector.load %arg2[%c2856, %c0_225] : memref<3120x128xf32, #tpu.memory_space<vmem>>, vector<16x16xf32>
    %cst_226 = arith.constant dense<0.000000e+00> : vector<32x16xf32>
    %508 = tpu.matmul %501, %507, %cst_226 {dimension_numbers = #tpu.dot_dimension_numbers<[1], [0], [0], [1], [0, 0, 1, 1], [], []>} : vector<32x16xf32>, vector<16x16xf32>, vector<32x16xf32> -> vector<32x16xf32>
    %509 = arith.addf %506, %508 : vector<32x16xf32>
    %c2888 = arith.constant 2888 : index
    %c0_227 = arith.constant 0 : index
    %510 = vector.load %arg2[%c2888, %c0_227] : memref<3120x128xf32, #tpu.memory_space<vmem>>, vector<16x16xf32>
    %cst_228 = arith.constant dense<0.000000e+00> : vector<32x16xf32>
    %511 = tpu.matmul %504, %510, %cst_228 {dimension_numbers = #tpu.dot_dimension_numbers<[1], [0], [0], [1], [0, 0, 1, 1], [], []>} : vector<32x16xf32>, vector<16x16xf32>, vector<32x16xf32> -> vector<32x16xf32>
    %512 = arith.addf %509, %511 : vector<32x16xf32>
    %513 = arith.addf %498, %512 : vector<32x16xf32>
    %c2848 = arith.constant 2848 : index
    %c0_229 = arith.constant 0 : index
    %514 = vector.load %arg2[%c2848, %c0_229] : memref<3120x128xf32, #tpu.memory_space<vmem>>, vector<1x16xf32>
    %515 = vector.broadcast %514 : vector<1x16xf32> to vector<32x16xf32>
    %516 = arith.addf %513, %515 : vector<32x16xf32>
    %cst_230 = arith.constant 0.000000e+00 : f32
    %517 = vector.broadcast %cst_230 : f32 to vector<32x16xf32>
    %518 = arith.maximumf %516, %517 : vector<32x16xf32>
    %c1_i32_231 = arith.constant 1 : i32
    %519 = tpu.dynamic_rotate %518 by %c1_i32_231 dim 0 : vector<32x16xf32>, i32 -> vector<32x16xf32>
    %520 = vector.broadcast %84 : vector<32x1xf32> to vector<32x16xf32>
    %521 = arith.mulf %519, %520 : vector<32x16xf32>
    %c31_i32_232 = arith.constant 31 : i32
    %522 = tpu.dynamic_rotate %518 by %c31_i32_232 dim 0 : vector<32x16xf32>, i32 -> vector<32x16xf32>
    %523 = vector.broadcast %88 : vector<32x1xf32> to vector<32x16xf32>
    %524 = arith.mulf %522, %523 : vector<32x16xf32>
    %c2920 = arith.constant 2920 : index
    %c0_233 = arith.constant 0 : index
    %525 = vector.load %arg2[%c2920, %c0_233] : memref<3120x128xf32, #tpu.memory_space<vmem>>, vector<16x16xf32>
    %cst_234 = arith.constant dense<0.000000e+00> : vector<32x16xf32>
    %526 = tpu.matmul %518, %525, %cst_234 {dimension_numbers = #tpu.dot_dimension_numbers<[1], [0], [0], [1], [0, 0, 1, 1], [], []>} : vector<32x16xf32>, vector<16x16xf32>, vector<32x16xf32> -> vector<32x16xf32>
    %c2904 = arith.constant 2904 : index
    %c0_235 = arith.constant 0 : index
    %527 = vector.load %arg2[%c2904, %c0_235] : memref<3120x128xf32, #tpu.memory_space<vmem>>, vector<16x16xf32>
    %cst_236 = arith.constant dense<0.000000e+00> : vector<32x16xf32>
    %528 = tpu.matmul %521, %527, %cst_236 {dimension_numbers = #tpu.dot_dimension_numbers<[1], [0], [0], [1], [0, 0, 1, 1], [], []>} : vector<32x16xf32>, vector<16x16xf32>, vector<32x16xf32> -> vector<32x16xf32>
    %529 = arith.addf %526, %528 : vector<32x16xf32>
    %c2936 = arith.constant 2936 : index
    %c0_237 = arith.constant 0 : index
    %530 = vector.load %arg2[%c2936, %c0_237] : memref<3120x128xf32, #tpu.memory_space<vmem>>, vector<16x16xf32>
    %cst_238 = arith.constant dense<0.000000e+00> : vector<32x16xf32>
    %531 = tpu.matmul %524, %530, %cst_238 {dimension_numbers = #tpu.dot_dimension_numbers<[1], [0], [0], [1], [0, 0, 1, 1], [], []>} : vector<32x16xf32>, vector<16x16xf32>, vector<32x16xf32> -> vector<32x16xf32>
    %532 = arith.addf %529, %531 : vector<32x16xf32>
    %c2952 = arith.constant 2952 : index
    %c0_239 = arith.constant 0 : index
    %533 = vector.load %arg2[%c2952, %c0_239] : memref<3120x128xf32, #tpu.memory_space<vmem>>, vector<1x16xf32>
    %534 = vector.broadcast %533 : vector<1x16xf32> to vector<32x16xf32>
    %535 = arith.addf %532, %534 : vector<32x16xf32>
    %cst_240 = arith.constant 0.000000e+00 : f32
    %536 = vector.broadcast %cst_240 : f32 to vector<32x16xf32>
    %537 = arith.maximumf %535, %536 : vector<32x16xf32>
    %c3008 = arith.constant 3008 : index
    %c0_241 = arith.constant 0 : index
    %538 = vector.load %arg2[%c3008, %c0_241] : memref<3120x128xf32, #tpu.memory_space<vmem>>, vector<1x8xf32>
    %c31_i32_242 = arith.constant 31 : i32
    %539 = tpu.dynamic_rotate %537 by %c31_i32_242 dim 0 : vector<32x16xf32>, i32 -> vector<32x16xf32>
    %540 = vector.broadcast %88 : vector<32x1xf32> to vector<32x16xf32>
    %541 = arith.mulf %539, %540 : vector<32x16xf32>
    %c2976 = arith.constant 2976 : index
    %c0_243 = arith.constant 0 : index
    %542 = vector.load %arg2[%c2976, %c0_243] : memref<3120x128xf32, #tpu.memory_space<vmem>>, vector<16x8xf32>
    %cst_244 = arith.constant dense<0.000000e+00> : vector<32x8xf32>
    %543 = tpu.matmul %537, %542, %cst_244 {dimension_numbers = #tpu.dot_dimension_numbers<[1], [0], [0], [1], [0, 0, 1, 1], [], []>} : vector<32x16xf32>, vector<16x8xf32>, vector<32x8xf32> -> vector<32x8xf32>
    %544 = vector.broadcast %538 : vector<1x8xf32> to vector<32x8xf32>
    %545 = arith.addf %543, %544 : vector<32x8xf32>
    %c2992 = arith.constant 2992 : index
    %c0_245 = arith.constant 0 : index
    %546 = vector.load %arg2[%c2992, %c0_245] : memref<3120x128xf32, #tpu.memory_space<vmem>>, vector<16x8xf32>
    %cst_246 = arith.constant dense<0.000000e+00> : vector<32x8xf32>
    %547 = tpu.matmul %537, %546, %cst_246 {dimension_numbers = #tpu.dot_dimension_numbers<[1], [0], [0], [1], [0, 0, 1, 1], [], []>} : vector<32x16xf32>, vector<16x8xf32>, vector<32x8xf32> -> vector<32x8xf32>
    %c2960 = arith.constant 2960 : index
    %c0_247 = arith.constant 0 : index
    %548 = vector.load %arg2[%c2960, %c0_247] : memref<3120x128xf32, #tpu.memory_space<vmem>>, vector<16x8xf32>
    %cst_248 = arith.constant dense<0.000000e+00> : vector<32x8xf32>
    %549 = tpu.matmul %541, %548, %cst_248 {dimension_numbers = #tpu.dot_dimension_numbers<[1], [0], [0], [1], [0, 0, 1, 1], [], []>} : vector<32x16xf32>, vector<16x8xf32>, vector<32x8xf32> -> vector<32x8xf32>
    %550 = arith.addf %547, %549 : vector<32x8xf32>
    %551 = vector.broadcast %538 : vector<1x8xf32> to vector<32x8xf32>
    %552 = arith.addf %550, %551 : vector<32x8xf32>
    %553 = vector.shape_cast %545 : vector<32x8xf32> to vector<32x1x8xf32>
    %554 = vector.shape_cast %552 : vector<32x8xf32> to vector<32x1x8xf32>
    %555 = tpu.concatenate %553, %554 in 1 : vector<32x1x8xf32>, vector<32x1x8xf32> -> vector<32x2x8xf32>
    %556 = vector.shape_cast %555 : vector<32x2x8xf32> to vector<64x8xf32>
    %c1_i32_249 = arith.constant 1 : i32
    %557 = tpu.dynamic_rotate %556 by %c1_i32_249 dim 0 : vector<64x8xf32>, i32 -> vector<64x8xf32>
    %558 = vector.broadcast %21 : vector<64x1xf32> to vector<64x8xf32>
    %559 = arith.mulf %557, %558 : vector<64x8xf32>
    %c63_i32_250 = arith.constant 63 : i32
    %560 = tpu.dynamic_rotate %556 by %c63_i32_250 dim 0 : vector<64x8xf32>, i32 -> vector<64x8xf32>
    %561 = vector.broadcast %25 : vector<64x1xf32> to vector<64x8xf32>
    %562 = arith.mulf %560, %561 : vector<64x8xf32>
    %c3024 = arith.constant 3024 : index
    %c0_251 = arith.constant 0 : index
    %563 = vector.load %arg2[%c3024, %c0_251] : memref<3120x128xf32, #tpu.memory_space<vmem>>, vector<8x8xf32>
    %cst_252 = arith.constant dense<0.000000e+00> : vector<64x8xf32>
    %564 = tpu.matmul %556, %563, %cst_252 {dimension_numbers = #tpu.dot_dimension_numbers<[1], [0], [0], [1], [0, 0, 1, 1], [], []>} : vector<64x8xf32>, vector<8x8xf32>, vector<64x8xf32> -> vector<64x8xf32>
    %c3016 = arith.constant 3016 : index
    %c0_253 = arith.constant 0 : index
    %565 = vector.load %arg2[%c3016, %c0_253] : memref<3120x128xf32, #tpu.memory_space<vmem>>, vector<8x8xf32>
    %cst_254 = arith.constant dense<0.000000e+00> : vector<64x8xf32>
    %566 = tpu.matmul %559, %565, %cst_254 {dimension_numbers = #tpu.dot_dimension_numbers<[1], [0], [0], [1], [0, 0, 1, 1], [], []>} : vector<64x8xf32>, vector<8x8xf32>, vector<64x8xf32> -> vector<64x8xf32>
    %567 = arith.addf %564, %566 : vector<64x8xf32>
    %c3032 = arith.constant 3032 : index
    %c0_255 = arith.constant 0 : index
    %568 = vector.load %arg2[%c3032, %c0_255] : memref<3120x128xf32, #tpu.memory_space<vmem>>, vector<8x8xf32>
    %cst_256 = arith.constant dense<0.000000e+00> : vector<64x8xf32>
    %569 = tpu.matmul %562, %568, %cst_256 {dimension_numbers = #tpu.dot_dimension_numbers<[1], [0], [0], [1], [0, 0, 1, 1], [], []>} : vector<64x8xf32>, vector<8x8xf32>, vector<64x8xf32> -> vector<64x8xf32>
    %570 = arith.addf %567, %569 : vector<64x8xf32>
    %c1_i32_257 = arith.constant 1 : i32
    %571 = tpu.dynamic_rotate %61 by %c1_i32_257 dim 0 : vector<64x8xf32>, i32 -> vector<64x8xf32>
    %572 = vector.broadcast %21 : vector<64x1xf32> to vector<64x8xf32>
    %573 = arith.mulf %571, %572 : vector<64x8xf32>
    %c63_i32_258 = arith.constant 63 : i32
    %574 = tpu.dynamic_rotate %61 by %c63_i32_258 dim 0 : vector<64x8xf32>, i32 -> vector<64x8xf32>
    %575 = vector.broadcast %25 : vector<64x1xf32> to vector<64x8xf32>
    %576 = arith.mulf %574, %575 : vector<64x8xf32>
    %c3056 = arith.constant 3056 : index
    %c0_259 = arith.constant 0 : index
    %577 = vector.load %arg2[%c3056, %c0_259] : memref<3120x128xf32, #tpu.memory_space<vmem>>, vector<8x8xf32>
    %cst_260 = arith.constant dense<0.000000e+00> : vector<64x8xf32>
    %578 = tpu.matmul %61, %577, %cst_260 {dimension_numbers = #tpu.dot_dimension_numbers<[1], [0], [0], [1], [0, 0, 1, 1], [], []>} : vector<64x8xf32>, vector<8x8xf32>, vector<64x8xf32> -> vector<64x8xf32>
    %c3048 = arith.constant 3048 : index
    %c0_261 = arith.constant 0 : index
    %579 = vector.load %arg2[%c3048, %c0_261] : memref<3120x128xf32, #tpu.memory_space<vmem>>, vector<8x8xf32>
    %cst_262 = arith.constant dense<0.000000e+00> : vector<64x8xf32>
    %580 = tpu.matmul %573, %579, %cst_262 {dimension_numbers = #tpu.dot_dimension_numbers<[1], [0], [0], [1], [0, 0, 1, 1], [], []>} : vector<64x8xf32>, vector<8x8xf32>, vector<64x8xf32> -> vector<64x8xf32>
    %581 = arith.addf %578, %580 : vector<64x8xf32>
    %c3064 = arith.constant 3064 : index
    %c0_263 = arith.constant 0 : index
    %582 = vector.load %arg2[%c3064, %c0_263] : memref<3120x128xf32, #tpu.memory_space<vmem>>, vector<8x8xf32>
    %cst_264 = arith.constant dense<0.000000e+00> : vector<64x8xf32>
    %583 = tpu.matmul %576, %582, %cst_264 {dimension_numbers = #tpu.dot_dimension_numbers<[1], [0], [0], [1], [0, 0, 1, 1], [], []>} : vector<64x8xf32>, vector<8x8xf32>, vector<64x8xf32> -> vector<64x8xf32>
    %584 = arith.addf %581, %583 : vector<64x8xf32>
    %585 = arith.addf %570, %584 : vector<64x8xf32>
    %c3040 = arith.constant 3040 : index
    %c0_265 = arith.constant 0 : index
    %586 = vector.load %arg2[%c3040, %c0_265] : memref<3120x128xf32, #tpu.memory_space<vmem>>, vector<1x8xf32>
    %587 = vector.broadcast %586 : vector<1x8xf32> to vector<64x8xf32>
    %588 = arith.addf %585, %587 : vector<64x8xf32>
    %cst_266 = arith.constant 0.000000e+00 : f32
    %589 = vector.broadcast %cst_266 : f32 to vector<64x8xf32>
    %590 = arith.maximumf %588, %589 : vector<64x8xf32>
    %c1_i32_267 = arith.constant 1 : i32
    %591 = tpu.dynamic_rotate %590 by %c1_i32_267 dim 0 : vector<64x8xf32>, i32 -> vector<64x8xf32>
    %592 = vector.broadcast %21 : vector<64x1xf32> to vector<64x8xf32>
    %593 = arith.mulf %591, %592 : vector<64x8xf32>
    %c63_i32_268 = arith.constant 63 : i32
    %594 = tpu.dynamic_rotate %590 by %c63_i32_268 dim 0 : vector<64x8xf32>, i32 -> vector<64x8xf32>
    %595 = vector.broadcast %25 : vector<64x1xf32> to vector<64x8xf32>
    %596 = arith.mulf %594, %595 : vector<64x8xf32>
    %c3080 = arith.constant 3080 : index
    %c0_269 = arith.constant 0 : index
    %597 = vector.load %arg2[%c3080, %c0_269] : memref<3120x128xf32, #tpu.memory_space<vmem>>, vector<8x8xf32>
    %cst_270 = arith.constant dense<0.000000e+00> : vector<64x8xf32>
    %598 = tpu.matmul %590, %597, %cst_270 {dimension_numbers = #tpu.dot_dimension_numbers<[1], [0], [0], [1], [0, 0, 1, 1], [], []>} : vector<64x8xf32>, vector<8x8xf32>, vector<64x8xf32> -> vector<64x8xf32>
    %c3072 = arith.constant 3072 : index
    %c0_271 = arith.constant 0 : index
    %599 = vector.load %arg2[%c3072, %c0_271] : memref<3120x128xf32, #tpu.memory_space<vmem>>, vector<8x8xf32>
    %cst_272 = arith.constant dense<0.000000e+00> : vector<64x8xf32>
    %600 = tpu.matmul %593, %599, %cst_272 {dimension_numbers = #tpu.dot_dimension_numbers<[1], [0], [0], [1], [0, 0, 1, 1], [], []>} : vector<64x8xf32>, vector<8x8xf32>, vector<64x8xf32> -> vector<64x8xf32>
    %601 = arith.addf %598, %600 : vector<64x8xf32>
    %c3088 = arith.constant 3088 : index
    %c0_273 = arith.constant 0 : index
    %602 = vector.load %arg2[%c3088, %c0_273] : memref<3120x128xf32, #tpu.memory_space<vmem>>, vector<8x8xf32>
    %cst_274 = arith.constant dense<0.000000e+00> : vector<64x8xf32>
    %603 = tpu.matmul %596, %602, %cst_274 {dimension_numbers = #tpu.dot_dimension_numbers<[1], [0], [0], [1], [0, 0, 1, 1], [], []>} : vector<64x8xf32>, vector<8x8xf32>, vector<64x8xf32> -> vector<64x8xf32>
    %604 = arith.addf %601, %603 : vector<64x8xf32>
    %c3096 = arith.constant 3096 : index
    %c0_275 = arith.constant 0 : index
    %605 = vector.load %arg2[%c3096, %c0_275] : memref<3120x128xf32, #tpu.memory_space<vmem>>, vector<1x8xf32>
    %606 = vector.broadcast %605 : vector<1x8xf32> to vector<64x8xf32>
    %607 = arith.addf %604, %606 : vector<64x8xf32>
    %cst_276 = arith.constant 0.000000e+00 : f32
    %608 = vector.broadcast %cst_276 : f32 to vector<64x8xf32>
    %609 = arith.maximumf %607, %608 : vector<64x8xf32>
    %c3104 = arith.constant 3104 : index
    %c0_277 = arith.constant 0 : index
    %610 = vector.load %arg2[%c3104, %c0_277] : memref<3120x128xf32, #tpu.memory_space<vmem>>, vector<4x8xf32>
    %cst_278 = arith.constant dense<0.000000e+00> : vector<4x64xf32>
    %611 = tpu.matmul %610, %609, %cst_278 {dimension_numbers = #tpu.dot_dimension_numbers<[1], [1], [0], [0], [0, 0, 1, 0], [], []>} : vector<4x8xf32>, vector<64x8xf32>, vector<4x64xf32> -> vector<4x64xf32>
    %c3112 = arith.constant 3112 : index
    %c0_279 = arith.constant 0 : index
    %612 = vector.load %arg2[%c3112, %c0_279] : memref<3120x128xf32, #tpu.memory_space<vmem>>, vector<4x1xf32>
    %613 = vector.broadcast %612 : vector<4x1xf32> to vector<4x64xf32>
    %614 = arith.addf %611, %613 : vector<4x64xf32>
    %c0_280 = arith.constant 0 : index
    %c0_281 = arith.constant 0 : index
    %615 = vector.load %arg3[%c0_280, %c0_281] : memref<4x64xf32, #tpu.memory_space<vmem>>, vector<4x64xf32>
    tpu.vector_store %arg3[%c0_280, %c0_281], %614 {strides = array<i32>} : memref<4x64xf32, #tpu.memory_space<vmem>>, vector<4x64xf32>,
    return
  }
  func.func @transform_0(%arg0: i32) -> (i32, i32) {
    %c0_i32 = arith.constant 0 : i32
    %c0_i32_0 = arith.constant 0 : i32
    %c0_i32_1 = arith.constant 0 : i32
    return %c0_i32, %c0_i32_0 : i32, i32
  }
  func.func @transform_1(%arg0: i32) -> (i32, i32) {
    %c0_i32 = arith.constant 0 : i32
    %c0_i32_0 = arith.constant 0 : i32
    %c0_i32_1 = arith.constant 0 : i32
    return %c0_i32, %c0_i32_0 : i32, i32
  }
  func.func @transform_2(%arg0: i32) -> (i32, i32) {
    %c0_i32 = arith.constant 0 : i32
    %c0_i32_0 = arith.constant 0 : i32
    %c0_i32_1 = arith.constant 0 : i32
    return %c0_i32, %c0_i32_0 : i32, i32
  }
}

</mosaic_0001>

<bundles_post_ra>
// kernel: _lambda_.1
= control target key start
LH: loop header
LB: loop body
LE: loop exit
PB: predicated region body
PF: predicated region fallthrough
CT: control target
= control target key end

     0   :  { %7 = vsyncpa [#allocation3], 0  ;;  %s13950_s9 = smov [#allocation2]   ;;  %s15847_s0 = inlined_call_operand.vmem [shape: f32[64,1], index: 0, kind: input, shape index: {}]   ;;  %s15848_s1 = inlined_call_operand.hbm [shape: f32[3120,128], index: 1, kind: input, shape index: {}]   ;;  %s15849_s2 = inlined_call_operand.vmem [shape: f32[4,64], index: 2, kind: output, shape index: {}]  }
   0x1   :  { %s15_s10 = sshll.u32 %s13950_s9, 4  ;;  %s13926_s13 = scalar_lea.hbm %s15848_s1, 49920  ;;  %s16_s10 = int_to_ptr.vmem [resolvable:$true] %s15_s10 }
   0x2   :  { %p13927_p0 = scmp.ne.s32.totalorder %s15848_s1, %s13926_s13  ;;  %p13930_p1 = scmp.lt.u32.totalorder %s13926_s13, %s15848_s1 }
   0x4   :  { %p13932_p2 = pnand %p13930_p1, %p13927_p0 }
   0x6   :  { %13935 = shalt.err (!%p13932_p2)
}
   0x7   :  { %s13936_s18 = scalar_lea.vmem %s16_s10, 49920  ;;  %p13941_p4 = scmp.lt.s32.totalorder %s16_s10, %s16_s10 }
   0x8   :  { %p13937_p3 = scmp.ne.s32.totalorder %s16_s10, %s13936_s18  ;;  %p13942_p5 = scmp.lt.s32.totalorder %s13936_s18, %s13936_s18 }
   0xa   :  { %p13943_p6 = por %p13942_p5, %p13941_p4 }
   0xc   :  { %p13944_p7 = pnand %p13943_p6, %p13937_p3 }
   0xe   :  { %13947 = shalt.err (!%p13944_p7)
}
   0xf   :  { %s13951_s19 = smov 128   ;;  %s13952_s20 = smov 8  }
  0x10   :  { %21 = dma.hbm_to_vmem [thread:$0]  %s15848_s1, 49920, %s16_s10, [#allocation3], %s13951_s19, %s13951_s19, %s13952_s20  }
  0x11   :  { %13948 = dma.done.wait [#allocation3], 49920  }
  0x12   :  { %13949 = vsyncadd [#allocation3], 4294917376  ;;  %v33_v0 = vlaneseq  ;;  %vm263_vm0 = vcmask 1040384   ;;  %vm238_vm1 = vcmask 7168   ;;  %v236_v3 = vld [vmem:[#allocation2 + $0x8] sm:$0x1] }
  0x13   :  { %v13992_v4 = vld [vmem:[%s15847_s0] sm:$0xff]  ;;  %v13997_v5 = vld [vmem:[%s15847_s0 + $0x8] sm:$0xff]  ;;  %12010 = vmatprep.subr.msk.mxu0 %vm263_vm0, %v236_v3  ;;  %v504_v7 = vld [vmem:[#allocation2 + $0x10] sm:$0x1]  ;;  %v15850_v15 = vmov 0.0   ;;  %vm716_vm8 = vcmask 64512  }
  0x14   :  { %v13986_v1 = vshrl.u32 %v33_v0, 7  ;;  %12012 = vmatprep.mubr.msk.f32.mxu0 %vm238_vm1, %v13992_v4  ;;  %12011 = vmatpush3.msk.msra.mxu0 %vm263_vm0, %v236_v3  ;;  %v14007_v8 = vld [vmem:[%s15847_s0 + $0x10] sm:$0xff]  ;;  %v186_v9 = vrot.slane %v13992_v4, 7  ;;  %v187_v11 = vrot.slane %v13997_v5, 7  ;;  %v28_v12 = vld [vmem:[%s15847_s0 + $0x18] sm:$0xff]  ;;  %v14027_v13 = vld [vmem:[%s15847_s0 + $0x20] sm:$0xff] }
  0x15   :  { %12013 = vmatmul.mubr.msk.f32.vlgmr.msra.gmra.mrb[0].mxu0 %vm238_vm1, %v13997_v5  ;;  %12024 = vmatprep.subr.msk.mxu0 %vm263_vm0, %v504_v7  ;;  %v14032_v14 = vld [vmem:[%s15847_s0 + $0x38] sm:$0xff]  ;;  %v188_v18 = vrot.slane %v14007_v8, 7  ;;  %v189_v19 = vrot.slane %v28_v12, 7  ;;  %v190_v20 = vrot.slane %v14027_v13, 7  ;;  %v237_v22 = vld [vmem:[#allocation2] sm:$0x1] }
  0x16   :  { %v46_v2 = vand.u32 31, %v13986_v1  ;;  %v38_v6 = vadd.s32 32, %v13986_v1  ;;  %vm194_vm3 = vcmp.lt.s32.totalorder %v13986_v1, 1  ;;  %v14015_v10 = vadd.s32 24, %v13986_v1  ;;  %12025 = vmatpush3.msk.msra.mxu0 %vm263_vm0, %v504_v7  ;;  %12015 = vmatprep.mubr.msk.f32.mxu0 %vm238_vm1, %v14007_v8  ;;  %v30_v26 = vld [vmem:[%s15847_s0 + $0x28] sm:$0xff]  ;;  %v31_v30 = vld [vmem:[%s15847_s0 + $0x30] sm:$0xff] }
  0x17   :  { %v193_v21 = vrot.slane %v14032_v14, 7  ;;  %11996 = vmatprep.subr.msk.mxu1 %vm263_vm0, %v237_v22  ;;  %v211_v25 = vrot.slane %v13992_v4, 1  ;;  %v201_v28 = vsel %vm194_vm3, %v186_v9, %v187_v11  ;;  %v212_v29 = vrot.slane %v13997_v5, 1  ;;  %v715_v61 = vld [vmem:[#allocation2 + $0x20] sm:$0xff]  ;;  %v14124_v62 = vld [vmem:[#allocation2 + $0x28] sm:$0xff] }
  0x18   :  { %vm138_vm2 = vcmp.ne.s32.totalorder %v46_v2, 0  ;;  %v74_v17 = vand.u32 31, %v38_v6  ;;  %11997 = vmatpush3.msk.msra.mxu1 %vm263_vm0, %v237_v22  ;;  %v67_v24 = vand.u32 31, %v14015_v10  ;;  %v200_v31 = vsel %vm194_vm3, %v187_v11, %v188_v18  ;;  %v11098_v5 = vld [vmem:[#allocation2 + $0x18] ss:$0 sm:$0xff] }
  0x19   :  { %v14035_v16 = vsel %vm138_vm2, 1.0, %v15850_v15  ;;  %12016 = vmatmul.mubr.msk.f32.gmra.mrb[2].mxu0 %vm238_vm1, %v28_v12  ;;  %v202_v23 = vsel %vm194_vm3, %v193_v21, %v186_v9  ;;  %v198_v33 = vsel %vm194_vm3, %v189_v19, %v190_v20  ;;  %vm219_vm5 = vcmp.lt.s32.totalorder %v13986_v1, 7  ;;  %12038 = vmatprep.subr.mxu1 %v715_v61 }
  0x1a   :  { %12018 = vmatprep.mubr.msk.f32.mxu0 %vm238_vm1, %v14027_v13  ;;  %v203_v27 = vmul.f32 %v14035_v16, %v202_v23  ;;  %vm142_vm4 = vcmp.ne.s32.totalorder %v74_v17, 0  ;;  %v213_v34 = vrot.slane %v14007_v8, 1  ;;  %v214_v35 = vrot.slane %v28_v12, 1 }
  0x1b   :  { %v14062_v32 = vsel %vm142_vm4, 1.0, %v15850_v15  ;;  %v215_v36 = vrot.slane %v14027_v13, 1  ;;  %v191_v37 = vrot.slane %v30_v26, 7  ;;  %v199_v38 = vsel %vm194_vm3, %v188_v18, %v189_v19 }
  0x1c   :  { %11998 = vmatprep.mubr.msk.f32.mxu1 %vm238_vm1, %v203_v27  ;;  %v207_v39 = vmul.f32 %v14062_v32, %v198_v33  ;;  %v192_v40 = vrot.slane %v31_v30, 7  ;;  %v226_v41 = vsel %vm219_vm5, %v211_v25, %v212_v29  ;;  %vm165_vm6 = vcmp.ne.s32.totalorder %v67_v24, 31 }
  0x1d   :  { %12019 = vmatmul.mubr.msk.f32.gmra.mrb[4].mxu0 %vm238_vm1, %v30_v26  ;;  %11999 = vmatmul.mubr.msk.f32.vlgmr.msra.gmra.mrb[0].mxu1 %vm238_vm1, %v201_v28  ;;  %v41_v42 = vadd.s32 56, %v13986_v1  ;;  %v225_v43 = vsel %vm219_vm5, %v212_v29, %v213_v34  ;;  %v14087_v44 = vsel %vm165_vm6, 1.0, %v15850_v15  ;;  %v223_v45 = vsel %vm219_vm5, %v214_v35, %v215_v36 }
  0x1e   :  { %12021 = vmatprep.mubr.msk.f32.mxu0 %vm238_vm1, %v31_v30  ;;  %12001 = vmatprep.mubr.msk.f32.mxu1 %vm238_vm1, %v200_v31  ;;  %v197_v46 = vsel %vm194_vm3, %v190_v20, %v191_v37  ;;  %v216_v47 = vrot.slane %v30_v26, 1  ;;  %v224_v48 = vsel %vm219_vm5, %v213_v34, %v214_v35  ;;  %v196_v49 = vsel %vm194_vm3, %v191_v37, %v192_v40 }
  0x1f   :  { %v95_v50 = vand.u32 31, %v41_v42  ;;  %v231_v51 = vmul.f32 %v14087_v44, %v223_v45  ;;  %v217_v52 = vrot.slane %v31_v30, 1  ;;  %v218_v53 = vrot.slane %v14032_v14, 1  ;;  %12039 = vmatpush3.msra.mxu1 %v715_v61 }
  0x20   :  { %v195_v54 = vsel %vm194_vm3, %v192_v40, %v193_v21  ;;  %v222_v55 = vsel %vm219_vm5, %v215_v36, %v216_v47  ;;  %12052 = vmatprep.subr.mxu1 %v14124_v62  ;;  %vm1310_vm9 = vcmask 58368   ;;  %vm1639_vm10 = vcmask 1041409  }
  0x21   :  { %12022 = vmatmul.mubr.msk.f32.gmra.mrb[6].mxu0 %vm238_vm1, %v14032_v14  ;;  %12002 = vmatmul.mubr.msk.f32.gmra.mrb[2].mxu1 %vm238_vm1, %v199_v38  ;;  %vm169_vm7 = vcmp.ne.s32.totalorder %v95_v50, 31  ;;  %v221_v56 = vsel %vm219_vm5, %v216_v47, %v217_v52  ;;  %v227_v58 = vsel %vm219_vm5, %v218_v53, %v211_v25  ;;  %v220_v59 = vsel %vm219_vm5, %v217_v52, %v218_v53 }
  0x22   :  { %12026 = vmatprep.mubr.msk.f32.mxu0 %vm238_vm1, %v226_v41  ;;  %12004 = vmatprep.mubr.msk.f32.mxu1 %vm238_vm1, %v207_v39  ;;  %v14114_v57 = vsel %vm169_vm7, 1.0, %v15850_v15  ;;  %vm1641_vm11 = vcmask 1042434   ;;  %vm1643_vm12 = vcmask 1043459   ;;  %vm1645_vm13 = vcmask 1044484  }
  0x23   :  { %15872 = vst [vmem:[#allocation5_spill] sm:$0xff] %v14114_v57  ;;  %v235_v60 = vmul.f32 %v14114_v57, %v227_v58  ;;  %vm1647_vm14 = vcmask 1045509   ;;  %vm1649_vm15 = vcmask 1046534  }
  0x25   :  { %12027 = vmatmul.mubr.msk.f32.vlgmr.msra.gmra.mrb[0].mxu0 %vm238_vm1, %v225_v43  ;;  %12005 = vmatmul.mubr.msk.f32.gmra.mrb[4].mxu1 %vm238_vm1, %v197_v46 }
  0x26   :  { %12029 = vmatprep.mubr.msk.f32.mxu0 %vm238_vm1, %v224_v48  ;;  %12007 = vmatprep.mubr.msk.f32.mxu1 %vm238_vm1, %v196_v49 }
  0x29   :  { %12030 = vmatmul.mubr.msk.f32.gmra.mrb[2].mxu0 %vm238_vm1, %v231_v51  ;;  %12008 = vmatmul.mubr.msk.f32.gmra.mrb[6].mxu1 %vm238_vm1, %v195_v54 }
  0x2a   :  { %12032 = vmatprep.mubr.msk.f32.mxu0 %vm238_vm1, %v222_v55 }
  0x2d   :  { %12033 = vmatmul.mubr.msk.f32.gmra.mrb[4].mxu0 %vm238_vm1, %v221_v56 }
  0x2e   :  { %12035 = vmatprep.mubr.msk.f32.mxu0 %vm238_vm1, %v220_v59 }
  0x31   :  { %12036 = vmatmul.mubr.msk.f32.gmra.mrb[6].mxu0 %vm238_vm1, %v235_v60  ;;  %vm1651_vm1 = vcmask 1047559  }
  0xf0   :  { %v12000_v63 = vpop.f32.mrb[0].mxu1 }
  0xf1   :  { %v333_v0 = vpop.f32.mrb[1].mxu1 }
  0xf4   :  { %v12003_v2 = vpop.f32.mrb[2].mxu1 }
  0xf5   :  { %v343_v3 = vpop.f32.mrb[3].mxu1 }
  0xf8   :  { %v12028_v4 = vpop.f32.mrb[0].mxu0  ;;  %v12006_v6 = vpop.f32.mrb[4].mxu1 }
  0xf9   :  { %v13756_v7 = vadd.f32 %v12028_v4, %v12000_v63  ;;  %v598_v8 = vpop.f32.mrb[1].mxu0  ;;  %v353_v9 = vpop.f32.mrb[5].mxu1 }
  0xfa   :  { %v13757_v11 = vadd.f32 %v598_v8, %v333_v0 }
  0xfb   :  { %v651_v12 = vadd.f32 %v13756_v7, %v11098_v5 }
  0xfc   :  { %v650_v13 = vadd.f32 %v13757_v11, %v11098_v5  ;;  %v12031_v14 = vpop.f32.mrb[2].mxu0  ;;  %v12009_v17 = vpop.f32.mrb[6].mxu1 }
  0xfd   :  { %v14127_v18 = vmax.f32 %v651_v12, 0.0  ;;  %v13758_v19 = vadd.f32 %v12031_v14, %v12003_v2  ;;  %v608_v20 = vpop.f32.mrb[3].mxu0  ;;  %v363_v21 = vpop.f32.mrb[7].mxu1 }
  0xfe   :  { %v14129_v22 = vmax.f32 %v650_v13, 0.0  ;;  %v13759_v23 = vadd.f32 %v608_v20, %v343_v3 }
  0xff   :  { %v667_v24 = vrot.slane %v14127_v18, 7  ;;  %v691_v25 = vrot.slane %v14127_v18, 1  ;;  %v653_v26 = vadd.f32 %v13758_v19, %v11098_v5 }
 0x100   :  { %v666_v27 = vrot.slane %v14129_v22, 7  ;;  %v690_v28 = vrot.slane %v14129_v22, 1  ;;  %v652_v29 = vadd.f32 %v13759_v23, %v11098_v5  ;;  %v12034_v30 = vpop.f32.mrb[4].mxu0  ;;  %v975_v23 = vld [vmem:[#allocation2 + $0x30] sm:$0xff] }
 0x101   :  { %v14135_v31 = vmax.f32 %v653_v26, 0.0  ;;  %v13760_v33 = vadd.f32 %v12034_v30, %v12006_v6  ;;  %v618_v34 = vpop.f32.mrb[5].mxu0  ;;  %v2035_v26 = vld [vmem:[#allocation2 + $0x60] sm:$0xff] }
 0x102   :  { %v660_v35 = vmax.f32 %v652_v29, 0.0  ;;  %v13761_v36 = vadd.f32 %v618_v34, %v353_v9  ;;  %v680_v37 = vsel %vm194_vm3, %v666_v27, %v667_v24  ;;  %v704_v38 = vsel %vm219_vm5, %v690_v28, %v691_v25 }
 0x103   :  { %v669_v39 = vrot.slane %v14135_v31, 7  ;;  %v655_v40 = vadd.f32 %v13760_v33, %v11098_v5  ;;  %v693_v41 = vrot.slane %v14135_v31, 1  ;;  %v13954_v29 = vmov 1983009808   ;;  %v14206_v33 = vld [vmem:[#allocation2 + $0x38] ss:$0 sm:$0xff] }
 0x104   :  { %v668_v42 = vrot.slane %v660_v35, 7  ;;  %v692_v43 = vrot.slane %v660_v35, 1  ;;  %v654_v45 = vadd.f32 %v13761_v36, %v11098_v5  ;;  %v12037_v46 = vpop.f32.mrb[6].mxu0  ;;  %v1144_v30 = vunpack.c.l.s4 %v13954_v29 }
 0x105   :  { %v663_v47 = vmax.f32 %v655_v40, 0.0  ;;  %v13762_v48 = vadd.f32 %v12037_v46, %v12009_v17  ;;  %v628_v49 = vpop.f32.mrb[7].mxu0 }
 0x106   :  { %v662_v50 = vmax.f32 %v654_v45, 0.0  ;;  %v13763_v51 = vadd.f32 %v628_v49, %v363_v21  ;;  %v679_v52 = vsel %vm194_vm3, %v667_v24, %v668_v42  ;;  %v678_v53 = vsel %vm194_vm3, %v668_v42, %v669_v39 }
 0x107   :  { %v671_v54 = vrot.slane %v663_v47, 7  ;;  %v695_v55 = vrot.slane %v663_v47, 1  ;;  %v657_v56 = vadd.f32 %v13762_v48, %v11098_v5  ;;  %v703_v58 = vsel %vm219_vm5, %v691_v25, %v692_v43  ;;  %v14203_v25 = vld [vmem:[#allocation2 + $0x48] sm:$0xff] }
 0x108   :  { %v670_v59 = vrot.slane %v662_v50, 7  ;;  %v694_v60 = vrot.slane %v662_v50, 1  ;;  %v656_v61 = vadd.f32 %v13763_v51, %v11098_v5  ;;  %v702_v63 = vsel %vm219_vm5, %v692_v43, %v693_v41 }
 0x109   :  { %v665_v0 = vmax.f32 %v657_v56, 0.0  ;;  %v14226_v48 = vadd.s32 16, %v13986_v1 }
 0x10a   :  { %v664_v2 = vmax.f32 %v656_v61, 0.0  ;;  %v677_v3 = vsel %vm194_vm3, %v669_v39, %v670_v59  ;;  %v676_v4 = vsel %vm194_vm3, %v670_v59, %v671_v54  ;;  %v701_v6 = vsel %vm219_vm5, %v693_v41, %v694_v60 }
 0x10b   :  { %v673_v7 = vrot.slane %v665_v0, 7  ;;  %v697_v8 = vrot.slane %v665_v0, 1  ;;  %v700_v5 = vsel %vm219_vm5, %v694_v60, %v695_v55  ;;  %v686_v24 = vmul.f32 %v14062_v32, %v677_v3 }
 0x10c   :  { %v672_v9 = vrot.slane %v664_v2, 7  ;;  %v696_v11 = vrot.slane %v664_v2, 1 }
 0x10d   :  { %v681_v12 = vsel %vm194_vm3, %v673_v7, %v666_v27  ;;  %v705_v13 = vsel %vm219_vm5, %v697_v8, %v690_v28  ;;  %v2036_v27 = vld [vmem:[#allocation2 + $0x68] sm:$0xff] }
 0x10e   :  { %v682_v14 = vmul.f32 %v14035_v16, %v681_v12  ;;  %v675_v17 = vsel %vm194_vm3, %v671_v54, %v672_v9  ;;  %v674_v19 = vsel %vm194_vm3, %v672_v9, %v673_v7  ;;  %v699_v20 = vsel %vm219_vm5, %v695_v55, %v696_v11 }
 0x10f   :  { %v698_v21 = vsel %vm219_vm5, %v696_v11, %v697_v8  ;;  %v13170_v28 = vpack.c.bf16 %v2036_v27, %v2035_v26 }
 0x110   :  { %12040 = vmatprep.mubr.msk.f32.mxu1 %vm716_vm8, %v682_v14 }
 0x111   :  { %12041 = vmatmul.mubr.msk.f32.vlgmr.msra.gmra.mrb[8].mxu1 %vm716_vm8, %v680_v37 }
 0x112   :  { %12043 = vmatprep.mubr.msk.f32.mxu1 %vm716_vm8, %v679_v52  ;;  %12053 = vmatpush3.msra.mxu1 %v14124_v62  ;;  %v709_v62 = vmul.f32 %v14087_v44, %v701_v6 }
 0x113   :  { %12066 = vmatprep.subr.mxu1 %v975_v23 }
 0x115   :  { %12044 = vmatmul.mubr.msk.f32.gmra.mrb[10].mxu1 %vm716_vm8, %v678_v53 }
 0x116   :  { %12046 = vmatprep.mubr.msk.f32.mxu1 %vm716_vm8, %v686_v24 }
 0x119   :  { %12047 = vmatmul.mubr.msk.f32.gmra.mrb[12].mxu1 %vm716_vm8, %v676_v4 }
 0x11a   :  { %12049 = vmatprep.mubr.msk.f32.mxu1 %vm716_vm8, %v675_v17 }
 0x11d   :  { %12050 = vmatmul.mubr.msk.f32.gmra.mrb[14].mxu1 %vm716_vm8, %v674_v19 }
 0x11e   :  { %12054 = vmatprep.mubr.msk.f32.mxu1 %vm716_vm8, %v14129_v22  ;;  %v1703_v22 = vld [vmem:[#allocation2 + $0x40] sm:$0xff] }
 0x11f   :  { %12080 = vmatprep.subr.mxu0 %v1703_v22 }
 0x120   :  { %12081 = vmatpush3.msra.mxu0 %v1703_v22 }
 0x121   :  { %12055 = vmatmul.mubr.msk.f32.vlgmr.msra.gmra.mrb[8].mxu1 %vm716_vm8, %v14127_v18  ;;  %v713_v18 = vmul.f32 %v14114_v57, %v705_v13  ;;  %12088 = vmatprep.subr.mxu0 %v14203_v25 }
 0x122   :  { %12057 = vmatprep.mubr.msk.f32.mxu1 %vm716_vm8, %v660_v35  ;;  %12067 = vmatpush3.msra.mxu1 %v975_v23 }
 0x123   :  { %13171 = vmatprep.subr.bf16.mxu1 %v13170_v28 }
 0x125   :  { %12058 = vmatmul.mubr.msk.f32.gmra.mrb[10].mxu1 %vm716_vm8, %v14135_v31  ;;  %v1145_v31 = vunpack.c.0.s8 %v1144_v30 }
 0x126   :  { %12060 = vmatprep.mubr.msk.f32.mxu1 %vm716_vm8, %v662_v50 }
 0x127   :  { %v14209_v35 = vsub.s32 %v1145_v31, %v13986_v1 }
 0x129   :  { %12061 = vmatmul.mubr.msk.f32.gmra.mrb[12].mxu1 %vm716_vm8, %v663_v47 }
 0x12a   :  { %12063 = vmatprep.mubr.msk.f32.mxu1 %vm716_vm8, %v664_v2 }
 0x12d   :  { %12064 = vmatmul.mubr.msk.f32.gmra.mrb[14].mxu1 %vm716_vm8, %v665_v0 }
 0x12e   :  { %12068 = vmatprep.mubr.msk.f32.mxu1 %vm716_vm8, %v704_v38 }
 0x131   :  { %12069 = vmatmul.mubr.msk.f32.vlgmr.msra.gmra.mrb[8].mxu1 %vm716_vm8, %v703_v58 }
 0x132   :  { %12071 = vmatprep.mubr.msk.f32.mxu1 %vm716_vm8, %v702_v63  ;;  %13173 = vmatpush3.bf16.msra.mxu1 %v13170_v28 }
 0x135   :  { %12072 = vmatmul.mubr.msk.f32.gmra.mrb[10].mxu1 %vm716_vm8, %v709_v62 }
 0x136   :  { %12074 = vmatprep.mubr.msk.f32.mxu1 %vm716_vm8, %v700_v5 }
 0x139   :  { %12075 = vmatmul.mubr.msk.f32.gmra.mrb[12].mxu1 %vm716_vm8, %v699_v20 }
 0x13a   :  { %12077 = vmatprep.mubr.msk.f32.mxu1 %vm716_vm8, %v698_v21 }
 0x13d   :  { %12078 = vmatmul.mubr.msk.f32.gmra.mrb[14].mxu1 %vm716_vm8, %v713_v18 }
 0x204   :  { %v12070_v34 = vpop.f32.mrb[8].mxu1 }
 0x205   :  { %v1119_v36 = vadd.f32 %v12070_v34, %v14206_v33  ;;  %v1066_v37 = vpop.f32.mrb[9].mxu1 }
 0x206   :  { %v1118_v38 = vadd.f32 %v14206_v33, %v1066_v37 }
 0x207   :  { %v14213_v39 = vmax.f32 %v1119_v36, 0.0 }
 0x208   :  { %v14215_v40 = vmax.f32 %v1118_v38, 0.0  ;;  %v12073_v41 = vpop.f32.mrb[10].mxu1 }
 0x209   :  { %15873 = vst [vmem:[#allocation6_spill] sm:$0xff] %v14213_v39  ;;  %v1159_v42 = vcombine.high %v14213_v39, %v14213_v39  ;;  %v1166_v43 = vrot.slane %v14213_v39, %v14209_v35  ;;  %v1076_v45 = vpop.f32.mrb[11].mxu1  ;;  %v1121_v52 = vadd.f32 %v12073_v41, %v14206_v33 }
 0x20a   :  { %15874 = vst [vmem:[#allocation7_spill] sm:$0xff] %v14215_v40  ;;  %v1142_v46 = vcombine.high %v14215_v40, %v14215_v40  ;;  %v1149_v47 = vrot.slane %v14215_v40, %v14209_v35  ;;  %v1120_v36 = vadd.f32 %v14206_v33, %v1076_v45 }
 0x20b   :  { %v1173_v49 = vrot.slane %v1159_v42, %v14209_v35  ;;  %v1174_v50 = vcombine.high %v1166_v43, %v1166_v43  ;;  %v1339_v51 = vsel %vm1310_vm9, %v1166_v43, -inf  ;;  %v14247_v26 = vmax.f32 %v1121_v52, 0.0 }
 0x20c   :  { %v1340_v53 = vrot.slane %v1339_v51, 4  ;;  %v1156_v54 = vrot.slane %v1142_v46, %v14209_v35  ;;  %v1157_v55 = vcombine.high %v1149_v47, %v1149_v47  ;;  %v1311_v56 = vsel %vm1310_vm9, %v1149_v47, -inf  ;;  %v14233_v58 = vpop.f32.mrb[12].mxu1 }
 0x20d   :  { %v1175_v59 = vcombine.high %v1173_v49, %v1173_v49  ;;  %v1346_v60 = vsel %vm1310_vm9, %v1174_v50, -inf  ;;  %v1353_v61 = vsel %vm1310_vm9, %v1173_v49, -inf  ;;  %v1312_v63 = vrot.slane %v1311_v56, 4  ;;  %v14237_v0 = vpop.f32.mrb[13].mxu1  ;;  %15875 = vst [vmem:[#allocation8_spill] sm:$0xff] %v14247_v26 }
 0x20e   :  { %v1341_v2 = vmax.f32 %v1339_v51, %v1340_v53  ;;  %v1347_v3 = vrot.slane %v1346_v60, 4  ;;  %v1354_v4 = vrot.slane %v1353_v61, 4  ;;  %v1158_v6 = vcombine.high %v1156_v54, %v1156_v54 }
 0x20f   :  { %v1360_v7 = vsel %vm1310_vm9, %v1175_v59, -inf  ;;  %v1313_v8 = vmax.f32 %v1311_v56, %v1312_v63  ;;  %v1318_v9 = vsel %vm1310_vm9, %v1157_v55, -inf  ;;  %v1325_v11 = vsel %vm1310_vm9, %v1156_v54, -inf }
 0x210   :  { %v1342_v5 = vrot.slane %v1341_v2, 2  ;;  %v1348_v12 = vmax.f32 %v1346_v60, %v1347_v3  ;;  %v1355_v13 = vmax.f32 %v1353_v61, %v1354_v4  ;;  %v1361_v14 = vrot.slane %v1360_v7, 4  ;;  %v14242_v17 = vpop.f32.mrb[14].mxu1 }
 0x211   :  { %v1314_v19 = vrot.slane %v1313_v8, 2  ;;  %v1319_v20 = vrot.slane %v1318_v9, 4  ;;  %v1326_v21 = vrot.slane %v1325_v11, 4  ;;  %v1332_v23 = vsel %vm1310_vm9, %v1158_v6, -inf  ;;  %v14245_v24 = vpop.f32.mrb[15].mxu1 }
 0x212   :  { %v1343_v62 = vmax.f32 %v1341_v2, %v1342_v5  ;;  %v1349_v18 = vrot.slane %v1348_v12, 2  ;;  %v1356_v22 = vrot.slane %v1355_v13, 2  ;;  %v14249_v27 = vmax.f32 %v1360_v7, %v1361_v14 }
 0x213   :  { %v1320_v28 = vmax.f32 %v1318_v9, %v1319_v20  ;;  %v1327_v29 = vmax.f32 %v1325_v11, %v1326_v21  ;;  %v1333_v30 = vrot.slane %v1332_v23, 4  ;;  %v1315_v34 = vmax.f32 %v1313_v8, %v1314_v19 }
 0x214   :  { %v1344_v31 = vrot.slane %v1343_v62, 1  ;;  %v1350_v37 = vmax.f32 %v1348_v12, %v1349_v18  ;;  %v14252_v43 = vmax.f32 %v1355_v13, %v1356_v22  ;;  %v1193_v46 = vcombine.high %v14247_v26, %v14247_v26 }
 0x215   :  { %v1321_v38 = vrot.slane %v1320_v28, 2  ;;  %v1328_v41 = vrot.slane %v1327_v29, 2  ;;  %v1334_v42 = vmax.f32 %v1332_v23, %v1333_v30  ;;  %v1363_v50 = vrot.slane %v14249_v27, 2 }
 0x216   :  { %v1316_v45 = vrot.slane %v1315_v34, 1  ;;  %v1200_v54 = vrot.slane %v14247_v26, %v14209_v35  ;;  %v1207_v55 = vrot.slane %v1193_v46, %v14209_v35  ;;  %v14262_v56 = vmax.f32 %v1120_v36, 0.0 }
 0x217   :  { %v1322_v51 = vmax.f32 %v1320_v28, %v1321_v38  ;;  %v1329_v52 = vmax.f32 %v1327_v29, %v1328_v41  ;;  %v1335_v53 = vrot.slane %v1334_v42, 2  ;;  %v14264_v59 = vmax.f32 %v1343_v62, %v1344_v31 }
 0x218   :  { %15876 = vst [vmem:[#allocation9_spill] sm:$0xff] %v14262_v56  ;;  %v1351_v60 = vrot.slane %v1350_v37, 1  ;;  %v1208_v2 = vcombine.high %v1200_v54, %v1200_v54  ;;  %v1209_v3 = vcombine.high %v1207_v55, %v1207_v55  ;;  %v1395_v4 = vsel %vm1310_vm9, %v1200_v54, -inf }
 0x219   :  { %v1323_v61 = vrot.slane %v1322_v51, 1  ;;  %v1336_v63 = vmax.f32 %v1334_v42, %v1335_v53  ;;  %v1409_v6 = vsel %vm1310_vm9, %v1207_v55, -inf  ;;  %v1358_v7 = vrot.slane %v14252_v43, 1 }
 0x21a   :  { %v1330_v8 = vrot.slane %v1329_v52, 1  ;;  %v1396_v9 = vrot.slane %v1395_v4, 4  ;;  %v1123_v11 = vadd.f32 %v14233_v58, %v14206_v33  ;;  %v1402_v5 = vsel %vm1310_vm9, %v1208_v2, -inf }
 0x21b   :  { %v1410_v12 = vrot.slane %v1409_v6, 4  ;;  %v1416_v13 = vsel %vm1310_vm9, %v1209_v3, -inf  ;;  %v1176_v14 = vcombine.high %v14262_v56, %v14262_v56  ;;  %v1324_v19 = vmax.f32 %v1322_v51, %v1323_v61 }
 0x21c   :  { %v1337_v20 = vrot.slane %v1336_v63, 1  ;;  %v1397_v21 = vmax.f32 %v1395_v4, %v1396_v9  ;;  %v1403_v23 = vrot.slane %v1402_v5, 4  ;;  %v1417_v18 = vrot.slane %v1416_v13, 4 }
 0x21d   :  { %v1411_v62 = vmax.f32 %v1409_v6, %v1410_v12  ;;  %v1183_v22 = vrot.slane %v14262_v56, %v14209_v35  ;;  %v1190_v28 = vrot.slane %v1176_v14, %v14209_v35  ;;  %v14278_v58 = vmax.f32 %v1350_v37, %v1351_v60 }
 0x21e   :  { %v1317_v29 = vmax.f32 %v1315_v34, %v1316_v45  ;;  %v1398_v30 = vrot.slane %v1397_v21, 2  ;;  %v1404_v31 = vmax.f32 %v1402_v5, %v1403_v23  ;;  %v14280_v36 = vmax.f32 %v1329_v52, %v1330_v8 }
 0x21f   :  { %v1191_v38 = vcombine.high %v1183_v22, %v1183_v22  ;;  %v1192_v41 = vcombine.high %v1190_v28, %v1190_v28  ;;  %v14282_v42 = vmax.f32 %v1123_v11, 0.0  ;;  %v1412_v46 = vrot.slane %v1411_v62, 2 }
 0x220   :  { %v14284_v51 = vmax.f32 %v1416_v13, %v1417_v18  ;;  %v1367_v53 = vsel %vm1310_vm9, %v1183_v22, -inf  ;;  %v1381_v54 = vsel %vm1310_vm9, %v1190_v28, -inf  ;;  %v14288_v55 = vmax.f32 %v1336_v63, %v1337_v20 }
 0x221   :  { %15877 = vst [vmem:[#allocation10_spill] sm:$0xff] %v14282_v42  ;;  %v14291_v37 = vsel %vm1639_vm10, %v1324_v19, %v1317_v29  ;;  %v1368_v34 = vrot.slane %v1367_v53, 4  ;;  %v1374_v52 = vsel %vm1310_vm9, %v1191_v38, -inf  ;;  %v1399_v45 = vmax.f32 %v1397_v21, %v1398_v30 }
 0x222   :  { %v1405_v60 = vrot.slane %v1404_v31, 2  ;;  %v1375_v61 = vrot.slane %v1374_v52, 4  ;;  %v1382_v2 = vrot.slane %v1381_v54, 4  ;;  %v1388_v4 = vsel %vm1310_vm9, %v1192_v41, -inf }
 0x223   :  { %v1369_v3 = vmax.f32 %v1367_v53, %v1368_v34  ;;  %v1227_v6 = vcombine.high %v14282_v42, %v14282_v42  ;;  %v1122_v63 = vadd.f32 %v14206_v33, %v14237_v0  ;;  %v14299_v8 = vmax.f32 %v1411_v62, %v1412_v46 }
 0x224   :  { %v1376_v11 = vmax.f32 %v1374_v52, %v1375_v61  ;;  %v1383_v5 = vmax.f32 %v1381_v54, %v1382_v2  ;;  %v1389_v13 = vrot.slane %v1388_v4, 4  ;;  %v1234_v14 = vrot.slane %v14282_v42, %v14209_v35 }
 0x225   :  { %v1370_v12 = vrot.slane %v1369_v3, 2  ;;  %v1241_v19 = vrot.slane %v1227_v6, %v14209_v35  ;;  %v1400_v20 = vrot.slane %v1399_v45, 1  ;;  %v1406_v21 = vmax.f32 %v1404_v31, %v1405_v60 }
 0x226   :  { %v1377_v23 = vrot.slane %v1376_v11, 2  ;;  %v1384_v18 = vrot.slane %v1383_v5, 2  ;;  %v1390_v28 = vmax.f32 %v1388_v4, %v1389_v13  ;;  %v1242_v0 = vcombine.high %v1234_v14, %v1234_v14 }
 0x227   :  { %v1371_v22 = vmax.f32 %v1369_v3, %v1370_v12  ;;  %v1243_v62 = vcombine.high %v1241_v19, %v1241_v19  ;;  %v1451_v38 = vsel %vm1310_vm9, %v1234_v14, -inf  ;;  %v1465_v41 = vsel %vm1310_vm9, %v1241_v19, -inf }
 0x228   :  { %v1378_v29 = vmax.f32 %v1376_v11, %v1377_v23  ;;  %v1385_v30 = vmax.f32 %v1383_v5, %v1384_v18  ;;  %v1391_v46 = vrot.slane %v1390_v28, 2  ;;  %v1452_v53 = vrot.slane %v1451_v38, 4 }
 0x229   :  { %v1458_v54 = vsel %vm1310_vm9, %v1242_v0, -inf  ;;  %v14308_v34 = vmax.f32 %v1122_v63, 0.0  ;;  %v1466_v61 = vrot.slane %v1465_v41, 4  ;;  %v1407_v2 = vrot.slane %v1406_v21, 1 }
 0x22a   :  { %v1379_v52 = vrot.slane %v1378_v29, 1  ;;  %v1459_v60 = vrot.slane %v1458_v54, 4  ;;  %v1372_v3 = vrot.slane %v1371_v22, 1  ;;  %v1453_v4 = vmax.f32 %v1451_v38, %v1452_v53 }
 0x22b   :  { %15878 = vst [vmem:[#allocation11_spill] sm:$0xff] %v14308_v34  ;;  %v1472_v6 = vsel %vm1310_vm9, %v1243_v62, -inf  ;;  %v14312_v11 = vmax.f32 %v1399_v45, %v1400_v20  ;;  %v1386_v5 = vrot.slane %v1385_v30, 1  ;;  %v1467_v13 = vmax.f32 %v1465_v41, %v1466_v61 }
 0x22c   :  { %v1460_v12 = vmax.f32 %v1458_v54, %v1459_v60  ;;  %v1380_v14 = vmax.f32 %v1378_v29, %v1379_v52  ;;  %v1392_v19 = vmax.f32 %v1390_v28, %v1391_v46  ;;  %v1454_v23 = vrot.slane %v1453_v4, 2 }
 0x22d   :  { %v1210_v63 = vcombine.high %v14308_v34, %v14308_v34  ;;  %v1468_v0 = vrot.slane %v1467_v13, 2  ;;  %v1473_v15 = vrot.slane %v1472_v6, 4  ;;  %v1217_v49 = vrot.slane %v14308_v34, %v14209_v35 }
 0x22e   :  { %v1461_v18 = vrot.slane %v1460_v12, 2  ;;  %v14318_v38 = vmax.f32 %v1406_v21, %v1407_v2  ;;  %v1373_v62 = vmax.f32 %v1371_v22, %v1372_v3  ;;  %v1455_v45 = vmax.f32 %v1453_v4, %v1454_v23 }
 0x22f   :  { %v1224_v20 = vrot.slane %v1210_v63, %v14209_v35  ;;  %v14321_v53 = vmax.f32 %v1385_v30, %v1386_v5  ;;  %v1225_v28 = vcombine.high %v1217_v49, %v1217_v49  ;;  %v1423_v41 = vsel %vm1310_vm9, %v1217_v49, -inf }
 0x230   :  { %v1462_v29 = vmax.f32 %v1460_v12, %v1461_v18  ;;  %v1393_v46 = vrot.slane %v1392_v19, 1  ;;  %v14325_v54 = vsel %vm1639_vm10, %v1380_v14, %v1373_v62  ;;  %v1424_v60 = vrot.slane %v1423_v41, 4 }
 0x231   :  { %v1226_v52 = vcombine.high %v1224_v20, %v1224_v20  ;;  %v14327_v61 = vmax.f32 %v1467_v13, %v1468_v0  ;;  %v14329_v21 = vmax.f32 %v1472_v6, %v1473_v15  ;;  %v1430_v22 = vsel %vm1310_vm9, %v1225_v28, -inf }
 0x232   :  { %v1437_v2 = vsel %vm1310_vm9, %v1224_v20, -inf  ;;  %v1456_v30 = vrot.slane %v1455_v45, 1  ;;  %v1425_v3 = vmax.f32 %v1423_v41, %v1424_v60  ;;  %v1431_v4 = vrot.slane %v1430_v22, 4 }
 0x233   :  { %v1438_v5 = vrot.slane %v1437_v2, 4  ;;  %v1463_v12 = vrot.slane %v1462_v29, 1  ;;  %v1444_v49 = vsel %vm1310_vm9, %v1226_v52, -inf  ;;  %v1125_v14 = vadd.f32 %v14242_v17, %v14206_v33 }
 0x234   :  { %v1124_v13 = vadd.f32 %v14206_v33, %v14245_v24  ;;  %v1426_v23 = vrot.slane %v1425_v3, 2  ;;  %v1432_v15 = vmax.f32 %v1430_v22, %v1431_v4  ;;  %v1445_v63 = vrot.slane %v1444_v49, 4 }
 0x235   :  { %v1439_v6 = vmax.f32 %v1437_v2, %v1438_v5  ;;  %v14338_v18 = vmax.f32 %v1392_v19, %v1393_v46  ;;  %v14341_v62 = vmax.f32 %v1125_v14, 0.0  ;;  %v14346_v60 = vmax.f32 %v1455_v45, %v1456_v30 }
 0x236   :  { %v14343_v20 = vmax.f32 %v1124_v13, 0.0  ;;  %v1433_v41 = vrot.slane %v1432_v15, 2  ;;  %v1446_v17 = vmax.f32 %v1444_v49, %v1445_v63  ;;  %v14354_v46 = vmax.f32 %v1462_v29, %v1463_v12 }
 0x237   :  { %15879 = vst [vmem:[#allocation12_spill] sm:$0xff] %v14341_v62  ;;  %v1440_v52 = vrot.slane %v1439_v6, 2  ;;  %v1261_v33 = vcombine.high %v14341_v62, %v14341_v62  ;;  %v1268_v24 = vrot.slane %v14341_v62, %v14209_v35  ;;  %v1427_v22 = vmax.f32 %v1425_v3, %v1426_v23 }
 0x238   :  { %15880 = vst [vmem:[#allocation13_spill] sm:$0xff] %v14343_v20  ;;  %v1244_v19 = vcombine.high %v14343_v20, %v14343_v20  ;;  %v1434_v2 = vmax.f32 %v1432_v15, %v1433_v41  ;;  %v1447_v4 = vrot.slane %v1446_v17, 2  ;;  %v1251_v30 = vrot.slane %v14343_v20, %v14209_v35 }
 0x239   :  { %v1275_v5 = vrot.slane %v1261_v33, %v14209_v35  ;;  %v1276_v14 = vcombine.high %v1268_v24, %v1268_v24  ;;  %v1507_v45 = vsel %vm1310_vm9, %v1268_v24, -inf  ;;  %v1441_v49 = vmax.f32 %v1439_v6, %v1440_v52 }
 0x23a   :  { %v1448_v13 = vmax.f32 %v1446_v17, %v1447_v4  ;;  %v1258_v63 = vrot.slane %v1244_v19, %v14209_v35  ;;  %v14364_v29 = vmax.f32 %v14252_v43, %v1358_v7  ;;  %v1508_v12 = vrot.slane %v1507_v45, 4 }
 0x23b   :  { %v1277_v3 = vcombine.high %v1275_v5, %v1275_v5  ;;  %v1514_v23 = vsel %vm1310_vm9, %v1276_v14, -inf  ;;  %v1521_v15 = vsel %vm1310_vm9, %v1275_v5, -inf  ;;  %v1428_v41 = vrot.slane %v1427_v22, 1 }
 0x23c   :  { %v1435_v33 = vrot.slane %v1434_v2, 1  ;;  %v1515_v24 = vrot.slane %v1514_v23, 4  ;;  %v14371_v6 = vmax.f32 %v14249_v27, %v1363_v50  ;;  %v1509_v52 = vmax.f32 %v1507_v45, %v1508_v12 }
 0x23d   :  { %v1522_v17 = vrot.slane %v1521_v15, 4  ;;  %v1528_v19 = vsel %vm1310_vm9, %v1277_v3, -inf  ;;  %v1259_v43 = vcombine.high %v1251_v30, %v1251_v30  ;;  %v1442_v7 = vrot.slane %v1441_v49, 1 }
 0x23e   :  { %v1449_v4 = vrot.slane %v1448_v13, 1  ;;  %v1516_v28 = vmax.f32 %v1514_v23, %v1515_v24  ;;  %v1529_v14 = vrot.slane %v1528_v19, 4  ;;  %v1510_v5 = vrot.slane %v1509_v52, 2 }
 0x23f   :  { %v1523_v0 = vmax.f32 %v1521_v15, %v1522_v17  ;;  %v1260_v31 = vcombine.high %v1258_v63, %v1258_v63  ;;  %v1479_v9 = vsel %vm1310_vm9, %v1251_v30, -inf  ;;  %v1486_v45 = vsel %vm1310_vm9, %v1259_v43, -inf }
 0x240   :  { %v1517_v47 = vrot.slane %v1516_v28, 2  ;;  %v1530_v27 = vmax.f32 %v1528_v19, %v1529_v14  ;;  %v1480_v50 = vrot.slane %v1479_v9, 4  ;;  %v1511_v12 = vmax.f32 %v1509_v52, %v1510_v5 }
 0x241   :  { %v1524_v3 = vrot.slane %v1523_v0, 2  ;;  %v1487_v20 = vrot.slane %v1486_v45, 4  ;;  %v1493_v42 = vsel %vm1310_vm9, %v1258_v63, -inf  ;;  %v1436_v23 = vmax.f32 %v1434_v2, %v1435_v33 }
 0x242   :  { %v1518_v24 = vmax.f32 %v1516_v28, %v1517_v47  ;;  %v1481_v26 = vmax.f32 %v1479_v9, %v1480_v50  ;;  %v1494_v34 = vrot.slane %v1493_v42, 4  ;;  %v1512_v15 = vrot.slane %v1511_v12, 1 }
 0x243   :  { %v1531_v17 = vrot.slane %v1530_v27, 2  ;;  %v1488_v56 = vmax.f32 %v1486_v45, %v1487_v20  ;;  %v1500_v30 = vsel %vm1310_vm9, %v1260_v31, -inf  ;;  %v1429_v39 = vmax.f32 %v1427_v22, %v1428_v41 }
 0x244   :  { %v1482_v19 = vrot.slane %v1481_v26, 2  ;;  %v1495_v14 = vmax.f32 %v1493_v42, %v1494_v34  ;;  %v1501_v57 = vrot.slane %v1500_v30, 4  ;;  %v1443_v52 = vmax.f32 %v1441_v49, %v1442_v7 }
 0x245   :  { %v1450_v43 = vmax.f32 %v1448_v13, %v1449_v4  ;;  %v1525_v5 = vmax.f32 %v1523_v0, %v1524_v3  ;;  %v1489_v40 = vrot.slane %v1488_v56, 2  ;;  %v1519_v63 = vrot.slane %v1518_v24, 1 }
 0x246   :  { %v1483_v62 = vmax.f32 %v1481_v26, %v1482_v19  ;;  %v1496_v2 = vrot.slane %v1495_v14, 2  ;;  %v1502_v47 = vmax.f32 %v1500_v30, %v1501_v57  ;;  %v1660_v9 = vsel %vm1639_vm10, %v1436_v23, %v1429_v39 }
 0x247   :  { %v1513_v28 = vmax.f32 %v1511_v12, %v1512_v15  ;;  %v1490_v33 = vmax.f32 %v1488_v56, %v1489_v40  ;;  %v1532_v20 = vmax.f32 %v1530_v27, %v1531_v17  ;;  %v1642_v42 = vsel %vm1641_vm11, %v14280_v36, %v14291_v37 }
 0x248   :  { %v1484_v31 = vrot.slane %v1483_v62, 1  ;;  %v1497_v22 = vmax.f32 %v1495_v14, %v1496_v2  ;;  %v1503_v41 = vrot.slane %v1502_v47, 2  ;;  %v1526_v34 = vrot.slane %v1525_v5, 1 }
 0x249   :  { %v1491_v0 = vrot.slane %v1490_v33, 1  ;;  %v1365_v49 = vrot.slane %v14371_v6, 1  ;;  %v1644_v57 = vsel %vm1643_vm12, %v14288_v55, %v1642_v42  ;;  %v1520_v26 = vmax.f32 %v1518_v24, %v1519_v63 }
 0x24a   :  { %v1498_v39 = vrot.slane %v1497_v22, 1  ;;  %v1504_v13 = vmax.f32 %v1502_v47, %v1503_v41  ;;  %v15881_v40 = vand.u32 15, %v13986_v1  ;;  %v1646_v7 = vsel %vm1645_vm13, %v14264_v59, %v1644_v57 }
 0x24b   :  { %v1485_v36 = vmax.f32 %v1483_v62, %v1484_v31  ;;  %v1492_v37 = vmax.f32 %v1490_v33, %v1491_v0  ;;  %v1533_v4 = vrot.slane %v1532_v20, 1  ;;  %v15884_v27 = vrot.slane %v14284_v51, 2 }
 0x24c   :  { %vm14387_vm2 = vcmp.ne.s32.totalorder %v15881_v40, 0  ;;  %v1499_v55 = vmax.f32 %v1497_v22, %v1498_v39  ;;  %v1505_v45 = vrot.slane %v1504_v13, 1  ;;  %v1648_v12 = vsel %vm1647_vm14, %v14278_v58, %v1646_v7  ;;  %v1894_v7 = vld [vmem:[#allocation2 + $0x50] sm:$0xff] }
 0x24d   :  { %v1420_v50 = vmax.f32 %v14284_v51, %v15884_v27  ;;  %v1654_v3 = vsel %vm1641_vm11, %v14321_v53, %v14325_v54  ;;  %v1667_v23 = vsel %vm1639_vm10, %v1492_v37, %v1485_v36  ;;  %v1366_v59 = vmax.f32 %v14371_v6, %v1365_v49 }
 0x24e   :  { %v1655_v24 = vsel %vm1643_vm12, %v14338_v18, %v1654_v3  ;;  %v1506_v15 = vmax.f32 %v1504_v13, %v1505_v45  ;;  %v1668_v51 = vsel %vm1641_vm11, %v1499_v55, %v1667_v23  ;;  %v15885_v17 = vrot.slane %v14299_v8, 1 }
 0x24f   :  { %v1421_v62 = vrot.slane %v1420_v50, 1  ;;  %v1656_v58 = vsel %vm1645_vm13, %v14312_v11, %v1655_v24  ;;  %v1527_v19 = vmax.f32 %v1525_v5, %v1526_v34  ;;  %v1650_v53 = vsel %vm1649_vm15, %v14364_v29, %v1648_v12 }
 0x250   :  { %v1415_v30 = vmax.f32 %v14299_v8, %v15885_v17  ;;  %v1657_v54 = vsel %vm1647_vm14, %v14318_v38, %v1656_v58  ;;  %v15886_v6 = vrot.slane %v14329_v21, 2  ;;  %v1534_v14 = vmax.f32 %v1532_v20, %v1533_v4  ;;  %v2034_v17 = vld [vmem:[#allocation2 + $0x78] sm:$0xff] }
 0x251   :  { %v1669_v63 = vsel %vm1643_vm12, %v1506_v15, %v1668_v51  ;;  %v1661_v8 = vsel %vm1641_vm11, %v1443_v52, %v1660_v9  ;;  %v1422_v5 = vmax.f32 %v1420_v50, %v1421_v62  ;;  %v1652_v33 = vsel %vm1651_vm1, %v1366_v59, %v1650_v53  ;;  %v2033_v51 = vld [vmem:[#allocation2 + $0x70] sm:$0xff]  ;;  %v11140_v58 = vld [vmem:[#allocation2 + $0x58] ss:$0 sm:$0xff] }
 0x252   :  { %v1476_v18 = vmax.f32 %v14329_v21, %v15886_v6  ;;  %v1658_v2 = vsel %vm1649_vm15, %v1415_v30, %v1657_v54  ;;  %v1670_v11 = vsel %vm1645_vm13, %v1513_v28, %v1669_v63  ;;  %v1662_v29 = vsel %vm1643_vm12, %v1450_v43, %v1661_v8 }
 0x253   :  { %v1671_v38 = vsel %vm1647_vm14, %v1520_v26, %v1670_v11  ;;  %v15887_v31 = vrot.slane %v14327_v61, 1  ;;  %v1663_v20 = vsel %vm1645_vm13, %v14346_v60, %v1662_v29  ;;  %v1659_v52 = vsel %vm1651_vm1, %v1422_v5, %v1658_v2 }
 0x254   :  { %v1477_v47 = vrot.slane %v1476_v18, 1  ;;  %v1672_v22 = vsel %vm1649_vm15, %v1527_v19, %v1671_v38  ;;  %v1664_v28 = vsel %vm1647_vm14, %v14354_v46, %v1663_v20  ;;  %v15888_v41 = vand.u32 15, %v14226_v48 }
 0x255   :  { %v1471_v21 = vmax.f32 %v14327_v61, %v15887_v31  ;;  %v1673_v43 = vsel %vm1651_vm1, %v1534_v14, %v1672_v22  ;;  %v15889_v34 = vmov 0.0   ;;  %v1678_v60 = vrot.slane %v1652_v33, 7 }
 0x256   :  { %v1478_v9 = vmax.f32 %v1476_v18, %v1477_v47  ;;  %vm1585_vm4 = vcmp.ne.s32.totalorder %v15888_v41, 0  ;;  %v14441_v61 = vsel %vm14387_vm2, 1.0, %v15889_v34  ;;  %v1681_v0 = vrot.slane %v1673_v43, 7  ;;  %v2233_v41 = vld [vmem:[#allocation2 + $0x88] sm:$0xff] }
 0x257   :  { %v1665_v42 = vsel %vm1649_vm15, %v1471_v21, %v1664_v28  ;;  %v1679_v57 = vrot.slane %v1659_v52, 7  ;;  %v14447_v39 = vsel %vm1585_vm4, 1.0, %v15889_v34  ;;  %v14458_v36 = vadd.s32 8, %v13986_v1 }
 0x258   :  { %v1666_v49 = vsel %vm1651_vm1, %v1478_v9, %v1665_v42  ;;  %v1685_v46 = vsel %vm194_vm3, %v1681_v0, %v1678_v60  ;;  %v1691_v50 = vrot.slane %v1659_v52, 1  ;;  %v1560_v55 = vand.u32 15, %v14015_v10 }
 0x259   :  { %v1680_v26 = vrot.slane %v1666_v49, 7  ;;  %v1686_v48 = vmul.f32 %v14441_v61, %v1685_v46  ;;  %v1684_v40 = vsel %vm194_vm3, %v1678_v60, %v1679_v57  ;;  %v1546_v4 = vand.u32 15, %v14458_v36 }
 0x25a   :  { %v1692_v27 = vrot.slane %v1666_v49, 1  ;;  %v1693_v3 = vrot.slane %v1673_v43, 1  ;;  %vm1598_vm7 = vcmp.ne.s32.totalorder %v1560_v55, 15  ;;  %v13174_v30 = vpack.c.bf16 %v2034_v17, %v2033_v51 }
 0x25b   :  { %v1683_v13 = vsel %vm194_vm3, %v1679_v57, %v1680_v26  ;;  %12082 = vmatprep.mubr.msk.f32.mxu0 %vm716_vm8, %v1686_v48  ;;  %v1682_v37 = vsel %vm194_vm3, %v1680_v26, %v1681_v0  ;;  %vm1596_vm6 = vcmp.ne.s32.totalorder %v1546_v4, 15  ;;  %v14481_v59 = vsel %vm1598_vm7, 1.0, %v15889_v34 }
 0x25c   :  { %v1688_v56 = vmul.f32 %v14447_v39, %v1683_v13  ;;  %12083 = vmatmul.mubr.msk.f32.vlgmr.msra.gmra.mrb[8].mxu0 %vm716_vm8, %v1684_v40  ;;  %v14471_v45 = vsel %vm1596_vm6, 1.0, %v15889_v34  ;;  %v1695_v12 = vsel %vm219_vm5, %v1691_v50, %v1692_v27  ;;  %v1694_v24 = vsel %vm219_vm5, %v1692_v27, %v1693_v3  ;;  %13175 = vmatprep.subr.bf16.mxu1 %v13174_v30  ;;  %v2629_v27 = vld [vmem:[#allocation2 + $0xa8] sm:$0xff] }
 0x25d   :  { %12089 = vmatpush3.msra.mxu0 %v14203_v25  ;;  %v1690_v25 = vrot.slane %v1652_v33, 1  ;;  %v1699_v10 = vmul.f32 %v14471_v45, %v1695_v12  ;;  %vm2037_vm9 = vcmask 130048   ;;  %vm2436_vm2 = vcmask 123904  }
 0x25e   :  { %12085 = vmatprep.mubr.msk.f32.mxu0 %vm716_vm8, %v1688_v56  ;;  %12096 = vmatprep.subr.mxu0 %v1894_v7 }
 0x25f   :  { %v1696_v23 = vsel %vm219_vm5, %v1690_v25, %v1691_v50  ;;  %v1697_v62 = vsel %vm219_vm5, %v1693_v3, %v1690_v25  ;;  %v2630_v50 = vld [vmem:[#allocation2 + $0xb0] sm:$0xff] }
 0x260   :  { %12086 = vmatmul.mubr.msk.f32.gmra.mrb[10].mxu0 %vm716_vm8, %v1682_v37  ;;  %v1701_v15 = vmul.f32 %v14481_v59, %v1697_v62  ;;  %v2632_v37 = vld [vmem:[#allocation2 + $0xa0] sm:$0xff]  ;;  %v14523_v55 = vpack.c.bf16 %v2630_v50, %v2629_v27  ;;  %v11153_v25 = vld [vmem:[#allocation2 + $0x90] ss:$0 sm:$0xff] }
 0x261   :  { %12090 = vmatprep.mubr.msk.f32.mxu0 %vm716_vm8, %v1652_v33 }
 0x264   :  { %12091 = vmatmul.mubr.msk.f32.vlgmr.msra.gmra.mrb[8].mxu0 %vm716_vm8, %v1659_v52 }
 0x265   :  { %12093 = vmatprep.mubr.msk.f32.mxu0 %vm716_vm8, %v1666_v49  ;;  %12097 = vmatpush3.msra.mxu0 %v1894_v7  ;;  %v2631_v7 = vld [vmem:[#allocation2 + $0x98] sm:$0xff] }
 0x266   :  { %v13182_v4 = vpack.c.bf16 %v2632_v37, %v2631_v7 }
 0x268   :  { %12094 = vmatmul.mubr.msk.f32.gmra.mrb[10].mxu0 %vm716_vm8, %v1673_v43  ;;  %v2232_v43 = vld [vmem:[#allocation2 + $0x80] sm:$0xff]  ;;  %13183 = vmatprep.subr.bf16.mxu0 %v13182_v4 }
 0x269   :  { %12098 = vmatprep.mubr.msk.f32.mxu0 %vm716_vm8, %v1696_v23  ;;  %v13178_v48 = vpack.c.bf16 %v2233_v41, %v2232_v43 }
 0x26c   :  { %12099 = vmatmul.mubr.msk.f32.vlgmr.msra.gmra.mrb[8].mxu0 %vm716_vm8, %v1699_v10 }
 0x26d   :  { %12101 = vmatprep.mubr.msk.f32.mxu0 %vm716_vm8, %v1694_v24  ;;  %13185 = vmatpush3.bf16.msra.mxu0 %v13182_v4 }
 0x26e   :  { %13187 = vmatprep.subr.bf16.mxu0 %v14523_v55 }
 0x270   :  { %12102 = vmatmul.mubr.msk.f32.gmra.mrb[10].mxu0 %vm716_vm8, %v1701_v15 }
 0x33f   :  { %v12100_v19 = vpop.f32.mrb[8].mxu0 }
 0x340   :  { %v2002_v53 = vadd.f32 %v12100_v19, %v11140_v58  ;;  %v1973_v54 = vpop.f32.mrb[9].mxu0 }
 0x341   :  { %v2001_v6 = vadd.f32 %v11140_v58, %v1973_v54 }
 0x342   :  { %v2006_v18 = vmax.f32 %v2002_v53, 0.0 }
 0x343   :  { %v2005_v14 = vmax.f32 %v2001_v6, 0.0  ;;  %v12103_v63 = vpop.f32.mrb[10].mxu0 }
 0x344   :  { %v2010_v2 = vrot.slane %v2006_v18, 7  ;;  %v2022_v8 = vrot.slane %v2006_v18, 1  ;;  %v2004_v11 = vadd.f32 %v12103_v63, %v11140_v58  ;;  %v1983_v5 = vpop.f32.mrb[11].mxu0 }
 0x345   :  { %v2009_v47 = vrot.slane %v2005_v14, 7  ;;  %v2021_v29 = vrot.slane %v2005_v14, 1  ;;  %v2003_v33 = vadd.f32 %v11140_v58, %v1983_v5 }
 0x346   :  { %v2008_v38 = vmax.f32 %v2004_v11, 0.0 }
 0x347   :  { %v2007_v31 = vmax.f32 %v2003_v33, 0.0  ;;  %v2015_v21 = vsel %vm194_vm3, %v2009_v47, %v2010_v2  ;;  %v2027_v20 = vsel %vm219_vm5, %v2021_v29, %v2022_v8 }
 0x348   :  { %v2012_v22 = vrot.slane %v2008_v38, 7  ;;  %v2024_v52 = vrot.slane %v2008_v38, 1 }
 0x349   :  { %v2011_v9 = vrot.slane %v2007_v31, 7  ;;  %v2023_v28 = vrot.slane %v2007_v31, 1 }
 0x34a   :  { %v2016_v42 = vsel %vm194_vm3, %v2012_v22, %v2009_v47  ;;  %v2028_v60 = vsel %vm219_vm5, %v2024_v52, %v2021_v29 }
 0x34b   :  { %v2026_v0 = vsel %vm219_vm5, %v2022_v8, %v2023_v28  ;;  %v2017_v49 = vmul.f32 %v14441_v61, %v2016_v42  ;;  %v2014_v57 = vsel %vm194_vm3, %v2010_v2, %v2011_v9  ;;  %v2013_v26 = vsel %vm194_vm3, %v2011_v9, %v2012_v22 }
 0x34c   :  { %v2019_v46 = vmul.f32 %v14447_v39, %v2014_v57  ;;  %v2025_v13 = vsel %vm219_vm5, %v2023_v28, %v2024_v52  ;;  %v2030_v40 = vmul.f32 %v14471_v45, %v2026_v0  ;;  %v2032_v56 = vmul.f32 %v14481_v59, %v2028_v60 }
 0x34d   :  { %12108 = vmatprep.mubr.msk.f32.mxu1 %vm2037_vm9, %v2017_v49 }
 0x34e   :  { %12109 = vmatmul.mubr.msk.f32.vlgmr.msra.gmra.mrb[16].mxu1 %vm2037_vm9, %v2015_v21 }
 0x34f   :  { %12111 = vmatprep.mubr.msk.f32.mxu1 %vm2037_vm9, %v2019_v46  ;;  %13177 = vmatpush3.bf16.msra.mxu1 %v13174_v30 }
 0x350   :  { %13179 = vmatprep.subr.bf16.mxu1 %v13178_v48 }
 0x352   :  { %12112 = vmatmul.mubr.msk.f32.gmra.mrb[18].mxu1 %vm2037_vm9, %v2013_v26 }
 0x353   :  { %12118 = vmatprep.mubr.msk.f32.mxu1 %vm2037_vm9, %v2005_v14 }
 0x356   :  { %12119 = vmatmul.mubr.msk.f32.vlgmr.msra.gmra.mrb[16].mxu1 %vm2037_vm9, %v2006_v18 }
 0x357   :  { %12121 = vmatprep.mubr.msk.f32.mxu1 %vm2037_vm9, %v2007_v31  ;;  %13181 = vmatpush3.bf16.msra.mxu1 %v13178_v48 }
 0x35a   :  { %12122 = vmatmul.mubr.msk.f32.gmra.mrb[18].mxu1 %vm2037_vm9, %v2008_v38 }
 0x35b   :  { %12128 = vmatprep.mubr.msk.f32.mxu1 %vm2037_vm9, %v2027_v20 }
 0x35e   :  { %12129 = vmatmul.mubr.msk.f32.vlgmr.msra.gmra.mrb[16].mxu1 %vm2037_vm9, %v2030_v40 }
 0x35f   :  { %12131 = vmatprep.mubr.msk.f32.mxu1 %vm2037_vm9, %v2025_v13 }
 0x362   :  { %12132 = vmatmul.mubr.msk.f32.gmra.mrb[18].mxu1 %vm2037_vm9, %v2032_v56 }
 0x431   :  { %v12130_v12 = vpop.f32.mrb[16].mxu1 }
 0x432   :  { %v2341_v3 = vadd.f32 %v12130_v12, %v11153_v25  ;;  %v2312_v23 = vpop.f32.mrb[17].mxu1 }
 0x433   :  { %v2340_v10 = vadd.f32 %v11153_v25, %v2312_v23 }
 0x434   :  { %v14526_v62 = vmax.f32 %v2341_v3, 0.0 }
 0x435   :  { %v14528_v24 = vmax.f32 %v2340_v10, 0.0  ;;  %v12133_v15 = vpop.f32.mrb[18].mxu1 }
 0x436   :  { %v2369_v51 = vcombine.high %v14526_v62, %v14526_v62  ;;  %v2376_v17 = vrot.slane %v14526_v62, %v14209_v35  ;;  %v2322_v30 = vpop.f32.mrb[19].mxu1  ;;  %v2343_v11 = vadd.f32 %v12133_v15, %v11153_v25 }
 0x437   :  { %v2352_v58 = vcombine.high %v14528_v24, %v14528_v24  ;;  %v2359_v19 = vrot.slane %v14528_v24, %v14209_v35  ;;  %v2342_v46 = vadd.f32 %v11153_v25, %v2322_v30 }
 0x438   :  { %v2383_v53 = vrot.slane %v2369_v51, %v14209_v35  ;;  %v2384_v54 = vcombine.high %v2376_v17, %v2376_v17  ;;  %v2465_v6 = vsel %vm2436_vm2, %v2376_v17, -inf  ;;  %v14547_v42 = vmax.f32 %v2343_v11, 0.0 }
 0x439   :  { %v2466_v18 = vrot.slane %v2465_v6, 4  ;;  %v2366_v14 = vrot.slane %v2352_v58, %v14209_v35  ;;  %v2367_v63 = vcombine.high %v2359_v19, %v2359_v19  ;;  %v2437_v2 = vsel %vm2436_vm2, %v2359_v19, -inf }
 0x43a   :  { %v2472_v8 = vsel %vm2436_vm2, %v2384_v54, -inf  ;;  %v2479_v47 = vsel %vm2436_vm2, %v2383_v53, -inf  ;;  %v2438_v33 = vrot.slane %v2437_v2, 4  ;;  %v2385_v20 = vcombine.high %v2383_v53, %v2383_v53 }
 0x43b   :  { %v2467_v5 = vmax.f32 %v2465_v6, %v2466_v18  ;;  %v2368_v29 = vcombine.high %v2366_v14, %v2366_v14  ;;  %v2473_v38 = vrot.slane %v2472_v8, 4  ;;  %v2444_v31 = vsel %vm2436_vm2, %v2367_v63, -inf }
 0x43c   :  { %v2451_v21 = vsel %vm2436_vm2, %v2366_v14, -inf  ;;  %v2480_v22 = vrot.slane %v2479_v47, 4  ;;  %v2445_v52 = vrot.slane %v2444_v31, 4  ;;  %v2439_v41 = vmax.f32 %v2437_v2, %v2438_v33 }
 0x43d   :  { %v2452_v9 = vrot.slane %v2451_v21, 4  ;;  %v2458_v28 = vsel %vm2436_vm2, %v2368_v29, -inf  ;;  %v2468_v43 = vrot.slane %v2467_v5, 2  ;;  %v2474_v60 = vmax.f32 %v2472_v8, %v2473_v38 }
 0x43e   :  { %v2446_v0 = vmax.f32 %v2444_v31, %v2445_v52  ;;  %v2459_v57 = vrot.slane %v2458_v28, 4  ;;  %v2486_v26 = vsel %vm2436_vm2, %v2385_v20, -inf  ;;  %v2481_v48 = vmax.f32 %v2479_v47, %v2480_v22 }
 0x43f   :  { %v2453_v49 = vmax.f32 %v2451_v21, %v2452_v9  ;;  %v2440_v56 = vrot.slane %v2439_v41, 2  ;;  %v2403_v7 = vcombine.high %v14547_v42, %v14547_v42  ;;  %v2469_v37 = vmax.f32 %v2467_v5, %v2468_v43 }
 0x440   :  { %v2447_v13 = vrot.slane %v2446_v0, 2  ;;  %v2460_v40 = vmax.f32 %v2458_v28, %v2459_v57  ;;  %v2475_v4 = vrot.slane %v2474_v60, 2  ;;  %v2487_v27 = vrot.slane %v2486_v26, 4 }
 0x441   :  { %v2454_v50 = vrot.slane %v2453_v49, 2  ;;  %v2410_v3 = vrot.slane %v14547_v42, %v14209_v35  ;;  %v2417_v23 = vrot.slane %v2403_v7, %v14209_v35  ;;  %v14555_v10 = vmax.f32 %v2342_v46, 0.0 }
 0x442   :  { %v2461_v12 = vrot.slane %v2460_v40, 2  ;;  %v2482_v25 = vrot.slane %v2481_v48, 2  ;;  %v2448_v15 = vmax.f32 %v2446_v0, %v2447_v13  ;;  %v2441_v51 = vmax.f32 %v2439_v41, %v2440_v56 }
 0x443   :  { %v2418_v17 = vcombine.high %v2410_v3, %v2410_v3  ;;  %v2419_v30 = vcombine.high %v2417_v23, %v2417_v23  ;;  %v2521_v58 = vsel %vm2436_vm2, %v2410_v3, -inf  ;;  %v2470_v19 = vrot.slane %v2469_v37, 1 }
 0x444   :  { %v14558_v53 = vmax.f32 %v2474_v60, %v2475_v4  ;;  %v2488_v54 = vmax.f32 %v2486_v26, %v2487_v27  ;;  %v2455_v6 = vmax.f32 %v2453_v49, %v2454_v50  ;;  %v2462_v18 = vmax.f32 %v2460_v40, %v2461_v12 }
 0x445   :  { %v2528_v14 = vsel %vm2436_vm2, %v2418_v17, -inf  ;;  %v2535_v63 = vsel %vm2436_vm2, %v2417_v23, -inf  ;;  %v2386_v2 = vcombine.high %v14555_v10, %v14555_v10  ;;  %v14564_v8 = vmax.f32 %v2481_v48, %v2482_v25 }
 0x446   :  { %v2449_v11 = vrot.slane %v2448_v15, 1  ;;  %v2522_v5 = vrot.slane %v2521_v58, 4  ;;  %v2542_v47 = vsel %vm2436_vm2, %v2419_v30, -inf  ;;  %v2442_v29 = vrot.slane %v2441_v51, 1 }
 0x447   :  { %v2529_v33 = vrot.slane %v2528_v14, 4  ;;  %v2393_v38 = vrot.slane %v14555_v10, %v14209_v35  ;;  %v2400_v31 = vrot.slane %v2386_v2, %v14209_v35  ;;  %v2471_v21 = vmax.f32 %v2469_v37, %v2470_v19 }
 0x448   :  { %v2489_v20 = vrot.slane %v2488_v54, 2  ;;  %v2456_v22 = vrot.slane %v2455_v6, 1  ;;  %v2536_v52 = vrot.slane %v2535_v63, 4  ;;  %v2463_v9 = vrot.slane %v2462_v18, 1 }
 0x449   :  { %v2543_v28 = vrot.slane %v2542_v47, 4  ;;  %v2401_v43 = vcombine.high %v2393_v38, %v2393_v38  ;;  %v2402_v41 = vcombine.high %v2400_v31, %v2400_v31  ;;  %v2450_v60 = vmax.f32 %v2448_v15, %v2449_v11 }
 0x44a   :  { %v2523_v0 = vmax.f32 %v2521_v58, %v2522_v5  ;;  %v2493_v49 = vsel %vm2436_vm2, %v2393_v38, -inf  ;;  %v2507_v57 = vsel %vm2436_vm2, %v2400_v31, -inf  ;;  %v2443_v26 = vmax.f32 %v2441_v51, %v2442_v29 }
 0x44b   :  { %v2530_v46 = vmax.f32 %v2528_v14, %v2529_v33  ;;  %v2494_v48 = vrot.slane %v2493_v49, 4  ;;  %v2500_v13 = vsel %vm2436_vm2, %v2401_v43, -inf  ;;  %v2457_v40 = vmax.f32 %v2455_v6, %v2456_v22 }
 0x44c   :  { %v2537_v56 = vmax.f32 %v2535_v63, %v2536_v52  ;;  %v2501_v7 = vrot.slane %v2500_v13, 4  ;;  %v2508_v37 = vrot.slane %v2507_v57, 4  ;;  %v2464_v4 = vmax.f32 %v2462_v18, %v2463_v9 }
 0x44d   :  { %v2544_v27 = vmax.f32 %v2542_v47, %v2543_v28  ;;  %v2495_v50 = vmax.f32 %v2493_v49, %v2494_v48  ;;  %v2514_v12 = vsel %vm2436_vm2, %v2402_v41, -inf  ;;  %v2601_v3 = vsel %vm1639_vm10, %v2450_v60, %v2443_v26 }
 0x44e   :  { %v2524_v23 = vrot.slane %v2523_v0, 2  ;;  %v2502_v25 = vmax.f32 %v2500_v13, %v2501_v7  ;;  %v2509_v15 = vmax.f32 %v2507_v57, %v2508_v37  ;;  %v2477_v51 = vrot.slane %v14558_v53, 1 }
 0x44f   :  { %v2531_v17 = vrot.slane %v2530_v46, 2  ;;  %v2496_v30 = vrot.slane %v2495_v50, 2  ;;  %v2515_v58 = vrot.slane %v2514_v12, 4  ;;  %v2484_v19 = vrot.slane %v14564_v8, 1 }
 0x450   :  { %v2538_v6 = vrot.slane %v2537_v56, 2  ;;  %v2503_v14 = vrot.slane %v2502_v25, 2  ;;  %v2510_v63 = vrot.slane %v2509_v15, 2  ;;  %v2545_v18 = vrot.slane %v2544_v27, 2 }
 0x451   :  { %v2497_v2 = vmax.f32 %v2495_v50, %v2496_v30  ;;  %v2516_v11 = vmax.f32 %v2514_v12, %v2515_v58  ;;  %v2602_v5 = vsel %vm1641_vm11, %v2457_v40, %v2601_v3  ;;  %v2525_v47 = vmax.f32 %v2523_v0, %v2524_v23 }
 0x452   :  { %v2504_v29 = vmax.f32 %v2502_v25, %v2503_v14  ;;  %v2511_v33 = vmax.f32 %v2509_v15, %v2510_v63  ;;  %v2603_v38 = vsel %vm1643_vm12, %v2464_v4, %v2602_v5  ;;  %v2532_v31 = vmax.f32 %v2530_v46, %v2531_v17  ;;  %v2794_v5 = vld [vmem:[#allocation2 + $0xc0] sm:$0xff] }
 0x453   :  { %v2498_v22 = vrot.slane %v2497_v2, 1  ;;  %v2517_v52 = vrot.slane %v2516_v11, 2  ;;  %v2490_v9 = vmax.f32 %v2488_v54, %v2489_v20  ;;  %v2539_v28 = vmax.f32 %v2537_v56, %v2538_v6 }
 0x454   :  { %v2505_v43 = vrot.slane %v2504_v29, 1  ;;  %v2512_v41 = vrot.slane %v2511_v33, 1  ;;  %v2604_v60 = vsel %vm1645_vm13, %v2471_v21, %v2603_v38  ;;  %v2478_v49 = vmax.f32 %v14558_v53, %v2477_v51 }
 0x455   :  { %v2518_v57 = vmax.f32 %v2516_v11, %v2517_v52  ;;  %v2546_v26 = vmax.f32 %v2544_v27, %v2545_v18  ;;  %v2526_v48 = vrot.slane %v2525_v47, 1  ;;  %v2499_v13 = vmax.f32 %v2497_v2, %v2498_v22  ;;  %v2793_v11 = vld [vmem:[#allocation2 + $0xb8] sm:$0xff] }
 0x456   :  { %v2506_v0 = vmax.f32 %v2504_v29, %v2505_v43  ;;  %v2513_v40 = vmax.f32 %v2511_v33, %v2512_v41  ;;  %v2533_v7 = vrot.slane %v2532_v31, 1  ;;  %v2491_v4 = vrot.slane %v2490_v9, 1 }
 0x457   :  { %v2519_v37 = vrot.slane %v2518_v57, 1  ;;  %v2605_v46 = vsel %vm1647_vm14, %v2478_v49, %v2604_v60  ;;  %v2540_v50 = vrot.slane %v2539_v28, 1  ;;  %v2485_v20 = vmax.f32 %v14564_v8, %v2484_v19  ;;  %v2903_v49 = vld [vmem:[#allocation2 + $0xd0] sm:$0xff] }
 0x458   :  { %v2608_v54 = vsel %vm1639_vm10, %v2506_v0, %v2499_v13  ;;  %v2553_v21 = vand.u32 7, %v13986_v1  ;;  %v2547_v53 = vrot.slane %v2546_v26, 1  ;;  %v2560_v12 = vand.u32 7, %v14458_v36  ;;  %v2906_v13 = vld [vmem:[#allocation2 + $0xe8] sm:$0xff] }
 0x459   :  { %v2520_v56 = vmax.f32 %v2518_v57, %v2519_v37  ;;  %v2609_v27 = vsel %vm1641_vm11, %v2513_v40, %v2608_v54  ;;  %v2527_v3 = vmax.f32 %v2525_v47, %v2526_v48  ;;  %v2606_v23 = vsel %vm1649_vm15, %v2485_v20, %v2605_v46  ;;  %v2904_v57 = vld [vmem:[#allocation2 + $0xd8] sm:$0xff]  ;;  %v2905_v48 = vld [vmem:[#allocation2 + $0xe0] sm:$0xff]  ;;  %v2899_v40 = vld [vmem:[#allocation2 + $0xf0] sm:$0xff] }
 0x45a   :  { %v2534_v25 = vmax.f32 %v2532_v31, %v2533_v7  ;;  %v2492_v15 = vmax.f32 %v2490_v9, %v2491_v4  ;;  %v2541_v17 = vmax.f32 %v2539_v28, %v2540_v50  ;;  %vm2573_vm4 = vcmp.ne.s32.totalorder %v2553_v21, 0  ;;  %v2900_v7 = vld [vmem:[#allocation2 + $0xf8] sm:$0xff]  ;;  %v11164_v4 = vld [vmem:[#allocation2 + $0xc8] ss:$0 sm:$0xff] }
 0x45b   :  { %v2610_v51 = vsel %vm1643_vm12, %v2520_v56, %v2609_v27  ;;  %v2548_v8 = vmax.f32 %v2546_v26, %v2547_v53  ;;  %vm2574_vm6 = vcmp.ne.s32.totalorder %v2560_v12, 0  ;;  %v14595_v14 = vsel %vm2573_vm4, 1.0, %v15889_v34 }
 0x45c   :  { %v2611_v30 = vsel %vm1645_vm13, %v2527_v3, %v2610_v51  ;;  %v2607_v58 = vsel %vm1651_vm1, %v2492_v15, %v2606_v23  ;;  %v14598_v2 = vsel %vm2574_vm6, 1.0, %v15889_v34  ;;  %v13190_v31 = vpack.c.bf16 %v2794_v5, %v2793_v11  ;;  %v2901_v23 = vld [vmem:[#allocation2 + $0x100] sm:$0xff]  ;;  %v3073_v11 = vld [vmem:[#allocation2 + $0x128] sm:$0xff] }
 0x45d   :  { %v2612_v19 = vsel %vm1647_vm14, %v2534_v25, %v2611_v30  ;;  %v2617_v63 = vrot.slane %v2607_v58, 7  ;;  %vm2579_vm7 = vcmp.ne.s32.totalorder %v2553_v21, 7  ;;  %v2623_v52 = vrot.slane %v2607_v58, 1  ;;  %v2902_v25 = vld [vmem:[#allocation2 + $0x108] sm:$0xff] }
 0x45e   :  { %v2613_v6 = vsel %vm1649_vm15, %v2541_v17, %v2612_v19  ;;  %v14611_v9 = vsel %vm2579_vm7, 1.0, %v15889_v34  ;;  %vm2580_vm2 = vcmp.ne.s32.totalorder %v2560_v12, 7  ;;  %v13194_v26 = vpack.c.bf16 %v2904_v57, %v2903_v49  ;;  %v3460_v49 = vld [vmem:[#allocation2 + $0x188] sm:$0xff]  ;;  %v3461_v57 = vld [vmem:[#allocation2 + $0x190] sm:$0xff] }
 0x45f   :  { %v2614_v36 = vsel %vm1651_vm1, %v2548_v8, %v2613_v6  ;;  %v13198_v0 = vpack.c.bf16 %v2906_v13, %v2905_v48  ;;  %v13202_v37 = vpack.c.bf16 %v2900_v7, %v2899_v40  ;;  %vm2907_vm4 = vcmask 261120   ;;  %v3070_v6 = vld [vmem:[#allocation2 + $0x110] sm:$0xff] }
 0x460   :  { %v2618_v18 = vrot.slane %v2614_v36, 7  ;;  %v2624_v22 = vrot.slane %v2614_v36, 1  ;;  %13195 = vmatprep.subr.bf16.mxu1 %v13194_v26  ;;  %v13206_v19 = vpack.c.bf16 %v2902_v25, %v2901_v23  ;;  %vm13956_vm6 = vmmov 0   ;;  %v11171_v13 = vld [vmem:[#allocation2 + $0x130] ss:$0 sm:$0xff] }
 0x461   :  { %13197 = vmatpush3.bf16.msra.mxu1 %v13194_v26  ;;  %v13234_v48 = vpack.c.bf16 %v3461_v57, %v3460_v49  ;;  %vm3210_vm7 = vcmask 254976  }
 0x462   :  { %v2619_v47 = vsel %vm194_vm3, %v2617_v63, %v2618_v18  ;;  %v2620_v29 = vsel %vm194_vm3, %v2618_v18, %v2617_v63  ;;  %v2625_v28 = vsel %vm219_vm5, %v2623_v52, %v2624_v22  ;;  %v2626_v41 = vsel %vm219_vm5, %v2624_v22, %v2623_v52  ;;  %13199 = vmatprep.subr.bf16.mxu1 %v13198_v0  ;;  %v3072_v18 = vld [vmem:[#allocation2 + $0x120] sm:$0xff]  ;;  %v3458_v22 = vld [vmem:[#allocation2 + $0x178] sm:$0xff] }
 0x463   :  { %v2621_v33 = vmul.f32 %v14595_v14, %v2620_v29  ;;  %v2622_v38 = vmul.f32 %v14598_v2, %v2619_v47  ;;  %v2627_v43 = vmul.f32 %v14611_v9, %v2625_v28  ;;  %v13214_v5 = vpack.c.bf16 %v3073_v11, %v3072_v18  ;;  %v3459_v52 = vld [vmem:[#allocation2 + $0x180] sm:$0xff]  ;;  %v3311_v28 = vld [vmem:[#allocation2 + $0x148] sm:$0xff] }
 0x465   :  { %12138 = vmatprep.mubr.msk.f32.mxu0 %vm2037_vm9, %v2621_v33  ;;  %13201 = vmatpush3.bf16.msra.mxu1 %v13198_v0  ;;  %v3309_v33 = vld [vmem:[#allocation2 + $0x138] sm:$0xff] }
 0x466   :  { %12139 = vmatmul.mubr.msk.f32.vlgmr.msra.gmra.mrb[12].mxu0 %vm2037_vm9, %v2622_v38  ;;  %13203 = vmatprep.subr.bf16.mxu1 %v13202_v37  ;;  %v3310_v38 = vld [vmem:[#allocation2 + $0x140] sm:$0xff] }
 0x467   :  { %13189 = vmatpush3.bf16.msra.mxu0 %v14523_v55  ;;  %12145 = vmatprep.mubr.msk.f32.mxu0 %vm2037_vm9, %v2607_v58  ;;  %v14619_v55 = vsel %vm2580_vm2, 1.0, %v15889_v34 }
 0x468   :  { %13191 = vmatprep.subr.bf16.mxu0 %v13190_v31  ;;  %v2628_v60 = vmul.f32 %v14619_v55, %v2626_v41  ;;  %v13231_v41 = vpack.c.bf16 %v3459_v52, %v3458_v22 }
 0x46e   :  { %12146 = vmatmul.mubr.msk.f32.vlgmr.msra.gmra.mrb[12].mxu0 %vm2037_vm9, %v2614_v36  ;;  %v3071_v36 = vld [vmem:[#allocation2 + $0x118] sm:$0xff] }
 0x46f   :  { %13193 = vmatpush3.bf16.msra.mxu0 %v13190_v31  ;;  %12152 = vmatprep.mubr.msk.f32.mxu0 %vm2037_vm9, %v2627_v43  ;;  %v13210_v63 = vpack.c.bf16 %v3071_v36, %v3070_v6  ;;  %v13219_v31 = vpack.c.bf16 %v3310_v38, %v3309_v33  ;;  %v15870_v43 = vmov 0.0|0.0  }
 0x470   :  { %13218 = vmatprep.subr.bf16.mxu0 %v15870_v43 }
 0x476   :  { %12153 = vmatmul.mubr.msk.f32.vlgmr.msra.gmra.mrb[12].mxu0 %vm2037_vm9, %v2628_v60  ;;  %v3312_v60 = vld [vmem:[#allocation2 + $0x150] sm:$0xff] }
 0x477   :  { %13220 = vmatpush3.bf16.msra.mxu0 %v13219_v31  ;;  %v13222_v26 = vpack.c.bf16 %v3312_v60, %v3311_v28  ;;  %12196 = vmatprep.mubr.msk.f32.mxu0 %vm13956_vm6, %v15889_v34 }
 0x478   :  { %13221 = vmatprep.subr.bf16.mxu0 %v15870_v43 }
 0x47b   :  { %13223 = vmatpush3.bf16.msra.mxu0 %v13222_v26 }
 0x47c   :  { %13224 = vmatprep.subr.bf16.mxu0 %v15870_v43 }
 0x549   :  { %v12154_v46 = vpop.f32.mrb[12].mxu0 }
 0x54a   :  { %v2884_v50 = vadd.f32 %v12154_v46, %v11164_v4  ;;  %v2867_v54 = vpop.f32.mrb[13].mxu0 }
 0x54b   :  { %v2883_v20 = vadd.f32 %v11164_v4, %v2867_v54 }
 0x54c   :  { %v2886_v21 = vmax.f32 %v2884_v50, 0.0 }
 0x54d   :  { %v2885_v56 = vmax.f32 %v2883_v20, 0.0 }
 0x54e   :  { %v2888_v53 = vrot.slane %v2886_v21, 7  ;;  %v2894_v27 = vrot.slane %v2886_v21, 1 }
 0x54f   :  { %v2887_v12 = vrot.slane %v2885_v56, 7  ;;  %v2893_v3 = vrot.slane %v2885_v56, 1 }
 0x551   :  { %v2889_v15 = vsel %vm194_vm3, %v2887_v12, %v2888_v53  ;;  %v2896_v51 = vsel %vm219_vm5, %v2894_v27, %v2893_v3  ;;  %v2890_v17 = vsel %vm194_vm3, %v2888_v53, %v2887_v12  ;;  %v2895_v30 = vsel %vm219_vm5, %v2893_v3, %v2894_v27 }
 0x552   :  { %v2892_v8 = vmul.f32 %v14598_v2, %v2889_v15  ;;  %v2891_v58 = vmul.f32 %v14595_v14, %v2890_v17  ;;  %v2897_v47 = vmul.f32 %v14611_v9, %v2895_v30  ;;  %v2898_v29 = vmul.f32 %v14619_v55, %v2896_v51 }
 0x554   :  { %12163 = vmatprep.mubr.msk.f32.mxu1 %vm2907_vm4, %v2891_v58 }
 0x555   :  { %12164 = vmatmul.mubr.msk.f32.vlgmr.msra.gmra.mrb[20].mxu1 %vm2907_vm4, %v2892_v8 }
 0x556   :  { %13205 = vmatpush3.bf16.msra.mxu1 %v13202_v37  ;;  %12174 = vmatprep.mubr.msk.f32.mxu1 %vm2907_vm4, %v2885_v56 }
 0x557   :  { %13207 = vmatprep.subr.bf16.mxu1 %v13206_v19 }
 0x55a   :  { %13209 = vmatpush3.bf16.msra.mxu1 %v13206_v19 }
 0x55b   :  { %13211 = vmatprep.subr.bf16.mxu1 %v13210_v63 }
 0x55d   :  { %12175 = vmatmul.mubr.msk.f32.vlgmr.msra.gmra.mrb[20].mxu1 %vm2907_vm4, %v2886_v21 }
 0x55e   :  { %13213 = vmatpush3.bf16.msra.mxu1 %v13210_v63  ;;  %12185 = vmatprep.mubr.msk.f32.mxu1 %vm2907_vm4, %v2897_v47 }
 0x55f   :  { %13215 = vmatprep.subr.bf16.mxu1 %v13214_v5 }
 0x562   :  { %13217 = vmatpush3.bf16.msra.mxu1 %v13214_v5 }
 0x563   :  { %13230 = vmatprep.subr.bf16.mxu1 %v15870_v43 }
 0x565   :  { %12186 = vmatmul.mubr.msk.f32.vlgmr.msra.gmra.mrb[20].mxu1 %vm2907_vm4, %v2898_v29 }
 0x566   :  { %13232 = vmatpush3.bf16.msra.mxu1 %v13231_v41  ;;  %12218 = vmatprep.mubr.msk.f32.mxu1 %vm13956_vm6, %v15889_v34 }
 0x567   :  { %13233 = vmatprep.subr.bf16.mxu1 %v15870_v43 }
 0x56a   :  { %13235 = vmatpush3.bf16.msra.mxu1 %v13234_v48 }
 0x56b   :  { %13248 = vmatprep.subr.bf16.mxu1 %v15870_v43 }
 0x638   :  { %v12187_v0 = vpop.f32.mrb[20].mxu1 }
 0x639   :  { %v3163_v40 = vadd.f32 %v12187_v0, %v11171_v13  ;;  %v3146_v7 = vpop.f32.mrb[21].mxu1 }
 0x63a   :  { %v3162_v37 = vadd.f32 %v11171_v13, %v3146_v7 }
 0x63b   :  { %v14653_v4 = vmax.f32 %v3163_v40, 0.0 }
 0x63c   :  { %v14655_v46 = vmax.f32 %v3162_v37, 0.0 }
 0x63d   :  { %v3185_v50 = vcombine.high %v14653_v4, %v14653_v4  ;;  %v3192_v54 = vrot.slane %v14653_v4, %v14209_v35 }
 0x63e   :  { %v3168_v20 = vcombine.high %v14655_v46, %v14655_v46  ;;  %v3175_v21 = vrot.slane %v14655_v46, %v14209_v35 }
 0x63f   :  { %v3199_v56 = vrot.slane %v3185_v50, %v14209_v35  ;;  %v3200_v53 = vcombine.high %v3192_v54, %v3192_v54  ;;  %v3239_v27 = vsel %vm3210_vm7, %v3192_v54, -inf }
 0x640   :  { %v3240_v12 = vrot.slane %v3239_v27, 4  ;;  %v3182_v3 = vrot.slane %v3168_v20, %v14209_v35  ;;  %v3183_v23 = vcombine.high %v3175_v21, %v3175_v21  ;;  %v3211_v25 = vsel %vm3210_vm7, %v3175_v21, -inf }
 0x641   :  { %v3201_v15 = vcombine.high %v3199_v56, %v3199_v56  ;;  %v3246_v51 = vsel %vm3210_vm7, %v3200_v53, -inf  ;;  %v3253_v17 = vsel %vm3210_vm7, %v3199_v56, -inf  ;;  %v3212_v30 = vrot.slane %v3211_v25, 4 }
 0x642   :  { %v3241_v8 = vmax.f32 %v3239_v27, %v3240_v12  ;;  %v3247_v58 = vrot.slane %v3246_v51, 4  ;;  %v3254_v19 = vrot.slane %v3253_v17, 4  ;;  %v3184_v6 = vcombine.high %v3182_v3, %v3182_v3 }
 0x643   :  { %v3260_v36 = vsel %vm3210_vm7, %v3201_v15, -inf  ;;  %v3213_v63 = vmax.f32 %v3211_v25, %v3212_v30  ;;  %v3218_v18 = vsel %vm3210_vm7, %v3183_v23, -inf  ;;  %v3225_v11 = vsel %vm3210_vm7, %v3182_v3, -inf }
 0x644   :  { %v3248_v5 = vmax.f32 %v3246_v51, %v3247_v58  ;;  %v3255_v47 = vmax.f32 %v3253_v17, %v3254_v19  ;;  %v3261_v29 = vrot.slane %v3260_v36, 4  ;;  %v3219_v38 = vrot.slane %v3218_v18, 4 }
 0x645   :  { %v3214_v33 = vrot.slane %v3213_v63, 2  ;;  %v3226_v31 = vrot.slane %v3225_v11, 4  ;;  %v3232_v22 = vsel %vm3210_vm7, %v3184_v6, -inf  ;;  %v3242_v52 = vrot.slane %v3241_v8, 2 }
 0x646   :  { %v3249_v28 = vrot.slane %v3248_v5, 2  ;;  %v3262_v41 = vmax.f32 %v3260_v36, %v3261_v29  ;;  %v3220_v49 = vmax.f32 %v3218_v18, %v3219_v38  ;;  %v3233_v26 = vrot.slane %v3232_v22, 4 }
 0x647   :  { %v3215_v60 = vmax.f32 %v3213_v63, %v3214_v33  ;;  %v3227_v57 = vmax.f32 %v3225_v11, %v3226_v31  ;;  %v3256_v48 = vrot.slane %v3255_v47, 2  ;;  %v3243_v37 = vmax.f32 %v3241_v8, %v3242_v52  ;;  %v3305_v52 = vld [vmem:[#allocation2 + $0x158] sm:$0xff] }
 0x648   :  { %v3263_v13 = vrot.slane %v3262_v41, 2  ;;  %v3221_v0 = vrot.slane %v3220_v49, 2  ;;  %v3234_v7 = vmax.f32 %v3232_v22, %v3233_v26  ;;  %v3250_v50 = vmax.f32 %v3248_v5, %v3249_v28  ;;  %v3306_v28 = vld [vmem:[#allocation2 + $0x160] sm:$0xff] }
 0x649   :  { %v3228_v40 = vrot.slane %v3227_v57, 2  ;;  %v3216_v54 = vrot.slane %v3215_v60, 1  ;;  %v3257_v53 = vmax.f32 %v3255_v47, %v3256_v48  ;;  %v3244_v25 = vrot.slane %v3243_v37, 1 }
 0x64a   :  { %v3222_v20 = vmax.f32 %v3220_v49, %v3221_v0  ;;  %v3235_v56 = vrot.slane %v3234_v7, 2  ;;  %v3264_v27 = vmax.f32 %v3262_v41, %v3263_v13  ;;  %v3251_v15 = vrot.slane %v3250_v50, 1 }
 0x64b   :  { %v3229_v21 = vmax.f32 %v3227_v57, %v3228_v40  ;;  %v3217_v51 = vmax.f32 %v3215_v60, %v3216_v54  ;;  %v3258_v19 = vrot.slane %v3257_v53, 1  ;;  %v3271_v6 = vand.u32 3, %v13986_v1  ;;  %v3307_v40 = vld [vmem:[#allocation2 + $0x168] sm:$0xff] }
 0x64c   :  { %v3223_v12 = vrot.slane %v3222_v20, 1  ;;  %v3236_v23 = vmax.f32 %v3234_v7, %v3235_v56  ;;  %v3265_v63 = vrot.slane %v3264_v27, 1  ;;  %v3245_v18 = vmax.f32 %v3243_v37, %v3244_v25  ;;  %v3308_v7 = vld [vmem:[#allocation2 + $0x170] sm:$0xff]  ;;  %v3548_v54 = vld [vmem:[#allocation2 + $0x1e8] sm:$0xff]  ;;  %v3558_v25 = vld [vmem:[#allocation2 + $0x1b8] sm:$0xff] }
 0x64d   :  { %v3230_v3 = vrot.slane %v3229_v21, 1  ;;  %v3252_v5 = vmax.f32 %v3250_v50, %v3251_v15  ;;  %v3259_v29 = vmax.f32 %v3257_v53, %v3258_v19  ;;  %vm3279_vm2 = vcmp.ne.s32.totalorder %v3271_v6, 0  ;;  %v3547_v50 = vld [vmem:[#allocation2 + $0x1e0] sm:$0xff]  ;;  %v3556_v56 = vld [vmem:[#allocation2 + $0x1a8] sm:$0xff]  ;;  %v3549_v53 = vld [vmem:[#allocation2 + $0x1f0] sm:$0xff] }
 0x64e   :  { %v3224_v17 = vmax.f32 %v3222_v20, %v3223_v12  ;;  %v3237_v58 = vrot.slane %v3236_v23, 1  ;;  %vm3282_vm7 = vcmp.ne.s32.totalorder %v3271_v6, 3  ;;  %v3266_v38 = vmax.f32 %v3264_v27, %v3265_v63  ;;  %v3550_v12 = vld [vmem:[#allocation2 + $0x1f8] sm:$0xff]  ;;  %v3560_v19 = vld [vmem:[#allocation2 + $0x1c8] sm:$0xff] }
 0x64f   :  { %v3231_v30 = vmax.f32 %v3229_v21, %v3230_v3  ;;  %v14683_v41 = vsel %vm3279_vm2, 1.0, %v15889_v34  ;;  %v14687_v49 = vsel %vm3282_vm7, 1.0, %v15889_v34  ;;  %v13225_v48 = vpack.c.bf16 %v3306_v28, %v3305_v52  ;;  %v3555_v21 = vld [vmem:[#allocation2 + $0x1a0] sm:$0xff]  ;;  %v11177_v28 = vld [vmem:[#allocation2 + $0x198] ss:$0 sm:$0xff] }
 0x650   :  { %v3238_v8 = vmax.f32 %v3236_v23, %v3237_v58  ;;  %v3293_v36 = vsel %vm1639_vm10, %v3224_v17, %v3217_v51  ;;  %v13228_v37 = vpack.c.bf16 %v3308_v7, %v3307_v40  ;;  %v13249_v20 = vpack.c.bf16 %v3548_v54, %v3547_v50  ;;  %v3557_v23 = vld [vmem:[#allocation2 + $0x1b0] sm:$0xff]  ;;  %v3551_v51 = vld [vmem:[#allocation2 + $0x200] sm:$0xff]  ;;  %v3552_v17 = vld [vmem:[#allocation2 + $0x208] sm:$0xff] }
 0x651   :  { %v3294_v11 = vsel %vm1641_vm11, %v3231_v30, %v3293_v36  ;;  %v13237_v27 = vpack.c.bf16 %v3556_v56, %v3555_v21  ;;  %v13252_v3 = vpack.c.bf16 %v3550_v12, %v3549_v53  ;;  %v13240_v15 = vpack.c.bf16 %v3558_v25, %v3557_v23  ;;  %v3559_v58 = vld [vmem:[#allocation2 + $0x1c0] sm:$0xff]  ;;  %v3554_v36 = vld [vmem:[#allocation2 + $0x218] sm:$0xff]  ;;  %v3715_v21 = vld [vmem:[#allocation2 + $0x248] sm:$0xff] }
 0x652   :  { %v3295_v47 = vsel %vm1643_vm12, %v3238_v8, %v3294_v11  ;;  %v13255_v30 = vpack.c.bf16 %v3552_v17, %v3551_v51  ;;  %v13243_v6 = vpack.c.bf16 %v3560_v19, %v3559_v58  ;;  %v3553_v8 = vld [vmem:[#allocation2 + $0x210] sm:$0xff]  ;;  %v3562_v11 = vld [vmem:[#allocation2 + $0x1d8] sm:$0xff]  ;;  %v3889_v25 = vld [vmem:[#allocation2 + $0x2a8] sm:$0xff] }
 0x653   :  { %v3296_v33 = vsel %vm1645_vm13, %v3245_v18, %v3295_v47  ;;  %v13258_v63 = vpack.c.bf16 %v3554_v36, %v3553_v8  ;;  %v3561_v18 = vld [vmem:[#allocation2 + $0x1d0] sm:$0xff]  ;;  %vm3563_vm13 = vcmask 523264   ;;  %v3713_v50 = vld [vmem:[#allocation2 + $0x238] sm:$0xff]  ;;  %v3893_v58 = vld [vmem:[#allocation2 + $0x2c8] sm:$0xff] }
 0x654   :  { %v3297_v31 = vsel %vm1647_vm14, %v3252_v5, %v3296_v33  ;;  %v13246_v5 = vpack.c.bf16 %v3562_v11, %v3561_v18  ;;  %v3716_v53 = vld [vmem:[#allocation2 + $0x250] sm:$0xff]  ;;  %v3891_v17 = vld [vmem:[#allocation2 + $0x2b8] sm:$0xff]  ;;  %v3897_v8 = vld [vmem:[#allocation2 + $0x268] sm:$0xff]  ;;  %vm3821_vm14 = vcmask 517120  }
 0x655   :  { %v3298_v22 = vsel %vm1649_vm15, %v3259_v29, %v3297_v31  ;;  %v3898_v36 = vld [vmem:[#allocation2 + $0x270] sm:$0xff]  ;;  %v3899_v18 = vld [vmem:[#allocation2 + $0x278] sm:$0xff]  ;;  %v3900_v11 = vld [vmem:[#allocation2 + $0x280] sm:$0xff] }
 0x656   :  { %v3299_v60 = vsel %vm1651_vm1, %v3266_v38, %v3298_v22  ;;  %vm3876_vm1 = vcmask 1047556  }
 0x657   :  { %v3301_v57 = vrot.slane %v3299_v60, 7  ;;  %v3303_v26 = vrot.slane %v3299_v60, 1 }
 0x659   :  { %v3302_v13 = vmul.f32 %v14683_v41, %v3301_v57  ;;  %v3304_v0 = vmul.f32 %v14687_v49, %v3303_v26 }
 0x65b   :  { %12197 = vmatmul.mubr.msk.f32.vlgmr.msra.gmra.mrb[14].mxu0 %vm2907_vm4, %v3302_v13  ;;  %12219 = vmatmul.mubr.msk.f32.vlgmr.msra.gmra.mrb[22].mxu1 %vm2907_vm4, %v3304_v0  ;;  %v3711_v13 = vld [vmem:[#allocation2 + $0x228] sm:$0xff] }
 0x65c   :  { %13226 = vmatpush3.bf16.msra.mxu0 %v13225_v48  ;;  %12207 = vmatprep.mubr.msk.f32.mxu0 %vm13956_vm6, %v15889_v34  ;;  %v3710_v48 = vld [vmem:[#allocation2 + $0x220] sm:$0xff] }
 0x65d   :  { %13227 = vmatprep.subr.bf16.mxu0 %v15870_v43  ;;  %12256 = vmatprep.mubr.msk.f32.mxu1 %vm13956_vm6, %v15889_v34  ;;  %v13261_v40 = vpack.c.bf16 %v3711_v13, %v3710_v48 }
 0x65e   :  { %13250 = vmatpush3.bf16.msra.mxu1 %v13249_v20  ;;  %v3714_v20 = vld [vmem:[#allocation2 + $0x240] sm:$0xff] }
 0x65f   :  { %13251 = vmatprep.subr.bf16.mxu1 %v15870_v43  ;;  %v13267_v56 = vpack.c.bf16 %v3715_v21, %v3714_v20 }
 0x660   :  { %13229 = vmatpush3.bf16.msra.mxu0 %v13228_v37  ;;  %v3712_v37 = vld [vmem:[#allocation2 + $0x230] sm:$0xff] }
 0x661   :  { %13236 = vmatprep.subr.bf16.mxu0 %v15870_v43  ;;  %v13264_v54 = vpack.c.bf16 %v3713_v50, %v3712_v37  ;;  %v11181_v37 = vld [vmem:[#allocation2 + $0x260] ss:$0 sm:$0xff] }
 0x662   :  { %13253 = vmatpush3.bf16.msra.mxu1 %v13252_v3 }
 0x663   :  { %12208 = vmatmul.mubr.msk.f32.vlgmr.msra.gmra.mrb[16].mxu0 %vm2907_vm4, %v3299_v60  ;;  %13254 = vmatprep.subr.bf16.mxu1 %v15870_v43 }
 0x664   :  { %12237 = vmatprep.mubr.msk.f32.mxu0 %vm13956_vm6, %v15889_v34  ;;  %13238 = vmatpush3.bf16.msra.mxu0 %v13237_v27  ;;  %v3717_v27 = vld [vmem:[#allocation2 + $0x258] sm:$0xff] }
 0x665   :  { %13239 = vmatprep.subr.bf16.mxu0 %v15870_v43  ;;  %v13270_v12 = vpack.c.bf16 %v3717_v27, %v3716_v53 }
 0x666   :  { %13256 = vmatpush3.bf16.msra.mxu1 %v13255_v30  ;;  %v3892_v30 = vld [vmem:[#allocation2 + $0x2c0] sm:$0xff] }
 0x667   :  { %13257 = vmatprep.subr.bf16.mxu1 %v15870_v43  ;;  %v13288_v19 = vpack.c.bf16 %v3892_v30, %v3891_v17 }
 0x668   :  { %13241 = vmatpush3.bf16.msra.mxu0 %v13240_v15  ;;  %v3890_v15 = vld [vmem:[#allocation2 + $0x2b0] sm:$0xff] }
 0x669   :  { %13242 = vmatprep.subr.bf16.mxu0 %v15870_v43  ;;  %v13285_v51 = vpack.c.bf16 %v3890_v15, %v3889_v25 }
 0x66a   :  { %13259 = vmatpush3.bf16.msra.mxu1 %v13258_v63  ;;  %v13273_v63 = vpack.c.bf16 %v3898_v36, %v3897_v8 }
 0x66b   :  { %13272 = vmatprep.subr.bf16.mxu1 %v15870_v43 }
 0x66c   :  { %13244 = vmatpush3.bf16.msra.mxu0 %v13243_v6  ;;  %v3894_v6 = vld [vmem:[#allocation2 + $0x2d0] sm:$0xff] }
 0x66d   :  { %13245 = vmatprep.subr.bf16.mxu0 %v15870_v43 }
 0x670   :  { %13247 = vmatpush3.bf16.msra.mxu0 %v13246_v5  ;;  %v13291_v5 = vpack.c.bf16 %v3894_v6, %v3893_v58 }
 0x671   :  { %13260 = vmatprep.subr.bf16.mxu0 %v15870_v43 }
 0x72e   :  { %v3382_v47 = vpop.f32.mrb[14].mxu0  ;;  %v3531_v29 = vpop.f32.mrb[22].mxu1 }
 0x72f   :  { %v12198_v33 = vpop.f32.mrb[15].mxu0  ;;  %v12220_v38 = vpop.f32.mrb[23].mxu1 }
 0x730   :  { %v3896_v33 = vld [vmem:[#allocation2 + $0x2e0] sm:$0xff] }
 0x736   :  { %v3454_v31 = vpop.f32.mrb[16].mxu0 }
 0x737   :  { %v3455_v22 = vadd.f32 %v3454_v31, %v3382_v47  ;;  %v12209_v52 = vpop.f32.mrb[17].mxu0  ;;  %v13276_v47 = vpack.c.bf16 %v3900_v11, %v3899_v18  ;;  %v3901_v31 = vld [vmem:[#allocation2 + $0x288] sm:$0xff] }
 0x739   :  { %v3535_v60 = vadd.f32 %v3531_v29, %v3455_v22  ;;  %v3895_v29 = vld [vmem:[#allocation2 + $0x2d8] sm:$0xff]  ;;  %v3902_v22 = vld [vmem:[#allocation2 + $0x290] sm:$0xff] }
 0x73a   :  { %v13294_v38 = vpack.c.bf16 %v3896_v33, %v3895_v29  ;;  %v13279_v52 = vpack.c.bf16 %v3902_v22, %v3901_v31  ;;  %v3854_v22 = vand.u32 1, %v13986_v1 }
 0x73b   :  { %v3541_v57 = vadd.f32 %v11177_v28, %v3535_v60  ;;  %v3903_v28 = vld [vmem:[#allocation2 + $0x298] sm:$0xff]  ;;  %v3904_v60 = vld [vmem:[#allocation2 + $0x2a0] sm:$0xff] }
 0x73c   :  { %vm3862_vm15 = vcmp.ne.s32.totalorder %v3854_v22, 0 }
 0x73d   :  { %v3542_v26 = vmax.f32 %v3541_v57, 0.0  ;;  %v13282_v57 = vpack.c.bf16 %v3904_v60, %v3903_v28 }
 0x73f   :  { %v3543_v0 = vrot.slane %v3542_v26, 7  ;;  %12257 = vmatmul.mubr.msk.f32.vlgmr.msra.gmra.mrb[24].mxu1 %vm3563_vm13, %v3542_v26  ;;  %v3545_v3 = vrot.slane %v3542_v26, 1 }
 0x740   :  { %12294 = vmatprep.mubr.msk.f32.mxu1 %vm13956_vm6, %v15889_v34  ;;  %13274 = vmatpush3.bf16.msra.mxu1 %v13273_v63 }
 0x741   :  { %v3544_v7 = vmul.f32 %v14683_v41, %v3543_v0  ;;  %v3546_v23 = vmul.f32 %v14687_v49, %v3545_v3  ;;  %13275 = vmatprep.subr.bf16.mxu1 %v15870_v43 }
 0x743   :  { %12238 = vmatmul.mubr.msk.f32.vlgmr.msra.gmra.mrb[18].mxu0 %vm3563_vm13, %v3544_v7 }
 0x744   :  { %13262 = vmatpush3.bf16.msra.mxu0 %v13261_v40  ;;  %12275 = vmatprep.mubr.msk.f32.mxu0 %vm13956_vm6, %v15889_v34 }
 0x745   :  { %13263 = vmatprep.subr.bf16.mxu0 %v15870_v43  ;;  %13277 = vmatpush3.bf16.msra.mxu1 %v13276_v47 }
 0x746   :  { %13278 = vmatprep.subr.bf16.mxu1 %v15870_v43 }
 0x748   :  { %13265 = vmatpush3.bf16.msra.mxu0 %v13264_v54 }
 0x749   :  { %13266 = vmatprep.subr.bf16.mxu0 %v15870_v43  ;;  %13280 = vmatpush3.bf16.msra.mxu1 %v13279_v52 }
 0x74a   :  { %13281 = vmatprep.subr.bf16.mxu1 %v15870_v43 }
 0x74c   :  { %13268 = vmatpush3.bf16.msra.mxu0 %v13267_v56 }
 0x74d   :  { %13269 = vmatprep.subr.bf16.mxu0 %v15870_v43  ;;  %13283 = vmatpush3.bf16.msra.mxu1 %v13282_v57 }
 0x74e   :  { %13296 = vmatprep.subr.bf16.mxu1 %v15870_v43 }
 0x750   :  { %13271 = vmatpush3.bf16.msra.mxu0 %v13270_v12 }
 0x751   :  { %13284 = vmatprep.subr.bf16.mxu0 %v15870_v43 }
 0x753   :  { %12276 = vmatmul.mubr.msk.f32.vlgmr.msra.gmra.mrb[20].mxu0 %vm3563_vm13, %v3546_v23 }
 0x754   :  { %12313 = vmatprep.mubr.msk.f32.mxu0 %vm13956_vm6, %v15889_v34  ;;  %13286 = vmatpush3.bf16.msra.mxu0 %v13285_v51 }
 0x755   :  { %13287 = vmatprep.subr.bf16.mxu0 %v15870_v43 }
 0x758   :  { %13289 = vmatpush3.bf16.msra.mxu0 %v13288_v19 }
 0x759   :  { %13290 = vmatprep.subr.bf16.mxu0 %v15870_v43 }
 0x75c   :  { %13292 = vmatpush3.bf16.msra.mxu0 %v13291_v5 }
 0x75d   :  { %13293 = vmatprep.subr.bf16.mxu0 %v15870_v43 }
 0x760   :  { %13295 = vmatpush3.bf16.msra.mxu0 %v13294_v38 }
 0x761   :  { %13308 = vmatprep.subr.bf16.mxu0 %v15870_v43 }
 0x812   :  { %v3706_v26 = vpop.f32.mrb[24].mxu1 }
 0x813   :  { %v12258_v48 = vpop.f32.mrb[25].mxu1 }
 0x816   :  { %v3633_v13 = vpop.f32.mrb[18].mxu0 }
 0x817   :  { %v3707_v0 = vadd.f32 %v3706_v26, %v3633_v13  ;;  %v12239_v40 = vpop.f32.mrb[19].mxu0 }
 0x826   :  { %v3787_v7 = vpop.f32.mrb[20].mxu0 }
 0x827   :  { %v3791_v50 = vadd.f32 %v3787_v7, %v3707_v0  ;;  %v12277_v54 = vpop.f32.mrb[21].mxu0 }
 0x829   :  { %v3797_v20 = vadd.f32 %v11181_v37, %v3791_v50  ;;  %v14744_v37 = vsel %vm3862_vm15, 1.0, %v15889_v34 }
 0x82b   :  { %v14733_v21 = vmax.f32 %v3797_v20, 0.0 }
 0x82d   :  { %v3800_v56 = vcombine.high %v14733_v21, %v14733_v21  ;;  %v3807_v53 = vrot.slane %v14733_v21, %v14209_v35 }
 0x82f   :  { %v3814_v27 = vrot.slane %v3800_v56, %v14209_v35  ;;  %v3815_v12 = vcombine.high %v3807_v53, %v3807_v53  ;;  %v3822_v3 = vsel %vm3821_vm14, %v3807_v53, -inf  ;;  %v3882_v56 = vrot.slane %v14744_v37, 5  ;;  %v4328_v37 = vld [vmem:[#allocation2 + $0x460] sm:$0xff] }
 0x830   :  { %v3823_v23 = vrot.slane %v3822_v3, 4 }
 0x831   :  { %v3829_v25 = vsel %vm3821_vm14, %v3815_v12, -inf  ;;  %v3816_v15 = vcombine.high %v3814_v27, %v3814_v27  ;;  %v3836_v51 = vsel %vm3821_vm14, %v3814_v27, -inf  ;;  %v4051_v27 = vld [vmem:[#allocation2 + $0x2e8] sm:$0xff]  ;;  %v4052_v12 = vld [vmem:[#allocation2 + $0x2f0] sm:$0xff] }
 0x832   :  { %v3824_v17 = vmax.f32 %v3822_v3, %v3823_v23  ;;  %v3830_v30 = vrot.slane %v3829_v25, 4  ;;  %v3837_v58 = vrot.slane %v3836_v51, 4 }
 0x833   :  { %v3843_v19 = vsel %vm3821_vm14, %v3816_v15, -inf }
 0x834   :  { %v3825_v6 = vrot.slane %v3824_v17, 2  ;;  %v3831_v8 = vmax.f32 %v3829_v25, %v3830_v30  ;;  %v3838_v36 = vmax.f32 %v3836_v51, %v3837_v58  ;;  %v3844_v63 = vrot.slane %v3843_v19, 4  ;;  %v4053_v51 = vld [vmem:[#allocation2 + $0x2f8] sm:$0xff]  ;;  %v4055_v58 = vld [vmem:[#allocation2 + $0x308] sm:$0xff] }
 0x835   :  { %v13297_v25 = vpack.c.bf16 %v4052_v12, %v4051_v27  ;;  %v4167_v12 = vld [vmem:[#allocation2 + $0x350] sm:$0xff] }
 0x836   :  { %v3826_v18 = vmax.f32 %v3824_v17, %v3825_v6  ;;  %v3832_v11 = vrot.slane %v3831_v8, 2  ;;  %v3839_v5 = vrot.slane %v3838_v36, 2  ;;  %v3845_v47 = vmax.f32 %v3843_v19, %v3844_v63  ;;  %v4054_v17 = vld [vmem:[#allocation2 + $0x300] sm:$0xff]  ;;  %v4056_v19 = vld [vmem:[#allocation2 + $0x310] sm:$0xff]  ;;  %v4057_v63 = vld [vmem:[#allocation2 + $0x318] sm:$0xff] }
 0x837   :  { %v13300_v30 = vpack.c.bf16 %v4054_v17, %v4053_v51  ;;  %v4158_v51 = vld [vmem:[#allocation2 + $0x408] sm:$0xff]  ;;  %v4169_v17 = vld [vmem:[#allocation2 + $0x360] sm:$0xff] }
 0x838   :  { %v3827_v29 = vrot.slane %v3826_v18, 1  ;;  %v3833_v33 = vmax.f32 %v3831_v8, %v3832_v11  ;;  %v3840_v38 = vmax.f32 %v3838_v36, %v3839_v5  ;;  %v3846_v31 = vrot.slane %v3845_v47, 2 }
 0x839   :  { %v13303_v8 = vpack.c.bf16 %v4056_v19, %v4055_v58 }
 0x83a   :  { %v3834_v52 = vrot.slane %v3833_v33, 1  ;;  %v3841_v28 = vrot.slane %v3840_v38, 1  ;;  %v3847_v60 = vmax.f32 %v3845_v47, %v3846_v31  ;;  %v3828_v57 = vmax.f32 %v3826_v18, %v3827_v29  ;;  %v4058_v18 = vld [vmem:[#allocation2 + $0x320] sm:$0xff]  ;;  %v4147_v29 = vld [vmem:[#allocation2 + $0x3b0] sm:$0xff] }
 0x83b   :  { %v13306_v11 = vpack.c.bf16 %v4058_v18, %v4057_v63  ;;  %v4149_v31 = vld [vmem:[#allocation2 + $0x3c0] sm:$0xff]  ;;  %v4171_v18 = vld [vmem:[#allocation2 + $0x370] sm:$0xff] }
 0x83c   :  { %v3835_v26 = vmax.f32 %v3833_v33, %v3834_v52  ;;  %v3842_v48 = vmax.f32 %v3840_v38, %v3841_v28  ;;  %v3848_v13 = vrot.slane %v3847_v60, 1  ;;  %v4148_v33 = vld [vmem:[#allocation2 + $0x3b8] sm:$0xff]  ;;  %v4151_v28 = vld [vmem:[#allocation2 + $0x3d0] sm:$0xff] }
 0x83d   :  { %v13333_v38 = vpack.c.bf16 %v4148_v33, %v4147_v29  ;;  %v4162_v29 = vld [vmem:[#allocation2 + $0x428] sm:$0xff] }
 0x83e   :  { %v3849_v0 = vmax.f32 %v3847_v60, %v3848_v13  ;;  %v3872_v40 = vsel %vm1639_vm10, %v3835_v26, %v3828_v57  ;;  %vm3865_vm10 = vcmp.ne.s32.totalorder %v3854_v22, 1  ;;  %v4150_v22 = vld [vmem:[#allocation2 + $0x3c8] sm:$0xff]  ;;  %v4152_v60 = vld [vmem:[#allocation2 + $0x3d8] sm:$0xff]  ;;  %v4163_v26 = vld [vmem:[#allocation2 + $0x330] sm:$0xff] }
 0x83f   :  { %v3873_v7 = vsel %vm1641_vm11, %v3842_v48, %v3872_v40  ;;  %v11183_v6 = vsel %vm3865_vm10, 1.0, %v15889_v34  ;;  %v13336_v52 = vpack.c.bf16 %v4150_v22, %v4149_v31  ;;  %v13339_v57 = vpack.c.bf16 %v4152_v60, %v4151_v28  ;;  %v4164_v48 = vld [vmem:[#allocation2 + $0x338] sm:$0xff]  ;;  %v4154_v40 = vld [vmem:[#allocation2 + $0x3e8] sm:$0xff] }
 0x840   :  { %v3874_v50 = vsel %vm1643_vm12, %v3849_v0, %v3873_v7  ;;  %v14760_v36 = vrot.slane %v11183_v6, 7  ;;  %v13309_v13 = vpack.c.bf16 %v4164_v48, %v4163_v26  ;;  %v4153_v0 = vld [vmem:[#allocation2 + $0x3e0] sm:$0xff]  ;;  %v4159_v6 = vld [vmem:[#allocation2 + $0x410] sm:$0xff]  ;;  %v4174_v31 = vld [vmem:[#allocation2 + $0x388] sm:$0xff] }
 0x841   :  { %v3877_v54 = vrot.slane %v3874_v50, 4  ;;  %12314 = vmatmul.mubr.msk.f32.vlgmr.msra.gmra.mrb[22].mxu0 %vm3563_vm13, %v3874_v50  ;;  %v4165_v7 = vld [vmem:[#allocation2 + $0x340] sm:$0xff]  ;;  %v4176_v28 = vld [vmem:[#allocation2 + $0x398] sm:$0xff]  ;;  %v4178_v26 = vld [vmem:[#allocation2 + $0x3a8] sm:$0xff] }
 0x842   :  { %12367 = vmatprep.mubr.msk.f32.mxu0 %vm13956_vm6, %v15889_v34  ;;  %13310 = vmatpush3.bf16.msra.mxu0 %v13309_v13 }
 0x843   :  { %v3878_v20 = vsel %vm3876_vm1, %v3877_v54, %v3874_v50  ;;  %13311 = vmatprep.subr.bf16.mxu0 %v15870_v43  ;;  %v4166_v54 = vld [vmem:[#allocation2 + $0x348] sm:$0xff] }
 0x844   :  { %v3879_v53 = vrot.slane %v3878_v20, 4  ;;  %v4155_v20 = vld [vmem:[#allocation2 + $0x3f0] sm:$0xff]  ;;  %v13312_v27 = vpack.c.bf16 %v4166_v54, %v4165_v7 }
 0x846   :  { %v3880_v3 = vsel %vm3876_vm1, %v3879_v53, %v3874_v50  ;;  %v13342_v50 = vpack.c.bf16 %v4154_v40, %v4153_v0  ;;  %v4156_v53 = vld [vmem:[#allocation2 + $0x3f8] sm:$0xff]  ;;  %13313 = vmatpush3.bf16.msra.mxu0 %v13312_v27 }
 0x847   :  { %v3884_v23 = vmul.f32 %v3882_v56, %v3880_v3  ;;  %v3888_v5 = vmul.f32 %v14760_v36, %v3880_v3  ;;  %v4168_v3 = vld [vmem:[#allocation2 + $0x358] sm:$0xff]  ;;  %13314 = vmatprep.subr.bf16.mxu0 %v15870_v43 }
 0x849   :  { %v3906_v15 = vrot.slane %v3884_v23, 3  ;;  %v4060_v47 = vrot.slane %v3888_v5, 1  ;;  %v13345_v23 = vpack.c.bf16 %v4156_v53, %v4155_v20  ;;  %v11187_v20 = vld [vmem:[#allocation2 + $0x328] ss:$0 sm:$0xff] }
 0x84b   :  { %12295 = vmatmul.mubr.msk.f32.vlgmr.msra.gmra.mrb[26].mxu1 %vm3563_vm13, %v3906_v15  ;;  %v4157_v15 = vld [vmem:[#allocation2 + $0x400] sm:$0xff] }
 0x84c   :  { %13298 = vmatpush3.bf16.msra.mxu1 %v13297_v25  ;;  %12332 = vmatprep.mubr.msk.f32.mxu1 %vm13956_vm6, %v15889_v34  ;;  %v13315_v25 = vpack.c.bf16 %v4168_v3, %v4167_v12  ;;  %v13348_v58 = vpack.c.bf16 %v4158_v51, %v4157_v15  ;;  %v4322_v51 = vld [vmem:[#allocation2 + $0x430] sm:$0xff] }
 0x84d   :  { %13299 = vmatprep.subr.bf16.mxu1 %v15870_v43 }
 0x84e   :  { %13316 = vmatpush3.bf16.msra.mxu0 %v13315_v25 }
 0x84f   :  { %13317 = vmatprep.subr.bf16.mxu0 %v15870_v43 }
 0x850   :  { %13301 = vmatpush3.bf16.msra.mxu1 %v13300_v30  ;;  %v4170_v30 = vld [vmem:[#allocation2 + $0x368] sm:$0xff] }
 0x851   :  { %13302 = vmatprep.subr.bf16.mxu1 %v15870_v43  ;;  %v13318_v19 = vpack.c.bf16 %v4170_v30, %v4169_v17  ;;  %v4323_v17 = vld [vmem:[#allocation2 + $0x438] sm:$0xff] }
 0x853   :  { %13319 = vmatpush3.bf16.msra.mxu0 %v13318_v19  ;;  %v13357_v19 = vpack.c.bf16 %v4323_v17, %v4322_v51  ;;  %v4534_v51 = vld [vmem:[#allocation2 + $0x4d0] sm:$0xff]  ;;  %v4429_v17 = vld [vmem:[#allocation2 + $0x558] sm:$0xff] }
 0x854   :  { %13304 = vmatpush3.bf16.msra.mxu1 %v13303_v8  ;;  %v4160_v8 = vld [vmem:[#allocation2 + $0x418] sm:$0xff]  ;;  %13320 = vmatprep.subr.bf16.mxu0 %v15870_v43 }
 0x855   :  { %13305 = vmatprep.subr.bf16.mxu1 %v15870_v43  ;;  %v13351_v63 = vpack.c.bf16 %v4160_v8, %v4159_v6  ;;  %v4324_v8 = vld [vmem:[#allocation2 + $0x440] sm:$0xff] }
 0x858   :  { %13307 = vmatpush3.bf16.msra.mxu1 %v13306_v11  ;;  %v4172_v11 = vld [vmem:[#allocation2 + $0x378] sm:$0xff] }
 0x859   :  { %13332 = vmatprep.subr.bf16.mxu1 %v15870_v43  ;;  %v13321_v5 = vpack.c.bf16 %v4172_v11, %v4171_v18  ;;  %v4326_v11 = vld [vmem:[#allocation2 + $0x450] sm:$0xff] }
 0x85b   :  { %12333 = vmatmul.mubr.msk.f32.vlgmr.msra.gmra.mrb[28].mxu1 %vm3563_vm13, %v4060_v47  ;;  %13322 = vmatpush3.bf16.msra.mxu0 %v13321_v5  ;;  %v4161_v47 = vld [vmem:[#allocation2 + $0x420] sm:$0xff]  ;;  %v4327_v5 = vld [vmem:[#allocation2 + $0x458] sm:$0xff] }
 0x85c   :  { %12402 = vmatprep.mubr.msk.f32.mxu1 %vm13956_vm6, %v15889_v34  ;;  %13334 = vmatpush3.bf16.msra.mxu1 %v13333_v38  ;;  %v13354_v33 = vpack.c.bf16 %v4162_v29, %v4161_v47  ;;  %v4173_v38 = vld [vmem:[#allocation2 + $0x380] sm:$0xff]  ;;  %v13363_v47 = vpack.c.bf16 %v4327_v5, %v4326_v11  ;;  %v4537_v5 = vld [vmem:[#allocation2 + $0x4e8] sm:$0xff] }
 0x85d   :  { %13335 = vmatprep.subr.bf16.mxu1 %v15870_v43  ;;  %13323 = vmatprep.subr.bf16.mxu0 %v15870_v43  ;;  %v13324_v22 = vpack.c.bf16 %v4174_v31, %v4173_v38  ;;  %v4331_v38 = vld [vmem:[#allocation2 + $0x478] sm:$0xff] }
 0x85f   :  { %13325 = vmatpush3.bf16.msra.mxu0 %v13324_v22  ;;  %v4332_v22 = vld [vmem:[#allocation2 + $0x480] sm:$0xff] }
 0x860   :  { %13337 = vmatpush3.bf16.msra.mxu1 %v13336_v52  ;;  %13326 = vmatprep.subr.bf16.mxu0 %v15870_v43  ;;  %v4175_v52 = vld [vmem:[#allocation2 + $0x390] sm:$0xff] }
 0x861   :  { %13338 = vmatprep.subr.bf16.mxu1 %v15870_v43  ;;  %v13327_v60 = vpack.c.bf16 %v4176_v28, %v4175_v52  ;;  %v4333_v52 = vld [vmem:[#allocation2 + $0x488] sm:$0xff] }
 0x862   :  { %v13372_v28 = vpack.c.bf16 %v4333_v52, %v4332_v22  ;;  %v4436_v22 = vld [vmem:[#allocation2 + $0x590] sm:$0xff] }
 0x863   :  { %13328 = vmatpush3.bf16.msra.mxu0 %v13327_v60  ;;  %v4334_v60 = vld [vmem:[#allocation2 + $0x490] sm:$0xff] }
 0x864   :  { %13340 = vmatpush3.bf16.msra.mxu1 %v13339_v57  ;;  %13329 = vmatprep.subr.bf16.mxu0 %v15870_v43  ;;  %v4177_v57 = vld [vmem:[#allocation2 + $0x3a0] sm:$0xff] }
 0x865   :  { %13341 = vmatprep.subr.bf16.mxu1 %v15870_v43  ;;  %v13330_v48 = vpack.c.bf16 %v4178_v26, %v4177_v57  ;;  %v4335_v57 = vld [vmem:[#allocation2 + $0x498] sm:$0xff] }
 0x866   :  { %v13375_v26 = vpack.c.bf16 %v4335_v57, %v4334_v60  ;;  %v4438_v60 = vld [vmem:[#allocation2 + $0x5a0] sm:$0xff] }
 0x867   :  { %13331 = vmatpush3.bf16.msra.mxu0 %v13330_v48  ;;  %v4336_v48 = vld [vmem:[#allocation2 + $0x4a0] sm:$0xff] }
 0x868   :  { %13343 = vmatpush3.bf16.msra.mxu1 %v13342_v50  ;;  %13356 = vmatprep.subr.bf16.mxu0 %v15870_v43 }
 0x869   :  { %13344 = vmatprep.subr.bf16.mxu1 %v15870_v43 }
 0x86c   :  { %13346 = vmatpush3.bf16.msra.mxu1 %v13345_v23 }
 0x86d   :  { %13347 = vmatprep.subr.bf16.mxu1 %v15870_v43 }
 0x870   :  { %13349 = vmatpush3.bf16.msra.mxu1 %v13348_v58 }
 0x871   :  { %13350 = vmatprep.subr.bf16.mxu1 %v15870_v43 }
 0x874   :  { %13352 = vmatpush3.bf16.msra.mxu1 %v13351_v63  ;;  %v4325_v63 = vld [vmem:[#allocation2 + $0x448] sm:$0xff] }
 0x875   :  { %13353 = vmatprep.subr.bf16.mxu1 %v15870_v43  ;;  %v13360_v18 = vpack.c.bf16 %v4325_v63, %v4324_v8  ;;  %v4431_v63 = vld [vmem:[#allocation2 + $0x568] sm:$0xff] }
 0x878   :  { %13355 = vmatpush3.bf16.msra.mxu1 %v13354_v33  ;;  %v4330_v33 = vld [vmem:[#allocation2 + $0x470] sm:$0xff] }
 0x879   :  { %13380 = vmatprep.subr.bf16.mxu1 %v15870_v43  ;;  %v13369_v31 = vpack.c.bf16 %v4331_v38, %v4330_v33 }
 0x914   :  { %v4047_v13 = vpop.f32.mrb[22].mxu0 }
 0x915   :  { %v12315_v0 = vpop.f32.mrb[23].mxu0 }
 0x91e   :  { %v3975_v40 = vpop.f32.mrb[26].mxu1 }
 0x91f   :  { %v4048_v7 = vadd.f32 %v4047_v13, %v3975_v40  ;;  %v12296_v50 = vpop.f32.mrb[27].mxu1  ;;  %v4337_v13 = vld [vmem:[#allocation2 + $0x4a8] sm:$0xff] }
 0x920   :  { %v13378_v0 = vpack.c.bf16 %v4337_v13, %v4336_v48  ;;  %v4425_v50 = vld [vmem:[#allocation2 + $0x538] sm:$0xff]  ;;  %v4540_v48 = vld [vmem:[#allocation2 + $0x500] sm:$0xff] }
 0x92e   :  { %v4129_v54 = vpop.f32.mrb[28].mxu1 }
 0x92f   :  { %v4133_v53 = vadd.f32 %v4129_v54, %v4048_v7  ;;  %v12334_v27 = vpop.f32.mrb[29].mxu1  ;;  %v4426_v54 = vld [vmem:[#allocation2 + $0x540] sm:$0xff] }
 0x930   :  { %v4428_v27 = vld [vmem:[#allocation2 + $0x550] sm:$0xff] }
 0x931   :  { %v4139_v12 = vadd.f32 %v11187_v20, %v4133_v53  ;;  %v4427_v20 = vld [vmem:[#allocation2 + $0x548] sm:$0xff]  ;;  %v13381_v53 = vpack.c.bf16 %v4426_v54, %v4425_v50  ;;  %v4542_v54 = vld [vmem:[#allocation2 + $0x510] sm:$0xff] }
 0x932   :  { %v4541_v50 = vld [vmem:[#allocation2 + $0x508] sm:$0xff] }
 0x933   :  { %v4140_v3 = vmax.f32 %v4139_v12, 0.0  ;;  %v4531_v12 = vld [vmem:[#allocation2 + $0x4b8] sm:$0xff] }
 0x935   :  { %v4141_v23 = vrot.slane %v4140_v3, 4  ;;  %12403 = vmatmul.mubr.f32.vlgmr.msra.gmra.mrb[30].mxu1 %v4140_v3 }
 0x936   :  { %12472 = vmatprep.mubr.msk.f32.mxu1 %vm13956_vm6, %v15889_v34  ;;  %13382 = vmatpush3.bf16.msra.mxu1 %v13381_v53  ;;  %v4543_v53 = vld [vmem:[#allocation2 + $0x518] sm:$0xff] }
 0x937   :  { %v4142_v25 = vsel %vm3876_vm1, %v4141_v23, %v4140_v3  ;;  %v13384_v23 = vpack.c.bf16 %v4428_v27, %v4427_v20  ;;  %13383 = vmatprep.subr.bf16.mxu1 %v15870_v43  ;;  %v13420_v20 = vpack.c.bf16 %v4542_v54, %v4541_v50  ;;  %v4544_v27 = vld [vmem:[#allocation2 + $0x520] sm:$0xff] }
 0x938   :  { %v4143_v15 = vrot.slane %v4142_v25, 4  ;;  %v4524_v50 = vld [vmem:[#allocation2 + $0x600] sm:$0xff] }
 0x93a   :  { %v4144_v30 = vsel %vm3876_vm1, %v4143_v15, %v4140_v3  ;;  %v4532_v3 = vld [vmem:[#allocation2 + $0x4c0] sm:$0xff]  ;;  %v4533_v15 = vld [vmem:[#allocation2 + $0x4c8] sm:$0xff]  ;;  %13385 = vmatpush3.bf16.msra.mxu1 %v13384_v23  ;;  %v4546_v23 = vld [vmem:[#allocation2 + $0x530] sm:$0xff] }
 0x93b   :  { %v4145_v58 = vmul.f32 %v4144_v30, %v3882_v56  ;;  %v4329_v56 = vld [vmem:[#allocation2 + $0x468] sm:$0xff]  ;;  %v4146_v40 = vmul.f32 %v4144_v30, %v14760_v36  ;;  %v13405_v25 = vpack.c.bf16 %v4532_v3, %v4531_v12  ;;  %v4430_v30 = vld [vmem:[#allocation2 + $0x560] sm:$0xff]  ;;  %13386 = vmatprep.subr.bf16.mxu1 %v15870_v43  ;;  %v13423_v12 = vpack.c.bf16 %v4544_v27, %v4543_v53  ;;  %v4526_v53 = vld [vmem:[#allocation2 + $0x610] sm:$0xff] }
 0x93c   :  { %v13366_v29 = vpack.c.bf16 %v4329_v56, %v4328_v37  ;;  %v13387_v8 = vpack.c.bf16 %v4430_v30, %v4429_v17  ;;  %v4433_v56 = vld [vmem:[#allocation2 + $0x578] sm:$0xff]  ;;  %v4545_v3 = vld [vmem:[#allocation2 + $0x528] sm:$0xff] }
 0x93d   :  { %v4180_v6 = vrot.slane %v4145_v58, 3  ;;  %v4339_v7 = vrot.slane %v4146_v40, 1  ;;  %v13408_v58 = vpack.c.bf16 %v4534_v51, %v4533_v15  ;;  %v4440_v40 = vld [vmem:[#allocation2 + $0x5b0] sm:$0xff]  ;;  %v4527_v27 = vld [vmem:[#allocation2 + $0x618] sm:$0xff] }
 0x93e   :  { %13388 = vmatpush3.bf16.msra.mxu1 %v13387_v8 }
 0x93f   :  { %12368 = vmatmul.mubr.f32.vlgmr.msra.gmra.mrb[24].mxu0 %v4180_v6  ;;  %v4536_v6 = vld [vmem:[#allocation2 + $0x4e0] sm:$0xff]  ;;  %13389 = vmatprep.subr.bf16.mxu1 %v15870_v43 }
 0x940   :  { %13358 = vmatpush3.bf16.msra.mxu0 %v13357_v19  ;;  %12437 = vmatprep.mubr.msk.f32.mxu0 %vm13956_vm6, %v15889_v34  ;;  %v4535_v19 = vld [vmem:[#allocation2 + $0x4d8] sm:$0xff] }
 0x941   :  { %13359 = vmatprep.subr.bf16.mxu0 %v15870_v43  ;;  %v13411_v11 = vpack.c.bf16 %v4536_v6, %v4535_v19  ;;  %v11188_v6 = vld [vmem:[#allocation2 + $0x4b0] ss:$0 sm:$0xff] }
 0x944   :  { %13361 = vmatpush3.bf16.msra.mxu0 %v13360_v18  ;;  %v4432_v18 = vld [vmem:[#allocation2 + $0x570] sm:$0xff] }
 0x945   :  { %13362 = vmatprep.subr.bf16.mxu0 %v15870_v43  ;;  %v13390_v37 = vpack.c.bf16 %v4432_v18, %v4431_v63  ;;  %v4515_v18 = vld [vmem:[#allocation2 + $0x5b8] sm:$0xff] }
 0x947   :  { %13391 = vmatpush3.bf16.msra.mxu1 %v13390_v37 }
 0x948   :  { %13364 = vmatpush3.bf16.msra.mxu0 %v13363_v47  ;;  %v4538_v47 = vld [vmem:[#allocation2 + $0x4f0] sm:$0xff]  ;;  %13392 = vmatprep.subr.bf16.mxu1 %v15870_v43 }
 0x949   :  { %13365 = vmatprep.subr.bf16.mxu0 %v15870_v43  ;;  %v13414_v33 = vpack.c.bf16 %v4538_v47, %v4537_v5 }
 0x94c   :  { %13367 = vmatpush3.bf16.msra.mxu0 %v13366_v29  ;;  %v4434_v29 = vld [vmem:[#allocation2 + $0x580] sm:$0xff] }
 0x94d   :  { %13368 = vmatprep.subr.bf16.mxu0 %v15870_v43  ;;  %v13393_v38 = vpack.c.bf16 %v4434_v29, %v4433_v56  ;;  %v4517_v56 = vld [vmem:[#allocation2 + $0x5c8] sm:$0xff]  ;;  %v4518_v29 = vld [vmem:[#allocation2 + $0x5d0] sm:$0xff] }
 0x94f   :  { %13394 = vmatpush3.bf16.msra.mxu1 %v13393_v38  ;;  %v13432_v38 = vpack.c.bf16 %v4518_v29, %v4517_v56  ;;  %v4800_v56 = vld [vmem:[#allocation2 + $0x6a8] sm:$0xff] }
 0x950   :  { %13370 = vmatpush3.bf16.msra.mxu0 %v13369_v31  ;;  %v4435_v31 = vld [vmem:[#allocation2 + $0x588] sm:$0xff]  ;;  %13395 = vmatprep.subr.bf16.mxu1 %v15870_v43 }
 0x951   :  { %13371 = vmatprep.subr.bf16.mxu0 %v15870_v43  ;;  %v13396_v52 = vpack.c.bf16 %v4436_v22, %v4435_v31  ;;  %v4519_v31 = vld [vmem:[#allocation2 + $0x5d8] sm:$0xff]  ;;  %v4520_v22 = vld [vmem:[#allocation2 + $0x5e0] sm:$0xff] }
 0x953   :  { %13397 = vmatpush3.bf16.msra.mxu1 %v13396_v52 }
 0x954   :  { %13373 = vmatpush3.bf16.msra.mxu0 %v13372_v28  ;;  %v4437_v28 = vld [vmem:[#allocation2 + $0x598] sm:$0xff]  ;;  %13398 = vmatprep.subr.bf16.mxu1 %v15870_v43 }
 0x955   :  { %13374 = vmatprep.subr.bf16.mxu0 %v15870_v43  ;;  %v13399_v57 = vpack.c.bf16 %v4438_v60, %v4437_v28  ;;  %v13435_v60 = vpack.c.bf16 %v4520_v22, %v4519_v31  ;;  %v4801_v31 = vld [vmem:[#allocation2 + $0x6b0] sm:$0xff] }
 0x957   :  { %13400 = vmatpush3.bf16.msra.mxu1 %v13399_v57 }
 0x958   :  { %13376 = vmatpush3.bf16.msra.mxu0 %v13375_v26  ;;  %13401 = vmatprep.subr.bf16.mxu1 %v15870_v43  ;;  %v4539_v26 = vld [vmem:[#allocation2 + $0x4f8] sm:$0xff] }
 0x959   :  { %13377 = vmatprep.subr.bf16.mxu0 %v15870_v43  ;;  %v13417_v13 = vpack.c.bf16 %v4540_v48, %v4539_v26  ;;  %v4521_v48 = vld [vmem:[#allocation2 + $0x5e8] sm:$0xff] }
 0x95c   :  { %13379 = vmatpush3.bf16.msra.mxu0 %v13378_v0  ;;  %v4439_v0 = vld [vmem:[#allocation2 + $0x5a8] sm:$0xff] }
 0x95d   :  { %13404 = vmatprep.subr.bf16.mxu0 %v15870_v43 }
 0x95f   :  { %12438 = vmatmul.mubr.f32.vlgmr.msra.gmra.mrb[26].mxu0 %v4339_v7  ;;  %v13402_v7 = vpack.c.bf16 %v4440_v40, %v4439_v0 }
 0x960   :  { %12507 = vmatprep.mubr.msk.f32.mxu0 %vm13956_vm6, %v15889_v34  ;;  %13406 = vmatpush3.bf16.msra.mxu0 %v13405_v25  ;;  %v13426_v25 = vpack.c.bf16 %v4546_v23, %v4545_v3  ;;  %v4529_v23 = vld [vmem:[#allocation2 + $0x628] sm:$0xff] }
 0x961   :  { %13407 = vmatprep.subr.bf16.mxu0 %v15870_v43  ;;  %13403 = vmatpush3.bf16.msra.mxu1 %v13402_v7  ;;  %v4523_v7 = vld [vmem:[#allocation2 + $0x5f8] sm:$0xff] }
 0x962   :  { %13428 = vmatprep.subr.bf16.mxu1 %v15870_v43  ;;  %v13441_v54 = vpack.c.bf16 %v4524_v50, %v4523_v7  ;;  %v13957_v7 = vmov 1966171168  }
 0x963   :  { %v4693_v50 = vunpack.c.l.s4 %v13957_v7  ;;  %v4957_v7 = vld [vmem:[#allocation2 + $0x6c8] sm:$0xff] }
 0x964   :  { %13409 = vmatpush3.bf16.msra.mxu0 %v13408_v58 }
 0x965   :  { %13410 = vmatprep.subr.bf16.mxu0 %v15870_v43 }
 0x968   :  { %13412 = vmatpush3.bf16.msra.mxu0 %v13411_v11  ;;  %v4516_v11 = vld [vmem:[#allocation2 + $0x5c0] sm:$0xff] }
 0x969   :  { %13413 = vmatprep.subr.bf16.mxu0 %v15870_v43  ;;  %v13429_v47 = vpack.c.bf16 %v4516_v11, %v4515_v18  ;;  %v4805_v11 = vld [vmem:[#allocation2 + $0x650] sm:$0xff] }
 0x96c   :  { %13415 = vmatpush3.bf16.msra.mxu0 %v13414_v33 }
 0x96d   :  { %13416 = vmatprep.subr.bf16.mxu0 %v15870_v43 }
 0x970   :  { %13418 = vmatpush3.bf16.msra.mxu0 %v13417_v13  ;;  %v4522_v13 = vld [vmem:[#allocation2 + $0x5f0] sm:$0xff] }
 0x971   :  { %13419 = vmatprep.subr.bf16.mxu0 %v15870_v43  ;;  %v13438_v40 = vpack.c.bf16 %v4522_v13, %v4521_v48 }
 0x974   :  { %13421 = vmatpush3.bf16.msra.mxu0 %v13420_v20  ;;  %v4525_v20 = vld [vmem:[#allocation2 + $0x608] sm:$0xff] }
 0x975   :  { %13422 = vmatprep.subr.bf16.mxu0 %v15870_v43 }
 0x978   :  { %13424 = vmatpush3.bf16.msra.mxu0 %v13423_v12  ;;  %v4528_v12 = vld [vmem:[#allocation2 + $0x620] sm:$0xff] }
 0x979   :  { %13425 = vmatprep.subr.bf16.mxu0 %v15870_v43  ;;  %v13447_v3 = vpack.c.bf16 %v4528_v12, %v4527_v27 }
 0x97c   :  { %13427 = vmatpush3.bf16.msra.mxu0 %v13426_v25  ;;  %v4530_v25 = vld [vmem:[#allocation2 + $0x630] sm:$0xff] }
 0x97d   :  { %13452 = vmatprep.subr.bf16.mxu0 %v15870_v43 }
 0xa08   :  { %v4318_v15 = vpop.f32.mrb[30].mxu1 }
 0xa09   :  { %v12404_v51 = vpop.f32.mrb[31].mxu1 }
 0xa0a   :  { %v4795_v51 = vld [vmem:[#allocation2 + $0x680] sm:$0xff] }
 0xa12   :  { %v4248_v17 = vpop.f32.mrb[24].mxu0 }
 0xa13   :  { %v4319_v30 = vadd.f32 %v4318_v15, %v4248_v17  ;;  %v12369_v58 = vpop.f32.mrb[25].mxu0  ;;  %v13450_v15 = vpack.c.bf16 %v4530_v25, %v4529_v23  ;;  %v4796_v17 = vld [vmem:[#allocation2 + $0x688] sm:$0xff] }
 0xa14   :  { %v4803_v58 = vld [vmem:[#allocation2 + $0x640] sm:$0xff] }
 0xa32   :  { %v4407_v19 = vpop.f32.mrb[26].mxu0 }
 0xa33   :  { %v4411_v8 = vadd.f32 %v4407_v19, %v4319_v30  ;;  %v12439_v63 = vpop.f32.mrb[27].mxu0  ;;  %v13465_v30 = vpack.c.bf16 %v4796_v17, %v4795_v51  ;;  %v4804_v19 = vld [vmem:[#allocation2 + $0x648] sm:$0xff] }
 0xa34   :  { %v4798_v63 = vld [vmem:[#allocation2 + $0x698] sm:$0xff] }
 0xa35   :  { %v4417_v5 = vadd.f32 %v11188_v6, %v4411_v8  ;;  %v4797_v6 = vld [vmem:[#allocation2 + $0x690] sm:$0xff]  ;;  %v13453_v8 = vpack.c.bf16 %v4804_v19, %v4803_v58 }
 0xa36   :  { %v13468_v18 = vpack.c.bf16 %v4798_v63, %v4797_v6 }
 0xa37   :  { %v4418_v37 = vmax.f32 %v4417_v5, 0.0  ;;  %v4806_v5 = vld [vmem:[#allocation2 + $0x658] sm:$0xff] }
 0xa39   :  { %v4420_v33 = vrot.slane %v4418_v37, 4  ;;  %12473 = vmatmul.mubr.f32.vlgmr.msra.gmra.mrb[32].mxu1 %v4418_v37 }
 0xa3a   :  { %13430 = vmatpush3.bf16.msra.mxu1 %v13429_v47  ;;  %12542 = vmatprep.mubr.msk.f32.mxu1 %vm13956_vm6, %v15889_v34  ;;  %v4799_v47 = vld [vmem:[#allocation2 + $0x6a0] sm:$0xff] }
 0xa3b   :  { %13431 = vmatprep.subr.bf16.mxu1 %v15870_v43  ;;  %v4421_v52 = vsel %vm3876_vm1, %v4420_v33, %v4418_v37  ;;  %v13471_v29 = vpack.c.bf16 %v4800_v56, %v4799_v47  ;;  %v4807_v33 = vld [vmem:[#allocation2 + $0x660] sm:$0xff] }
 0xa3c   :  { %v4422_v28 = vrot.slane %v4421_v52, 4  ;;  %v4802_v52 = vld [vmem:[#allocation2 + $0x6b8] sm:$0xff] }
 0xa3e   :  { %13433 = vmatpush3.bf16.msra.mxu1 %v13432_v38  ;;  %v4423_v57 = vsel %vm3876_vm1, %v4422_v28, %v4418_v37  ;;  %v4808_v38 = vld [vmem:[#allocation2 + $0x668] sm:$0xff]  ;;  %v4809_v28 = vld [vmem:[#allocation2 + $0x670] sm:$0xff] }
 0xa3f   :  { %13434 = vmatprep.subr.bf16.mxu1 %v15870_v43  ;;  %v4424_v26 = vmul.f32 %v4423_v57, %v14760_v36  ;;  %v13444_v36 = vpack.c.bf16 %v4526_v53, %v4525_v20  ;;  %v13459_v22 = vpack.c.bf16 %v4808_v38, %v4807_v33  ;;  %v13474_v57 = vpack.c.bf16 %v4802_v52, %v4801_v31  ;;  %v11189_v20 = vld [vmem:[#allocation2 + $0x638] ss:$0 sm:$0xff] }
 0xa41   :  { %v4548_v0 = vrot.slane %v4424_v26, 1 }
 0xa42   :  { %13436 = vmatpush3.bf16.msra.mxu1 %v13435_v60  ;;  %v4810_v60 = vld [vmem:[#allocation2 + $0x678] sm:$0xff] }
 0xa43   :  { %12508 = vmatmul.mubr.f32.vlgmr.msra.gmra.mrb[28].mxu0 %v4548_v0  ;;  %13437 = vmatprep.subr.bf16.mxu1 %v15870_v43  ;;  %v13462_v26 = vpack.c.bf16 %v4810_v60, %v4809_v28  ;;  %v5050_v60 = vld [vmem:[#allocation2 + $0x708] sm:$0xff] }
 0xa44   :  { %12561 = vmatprep.mubr.msk.f32.mxu0 %vm13956_vm6, %v15889_v34  ;;  %13454 = vmatpush3.bf16.msra.mxu0 %v13453_v8 }
 0xa45   :  { %13455 = vmatprep.subr.bf16.mxu0 %v15870_v43 }
 0xa46   :  { %13439 = vmatpush3.bf16.msra.mxu1 %v13438_v40 }
 0xa47   :  { %13440 = vmatprep.subr.bf16.mxu1 %v15870_v43 }
 0xa4a   :  { %13442 = vmatpush3.bf16.msra.mxu1 %v13441_v54  ;;  %v4694_v54 = vunpack.c.0.s8 %v4693_v50  ;;  %v5052_v50 = vld [vmem:[#allocation2 + $0x718] sm:$0xff] }
 0xa4b   :  { %13443 = vmatprep.subr.bf16.mxu1 %v15870_v43 }
 0xa4c   :  { %v14846_v53 = vsub.s32 %v4694_v54, %v13986_v1  ;;  %v5053_v54 = vld [vmem:[#allocation2 + $0x720] sm:$0xff] }
 0xa4e   :  { %13445 = vmatpush3.bf16.msra.mxu1 %v13444_v36 }
 0xa4f   :  { %13446 = vmatprep.subr.bf16.mxu1 %v15870_v43 }
 0xa52   :  { %13448 = vmatpush3.bf16.msra.mxu1 %v13447_v3 }
 0xa53   :  { %13449 = vmatprep.subr.bf16.mxu1 %v15870_v43 }
 0xa56   :  { %13451 = vmatpush3.bf16.msra.mxu1 %v13450_v15  ;;  %v14850_v15 = vsub.s32 0, %v13986_v1  ;;  %v15899_v1 = vmov 0.0|0.0  }
 0xa57   :  { %13464 = vmatprep.subr.bf16.mxu1 %v15870_v43 }
 0xa59   :  { %12543 = vmatmul.mubr.f32.vlgmr.msra.gmra.mrb[34].mxu1 %v4418_v37  ;;  %v13456_v37 = vpack.c.bf16 %v4806_v5, %v4805_v11 }
 0xa5a   :  { %12580 = vmatprep.mubr.msk.f32.mxu1 %vm13956_vm6, %v15889_v34  ;;  %13466 = vmatpush3.bf16.msra.mxu1 %v13465_v30 }
 0xa5b   :  { %13467 = vmatprep.subr.bf16.mxu1 %v15870_v43  ;;  %13457 = vmatpush3.bf16.msra.mxu0 %v13456_v37 }
 0xa5c   :  { %13458 = vmatprep.subr.bf16.mxu0 %v15870_v43 }
 0xa5e   :  { %13469 = vmatpush3.bf16.msra.mxu1 %v13468_v18 }
 0xa5f   :  { %13470 = vmatprep.subr.bf16.mxu1 %v15870_v43  ;;  %13460 = vmatpush3.bf16.msra.mxu0 %v13459_v22 }
 0xa60   :  { %13461 = vmatprep.subr.bf16.mxu0 %v15870_v43 }
 0xa62   :  { %13472 = vmatpush3.bf16.msra.mxu1 %v13471_v29 }
 0xa63   :  { %13473 = vmatprep.subr.bf16.mxu1 %v15870_v43  ;;  %13463 = vmatpush3.bf16.msra.mxu0 %v13462_v26 }
 0xa64   :  { %13476 = vmatprep.subr.bf16.mxu0 %v15870_v43 }
 0xa66   :  { %13475 = vmatpush3.bf16.msra.mxu1 %v13474_v57  ;;  %v5051_v57 = vld [vmem:[#allocation2 + $0x710] sm:$0xff] }
 0xa67   :  { %13488 = vmatprep.subr.bf16.mxu1 %v15870_v43 }
 0xb0c   :  { %v4511_v48 = vpop.f32.mrb[32].mxu1 }
 0xb0d   :  { %v12474_v13 = vpop.f32.mrb[33].mxu1  ;;  %v4512_v36 = vadd.f32 %v11189_v20, %v4511_v48 }
 0xb0e   :  { %v13489_v13 = vpack.c.bf16 %v5051_v57, %v5050_v60  ;;  %v5206_v60 = vld [vmem:[#allocation2 + $0x7a0] sm:$0xff] }
 0xb0f   :  { %v4698_v12 = vrot.slane %v4512_v36, %v14846_v53 }
 0xb11   :  { %v4699_v51 = vcombine.high %v4698_v12, %v4698_v12  ;;  %v4706_v30 = vrot.slane %v4698_v12, %v14846_v53  ;;  %v4958_v12 = vld [vmem:[#allocation2 + $0x6d0] sm:$0xff] }
 0xb13   :  { %v4713_v6 = vrot.slane %v4699_v51, %v14846_v53  ;;  %v4714_v11 = vcombine.high %v4706_v30, %v4706_v30  ;;  %v5055_v51 = vld [vmem:[#allocation2 + $0x730] sm:$0xff] }
 0xb15   :  { %v4715_v29 = vcombine.high %v4713_v6, %v4713_v6 }
 0xb16   :  { %v4616_v0 = vpop.f32.mrb[28].mxu0 }
 0xb17   :  { %v12509_v40 = vpop.f32.mrb[29].mxu0 }
 0xb2c   :  { %v4686_v27 = vpop.f32.mrb[34].mxu1 }
 0xb2d   :  { %v4687_v3 = vadd.f32 %v4686_v27, %v4616_v0  ;;  %v12544_v23 = vpop.f32.mrb[35].mxu1  ;;  %v4956_v0 = vld [vmem:[#allocation2 + $0x6c0] sm:$0xff]  ;;  %v13492_v27 = vpack.c.bf16 %v5053_v54, %v5052_v50  ;;  %v5208_v50 = vld [vmem:[#allocation2 + $0x7b0] sm:$0xff] }
 0xb2e   :  { %v13477_v36 = vpack.c.bf16 %v4957_v7, %v4956_v0  ;;  %v4959_v23 = vld [vmem:[#allocation2 + $0x6d8] sm:$0xff]  ;;  %v5045_v0 = vld [vmem:[#allocation2 + $0x760] sm:$0xff]  ;;  %v5207_v7 = vld [vmem:[#allocation2 + $0x7a8] sm:$0xff] }
 0xb2f   :  { %v4690_v25 = vadd.f32 %v11189_v20, %v4687_v3  ;;  %v13519_v54 = vpack.c.bf16 %v5208_v50, %v5207_v7 }
 0xb31   :  { %v4727_v17 = vrot.slane %v4690_v25, %v14846_v53  ;;  %v5054_v25 = vld [vmem:[#allocation2 + $0x728] sm:$0xff] }
 0xb33   :  { %v4728_v58 = vcombine.high %v4727_v17, %v4727_v17  ;;  %v4735_v19 = vrot.slane %v4727_v17, %v14846_v53  ;;  %v13480_v17 = vpack.c.bf16 %v4959_v23, %v4958_v12  ;;  %v5210_v12 = vld [vmem:[#allocation2 + $0x7c0] sm:$0xff] }
 0xb35   :  { %v4742_v8 = vrot.slane %v4728_v58, %v14846_v53  ;;  %v4743_v63 = vcombine.high %v4735_v19, %v4735_v19  ;;  %v4748_v18 = vrot.slane %v4735_v19, %v14850_v15  ;;  %v4960_v58 = vld [vmem:[#allocation2 + $0x6e0] sm:$0xff]  ;;  %v4961_v19 = vld [vmem:[#allocation2 + $0x6e8] sm:$0xff] }
 0xb37   :  { %v4744_v5 = vcombine.high %v4742_v8, %v4742_v8  ;;  %v4752_v47 = vrot.slane %v4742_v8, %v14850_v15  ;;  %v4756_v37 = vrot.slane %v4743_v63, %v14850_v15  ;;  %v4765_v56 = vsel %vm263_vm0, %v4706_v30, %v4748_v18  ;;  %v5057_v8 = vld [vmem:[#allocation2 + $0x740] sm:$0xff] }
 0xb38   :  { %v13495_v30 = vpack.c.bf16 %v5055_v51, %v5054_v25  ;;  %v13483_v63 = vpack.c.bf16 %v4961_v19, %v4960_v58  ;;  %v5040_v25 = vrot.slane %v14733_v21, 1  ;;  %v5048_v51 = vld [vmem:[#allocation2 + $0x778] sm:$0xff]  ;;  %v5297_v19 = vld [vmem:[#allocation2 + $0x808] sm:$0xff] }
 0xb39   :  { %v4760_v33 = vrot.slane %v4744_v5, %v14850_v15  ;;  %v4766_v38 = vsel %vm263_vm0, %v4713_v6, %v4752_v47  ;;  %v4767_v31 = vsel %vm263_vm0, %v4714_v11, %v4756_v37  ;;  %v5056_v6 = vld [vmem:[#allocation2 + $0x738] sm:$0xff]  ;;  %v4962_v11 = vld [vmem:[#allocation2 + $0x6f0] sm:$0xff]  ;;  %v5038_v5 = vrot.slane %v14733_v21, 7  ;;  %v5203_v37 = vld [vmem:[#allocation2 + $0x788] sm:$0xff] }
 0xb3a   :  { %v4773_v22 = vcombine.low %v4765_v56, %v4766_v38  ;;  %v13498_v18 = vpack.c.bf16 %v5057_v8, %v5056_v6  ;;  %v4963_v47 = vld [vmem:[#allocation2 + $0x6f8] sm:$0xff]  ;;  %v5204_v56 = vld [vmem:[#allocation2 + $0x790] sm:$0xff]  ;;  %v5042_v38 = vld [vmem:[#allocation2 + $0x748] sm:$0xff]  ;;  %v5041_v58 = vmul.f32 %v14687_v49, %v5040_v25 }
 0xb3b   :  { %v4768_v52 = vsel %vm263_vm0, %v4715_v29, %v4760_v33  ;;  %v13486_v29 = vpack.c.bf16 %v4963_v47, %v4962_v11  ;;  %v13513_v33 = vpack.c.bf16 %v5204_v56, %v5203_v37  ;;  %v5298_v6 = vld [vmem:[#allocation2 + $0x810] sm:$0xff]  ;;  %v5300_v47 = vld [vmem:[#allocation2 + $0x820] sm:$0xff] }
 0xb3c   :  { %v4774_v28 = vcombine.low %v4767_v31, %v4768_v52  ;;  %v4781_v26 = vrot.slane %v4773_v22, %v14209_v35  ;;  %v5039_v31 = vmul.f32 %v14683_v41, %v5038_v5  ;;  %v5043_v52 = vld [vmem:[#allocation2 + $0x750] sm:$0xff]  ;;  %v13537_v8 = vpack.c.bf16 %v5298_v6, %v5297_v19  ;;  %v5299_v5 = vld [vmem:[#allocation2 + $0x818] sm:$0xff]  ;;  %v5308_v56 = vld [vmem:[#allocation2 + $0x7e0] sm:$0xff] }
 0xb3d   :  { %v13501_v57 = vpack.c.bf16 %v5043_v52, %v5042_v38  ;;  %v13540_v37 = vpack.c.bf16 %v5300_v47, %v5299_v5  ;;  %v5302_v38 = vld [vmem:[#allocation2 + $0x830] sm:$0xff]  ;;  %v11196_v6 = vld [vmem:[#allocation2 + $0x700] ss:$0 sm:$0xff] }
 0xb3e   :  { %v4788_v48 = vrot.slane %v4774_v28, %v14209_v35  ;;  %v5205_v28 = vld [vmem:[#allocation2 + $0x798] sm:$0xff]  ;;  %v5310_v52 = vld [vmem:[#allocation2 + $0x7f0] sm:$0xff] }
 0xb3f   :  { %v5460_v5 = vld [vmem:[#allocation2 + $0x850] sm:$0xff] }
 0xb40   :  { %v4789_v40 = vcombine.low %v4781_v26, %v4788_v48  ;;  %v13516_v26 = vpack.c.bf16 %v5206_v60, %v5205_v28  ;;  %v5044_v48 = vld [vmem:[#allocation2 + $0x758] sm:$0xff] }
 0xb41   :  { %v5303_v60 = vld [vmem:[#allocation2 + $0x838] sm:$0xff] }
 0xb42   :  { %12581 = vmatmul.mubr.msk.f32.vlgmr.msra.gmra.mrb[36].mxu1 %vm3563_vm13, %v4789_v40  ;;  %v4791_v20 = vrot.slane %v4789_v40, 7  ;;  %v4793_v22 = vrot.slane %v4789_v40, 1  ;;  %v13504_v40 = vpack.c.bf16 %v5045_v0, %v5044_v48  ;;  %v5311_v48 = vld [vmem:[#allocation2 + $0x7f8] sm:$0xff] }
 0xb43   :  { %13490 = vmatpush3.bf16.msra.mxu1 %v13489_v13  ;;  %12618 = vmatprep.mubr.msk.f32.mxu1 %vm13956_vm6, %v15889_v34 }
 0xb44   :  { %13491 = vmatprep.subr.bf16.mxu1 %v15870_v43  ;;  %v4792_v3 = vmul.f32 %v14683_v41, %v4791_v20  ;;  %v4794_v13 = vmul.f32 %v14687_v49, %v4793_v22  ;;  %v5046_v20 = vld [vmem:[#allocation2 + $0x768] sm:$0xff] }
 0xb45   :  { %v5309_v22 = vld [vmem:[#allocation2 + $0x7e8] sm:$0xff] }
 0xb46   :  { %12562 = vmatmul.mubr.msk.f32.vlgmr.msra.gmra.mrb[30].mxu0 %vm3563_vm13, %v4792_v3  ;;  %v13531_v28 = vpack.c.bf16 %v5310_v52, %v5309_v22  ;;  %v5465_v52 = vld [vmem:[#allocation2 + $0x878] sm:$0xff] }
 0xb47   :  { %13478 = vmatpush3.bf16.msra.mxu0 %v13477_v36  ;;  %13493 = vmatpush3.bf16.msra.mxu1 %v13492_v27  ;;  %v5047_v36 = vld [vmem:[#allocation2 + $0x770] sm:$0xff]  ;;  %v5209_v27 = vld [vmem:[#allocation2 + $0x7b8] sm:$0xff] }
 0xb48   :  { %13479 = vmatprep.subr.bf16.mxu0 %v15870_v43  ;;  %13494 = vmatprep.subr.bf16.mxu1 %v15870_v43  ;;  %v13507_v3 = vpack.c.bf16 %v5047_v36, %v5046_v20  ;;  %v13522_v23 = vpack.c.bf16 %v5210_v12, %v5209_v27 }
 0xb49   :  { %12599 = vmatprep.mubr.msk.f32.mxu0 %vm13956_vm6, %v15889_v34 }
 0xb4b   :  { %13481 = vmatpush3.bf16.msra.mxu0 %v13480_v17  ;;  %13496 = vmatpush3.bf16.msra.mxu1 %v13495_v30  ;;  %v5049_v17 = vld [vmem:[#allocation2 + $0x780] sm:$0xff] }
 0xb4c   :  { %13482 = vmatprep.subr.bf16.mxu0 %v15870_v43  ;;  %13497 = vmatprep.subr.bf16.mxu1 %v15870_v43  ;;  %v13510_v30 = vpack.c.bf16 %v5049_v17, %v5048_v51 }
 0xb4f   :  { %13484 = vmatpush3.bf16.msra.mxu0 %v13483_v63  ;;  %13499 = vmatpush3.bf16.msra.mxu1 %v13498_v18  ;;  %v5305_v63 = vld [vmem:[#allocation2 + $0x7c8] sm:$0xff]  ;;  %v5306_v18 = vld [vmem:[#allocation2 + $0x7d0] sm:$0xff] }
 0xb50   :  { %13485 = vmatprep.subr.bf16.mxu0 %v15870_v43  ;;  %13512 = vmatprep.subr.bf16.mxu1 %v15870_v43  ;;  %v13525_v11 = vpack.c.bf16 %v5306_v18, %v5305_v63 }
 0xb52   :  { %12619 = vmatmul.mubr.msk.f32.vlgmr.msra.gmra.mrb[38].mxu1 %vm3563_vm13, %v5039_v31 }
 0xb53   :  { %13487 = vmatpush3.bf16.msra.mxu0 %v13486_v29  ;;  %13514 = vmatpush3.bf16.msra.mxu1 %v13513_v33  ;;  %v5301_v33 = vld [vmem:[#allocation2 + $0x828] sm:$0xff] }
 0xb54   :  { %13500 = vmatprep.subr.bf16.mxu0 %v15870_v43  ;;  %13515 = vmatprep.subr.bf16.mxu1 %v15870_v43  ;;  %v13543_v31 = vpack.c.bf16 %v5302_v38, %v5301_v33  ;;  %v5463_v38 = vld [vmem:[#allocation2 + $0x868] sm:$0xff] }
 0xb55   :  { %12656 = vmatprep.mubr.msk.f32.mxu1 %vm13956_vm6, %v15889_v34 }
 0xb56   :  { %12600 = vmatmul.mubr.msk.f32.vlgmr.msra.gmra.mrb[32].mxu0 %vm3563_vm13, %v4794_v13  ;;  %v5312_v13 = vld [vmem:[#allocation2 + $0x800] sm:$0xff] }
 0xb57   :  { %13502 = vmatpush3.bf16.msra.mxu0 %v13501_v57  ;;  %13517 = vmatpush3.bf16.msra.mxu1 %v13516_v26  ;;  %v5304_v57 = vld [vmem:[#allocation2 + $0x840] sm:$0xff]  ;;  %v13534_v0 = vpack.c.bf16 %v5312_v13, %v5311_v48  ;;  %v5552_v48 = vld [vmem:[#allocation2 + $0x8d8] sm:$0xff] }
 0xb58   :  { %13503 = vmatprep.subr.bf16.mxu0 %v15870_v43  ;;  %13518 = vmatprep.subr.bf16.mxu1 %v15870_v43  ;;  %v13546_v26 = vpack.c.bf16 %v5304_v57, %v5303_v60  ;;  %v5553_v13 = vld [vmem:[#allocation2 + $0x8e0] sm:$0xff] }
 0xb59   :  { %12637 = vmatprep.mubr.msk.f32.mxu0 %vm13956_vm6, %v15889_v34 }
 0xb5b   :  { %13505 = vmatpush3.bf16.msra.mxu0 %v13504_v40  ;;  %13520 = vmatpush3.bf16.msra.mxu1 %v13519_v54 }
 0xb5c   :  { %13506 = vmatprep.subr.bf16.mxu0 %v15870_v43  ;;  %13521 = vmatprep.subr.bf16.mxu1 %v15870_v43 }
 0xb5f   :  { %13508 = vmatpush3.bf16.msra.mxu0 %v13507_v3  ;;  %13523 = vmatpush3.bf16.msra.mxu1 %v13522_v23 }
 0xb60   :  { %13509 = vmatprep.subr.bf16.mxu0 %v15870_v43  ;;  %13536 = vmatprep.subr.bf16.mxu1 %v15870_v43 }
 0xb62   :  { %12657 = vmatmul.mubr.msk.f32.vlgmr.msra.gmra.mrb[40].mxu1 %vm3563_vm13, %v5041_v58 }
 0xb63   :  { %13511 = vmatpush3.bf16.msra.mxu0 %v13510_v30  ;;  %12694 = vmatprep.mubr.msk.f32.mxu1 %vm13956_vm6, %v15889_v34 }
 0xb64   :  { %13524 = vmatprep.subr.bf16.mxu0 %v15870_v43  ;;  %13538 = vmatpush3.bf16.msra.mxu1 %v13537_v8 }
 0xb65   :  { %13539 = vmatprep.subr.bf16.mxu1 %v15870_v43 }
 0xb66   :  { %12638 = vmatmul.mubr.msk.f32.vlgmr.msra.gmra.mrb[34].mxu0 %vm3563_vm13, %v14733_v21  ;;  %v5307_v21 = vld [vmem:[#allocation2 + $0x7d8] sm:$0xff] }
 0xb67   :  { %12675 = vmatprep.mubr.msk.f32.mxu0 %vm13956_vm6, %v15889_v34  ;;  %13526 = vmatpush3.bf16.msra.mxu0 %v13525_v11  ;;  %v13528_v29 = vpack.c.bf16 %v5308_v56, %v5307_v21  ;;  %v5459_v11 = vld [vmem:[#allocation2 + $0x848] sm:$0xff]  ;;  %v5461_v56 = vld [vmem:[#allocation2 + $0x858] sm:$0xff] }
 0xb68   :  { %13541 = vmatpush3.bf16.msra.mxu1 %v13540_v37  ;;  %13527 = vmatprep.subr.bf16.mxu0 %v15870_v43  ;;  %v13549_v37 = vpack.c.bf16 %v5460_v5, %v5459_v11 }
 0xb69   :  { %13542 = vmatprep.subr.bf16.mxu1 %v15870_v43 }
 0xb6b   :  { %13529 = vmatpush3.bf16.msra.mxu0 %v13528_v29  ;;  %v5462_v29 = vld [vmem:[#allocation2 + $0x860] sm:$0xff] }
 0xb6c   :  { %13544 = vmatpush3.bf16.msra.mxu1 %v13543_v31  ;;  %13530 = vmatprep.subr.bf16.mxu0 %v15870_v43  ;;  %v13552_v33 = vpack.c.bf16 %v5462_v29, %v5461_v56  ;;  %v5464_v31 = vld [vmem:[#allocation2 + $0x870] sm:$0xff]  ;;  %v11200_v29 = vld [vmem:[#allocation2 + $0x888] ss:$0 sm:$0xff] }
 0xb6d   :  { %13545 = vmatprep.subr.bf16.mxu1 %v15870_v43  ;;  %v13555_v22 = vpack.c.bf16 %v5464_v31, %v5463_v38  ;;  %v5636_v31 = vld [vmem:[#allocation2 + $0x910] sm:$0xff] }
 0xb6f   :  { %13532 = vmatpush3.bf16.msra.mxu0 %v13531_v28  ;;  %v5466_v28 = vld [vmem:[#allocation2 + $0x880] sm:$0xff] }
 0xb70   :  { %13547 = vmatpush3.bf16.msra.mxu1 %v13546_v26  ;;  %13533 = vmatprep.subr.bf16.mxu0 %v15870_v43  ;;  %v5551_v26 = vld [vmem:[#allocation2 + $0x8d0] sm:$0xff] }
 0xb71   :  { %13560 = vmatprep.subr.bf16.mxu1 %v15870_v43 }
 0xb73   :  { %13535 = vmatpush3.bf16.msra.mxu0 %v13534_v0  ;;  %v13561_v0 = vpack.c.bf16 %v5552_v48, %v5551_v26 }
 0xb74   :  { %13548 = vmatprep.subr.bf16.mxu0 %v15870_v43 }
 0xc15   :  { %v4952_v7 = vpop.f32.mrb[36].mxu1 }
 0xc16   :  { %v12582_v50 = vpop.f32.mrb[37].mxu1 }
 0xc17   :  { %v5644_v50 = vld [vmem:[#allocation2 + $0x890] sm:$0xff] }
 0xc19   :  { %v4880_v40 = vpop.f32.mrb[30].mxu0 }
 0xc1a   :  { %v4953_v54 = vadd.f32 %v4952_v7, %v4880_v40  ;;  %v12563_v20 = vpop.f32.mrb[31].mxu0  ;;  %v5554_v7 = vld [vmem:[#allocation2 + $0x8e8] sm:$0xff]  ;;  %v5645_v40 = vld [vmem:[#allocation2 + $0x898] sm:$0xff] }
 0xc1b   :  { %v13564_v20 = vpack.c.bf16 %v5554_v7, %v5553_v13  ;;  %v5641_v7 = vld [vmem:[#allocation2 + $0x938] sm:$0xff] }
 0xc25   :  { %v5127_v36 = vpop.f32.mrb[38].mxu1 }
 0xc26   :  { %v12620_v27 = vpop.f32.mrb[39].mxu1 }
 0xc27   :  { %v5556_v27 = vld [vmem:[#allocation2 + $0x8f8] sm:$0xff] }
 0xc29   :  { %v5033_v12 = vpop.f32.mrb[32].mxu0 }
 0xc2a   :  { %v5037_v3 = vadd.f32 %v5033_v12, %v4953_v54  ;;  %v12601_v23 = vpop.f32.mrb[33].mxu0  ;;  %v13573_v54 = vpack.c.bf16 %v5645_v40, %v5644_v50  ;;  %v5642_v40 = vld [vmem:[#allocation2 + $0x940] sm:$0xff] }
 0xc2b   :  { %v5647_v23 = vld [vmem:[#allocation2 + $0x8a8] sm:$0xff] }
 0xc35   :  { %v5280_v25 = vpop.f32.mrb[40].mxu1 }
 0xc36   :  { %v12658_v51 = vpop.f32.mrb[41].mxu1 }
 0xc37   :  { %v5557_v51 = vld [vmem:[#allocation2 + $0x900] sm:$0xff] }
 0xc39   :  { %v5199_v17 = vpop.f32.mrb[34].mxu0 }
 0xc3a   :  { %v5200_v30 = vadd.f32 %v5199_v17, %v5127_v36  ;;  %v12639_v58 = vpop.f32.mrb[35].mxu0  ;;  %v5555_v36 = vld [vmem:[#allocation2 + $0x8f0] sm:$0xff]  ;;  %v5558_v17 = vld [vmem:[#allocation2 + $0x908] sm:$0xff] }
 0xc3b   :  { %v13567_v12 = vpack.c.bf16 %v5556_v27, %v5555_v36  ;;  %v5648_v58 = vld [vmem:[#allocation2 + $0x8b0] sm:$0xff]  ;;  %v6013_v36 = vld [vmem:[#allocation2 + $0x960] sm:$0xff]  ;;  %v6014_v27 = vld [vmem:[#allocation2 + $0x968] sm:$0xff] }
 0xc3c   :  { %v5284_v19 = vadd.f32 %v5280_v25, %v5200_v30  ;;  %v13570_v30 = vpack.c.bf16 %v5558_v17, %v5557_v51  ;;  %v6009_v51 = vld [vmem:[#allocation2 + $0x980] sm:$0xff] }
 0xc3e   :  { %v5285_v8 = vadd.f32 %v5284_v19, %v5037_v3  ;;  %v5646_v3 = vld [vmem:[#allocation2 + $0x8a0] sm:$0xff]  ;;  %v5649_v19 = vld [vmem:[#allocation2 + $0x8b8] sm:$0xff] }
 0xc3f   :  { %v13576_v25 = vpack.c.bf16 %v5647_v23, %v5646_v3  ;;  %v6015_v3 = vld [vmem:[#allocation2 + $0x970] sm:$0xff] }
 0xc40   :  { %v5291_v63 = vadd.f32 %v11196_v6, %v5285_v8  ;;  %v13579_v6 = vpack.c.bf16 %v5649_v19, %v5648_v58  ;;  %v5650_v8 = vld [vmem:[#allocation2 + $0x8c0] sm:$0xff]  ;;  %v13600_v23 = vpack.c.bf16 %v6015_v3, %v6014_v27 }
 0xc42   :  { %v5292_v18 = vmax.f32 %v5291_v63, 0.0  ;;  %v5651_v63 = vld [vmem:[#allocation2 + $0x8c8] sm:$0xff] }
 0xc44   :  { %v5293_v47 = vrot.slane %v5292_v18, 7  ;;  %12695 = vmatmul.mubr.msk.f32.vlgmr.msra.gmra.mrb[42].mxu1 %vm3563_vm13, %v5292_v18  ;;  %v5295_v60 = vrot.slane %v5292_v18, 1  ;;  %v13582_v18 = vpack.c.bf16 %v5651_v63, %v5650_v8  ;;  %v11201_v8 = vld [vmem:[#allocation2 + $0x950] ss:$0 sm:$0xff] }
 0xc45   :  { %12732 = vmatprep.mubr.msk.f32.mxu1 %vm13956_vm6, %v15889_v34  ;;  %13562 = vmatpush3.bf16.msra.mxu1 %v13561_v0  ;;  %v5640_v0 = vld [vmem:[#allocation2 + $0x930] sm:$0xff] }
 0xc46   :  { %v5294_v21 = vmul.f32 %v14683_v41, %v5293_v47  ;;  %v13558_v41 = vpack.c.bf16 %v5466_v28, %v5465_v52  ;;  %v5296_v57 = vmul.f32 %v14687_v49, %v5295_v60  ;;  %13563 = vmatprep.subr.bf16.mxu1 %v15870_v43  ;;  %v5638_v60 = vld [vmem:[#allocation2 + $0x920] sm:$0xff]  ;;  %v13591_v50 = vpack.c.bf16 %v5641_v7, %v5640_v0 }
 0xc48   :  { %12676 = vmatmul.mubr.msk.f32.vlgmr.msra.gmra.mrb[36].mxu0 %vm3563_vm13, %v5294_v21 }
 0xc49   :  { %13550 = vmatpush3.bf16.msra.mxu0 %v13549_v37  ;;  %12713 = vmatprep.mubr.msk.f32.mxu0 %vm13956_vm6, %v15889_v34 }
 0xc4a   :  { %13551 = vmatprep.subr.bf16.mxu0 %v15870_v43  ;;  %13565 = vmatpush3.bf16.msra.mxu1 %v13564_v20 }
 0xc4b   :  { %13566 = vmatprep.subr.bf16.mxu1 %v15870_v43 }
 0xc4d   :  { %13553 = vmatpush3.bf16.msra.mxu0 %v13552_v33 }
 0xc4e   :  { %13554 = vmatprep.subr.bf16.mxu0 %v15870_v43  ;;  %13568 = vmatpush3.bf16.msra.mxu1 %v13567_v12 }
 0xc4f   :  { %13569 = vmatprep.subr.bf16.mxu1 %v15870_v43 }
 0xc51   :  { %13556 = vmatpush3.bf16.msra.mxu0 %v13555_v22  ;;  %v5637_v22 = vld [vmem:[#allocation2 + $0x918] sm:$0xff] }
 0xc52   :  { %13557 = vmatprep.subr.bf16.mxu0 %v15870_v43  ;;  %13571 = vmatpush3.bf16.msra.mxu1 %v13570_v30  ;;  %v13585_v28 = vpack.c.bf16 %v5637_v22, %v5636_v31 }
 0xc53   :  { %13584 = vmatprep.subr.bf16.mxu1 %v15870_v43 }
 0xc55   :  { %13559 = vmatpush3.bf16.msra.mxu0 %v13558_v41 }
 0xc56   :  { %13572 = vmatprep.subr.bf16.mxu0 %v15870_v43 }
 0xc58   :  { %12714 = vmatmul.mubr.msk.f32.vlgmr.msra.gmra.mrb[38].mxu0 %vm3563_vm13, %v5296_v57  ;;  %v5639_v57 = vld [vmem:[#allocation2 + $0x928] sm:$0xff] }
 0xc59   :  { %12751 = vmatprep.mubr.msk.f32.mxu0 %vm13956_vm6, %v15889_v34  ;;  %13574 = vmatpush3.bf16.msra.mxu0 %v13573_v54  ;;  %v13588_v48 = vpack.c.bf16 %v5639_v57, %v5638_v60  ;;  %v5643_v54 = vld [vmem:[#allocation2 + $0x948] sm:$0xff] }
 0xc5a   :  { %13575 = vmatprep.subr.bf16.mxu0 %v15870_v43  ;;  %v13594_v20 = vpack.c.bf16 %v5643_v54, %v5642_v40 }
 0xc5d   :  { %13577 = vmatpush3.bf16.msra.mxu0 %v13576_v25  ;;  %v6008_v25 = vld [vmem:[#allocation2 + $0x978] sm:$0xff] }
 0xc5e   :  { %13578 = vmatprep.subr.bf16.mxu0 %v15870_v43  ;;  %v14947_v17 = vpack.c.bf16 %v6009_v51, %v6008_v25 }
 0xc61   :  { %13580 = vmatpush3.bf16.msra.mxu0 %v13579_v6 }
 0xc62   :  { %13581 = vmatprep.subr.bf16.mxu0 %v15870_v43 }
 0xc65   :  { %13583 = vmatpush3.bf16.msra.mxu0 %v13582_v18 }
 0xd17   :  { %v5455_v11 = vpop.f32.mrb[42].mxu1 }
 0xd18   :  { %v12696_v5 = vpop.f32.mrb[43].mxu1 }
 0xd1b   :  { %v5382_v47 = vpop.f32.mrb[36].mxu0 }
 0xd1c   :  { %v5456_v37 = vadd.f32 %v5455_v11, %v5382_v47  ;;  %v12677_v21 = vpop.f32.mrb[37].mxu0 }
 0xd2b   :  { %v5536_v56 = vpop.f32.mrb[38].mxu0 }
 0xd2c   :  { %v5540_v33 = vadd.f32 %v5536_v56, %v5456_v37  ;;  %v12715_v38 = vpop.f32.mrb[39].mxu0 }
 0xd2e   :  { %v5546_v52 = vadd.f32 %v11200_v29, %v5540_v33 }
 0xd30   :  { %v5547_v41 = vmax.f32 %v5546_v52, 0.0 }
 0xd32   :  { %v5549_v26 = vrot.slane %v5547_v41, 1  ;;  %12733 = vmatmul.mubr.msk.f32.vlgmr.msra.gmra.mrb[44].mxu1 %vm3563_vm13, %v5547_v41 }
 0xd33   :  { %13586 = vmatpush3.bf16.msra.mxu1 %v13585_v28  ;;  %12770 = vmatprep.mubr.msk.f32.mxu1 %vm13956_vm6, %v15889_v34 }
 0xd34   :  { %v5550_v13 = vmul.f32 %v14687_v49, %v5549_v26  ;;  %13587 = vmatprep.subr.bf16.mxu1 %v15870_v43  ;;  %v6012_v49 = vld [vmem:[#allocation2 + $0x958] sm:$0xff] }
 0xd35   :  { %v13596_v12 = vpack.c.bf16 %v6013_v36, %v6012_v49 }
 0xd36   :  { %12752 = vmatmul.mubr.msk.f32.vlgmr.msra.gmra.mrb[40].mxu0 %vm3563_vm13, %v5550_v13 }
 0xd37   :  { %13589 = vmatpush3.bf16.msra.mxu1 %v13588_v48  ;;  %13597 = vmatprep.subr.bf16.mxu0 %v13596_v12 }
 0xd38   :  { %13590 = vmatprep.subr.bf16.mxu1 %v15870_v43  ;;  %13599 = vmatpush3.bf16.msra.mxu0 %v13596_v12 }
 0xd39   :  { %13601 = vmatprep.subr.bf16.mxu0 %v13600_v23 }
 0xd3b   :  { %13592 = vmatpush3.bf16.msra.mxu1 %v13591_v50 }
 0xd3c   :  { %13593 = vmatprep.subr.bf16.mxu1 %v15870_v43  ;;  %13603 = vmatpush3.bf16.msra.mxu0 %v13600_v23 }
 0xd3d   :  { %13605 = vmatprep.subr.bf16.mxu0 %v14947_v17 }
 0xd3f   :  { %13595 = vmatpush3.bf16.msra.mxu1 %v13594_v20 }
 0xd42   :  { %12771 = vmatmul.mubr.msk.f32.vlgmr.msra.gmra.mrb[46].mxu1 %vm3563_vm13, %v5547_v41 }
 0xe05   :  { %v5632_v30 = vpop.f32.mrb[44].mxu1 }
 0xe06   :  { %v12734_v58 = vpop.f32.mrb[45].mxu1  ;;  %v5633_v63 = vadd.f32 %v11201_v8, %v5632_v30 }
 0xe08   :  { %v5797_v18 = vcombine.high %v5633_v63, %v5633_v63  ;;  %v5804_v11 = vrot.slane %v5633_v63, %v14846_v53 }
 0xe09   :  { %v5721_v19 = vpop.f32.mrb[40].mxu0 }
 0xe0a   :  { %v12753_v6 = vpop.f32.mrb[41].mxu0  ;;  %v5811_v21 = vrot.slane %v5797_v18, %v14846_v53  ;;  %v5812_v29 = vcombine.high %v5804_v11, %v5804_v11  ;;  %v5820_v22 = vrot.slane %v5804_v11, %v14846_v53 }
 0xe0c   :  { %v5813_v31 = vcombine.high %v5811_v21, %v5811_v21  ;;  %v5827_v52 = vrot.slane %v5811_v21, %v14846_v53  ;;  %v5834_v57 = vrot.slane %v5812_v29, %v14846_v53  ;;  %v5842_v50 = vcombine.high %v5820_v22, %v5820_v22 }
 0xe0e   :  { %v5841_v7 = vrot.slane %v5813_v31, %v14846_v53  ;;  %v5843_v40 = vcombine.high %v5827_v52, %v5827_v52  ;;  %v5844_v12 = vcombine.high %v5834_v57, %v5834_v57 }
 0xe10   :  { %v5845_v6 = vcombine.high %v5841_v7, %v5841_v7 }
 0xe15   :  { %v5791_v5 = vpop.f32.mrb[46].mxu1 }
 0xe16   :  { %v5792_v47 = vadd.f32 %v5791_v5, %v5721_v19  ;;  %v12772_v37 = vpop.f32.mrb[47].mxu1 }
 0xe18   :  { %v5795_v56 = vadd.f32 %v11201_v8, %v5792_v47 }
 0xe1a   :  { %v5855_v33 = vcombine.high %v5795_v56, %v5795_v56  ;;  %v5862_v38 = vrot.slane %v5795_v56, %v14846_v53 }
 0xe1c   :  { %v5869_v28 = vrot.slane %v5855_v33, %v14846_v53  ;;  %v5870_v41 = vcombine.high %v5862_v38, %v5862_v38  ;;  %v5878_v60 = vrot.slane %v5862_v38, %v14846_v53 }
 0xe1e   :  { %v5871_v26 = vcombine.high %v5869_v28, %v5869_v28  ;;  %v5885_v48 = vrot.slane %v5869_v28, %v14846_v53  ;;  %v5892_v13 = vrot.slane %v5870_v41, %v14846_v53  ;;  %v5900_v0 = vcombine.high %v5878_v60, %v5878_v60 }
 0xe1f   :  { %v5907_v54 = vrot.slane %v5878_v60, %v14850_v15 }
 0xe20   :  { %v5899_v20 = vrot.slane %v5871_v26, %v14846_v53  ;;  %v5901_v49 = vcombine.high %v5885_v48, %v5885_v48  ;;  %v5902_v36 = vcombine.high %v5892_v13, %v5892_v13  ;;  %v5911_v27 = vrot.slane %v5892_v13, %v14850_v15 }
 0xe21   :  { %v5915_v3 = vrot.slane %v5900_v0, %v14850_v15  ;;  %v5923_v23 = vrot.slane %v5885_v48, %v14850_v15  ;;  %v5944_v25 = vsel %vm263_vm0, %v5820_v22, %v5907_v54  ;;  %v6010_v0 = vld [vmem:[#allocation2 + $0x988] sm:$0xff] }
 0xe22   :  { %v5903_v51 = vcombine.high %v5899_v20, %v5899_v20  ;;  %v5919_v30 = vrot.slane %v5902_v36, %v14850_v15  ;;  %v5927_v58 = vrot.slane %v5899_v20, %v14850_v15  ;;  %v5931_v19 = vrot.slane %v5901_v49, %v14850_v15 }
 0xe23   :  { %v5945_v8 = vsel %vm263_vm0, %v5834_v57, %v5911_v27  ;;  %v5946_v63 = vsel %vm263_vm0, %v5842_v50, %v5915_v3  ;;  %v5948_v18 = vsel %vm263_vm0, %v5827_v52, %v5923_v23  ;;  %v6177_v3 = vld [vmem:[#allocation2 + $0x9a0] sm:$0xff] }
 0xe24   :  { %v5935_v11 = vrot.slane %v5903_v51, %v14850_v15  ;;  %v5947_v5 = vsel %vm263_vm0, %v5844_v12, %v5919_v30  ;;  %v5949_v47 = vsel %vm263_vm0, %v5841_v7, %v5927_v58  ;;  %v5950_v37 = vsel %vm263_vm0, %v5843_v40, %v5931_v19  ;;  %v6011_v7 = vld [vmem:[#allocation2 + $0x990] sm:$0xff]  ;;  %v6176_v12 = vld [vmem:[#allocation2 + $0x998] sm:$0xff]  ;;  %v6279_v19 = vld [vmem:[#allocation2 + $0x9c0] sm:$0xff] }
 0xe25   :  { %v5960_v21 = vcombine.low %v5944_v25, %v5945_v8  ;;  %v5961_v56 = vcombine.low %v5946_v63, %v5947_v5  ;;  %v5977_v29 = vcombine.low %v5948_v18, %v5949_v47  ;;  %v13608_v27 = vpack.c.bf16 %v6011_v7, %v6010_v0  ;;  %v6178_v25 = vld [vmem:[#allocation2 + $0x9a8] sm:$0xff]  ;;  %v6179_v51 = vld [vmem:[#allocation2 + $0x9b0] sm:$0xff]  ;;  %v6446_v0 = vld [vmem:[#allocation2 + $0xa18] sm:$0xff] }
 0xe26   :  { %v5951_v33 = vsel %vm263_vm0, %v5845_v6, %v5935_v11  ;;  %v13612_v23 = vpack.c.bf16 %v6177_v3, %v6176_v12  ;;  %v13616_v30 = vpack.c.bf16 %v6179_v51, %v6178_v25  ;;  %v6280_v6 = vld [vmem:[#allocation2 + $0x9c8] sm:$0xff]  ;;  %v6263_v8 = vrot.slane %v14655_v46, 7  ;;  %v6281_v18 = vld [vmem:[#allocation2 + $0x9d0] sm:$0xff]  ;;  %v6282_v11 = vld [vmem:[#allocation2 + $0x9d8] sm:$0xff] }
 0xe27   :  { %v5968_v38 = vrot.slane %v5960_v21, %v14209_v35  ;;  %v5975_v31 = vrot.slane %v5961_v56, %v14209_v35  ;;  %v5978_v22 = vcombine.low %v5950_v37, %v5951_v33  ;;  %v5985_v52 = vrot.slane %v5977_v29, %v14209_v35  ;;  %v6275_v56 = vld [vmem:[#allocation2 + $0x9e0] sm:$0xff]  ;;  %v6276_v29 = vld [vmem:[#allocation2 + $0x9e8] sm:$0xff]  ;;  %v6560_v12 = vld [vmem:[#allocation2 + $0xa38] sm:$0xff] }
 0xe28   :  { %v6264_v63 = vrot.slane %v14653_v4, 7  ;;  %v13624_v37 = vpack.c.bf16 %v6282_v11, %v6281_v18  ;;  %v13628_v33 = vpack.c.bf16 %v6276_v29, %v6275_v56  ;;  %v6553_v3 = vld [vmem:[#allocation2 + $0xa40] sm:$0xff]  ;;  %v11217_v51 = vld [vmem:[#allocation2 + $0x9b8] ss:$0 sm:$0xff] }
 0xe29   :  { %v5976_v28 = vcombine.low %v5968_v38, %v5975_v31  ;;  %v5992_v41 = vrot.slane %v5978_v22, %v14209_v35  ;;  %v6277_v31 = vld [vmem:[#allocation2 + $0x9f0] sm:$0xff]  ;;  %v6278_v22 = vld [vmem:[#allocation2 + $0x9f8] sm:$0xff] }
 0xe2a   :  { %v6266_v5 = vsel %vm194_vm3, %v6264_v63, %v6263_v8  ;;  %v6265_v38 = vsel %vm194_vm3, %v6263_v8, %v6264_v63 }
 0xe2b   :  { %v5993_v60 = vcombine.low %v5985_v52, %v5992_v41  ;;  %v5996_v57 = vrot.slane %v5976_v28, 7  ;;  %v6002_v48 = vrot.slane %v5976_v28, 1  ;;  %v6267_v21 = vmul.f32 %v14595_v14, %v6266_v5  ;;  %v6443_v41 = vld [vmem:[#allocation2 + $0xa00] sm:$0xff] }
 0xe2c   :  { %v6268_v52 = vmul.f32 %v14598_v2, %v6265_v38 }
 0xe2d   :  { %v5997_v26 = vrot.slane %v5993_v60, 7  ;;  %v6003_v13 = vrot.slane %v5993_v60, 1 }
 0xe2f   :  { %v5999_v50 = vsel %vm194_vm3, %v5997_v26, %v5996_v57  ;;  %v5998_v40 = vsel %vm194_vm3, %v5996_v57, %v5997_v26  ;;  %v6004_v54 = vsel %vm219_vm5, %v6002_v48, %v6003_v13  ;;  %v6005_v20 = vsel %vm219_vm5, %v6003_v13, %v6002_v48  ;;  %v6445_v13 = vld [vmem:[#allocation2 + $0xa10] sm:$0xff] }
 0xe30   :  { %v6000_v49 = vmul.f32 %v14595_v14, %v5999_v50  ;;  %v6001_v36 = vmul.f32 %v14598_v2, %v5998_v40  ;;  %v6006_v58 = vmul.f32 %v14611_v9, %v6004_v54  ;;  %v6007_v47 = vmul.f32 %v14619_v55, %v6005_v20  ;;  %v6557_v20 = vld [vmem:[#allocation2 + $0xa20] sm:$0xff] }
 0xe31   :  { %v6269_v57 = vrot.slane %v14655_v46, 1  ;;  %v6270_v26 = vrot.slane %v14653_v4, 1  ;;  %v13640_v50 = vpack.c.bf16 %v6446_v0, %v6445_v13 }
 0xe32   :  { %12781 = vmatprep.mubr.msk.f32.mxu0 %vm2907_vm4, %v6000_v49  ;;  %v6558_v49 = vld [vmem:[#allocation2 + $0xa28] sm:$0xff] }
 0xe33   :  { %12782 = vmatmul.mubr.msk.f32.vlgmr.msra.gmra.mrb[42].mxu0 %vm2907_vm4, %v6001_v36  ;;  %v6271_v7 = vsel %vm219_vm5, %v6269_v57, %v6270_v26  ;;  %v13644_v36 = vpack.c.bf16 %v6558_v49, %v6557_v20  ;;  %v11224_v49 = vld [vmem:[#allocation2 + $0xa80] ss:$0 sm:$0xff] }
 0xe34   :  { %13607 = vmatpush3.bf16.msra.mxu0 %v14947_v17  ;;  %12792 = vmatprep.mubr.msk.f32.mxu0 %vm2907_vm4, %v5976_v28  ;;  %v13620_v17 = vpack.c.bf16 %v6280_v6, %v6279_v19  ;;  %v13632_v28 = vpack.c.bf16 %v6278_v22, %v6277_v31  ;;  %v6273_v40 = vmul.f32 %v14611_v9, %v6271_v7  ;;  %v6828_v7 = vld [vmem:[#allocation2 + $0xab8] sm:$0xff] }
 0xe35   :  { %13609 = vmatprep.subr.bf16.mxu0 %v13608_v27  ;;  %13645 = vmatprep.subr.bf16.mxu1 %v13644_v36 }
 0xe36   :  { %13647 = vmatpush3.bf16.msra.mxu1 %v13644_v36 }
 0xe38   :  { %13611 = vmatpush3.bf16.msra.mxu0 %v13608_v27  ;;  %v6559_v27 = vld [vmem:[#allocation2 + $0xa30] sm:$0xff] }
 0xe39   :  { %13613 = vmatprep.subr.bf16.mxu0 %v13612_v23 }
 0xe3b   :  { %12793 = vmatmul.mubr.msk.f32.vlgmr.msra.gmra.mrb[42].mxu0 %vm2907_vm4, %v5993_v60  ;;  %v6444_v60 = vld [vmem:[#allocation2 + $0xa08] sm:$0xff] }
 0xe3c   :  { %13615 = vmatpush3.bf16.msra.mxu0 %v13612_v23  ;;  %12803 = vmatprep.mubr.msk.f32.mxu0 %vm2907_vm4, %v6006_v58  ;;  %v13636_v48 = vpack.c.bf16 %v6444_v60, %v6443_v41  ;;  %v6554_v23 = vld [vmem:[#allocation2 + $0xa48] sm:$0xff]  ;;  %v6725_v60 = vld [vmem:[#allocation2 + $0xa70] sm:$0xff] }
 0xe3d   :  { %13617 = vmatprep.subr.bf16.mxu0 %v13616_v30  ;;  %v13652_v25 = vpack.c.bf16 %v6554_v23, %v6553_v3  ;;  %v6921_v3 = vld [vmem:[#allocation2 + $0xa98] sm:$0xff]  ;;  %v6922_v23 = vld [vmem:[#allocation2 + $0xaa0] sm:$0xff] }
 0xe40   :  { %13619 = vmatpush3.bf16.msra.mxu0 %v13616_v30 }
 0xe41   :  { %13621 = vmatprep.subr.bf16.mxu0 %v13620_v17 }
 0xe43   :  { %12804 = vmatmul.mubr.msk.f32.vlgmr.msra.gmra.mrb[42].mxu0 %vm2907_vm4, %v6007_v47  ;;  %v6555_v47 = vld [vmem:[#allocation2 + $0xa50] sm:$0xff] }
 0xe44   :  { %13623 = vmatpush3.bf16.msra.mxu0 %v13620_v17  ;;  %12814 = vmatprep.mubr.msk.f32.mxu0 %vm2907_vm4, %v6267_v21 }
 0xe45   :  { %13625 = vmatprep.subr.bf16.mxu0 %v13624_v37 }
 0xe48   :  { %13627 = vmatpush3.bf16.msra.mxu0 %v13624_v37  ;;  %v6556_v37 = vld [vmem:[#allocation2 + $0xa58] sm:$0xff] }
 0xe49   :  { %13629 = vmatprep.subr.bf16.mxu0 %v13628_v33  ;;  %v13656_v22 = vpack.c.bf16 %v6556_v37, %v6555_v47  ;;  %v6918_v47 = vld [vmem:[#allocation2 + $0xae0] sm:$0xff] }
 0xe4b   :  { %12815 = vmatmul.mubr.msk.f32.vlgmr.msra.gmra.mrb[42].mxu0 %vm2907_vm4, %v6268_v52  ;;  %v6723_v52 = vld [vmem:[#allocation2 + $0xa60] sm:$0xff] }
 0xe4c   :  { %13631 = vmatpush3.bf16.msra.mxu0 %v13628_v33  ;;  %12825 = vmatprep.mubr.msk.f32.mxu0 %vm2907_vm4, %v14655_v46  ;;  %v6272_v46 = vsel %vm219_vm5, %v6270_v26, %v6269_v57  ;;  %v6726_v57 = vld [vmem:[#allocation2 + $0xa78] sm:$0xff] }
 0xe4d   :  { %13633 = vmatprep.subr.bf16.mxu0 %v13632_v28  ;;  %v6274_v54 = vmul.f32 %v14619_v55, %v6272_v46  ;;  %v13664_v26 = vpack.c.bf16 %v6726_v57, %v6725_v60  ;;  %v6919_v46 = vld [vmem:[#allocation2 + $0xa88] sm:$0xff] }
 0xe50   :  { %13635 = vmatpush3.bf16.msra.mxu0 %v13632_v28  ;;  %v6724_v28 = vld [vmem:[#allocation2 + $0xa68] sm:$0xff] }
 0xe51   :  { %13637 = vmatprep.subr.bf16.mxu0 %v13636_v48  ;;  %v13660_v41 = vpack.c.bf16 %v6724_v28, %v6723_v52 }
 0xe53   :  { %12826 = vmatmul.mubr.msk.f32.vlgmr.msra.gmra.mrb[42].mxu0 %vm2907_vm4, %v14653_v4  ;;  %v13648_v4 = vpack.c.bf16 %v6560_v12, %v6559_v27 }
 0xe54   :  { %13639 = vmatpush3.bf16.msra.mxu0 %v13636_v48  ;;  %12836 = vmatprep.mubr.msk.f32.mxu0 %vm2907_vm4, %v6273_v40  ;;  %v6827_v48 = vld [vmem:[#allocation2 + $0xab0] sm:$0xff] }
 0xe55   :  { %13641 = vmatprep.subr.bf16.mxu0 %v13640_v50  ;;  %13649 = vmatprep.subr.bf16.mxu1 %v13648_v4 }
 0xe56   :  { %13651 = vmatpush3.bf16.msra.mxu1 %v13648_v4 }
 0xe57   :  { %13653 = vmatprep.subr.bf16.mxu1 %v13652_v25 }
 0xe58   :  { %13643 = vmatpush3.bf16.msra.mxu0 %v13640_v50  ;;  %v6829_v50 = vld [vmem:[#allocation2 + $0xac0] sm:$0xff] }
 0xe59   :  { %v13672_v40 = vpack.c.bf16 %v6829_v50, %v6828_v7 }
 0xe5b   :  { %12837 = vmatmul.mubr.msk.f32.vlgmr.msra.gmra.mrb[42].mxu0 %vm2907_vm4, %v6274_v54  ;;  %v6920_v54 = vld [vmem:[#allocation2 + $0xa90] sm:$0xff] }
 0xe5c   :  { %v13676_v20 = vpack.c.bf16 %v6920_v54, %v6919_v46 }
 0xf2e   :  { %v12838_v30 = vpop.f32.mrb[42].mxu0 }
 0xf2f   :  { %v6538_v58 = vadd.f32 %v12838_v30, %v11217_v51  ;;  %v6519_v19 = vpop.f32.mrb[43].mxu0 }
 0xf30   :  { %v6537_v6 = vadd.f32 %v11217_v51, %v6519_v19 }
 0xf31   :  { %v6540_v8 = vmax.f32 %v6538_v58, 0.0  ;;  %v13680_v58 = vpack.c.bf16 %v6922_v23, %v6921_v3 }
 0xf32   :  { %v6539_v63 = vmax.f32 %v6537_v6, 0.0  ;;  %v6915_v6 = vld [vmem:[#allocation2 + $0xac8] sm:$0xff] }
 0xf33   :  { %v6542_v17 = vrot.slane %v6540_v8, 7  ;;  %v6548_v18 = vrot.slane %v6540_v8, 1 }
 0xf34   :  { %v6541_v11 = vrot.slane %v6539_v63, 7  ;;  %v6547_v5 = vrot.slane %v6539_v63, 1 }
 0xf36   :  { %v6543_v21 = vsel %vm194_vm3, %v6541_v11, %v6542_v17  ;;  %v6550_v56 = vsel %vm219_vm5, %v6548_v18, %v6547_v5  ;;  %v6544_v29 = vsel %vm194_vm3, %v6542_v17, %v6541_v11  ;;  %v6549_v33 = vsel %vm219_vm5, %v6547_v5, %v6548_v18  ;;  %v6917_v5 = vld [vmem:[#allocation2 + $0xad8] sm:$0xff] }
 0xf37   :  { %v6546_v38 = vmul.f32 %v14598_v2, %v6543_v21  ;;  %v6545_v31 = vmul.f32 %v14595_v14, %v6544_v29  ;;  %v6551_v2 = vmul.f32 %v14611_v9, %v6549_v33  ;;  %v6826_v14 = vld [vmem:[#allocation2 + $0xaa8] sm:$0xff]  ;;  %v6552_v0 = vmul.f32 %v14619_v55, %v6550_v56  ;;  %v7508_v56 = vld [vmem:[#allocation2 + $0xaf8] sm:$0xff]  ;;  %v7505_v33 = vld [vmem:[#allocation2 + $0xb00] sm:$0xff] }
 0xf38   :  { %v13668_v13 = vpack.c.bf16 %v6827_v48, %v6826_v14  ;;  %v13688_v21 = vpack.c.bf16 %v6918_v47, %v6917_v5 }
 0xf39   :  { %12847 = vmatprep.mubr.msk.f32.mxu1 %vm2907_vm4, %v6545_v31 }
 0xf3a   :  { %12848 = vmatmul.mubr.msk.f32.vlgmr.msra.gmra.mrb[48].mxu1 %vm2907_vm4, %v6546_v38  ;;  %v7506_v38 = vld [vmem:[#allocation2 + $0xb08] sm:$0xff] }
 0xf3b   :  { %13655 = vmatpush3.bf16.msra.mxu1 %v13652_v25  ;;  %12858 = vmatprep.mubr.msk.f32.mxu1 %vm2907_vm4, %v6539_v63  ;;  %v15055_v31 = vpack.c.bf16 %v7506_v38, %v7505_v33 }
 0xf3c   :  { %13657 = vmatprep.subr.bf16.mxu1 %v13656_v22 }
 0xf3f   :  { %13659 = vmatpush3.bf16.msra.mxu1 %v13656_v22 }
 0xf40   :  { %13661 = vmatprep.subr.bf16.mxu1 %v13660_v41 }
 0xf42   :  { %12859 = vmatmul.mubr.msk.f32.vlgmr.msra.gmra.mrb[48].mxu1 %vm2907_vm4, %v6540_v8  ;;  %v6916_v8 = vld [vmem:[#allocation2 + $0xad0] sm:$0xff] }
 0xf43   :  { %13663 = vmatpush3.bf16.msra.mxu1 %v13660_v41  ;;  %12869 = vmatprep.mubr.msk.f32.mxu1 %vm2907_vm4, %v6551_v2  ;;  %v13684_v11 = vpack.c.bf16 %v6916_v8, %v6915_v6 }
 0xf44   :  { %13665 = vmatprep.subr.bf16.mxu1 %v13664_v26 }
 0xf47   :  { %13667 = vmatpush3.bf16.msra.mxu1 %v13664_v26 }
 0xf48   :  { %13669 = vmatprep.subr.bf16.mxu1 %v13668_v13 }
 0xf4a   :  { %12870 = vmatmul.mubr.msk.f32.vlgmr.msra.gmra.mrb[48].mxu1 %vm2907_vm4, %v6552_v0 }
 0xf4b   :  { %13671 = vmatpush3.bf16.msra.mxu1 %v13668_v13 }
 0xf4c   :  { %13673 = vmatprep.subr.bf16.mxu1 %v13672_v40 }
 0xf4f   :  { %13675 = vmatpush3.bf16.msra.mxu1 %v13672_v40 }
 0xf50   :  { %13677 = vmatprep.subr.bf16.mxu1 %v13676_v20 }
0x101d   :  { %v12871_v36 = vpop.f32.mrb[48].mxu1 }
0x101e   :  { %v6816_v27 = vadd.f32 %v12871_v36, %v11224_v49  ;;  %v6799_v12 = vpop.f32.mrb[49].mxu1 }
0x101f   :  { %v6815_v4 = vadd.f32 %v11224_v49, %v6799_v12 }
0x1020   :  { %v6818_v25 = vmax.f32 %v6816_v27, 0.0 }
0x1021   :  { %v6817_v51 = vmax.f32 %v6815_v4, 0.0 }
0x1022   :  { %v6821_v30 = vrot.slane %v6818_v25, 1 }
0x1023   :  { %v6820_v19 = vrot.slane %v6817_v51, 1  ;;  %12880 = vmatprep.mubr.msk.f32.mxu1 %vm2907_vm4, %v6817_v51 }
0x1024   :  { %12881 = vmatmul.mubr.msk.f32.vlgmr.msra.gmra.mrb[50].mxu1 %vm2907_vm4, %v6818_v25 }
0x1025   :  { %v6823_v63 = vsel %vm219_vm5, %v6821_v30, %v6820_v19  ;;  %13679 = vmatpush3.bf16.msra.mxu1 %v13676_v20  ;;  %v6822_v17 = vsel %vm219_vm5, %v6820_v19, %v6821_v30 }
0x1026   :  { %13681 = vmatprep.subr.bf16.mxu1 %v13680_v58  ;;  %v6824_v18 = vmul.f32 %v14611_v9, %v6822_v17  ;;  %v6825_v37 = vmul.f32 %v14619_v55, %v6823_v63  ;;  %v7507_v9 = vld [vmem:[#allocation2 + $0xaf0] sm:$0xff]  ;;  %v11225_v55 = vld [vmem:[#allocation2 + $0xae8] ss:$0 sm:$0xff] }
0x1027   :  { %v13692_v29 = vpack.c.bf16 %v7508_v56, %v7507_v9 }
0x1028   :  { %12891 = vmatprep.mubr.msk.f32.mxu1 %vm2907_vm4, %v6824_v18 }
0x1029   :  { %13683 = vmatpush3.bf16.msra.mxu1 %v13680_v58  ;;  %13693 = vmatprep.subr.bf16.mxu0 %v13692_v29 }
0x102a   :  { %13685 = vmatprep.subr.bf16.mxu1 %v13684_v11  ;;  %13695 = vmatpush3.bf16.msra.mxu0 %v13692_v29 }
0x102b   :  { %13697 = vmatprep.subr.bf16.mxu0 %v15055_v31 }
0x102c   :  { %12892 = vmatmul.mubr.msk.f32.vlgmr.msra.gmra.mrb[52].mxu1 %vm2907_vm4, %v6825_v37 }
0x102d   :  { %13687 = vmatpush3.bf16.msra.mxu1 %v13684_v11  ;;  %12902 = vmatprep.mubr.msk.f32.mxu1 %vm2907_vm4, %v6817_v51 }
0x102e   :  { %13689 = vmatprep.subr.bf16.mxu1 %v13688_v21 }
0x1031   :  { %13691 = vmatpush3.bf16.msra.mxu1 %v13688_v21 }
0x1034   :  { %12903 = vmatmul.mubr.msk.f32.vlgmr.msra.gmra.mrb[52].mxu1 %vm2907_vm4, %v6818_v25 }
0x10f7   :  { %v12882_v22 = vpop.f32.mrb[50].mxu1 }
0x10f8   :  { %v6912_v52 = vadd.f32 %v12882_v22, %v11225_v55  ;;  %v6906_v28 = vpop.f32.mrb[51].mxu1 }
0x10f9   :  { %v6907_v41 = vadd.f32 %v11225_v55, %v6906_v28 }
0x10fa   :  { %v7132_v60 = vcombine.high %v6912_v52, %v6912_v52  ;;  %v7139_v26 = vrot.slane %v6912_v52, %v14846_v53 }
0x10fb   :  { %v7083_v57 = vcombine.high %v6907_v41, %v6907_v41  ;;  %v7090_v2 = vrot.slane %v6907_v41, %v14846_v53 }
0x10fc   :  { %v7146_v14 = vrot.slane %v7132_v60, %v14846_v53  ;;  %v7147_v13 = vcombine.high %v7139_v26, %v7139_v26  ;;  %v7155_v50 = vrot.slane %v7139_v26, %v14846_v53 }
0x10fd   :  { %v7097_v48 = vrot.slane %v7083_v57, %v14846_v53  ;;  %v7098_v0 = vcombine.high %v7090_v2, %v7090_v2  ;;  %v15064_v46 = vrot.slane %v7090_v2, %v14846_v53 }
0x10fe   :  { %v7148_v7 = vcombine.high %v7146_v14, %v7146_v14  ;;  %v7162_v54 = vrot.slane %v7146_v14, %v14846_v53  ;;  %v7169_v20 = vrot.slane %v7147_v13, %v14846_v53  ;;  %v7177_v23 = vcombine.high %v7155_v50, %v7155_v50 }
0x10ff   :  { %v7099_v40 = vcombine.high %v7097_v48, %v7097_v48  ;;  %v15069_v49 = vrot.slane %v7097_v48, %v14846_v53  ;;  %v15072_v36 = vrot.slane %v7098_v0, %v14846_v53  ;;  %v7128_v51 = vcombine.high %v15064_v46, %v15064_v46 }
0x1100   :  { %v7176_v12 = vrot.slane %v7148_v7, %v14846_v53  ;;  %v7178_v58 = vcombine.high %v7162_v54, %v7162_v54  ;;  %v7179_v19 = vcombine.high %v7169_v20, %v7169_v20 }
0x1101   :  { %v15076_v25 = vrot.slane %v7099_v40, %v14846_v53  ;;  %v7129_v63 = vcombine.high %v15069_v49, %v15069_v49  ;;  %v7130_v17 = vcombine.high %v15072_v36, %v15072_v36 }
0x1102   :  { %v7180_v5 = vcombine.high %v7176_v12, %v7176_v12 }
0x1103   :  { %v7131_v9 = vcombine.high %v15076_v25, %v15076_v25 }
0x1107   :  { %v12904_v27 = vpop.f32.mrb[52].mxu1 }
0x1108   :  { %v7080_v4 = vadd.f32 %v12904_v27, %v11225_v55  ;;  %v7070_v3 = vpop.f32.mrb[53].mxu1 }
0x1109   :  { %v7079_v30 = vadd.f32 %v11225_v55, %v7070_v3 }
0x110a   :  { %v7248_v6 = vcombine.high %v7080_v4, %v7080_v4  ;;  %v7255_v8 = vrot.slane %v7080_v4, %v14846_v53 }
0x110b   :  { %v7199_v18 = vcombine.high %v7079_v30, %v7079_v30  ;;  %v7206_v11 = vrot.slane %v7079_v30, %v14846_v53 }
0x110c   :  { %v7262_v47 = vrot.slane %v7248_v6, %v14846_v53  ;;  %v7263_v37 = vcombine.high %v7255_v8, %v7255_v8  ;;  %v7271_v21 = vrot.slane %v7255_v8, %v14846_v53 }
0x110d   :  { %v7213_v56 = vrot.slane %v7199_v18, %v14846_v53  ;;  %v7214_v29 = vcombine.high %v7206_v11, %v7206_v11  ;;  %v7222_v33 = vrot.slane %v7206_v11, %v14846_v53 }
0x110e   :  { %v7264_v38 = vcombine.high %v7262_v47, %v7262_v47  ;;  %v7278_v55 = vrot.slane %v7262_v47, %v14846_v53  ;;  %v7285_v22 = vrot.slane %v7263_v37, %v14846_v53  ;;  %v7293_v52 = vcombine.high %v7271_v21, %v7271_v21 }
0x110f   :  { %v7332_v28 = vrot.slane %v7271_v21, %v14850_v15  ;;  %v7215_v41 = vcombine.high %v7213_v56, %v7213_v56  ;;  %v7229_v60 = vrot.slane %v7213_v56, %v14846_v53  ;;  %v7236_v57 = vrot.slane %v7214_v29, %v14846_v53 }
0x1110   :  { %v7292_v26 = vrot.slane %v7264_v38, %v14846_v53  ;;  %v7294_v2 = vcombine.high %v7278_v55, %v7278_v55  ;;  %v7295_v14 = vcombine.high %v7285_v22, %v7285_v22  ;;  %v7336_v48 = vrot.slane %v7285_v22, %v14850_v15 }
0x1111   :  { %v7340_v13 = vrot.slane %v7293_v52, %v14850_v15  ;;  %v7348_v0 = vrot.slane %v7278_v55, %v14850_v15  ;;  %v7385_v7 = vsel %vm263_vm0, %v7155_v50, %v7332_v28  ;;  %v7243_v40 = vrot.slane %v7215_v41, %v14846_v53 }
0x1112   :  { %v7296_v27 = vcombine.high %v7292_v26, %v7292_v26  ;;  %v7344_v4 = vrot.slane %v7295_v14, %v14850_v15  ;;  %v7352_v3 = vrot.slane %v7292_v26, %v14850_v15  ;;  %v7356_v30 = vrot.slane %v7294_v2, %v14850_v15 }
0x1113   :  { %v7386_v6 = vsel %vm263_vm0, %v7169_v20, %v7336_v48  ;;  %v7387_v8 = vsel %vm263_vm0, %v7177_v23, %v7340_v13  ;;  %v7389_v18 = vsel %vm263_vm0, %v7162_v54, %v7348_v0  ;;  %v7244_v11 = vcombine.high %v7222_v33, %v7222_v33 }
0x1114   :  { %v7360_v47 = vrot.slane %v7296_v27, %v14850_v15  ;;  %v7388_v50 = vsel %vm263_vm0, %v7179_v19, %v7344_v4  ;;  %v7390_v37 = vsel %vm263_vm0, %v7176_v12, %v7352_v3  ;;  %v7391_v21 = vsel %vm263_vm0, %v7178_v58, %v7356_v30 }
0x1115   :  { %v7443_v56 = vcombine.low %v7385_v7, %v7386_v6  ;;  %v7444_v29 = vcombine.low %v7387_v8, %v7388_v50  ;;  %v7460_v38 = vcombine.low %v7389_v18, %v7390_v37  ;;  %v7245_v55 = vcombine.high %v7229_v60, %v7229_v60 }
0x1116   :  { %v7392_v22 = vsel %vm263_vm0, %v7180_v5, %v7360_v47  ;;  %v7246_v20 = vcombine.high %v7236_v57, %v7236_v57  ;;  %v7247_v52 = vcombine.high %v7243_v40, %v7243_v40  ;;  %v7300_v23 = vrot.slane %v7222_v33, %v14850_v15 }
0x1117   :  { %v7451_v54 = vrot.slane %v7443_v56, %v14209_v35  ;;  %v7458_v28 = vrot.slane %v7444_v29, %v14209_v35  ;;  %v7461_v41 = vcombine.low %v7391_v21, %v7392_v22  ;;  %v7468_v19 = vrot.slane %v7460_v38, %v14209_v35  ;;  %v7700_v22 = vld [vmem:[#allocation2 + $0xb18] sm:$0xff] }
0x1118   :  { %v7304_v12 = vrot.slane %v7236_v57, %v14850_v15  ;;  %v7308_v58 = vrot.slane %v7244_v11, %v14850_v15  ;;  %v7312_v26 = vrot.slane %v7246_v20, %v14850_v15  ;;  %v7316_v2 = vrot.slane %v7229_v60, %v14850_v15 }
0x1119   :  { %v7459_v5 = vcombine.low %v7451_v54, %v7458_v28  ;;  %v7475_v14 = vrot.slane %v7461_v41, %v14209_v35  ;;  %v7320_v33 = vrot.slane %v7243_v40, %v14850_v15  ;;  %v7324_v48 = vrot.slane %v7245_v55, %v14850_v15  ;;  %v7699_v55 = vld [vmem:[#allocation2 + $0xb10] sm:$0xff] }
0x111a   :  { %v7328_v13 = vrot.slane %v7247_v52, %v14850_v15  ;;  %v7377_v0 = vsel %vm263_vm0, %v15064_v46, %v7300_v23  ;;  %v7378_v57 = vsel %vm263_vm0, %v15072_v36, %v7304_v12  ;;  %v7379_v60 = vsel %vm263_vm0, %v7128_v51, %v7308_v58 }
0x111b   :  { %v7380_v7 = vsel %vm263_vm0, %v7130_v17, %v7312_v26  ;;  %v7381_v40 = vsel %vm263_vm0, %v15069_v49, %v7316_v2  ;;  %v7382_v27 = vsel %vm263_vm0, %v15076_v25, %v7320_v33  ;;  %v7383_v4 = vsel %vm263_vm0, %v7129_v63, %v7324_v48  ;;  %v7828_v2 = vld [vmem:[#allocation2 + $0xb28] sm:$0xff]  ;;  %v7826_v48 = vld [vmem:[#allocation2 + $0xb38] sm:$0xff] }
0x111c   :  { %v7384_v46 = vsel %vm263_vm0, %v7131_v9, %v7328_v13  ;;  %v7409_v3 = vcombine.low %v7377_v0, %v7378_v57  ;;  %v7410_v51 = vcombine.low %v7379_v60, %v7380_v7  ;;  %v7426_v30 = vcombine.low %v7381_v40, %v7382_v27  ;;  %v7827_v13 = vld [vmem:[#allocation2 + $0xb40] sm:$0xff] }
0x111d   :  { %v7427_v6 = vcombine.low %v7383_v4, %v7384_v46  ;;  %v7476_v36 = vcombine.low %v7468_v19, %v7475_v14  ;;  %v7483_v18 = vrot.slane %v7459_v5, 7  ;;  %v7495_v11 = vrot.slane %v7459_v5, 1  ;;  %v7829_v14 = vld [vmem:[#allocation2 + $0xb30] sm:$0xff]  ;;  %v8020_v46 = vld [vmem:[#allocation2 + $0xb48] sm:$0xff] }
0x111e   :  { %v7417_v17 = vrot.slane %v7409_v3, %v14209_v35  ;;  %v7424_v8 = vrot.slane %v7410_v51, %v14209_v35  ;;  %v7434_v25 = vrot.slane %v7426_v30, %v14209_v35  ;;  %v13700_v58 = vpack.c.bf16 %v7700_v22, %v7699_v55  ;;  %v8021_v3 = vld [vmem:[#allocation2 + $0xb50] sm:$0xff] }
0x111f   :  { %v7484_v47 = vrot.slane %v7476_v36, 7  ;;  %v7441_v49 = vrot.slane %v7427_v6, %v14209_v35  ;;  %v7496_v50 = vrot.slane %v7476_v36, 1  ;;  %v13704_v33 = vpack.c.bf16 %v7829_v14, %v7828_v2 }
0x1120   :  { %v7425_v63 = vcombine.low %v7417_v17, %v7424_v8  ;;  %v7802_v57 = vrot.slane %v14528_v24, 7  ;;  %v13708_v60 = vpack.c.bf16 %v7827_v13, %v7826_v48  ;;  %v7804_v7 = vrot.slane %v14555_v10, 7 }
0x1121   :  { %v7442_v37 = vcombine.low %v7434_v25, %v7441_v49  ;;  %v7485_v9 = vsel %vm194_vm3, %v7483_v18, %v7484_v47  ;;  %v7497_v21 = vsel %vm219_vm5, %v7495_v11, %v7496_v50  ;;  %v7803_v27 = vrot.slane %v14526_v62, 7 }
0x1122   :  { %v7481_v56 = vrot.slane %v7425_v63, 7  ;;  %v7493_v29 = vrot.slane %v7425_v63, 1  ;;  %v13712_v30 = vpack.c.bf16 %v8021_v3, %v8020_v46  ;;  %v7816_v8 = vrot.slane %v14555_v10, 1 }
0x1123   :  { %v7482_v38 = vrot.slane %v7442_v37, 7  ;;  %v7494_v20 = vrot.slane %v7442_v37, 1  ;;  %v7807_v51 = vsel %vm194_vm3, %v7803_v27, %v7804_v7  ;;  %v7808_v6 = vsel %vm194_vm3, %v7802_v57, %v7803_v27 }
0x1124   :  { %v7488_v52 = vsel %vm194_vm3, %v7484_v47, %v7481_v56  ;;  %v7500_v23 = vsel %vm219_vm5, %v7496_v50, %v7493_v29  ;;  %v7817_v47 = vrot.slane %v14547_v42, 1 }
0x1125   :  { %v7489_v54 = vmul.f32 %v14441_v61, %v7488_v52  ;;  %v7487_v28 = vsel %vm194_vm3, %v7481_v56, %v7482_v38  ;;  %v7486_v41 = vsel %vm194_vm3, %v7482_v38, %v7483_v18  ;;  %v7498_v19 = vsel %vm219_vm5, %v7494_v20, %v7495_v11 }
0x1126   :  { %v7491_v12 = vmul.f32 %v14447_v39, %v7486_v41  ;;  %v7499_v26 = vsel %vm219_vm5, %v7493_v29, %v7494_v20  ;;  %v7502_v0 = vmul.f32 %v14471_v45, %v7498_v19  ;;  %v7504_v40 = vmul.f32 %v14481_v59, %v7500_v23  ;;  %v11256_v29 = vld [vmem:[#allocation2 + $0xb20] ss:$0 sm:$0xff] }
0x1127   :  { %12909 = vmatprep.mubr.msk.f32.mxu0 %vm2037_vm9, %v7489_v54  ;;  %v7814_v18 = vrot.slane %v14528_v24, 1  ;;  %v7815_v11 = vrot.slane %v14526_v62, 1 }
0x1128   :  { %12910 = vmatmul.mubr.msk.f32.vlgmr.msra.gmra.mrb[44].mxu0 %vm2037_vm9, %v7487_v28 }
0x1129   :  { %12912 = vmatprep.mubr.msk.f32.mxu0 %vm2037_vm9, %v7491_v12  ;;  %13699 = vmatpush3.bf16.msra.mxu0 %v15055_v31  ;;  %v7805_v31 = vrot.slane %v14547_v42, 7  ;;  %v7819_v25 = vsel %vm219_vm5, %v7815_v11, %v7816_v8  ;;  %v7820_v49 = vsel %vm219_vm5, %v7814_v18, %v7815_v11  ;;  %v8596_v11 = vld [vmem:[#allocation2 + $0xb90] sm:$0xff] }
0x112a   :  { %13701 = vmatprep.subr.bf16.mxu0 %v13700_v58 }
0x112b   :  { %v7806_v17 = vsel %vm194_vm3, %v7804_v7, %v7805_v31  ;;  %v8363_v7 = vld [vmem:[#allocation2 + $0xb80] sm:$0xff] }
0x112c   :  { %12913 = vmatmul.mubr.msk.f32.gmra.mrb[46].mxu0 %vm2037_vm9, %v7485_v9  ;;  %v8164_v9 = vld [vmem:[#allocation2 + $0xb68] sm:$0xff] }
0x112d   :  { %12919 = vmatprep.mubr.msk.f32.mxu0 %vm2037_vm9, %v7425_v63  ;;  %v8167_v63 = vld [vmem:[#allocation2 + $0xb60] sm:$0xff] }
0x1130   :  { %12920 = vmatmul.mubr.msk.f32.vlgmr.msra.gmra.mrb[44].mxu0 %vm2037_vm9, %v7442_v37 }
0x1131   :  { %12922 = vmatprep.mubr.msk.f32.mxu0 %vm2037_vm9, %v7459_v5  ;;  %13703 = vmatpush3.bf16.msra.mxu0 %v13700_v58  ;;  %v7809_v5 = vsel %vm194_vm3, %v7805_v31, %v7802_v57 }
0x1132   :  { %13705 = vmatprep.subr.bf16.mxu0 %v13704_v33  ;;  %v7810_v4 = vmul.f32 %v14441_v61, %v7809_v5  ;;  %v8362_v5 = vld [vmem:[#allocation2 + $0xb78] sm:$0xff] }
0x1134   :  { %12923 = vmatmul.mubr.msk.f32.gmra.mrb[46].mxu0 %vm2037_vm9, %v7476_v36  ;;  %v7812_v36 = vmul.f32 %v14447_v39, %v7807_v51 }
0x1135   :  { %12929 = vmatprep.mubr.msk.f32.mxu0 %vm2037_vm9, %v7499_v26 }
0x1138   :  { %12930 = vmatmul.mubr.msk.f32.vlgmr.msra.gmra.mrb[44].mxu0 %vm2037_vm9, %v7502_v0 }
0x1139   :  { %12932 = vmatprep.mubr.msk.f32.mxu0 %vm2037_vm9, %v7497_v21  ;;  %13707 = vmatpush3.bf16.msra.mxu0 %v13704_v33  ;;  %v8165_v21 = vld [vmem:[#allocation2 + $0xb70] sm:$0xff] }
0x113a   :  { %13709 = vmatprep.subr.bf16.mxu0 %v13708_v60  ;;  %v13720_v56 = vpack.c.bf16 %v8165_v21, %v8164_v9 }
0x113c   :  { %12933 = vmatmul.mubr.msk.f32.gmra.mrb[46].mxu0 %vm2037_vm9, %v7504_v40 }
0x113d   :  { %12939 = vmatprep.mubr.msk.f32.mxu0 %vm2037_vm9, %v7810_v4 }
0x1140   :  { %12940 = vmatmul.mubr.msk.f32.vlgmr.msra.gmra.mrb[44].mxu0 %vm2037_vm9, %v7808_v6  ;;  %v13724_v6 = vpack.c.bf16 %v8363_v7, %v8362_v5 }
0x1141   :  { %12942 = vmatprep.mubr.msk.f32.mxu0 %vm2037_vm9, %v7812_v36  ;;  %13711 = vmatpush3.bf16.msra.mxu0 %v13708_v60 }
0x1142   :  { %13713 = vmatprep.subr.bf16.mxu0 %v13712_v30 }
0x1144   :  { %12943 = vmatmul.mubr.msk.f32.gmra.mrb[46].mxu0 %vm2037_vm9, %v7806_v17  ;;  %v8492_v17 = vld [vmem:[#allocation2 + $0xba8] sm:$0xff] }
0x1145   :  { %12949 = vmatprep.mubr.msk.f32.mxu0 %vm2037_vm9, %v14528_v24  ;;  %v7823_v24 = vmul.f32 %v14471_v45, %v7819_v25  ;;  %v8597_v25 = vld [vmem:[#allocation2 + $0xb98] sm:$0xff] }
0x1148   :  { %12950 = vmatmul.mubr.msk.f32.vlgmr.msra.gmra.mrb[44].mxu0 %vm2037_vm9, %v14526_v62  ;;  %v7821_v62 = vsel %vm219_vm5, %v7817_v47, %v7814_v18 }
0x1149   :  { %12952 = vmatprep.mubr.msk.f32.mxu0 %vm2037_vm9, %v14555_v10  ;;  %13715 = vmatpush3.bf16.msra.mxu0 %v13712_v30  ;;  %v7818_v10 = vsel %vm219_vm5, %v7816_v8, %v7817_v47  ;;  %v7825_v50 = vmul.f32 %v14481_v59, %v7821_v62  ;;  %v13732_v47 = vpack.c.bf16 %v8597_v25, %v8596_v11 }
0x114c   :  { %12953 = vmatmul.mubr.msk.f32.gmra.mrb[46].mxu0 %vm2037_vm9, %v14547_v42  ;;  %v8166_v42 = vld [vmem:[#allocation2 + $0xb58] sm:$0xff] }
0x114d   :  { %12959 = vmatprep.mubr.msk.f32.mxu0 %vm2037_vm9, %v7820_v49  ;;  %v13716_v37 = vpack.c.bf16 %v8167_v63, %v8166_v42  ;;  %v11269_v49 = vld [vmem:[#allocation2 + $0xb88] ss:$0 sm:$0xff]  ;;  %v8594_v42 = vld [vmem:[#allocation2 + $0xbb0] sm:$0xff]  ;;  %v8595_v63 = vld [vmem:[#allocation2 + $0xbb8] sm:$0xff] }
0x114f   :  { %13717 = vmatprep.subr.bf16.mxu1 %v13716_v37 }
0x1150   :  { %12960 = vmatmul.mubr.msk.f32.vlgmr.msra.gmra.mrb[44].mxu0 %vm2037_vm9, %v7823_v24  ;;  %13719 = vmatpush3.bf16.msra.mxu1 %v13716_v37 }
0x1151   :  { %12962 = vmatprep.mubr.msk.f32.mxu0 %vm2037_vm9, %v7818_v10  ;;  %13721 = vmatprep.subr.bf16.mxu1 %v13720_v56 }
0x1154   :  { %12963 = vmatmul.mubr.msk.f32.gmra.mrb[46].mxu0 %vm2037_vm9, %v7825_v50 }
0x1223   :  { %v12961_v38 = vpop.f32.mrb[44].mxu0 }
0x1224   :  { %v8133_v55 = vadd.f32 %v12961_v38, %v11256_v29  ;;  %v8100_v22 = vpop.f32.mrb[45].mxu0 }
0x1225   :  { %v8132_v20 = vadd.f32 %v11256_v29, %v8100_v22 }
0x1226   :  { %v8137_v52 = vmax.f32 %v8133_v55, 0.0  ;;  %v13736_v55 = vpack.c.bf16 %v8595_v63, %v8594_v42 }
0x1227   :  { %v8136_v23 = vmax.f32 %v8132_v20, 0.0  ;;  %v12964_v54 = vpop.f32.mrb[46].mxu0 }
0x1228   :  { %v8141_v28 = vrot.slane %v8137_v52, 7  ;;  %v8153_v41 = vrot.slane %v8137_v52, 1  ;;  %v8135_v19 = vadd.f32 %v12964_v54, %v11256_v29  ;;  %v8110_v12 = vpop.f32.mrb[47].mxu0 }
0x1229   :  { %v8140_v58 = vrot.slane %v8136_v23, 7  ;;  %v8152_v26 = vrot.slane %v8136_v23, 1  ;;  %v8134_v2 = vadd.f32 %v11256_v29, %v8110_v12 }
0x122a   :  { %v8139_v14 = vmax.f32 %v8135_v19, 0.0 }
0x122b   :  { %v8138_v33 = vmax.f32 %v8134_v2, 0.0  ;;  %v8146_v48 = vsel %vm194_vm3, %v8140_v58, %v8141_v28  ;;  %v8158_v13 = vsel %vm219_vm5, %v8152_v26, %v8153_v41 }
0x122c   :  { %v8143_v31 = vrot.slane %v8139_v14, 7  ;;  %v8155_v0 = vrot.slane %v8139_v14, 1 }
0x122d   :  { %v8142_v57 = vrot.slane %v8138_v33, 7  ;;  %v8154_v60 = vrot.slane %v8138_v33, 1 }
0x122e   :  { %v8147_v40 = vsel %vm194_vm3, %v8143_v31, %v8140_v58  ;;  %v8159_v27 = vsel %vm219_vm5, %v8155_v0, %v8152_v26 }
0x122f   :  { %v8157_v4 = vsel %vm219_vm5, %v8153_v41, %v8154_v60  ;;  %v8148_v46 = vmul.f32 %v14441_v61, %v8147_v40  ;;  %v8145_v3 = vsel %vm194_vm3, %v8141_v28, %v8142_v57  ;;  %v8144_v51 = vsel %vm194_vm3, %v8142_v57, %v8143_v31  ;;  %v8491_v61 = vld [vmem:[#allocation2 + $0xba0] sm:$0xff] }
0x1230   :  { %v8150_v30 = vmul.f32 %v14447_v39, %v8145_v3  ;;  %v8156_v36 = vsel %vm219_vm5, %v8154_v60, %v8155_v0  ;;  %v13728_v8 = vpack.c.bf16 %v8492_v17, %v8491_v61  ;;  %v8161_v39 = vmul.f32 %v14471_v45, %v8157_v4 }
0x1231   :  { %12969 = vmatprep.mubr.msk.f32.mxu1 %vm2037_vm9, %v8148_v46  ;;  %v8163_v18 = vmul.f32 %v14481_v59, %v8159_v27 }
0x1232   :  { %12970 = vmatmul.mubr.msk.f32.vlgmr.msra.gmra.mrb[54].mxu1 %vm2037_vm9, %v8146_v48 }
0x1233   :  { %12972 = vmatprep.mubr.msk.f32.mxu1 %vm2037_vm9, %v8150_v30  ;;  %13723 = vmatpush3.bf16.msra.mxu1 %v13720_v56 }
0x1234   :  { %13725 = vmatprep.subr.bf16.mxu1 %v13724_v6 }
0x1236   :  { %12973 = vmatmul.mubr.msk.f32.gmra.mrb[56].mxu1 %vm2037_vm9, %v8144_v51 }
0x1237   :  { %12979 = vmatprep.mubr.msk.f32.mxu1 %vm2037_vm9, %v8136_v23 }
0x123a   :  { %12980 = vmatmul.mubr.msk.f32.vlgmr.msra.gmra.mrb[54].mxu1 %vm2037_vm9, %v8137_v52 }
0x123b   :  { %12982 = vmatprep.mubr.msk.f32.mxu1 %vm2037_vm9, %v8138_v33  ;;  %13727 = vmatpush3.bf16.msra.mxu1 %v13724_v6  ;;  %v15285_v33 = vld [vmem:[#allocation2 + $0xbc0] ss:$0 sm:$0xff] }
0x123c   :  { %13729 = vmatprep.subr.bf16.mxu1 %v13728_v8 }
0x123e   :  { %12983 = vmatmul.mubr.msk.f32.gmra.mrb[56].mxu1 %vm2037_vm9, %v8139_v14  ;;  %v9633_v14 = vld [vmem:[#allocation2 + $0xbc8] sm:$0xff] }
0x123f   :  { %12989 = vmatprep.mubr.msk.f32.mxu1 %vm2037_vm9, %v8158_v13  ;;  %13025 = vmatprep.subr.mxu0 %v9633_v14 }
0x1240   :  { %13026 = vmatpush3.msra.mxu0 %v9633_v14 }
0x1242   :  { %12990 = vmatmul.mubr.msk.f32.vlgmr.msra.gmra.mrb[54].mxu1 %vm2037_vm9, %v8161_v39 }
0x1243   :  { %12992 = vmatprep.mubr.msk.f32.mxu1 %vm2037_vm9, %v8156_v36  ;;  %13731 = vmatpush3.bf16.msra.mxu1 %v13728_v8 }
0x1244   :  { %13733 = vmatprep.subr.bf16.mxu1 %v13732_v47 }
0x1246   :  { %12993 = vmatmul.mubr.msk.f32.gmra.mrb[56].mxu1 %vm2037_vm9, %v8163_v18 }
0x1315   :  { %v12991_v24 = vpop.f32.mrb[54].mxu1 }
0x1316   :  { %v8471_v62 = vadd.f32 %v12991_v24, %v11269_v49  ;;  %v8442_v10 = vpop.f32.mrb[55].mxu1 }
0x1317   :  { %v8470_v50 = vadd.f32 %v11269_v49, %v8442_v10 }
0x1318   :  { %v8475_v37 = vmax.f32 %v8471_v62, 0.0 }
0x1319   :  { %v8474_v9 = vmax.f32 %v8470_v50, 0.0  ;;  %v12994_v21 = vpop.f32.mrb[56].mxu1 }
0x131a   :  { %v8480_v56 = vrot.slane %v8475_v37, 1  ;;  %v8473_v29 = vadd.f32 %v12994_v21, %v11269_v49  ;;  %v8452_v38 = vpop.f32.mrb[57].mxu1 }
0x131b   :  { %v8479_v22 = vrot.slane %v8474_v9, 1  ;;  %v8472_v20 = vadd.f32 %v11269_v49, %v8452_v38  ;;  %12999 = vmatprep.mubr.msk.f32.mxu1 %vm2037_vm9, %v8474_v9 }
0x131c   :  { %v8477_v52 = vmax.f32 %v8473_v29, 0.0  ;;  %13000 = vmatmul.mubr.msk.f32.vlgmr.msra.gmra.mrb[58].mxu1 %vm2037_vm9, %v8475_v37 }
0x131d   :  { %v8476_v23 = vmax.f32 %v8472_v20, 0.0  ;;  %13735 = vmatpush3.bf16.msra.mxu1 %v13732_v47  ;;  %v8485_v54 = vsel %vm219_vm5, %v8479_v22, %v8480_v56 }
0x131e   :  { %v8482_v28 = vrot.slane %v8477_v52, 1  ;;  %13737 = vmatprep.subr.bf16.mxu1 %v13736_v55 }
0x131f   :  { %v8481_v41 = vrot.slane %v8476_v23, 1  ;;  %13002 = vmatprep.mubr.msk.f32.mxu1 %vm2037_vm9, %v8476_v23 }
0x1320   :  { %13003 = vmatmul.mubr.msk.f32.gmra.mrb[60].mxu1 %vm2037_vm9, %v8477_v52  ;;  %v8486_v19 = vsel %vm219_vm5, %v8482_v28, %v8479_v22 }
0x1321   :  { %v8484_v12 = vsel %vm219_vm5, %v8480_v56, %v8481_v41  ;;  %13009 = vmatprep.mubr.msk.f32.mxu1 %vm2037_vm9, %v8485_v54  ;;  %v8483_v58 = vsel %vm219_vm5, %v8481_v41, %v8482_v28  ;;  %v8490_v2 = vmul.f32 %v14481_v59, %v8486_v19 }
0x1322   :  { %v8488_v26 = vmul.f32 %v14471_v45, %v8484_v12  ;;  %v15282_v45 = vld [vmem:[#allocation2 + $0xbd0] sm:$0xff] }
0x1323   :  { %13039 = vmatprep.subr.mxu0 %v15282_v45 }
0x1324   :  { %13010 = vmatmul.mubr.msk.f32.vlgmr.msra.gmra.mrb[62].mxu1 %vm2037_vm9, %v8488_v26 }
0x1325   :  { %13012 = vmatprep.mubr.msk.f32.mxu1 %vm2037_vm9, %v8483_v58  ;;  %13739 = vmatpush3.bf16.msra.mxu1 %v13736_v55 }
0x1328   :  { %13013 = vmatmul.mubr.msk.f32.gmra.mrb[64].mxu1 %vm2037_vm9, %v8490_v2 }
0x1329   :  { %13019 = vmatprep.mubr.msk.f32.mxu1 %vm2037_vm9, %v8474_v9 }
0x132c   :  { %13020 = vmatmul.mubr.msk.f32.vlgmr.msra.gmra.mrb[62].mxu1 %vm2037_vm9, %v8475_v37 }
0x132d   :  { %13022 = vmatprep.mubr.msk.f32.mxu1 %vm2037_vm9, %v8476_v23 }
0x1330   :  { %13023 = vmatmul.mubr.msk.f32.gmra.mrb[64].mxu1 %vm2037_vm9, %v8477_v52 }
0x13ef   :  { %v13001_v59 = vpop.f32.mrb[58].mxu1 }
0x13f0   :  { %v8581_v48 = vadd.f32 %v13001_v59, %v15285_v33  ;;  %v8575_v13 = vpop.f32.mrb[59].mxu1 }
0x13f1   :  { %v8576_v31 = vadd.f32 %v15285_v33, %v8575_v13 }
0x13f2   :  { %v8837_v0 = vcombine.high %v8581_v48, %v8581_v48  ;;  %v8844_v57 = vrot.slane %v8581_v48, %v14846_v53 }
0x13f3   :  { %v8788_v60 = vcombine.high %v8576_v31, %v8576_v31  ;;  %v8795_v5 = vrot.slane %v8576_v31, %v14846_v53  ;;  %v13004_v7 = vpop.f32.mrb[60].mxu1 }
0x13f4   :  { %v8851_v40 = vrot.slane %v8837_v0, %v14846_v53  ;;  %v8591_v27 = vadd.f32 %v13004_v7, %v15285_v33  ;;  %v8585_v4 = vpop.f32.mrb[61].mxu1  ;;  %v8852_v46 = vcombine.high %v8844_v57, %v8844_v57  ;;  %v15294_v3 = vrot.slane %v8844_v57, %v14846_v53 }
0x13f5   :  { %v8802_v51 = vrot.slane %v8788_v60, %v14846_v53  ;;  %v8803_v30 = vcombine.high %v8795_v5, %v8795_v5  ;;  %v8586_v6 = vadd.f32 %v15285_v33, %v8585_v4  ;;  %v15299_v17 = vrot.slane %v8795_v5, %v14846_v53 }
0x13f6   :  { %v8853_v36 = vcombine.high %v8851_v40, %v8851_v40  ;;  %v15302_v8 = vrot.slane %v8851_v40, %v14846_v53  ;;  %v8935_v39 = vcombine.high %v8591_v27, %v8591_v27  ;;  %v15305_v18 = vrot.slane %v8852_v46, %v14846_v53 }
0x13f7   :  { %v8804_v61 = vcombine.high %v8802_v51, %v8802_v51  ;;  %v8882_v11 = vcombine.high %v15294_v3, %v15294_v3  ;;  %v15310_v25 = vrot.slane %v8802_v51, %v14846_v53  ;;  %v8942_v47 = vrot.slane %v8591_v27, %v14846_v53 }
0x13f8   :  { %v15314_v49 = vrot.slane %v8803_v30, %v14846_v53  ;;  %v8949_v24 = vrot.slane %v8935_v39, %v14846_v53  ;;  %v8886_v62 = vcombine.high %v8586_v6, %v8586_v6  ;;  %v8893_v10 = vrot.slane %v8586_v6, %v14846_v53 }
0x13f9   :  { %v15319_v50 = vrot.slane %v8853_v36, %v14846_v53  ;;  %v15322_v42 = vrot.slane %v8804_v61, %v14846_v53  ;;  %v8833_v63 = vcombine.high %v15299_v17, %v15299_v17  ;;  %v8950_v37 = vcombine.high %v8942_v47, %v8942_v47 }
0x13fa   :  { %v8951_v9 = vcombine.high %v8949_v24, %v8949_v24  ;;  %v15327_v21 = vrot.slane %v8942_v47, %v14846_v53  ;;  %v8900_v56 = vrot.slane %v8886_v62, %v14846_v53  ;;  %v8901_v29 = vcombine.high %v8893_v10, %v8893_v10 }
0x13fb   :  { %v8883_v38 = vcombine.high %v15302_v8, %v15302_v8  ;;  %v15333_v55 = vrot.slane %v8949_v24, %v14846_v53  ;;  %v15336_v22 = vrot.slane %v8950_v37, %v14846_v53  ;;  %v15339_v20 = vrot.slane %v8893_v10, %v14846_v53 }
0x13fc   :  { %v8884_v52 = vcombine.high %v15305_v18, %v15305_v18  ;;  %v15344_v23 = vrot.slane %v8951_v9, %v14846_v53  ;;  %v8902_v54 = vcombine.high %v8900_v56, %v8900_v56  ;;  %v15347_v28 = vrot.slane %v8900_v56, %v14846_v53 }
0x13fd   :  { %v8885_v41 = vcombine.high %v15319_v50, %v15319_v50  ;;  %v8834_v19 = vcombine.high %v15310_v25, %v15310_v25  ;;  %v8835_v12 = vcombine.high %v15314_v49, %v15314_v49  ;;  %v15356_v58 = vrot.slane %v8901_v29, %v14846_v53 }
0x13fe   :  { %v8836_v2 = vcombine.high %v15322_v42, %v15322_v42  ;;  %v8980_v14 = vcombine.high %v15327_v21, %v15327_v21  ;;  %v15363_v59 = vrot.slane %v8902_v54, %v14846_v53  ;;  %v8981_v31 = vcombine.high %v15333_v55, %v15333_v55 }
0x13ff   :  { %v13021_v26 = vpop.f32.mrb[62].mxu1  ;;  %v8982_v0 = vcombine.high %v15336_v22, %v15336_v22  ;;  %v8931_v57 = vcombine.high %v15339_v20, %v15339_v20  ;;  %v8983_v5 = vcombine.high %v15344_v23, %v15344_v23  ;;  %v8932_v7 = vcombine.high %v15347_v28, %v15347_v28 }
0x1400   :  { %v8781_v48 = vadd.f32 %v13021_v26, %v15285_v33  ;;  %v8761_v13 = vpop.f32.mrb[63].mxu1  ;;  %v8933_v4 = vcombine.high %v15356_v58, %v15356_v58  ;;  %v8934_v46 = vcombine.high %v15363_v59, %v15363_v59 }
0x1401   :  { %v8780_v60 = vadd.f32 %v15285_v33, %v8761_v13 }
0x1402   :  { %v9069_v40 = vcombine.high %v8781_v48, %v8781_v48  ;;  %v9076_v27 = vrot.slane %v8781_v48, %v14846_v53 }
0x1403   :  { %v9020_v51 = vcombine.high %v8780_v60, %v8780_v60  ;;  %v9027_v30 = vrot.slane %v8780_v60, %v14846_v53  ;;  %v13024_v6 = vpop.f32.mrb[64].mxu1 }
0x1404   :  { %v9083_v36 = vrot.slane %v9069_v40, %v14846_v53  ;;  %v9084_v61 = vcombine.high %v9076_v27, %v9076_v27  ;;  %v9092_v39 = vrot.slane %v9076_v27, %v14846_v53  ;;  %v15386_v47 = vadd.f32 %v13024_v6, %v15285_v33  ;;  %v8771_v24 = vpop.f32.mrb[65].mxu1 }
0x1405   :  { %v9034_v62 = vrot.slane %v9020_v51, %v14846_v53  ;;  %v9035_v10 = vcombine.high %v9027_v30, %v9027_v30  ;;  %v9043_v37 = vrot.slane %v9027_v30, %v14846_v53  ;;  %v15391_v9 = vadd.f32 %v15285_v33, %v8771_v24 }
0x1406   :  { %v9085_v56 = vcombine.high %v9083_v36, %v9083_v36  ;;  %v9099_v29 = vrot.slane %v9083_v36, %v14846_v53  ;;  %v9106_v54 = vrot.slane %v9084_v61, %v14846_v53  ;;  %v9114_v26 = vcombine.high %v9092_v39, %v9092_v39 }
0x1407   :  { %v9251_v48 = vrot.slane %v9092_v39, %v14850_v15  ;;  %v9036_v13 = vcombine.high %v9034_v62, %v9034_v62  ;;  %v9050_v60 = vrot.slane %v9034_v62, %v14846_v53  ;;  %v9057_v40 = vrot.slane %v9035_v10, %v14846_v53 }
0x1408   :  { %v9113_v27 = vrot.slane %v9085_v56, %v14846_v53  ;;  %v9115_v51 = vcombine.high %v9099_v29, %v9099_v29  ;;  %v9116_v30 = vcombine.high %v9106_v54, %v9106_v54  ;;  %v9255_v33 = vrot.slane %v9106_v54, %v14850_v15 }
0x1409   :  { %v9259_v6 = vrot.slane %v9114_v26, %v14850_v15  ;;  %v9267_v36 = vrot.slane %v9099_v29, %v14850_v15  ;;  %v9384_v61 = vsel %vm263_vm0, %v15294_v3, %v9251_v48  ;;  %v9064_v39 = vrot.slane %v9036_v13, %v14846_v53 }
0x140a   :  { %v9117_v24 = vcombine.high %v9113_v27, %v9113_v27  ;;  %v9263_v62 = vrot.slane %v9116_v30, %v14850_v15  ;;  %v9271_v10 = vrot.slane %v9113_v27, %v14850_v15  ;;  %v9275_v56 = vrot.slane %v9115_v51, %v14850_v15 }
0x140b   :  { %v9385_v43 = vsel %vm263_vm0, %v15305_v18, %v9255_v33  ;;  %v15414_v29 = vsel %vm263_vm0, %v8882_v11, %v9259_v6  ;;  %v15418_v54 = vsel %vm263_vm0, %v15302_v8, %v9267_v36  ;;  %v9065_v26 = vcombine.high %v9043_v37, %v9043_v37 }
0x140c   :  { %v9279_v48 = vrot.slane %v9117_v24, %v14850_v15  ;;  %v15422_v13 = vsel %vm263_vm0, %v8884_v52, %v9263_v62  ;;  %v15426_v27 = vsel %vm263_vm0, %v15319_v50, %v9271_v10  ;;  %v15432_v3 = vsel %vm263_vm0, %v8883_v38, %v9275_v56 }
0x140d   :  { %v9474_v18 = vcombine.low %v9384_v61, %v9385_v43  ;;  %v9475_v11 = vcombine.low %v15414_v29, %v15422_v13  ;;  %v9491_v51 = vcombine.low %v15418_v54, %v15426_v27  ;;  %v9066_v30 = vcombine.high %v9050_v60, %v9050_v60 }
0x140e   :  { %v15442_v52 = vsel %vm263_vm0, %v8885_v41, %v9279_v48  ;;  %v9067_v33 = vcombine.high %v9057_v40, %v9057_v40  ;;  %v9068_v6 = vcombine.high %v9064_v39, %v9064_v39  ;;  %v9219_v8 = vrot.slane %v9043_v37, %v14850_v15 }
0x140f   :  { %v15446_v38 = vrot.slane %v9474_v18, %v14209_v35  ;;  %v9492_v43 = vcombine.low %v15432_v3, %v15442_v52  ;;  %v9223_v36 = vrot.slane %v9057_v40, %v14850_v15  ;;  %v9227_v61 = vrot.slane %v9065_v26, %v14850_v15 }
0x1410   :  { %v9231_v24 = vrot.slane %v9067_v33, %v14850_v15  ;;  %v9235_v50 = vrot.slane %v9050_v60, %v14850_v15  ;;  %v9239_v41 = vrot.slane %v9064_v39, %v14850_v15  ;;  %v9243_v62 = vrot.slane %v9066_v30, %v14850_v15 }
0x1411   :  { %v9247_v37 = vrot.slane %v9068_v6, %v14850_v15  ;;  %v9376_v10 = vsel %vm263_vm0, %v15299_v17, %v9219_v8  ;;  %v9377_v56 = vsel %vm263_vm0, %v15314_v49, %v9223_v36  ;;  %v9378_v40 = vsel %vm263_vm0, %v8833_v63, %v9227_v61 }
0x1412   :  { %v9379_v60 = vsel %vm263_vm0, %v8835_v12, %v9231_v24  ;;  %v9380_v39 = vsel %vm263_vm0, %v15310_v25, %v9235_v50  ;;  %v9381_v26 = vsel %vm263_vm0, %v15322_v42, %v9239_v41  ;;  %v9382_v48 = vsel %vm263_vm0, %v8834_v19, %v9243_v62 }
0x1413   :  { %v9383_v17 = vsel %vm263_vm0, %v8836_v2, %v9247_v37  ;;  %v9440_v63 = vcombine.low %v9376_v10, %v9377_v56  ;;  %v9441_v49 = vcombine.low %v9378_v40, %v9379_v60  ;;  %v9457_v18 = vcombine.low %v9380_v39, %v9381_v26 }
0x1414   :  { %v9458_v12 = vcombine.low %v9382_v48, %v9383_v17  ;;  %v9167_v30 = vcombine.high %v15386_v47, %v15386_v47  ;;  %v9174_v33 = vrot.slane %v15386_v47, %v14846_v53  ;;  %v9118_v25 = vcombine.high %v15391_v9, %v15391_v9 }
0x1415   :  { %v9448_v19 = vrot.slane %v9440_v63, %v14209_v35  ;;  %v9455_v6 = vrot.slane %v9441_v49, %v14209_v35  ;;  %v15490_v42 = vrot.slane %v9457_v18, %v14209_v35  ;;  %v9125_v2 = vrot.slane %v15391_v9, %v14846_v53 }
0x1416   :  { %v15495_v8 = vrot.slane %v9458_v12, %v14209_v35  ;;  %v9181_v36 = vrot.slane %v9167_v30, %v14846_v53  ;;  %v9182_v61 = vcombine.high %v9174_v33, %v9174_v33  ;;  %v9190_v47 = vrot.slane %v9174_v33, %v14846_v53 }
0x1417   :  { %v15499_v24 = vcombine.low %v9448_v19, %v9455_v6  ;;  %v9132_v50 = vrot.slane %v9118_v25, %v14846_v53  ;;  %v9133_v41 = vcombine.high %v9125_v2, %v9125_v2  ;;  %v9141_v62 = vrot.slane %v9125_v2, %v14846_v53 }
0x1418   :  { %v9183_v37 = vcombine.high %v9181_v36, %v9181_v36  ;;  %v9197_v10 = vrot.slane %v9181_v36, %v14846_v53  ;;  %v9204_v9 = vrot.slane %v9182_v61, %v14846_v53  ;;  %v9212_v56 = vcombine.high %v9190_v47, %v9190_v47 }
0x1419   :  { %v9315_v40 = vrot.slane %v9190_v47, %v14850_v15  ;;  %v9134_v60 = vcombine.high %v9132_v50, %v9132_v50  ;;  %v9148_v39 = vrot.slane %v9132_v50, %v14846_v53  ;;  %v9155_v26 = vrot.slane %v9133_v41, %v14846_v53 }
0x141a   :  { %v9211_v48 = vrot.slane %v9183_v37, %v14846_v53  ;;  %v9213_v17 = vcombine.high %v9197_v10, %v9197_v10  ;;  %v9214_v63 = vcombine.high %v9204_v9, %v9204_v9  ;;  %v9319_v49 = vrot.slane %v9204_v9, %v14850_v15 }
0x141b   :  { %v9323_v18 = vrot.slane %v9212_v56, %v14850_v15  ;;  %v9331_v12 = vrot.slane %v9197_v10, %v14850_v15  ;;  %v9400_v30 = vsel %vm263_vm0, %v15327_v21, %v9315_v40  ;;  %v9162_v33 = vrot.slane %v9134_v60, %v14846_v53 }
0x141c   :  { %v9215_v25 = vcombine.high %v9211_v48, %v9211_v48  ;;  %v9327_v19 = vrot.slane %v9214_v63, %v14850_v15  ;;  %v9335_v6 = vrot.slane %v9211_v48, %v14850_v15  ;;  %v9339_v2 = vrot.slane %v9213_v17, %v14850_v15 }
0x141d   :  { %v9401_v36 = vsel %vm263_vm0, %v15336_v22, %v9319_v49  ;;  %v9402_v61 = vsel %vm263_vm0, %v8980_v14, %v9323_v18  ;;  %v9404_v47 = vsel %vm263_vm0, %v15333_v55, %v9331_v12  ;;  %v9163_v50 = vcombine.high %v9141_v62, %v9141_v62 }
0x141e   :  { %v9343_v53 = vrot.slane %v9215_v25, %v14850_v15  ;;  %v9403_v41 = vsel %vm263_vm0, %v8982_v0, %v9327_v19  ;;  %v9405_v37 = vsel %vm263_vm0, %v15344_v23, %v9335_v6  ;;  %v9406_v21 = vsel %vm263_vm0, %v8981_v31, %v9339_v2 }
0x141f   :  { %v9542_v14 = vcombine.low %v9400_v30, %v9401_v36  ;;  %v9543_v10 = vcombine.low %v9402_v61, %v9403_v41  ;;  %v9559_v9 = vcombine.low %v9404_v47, %v9405_v37  ;;  %v9164_v56 = vcombine.high %v9148_v39, %v9148_v39 }
0x1420   :  { %v9407_v40 = vsel %vm263_vm0, %v8983_v5, %v9343_v53  ;;  %v9165_v22 = vcombine.high %v9155_v26, %v9155_v26  ;;  %v9166_v60 = vcombine.high %v9162_v33, %v9162_v33  ;;  %v9283_v0 = vrot.slane %v9141_v62, %v14850_v15 }
0x1421   :  { %v9550_v48 = vrot.slane %v9542_v14, %v14209_v35  ;;  %v9560_v17 = vcombine.low %v9406_v21, %v9407_v40  ;;  %v9567_v55 = vrot.slane %v9559_v9, %v14209_v35  ;;  %v9287_v31 = vrot.slane %v9155_v26, %v14850_v15 }
0x1422   :  { %v9291_v63 = vrot.slane %v9163_v50, %v14850_v15  ;;  %v9295_v49 = vrot.slane %v9165_v22, %v14850_v15  ;;  %v9299_v18 = vrot.slane %v9148_v39, %v14850_v15  ;;  %v9303_v23 = vrot.slane %v9162_v33, %v14850_v15 }
0x1423   :  { %v9574_v5 = vrot.slane %v9560_v17, %v14209_v35  ;;  %v9307_v12 = vrot.slane %v9164_v56, %v14850_v15  ;;  %v9311_v62 = vrot.slane %v9166_v60, %v14850_v15  ;;  %v9392_v30 = vsel %vm263_vm0, %v15339_v20, %v9283_v0  ;;  %v9884_v56 = vld [vmem:[#allocation2 + $0xbd8] sm:$0xff] }
0x1424   :  { %v9393_v26 = vsel %vm263_vm0, %v15356_v58, %v9287_v31  ;;  %v9394_v25 = vsel %vm263_vm0, %v8931_v57, %v9291_v63  ;;  %v9395_v39 = vsel %vm263_vm0, %v8933_v4, %v9295_v49  ;;  %v9396_v33 = vsel %vm263_vm0, %v15347_v28, %v9299_v18 }
0x1425   :  { %v9397_v15 = vsel %vm263_vm0, %v15363_v59, %v9303_v23  ;;  %v9398_v19 = vsel %vm263_vm0, %v8932_v7, %v9307_v12  ;;  %v9399_v20 = vsel %vm263_vm0, %v8934_v46, %v9311_v62  ;;  %v9508_v57 = vcombine.low %v9392_v30, %v9393_v26  ;;  %vm15828_vm0 = vmpackc.low %vm716_vm8, %vm716_vm8 }
0x1426   :  { %v9509_v58 = vcombine.low %v9394_v25, %v9395_v39  ;;  %v9525_v6 = vcombine.low %v9396_v33, %v9397_v15  ;;  %v9526_v4 = vcombine.low %v9398_v19, %v9399_v20  ;;  %v15576_v2 = vcombine.low %v9567_v55, %v9574_v5  ;;  %v10071_v33 = vld [vmem:[#allocation2 + $0xbe8] sm:$0xff] }
0x1427   :  { %v9516_v36 = vrot.slane %v9508_v57, %v14209_v35  ;;  %v9584_v61 = vrot.slane %v15499_v24, 7  ;;  %v9473_v28 = vcombine.low %v15490_v42, %v15495_v8  ;;  %v9489_v59 = vrot.slane %v9475_v11, %v14209_v35  ;;  %v15890_v19 = vld [vmem:[#allocation12_spill] sm:$0xff]  ;;  %v15891_v57 = vld [vmem:[#allocation7_spill] sm:$0xff] }
0x1428   :  { %v9523_v7 = vrot.slane %v9509_v58, %v14209_v35  ;;  %v9591_v46 = vrot.slane %v15576_v2, 7  ;;  %v9499_v47 = vrot.slane %v9491_v51, %v14209_v35  ;;  %v9506_v50 = vrot.slane %v9492_v43, %v14209_v35 }
0x1429   :  { %v9585_v42 = vrot.slane %v9473_v28, 7  ;;  %v9490_v8 = vcombine.low %v15446_v38, %v9489_v59  ;;  %v9533_v29 = vrot.slane %v9525_v6, %v14209_v35  ;;  %v9540_v13 = vrot.slane %v9526_v4, %v14209_v35  ;;  %v15892_v4 = vld [vmem:[#allocation5_spill] sm:$0xff] }
0x142a   :  { %v9524_v11 = vcombine.low %v9516_v36, %v9523_v7  ;;  %v9599_v53 = vsel %vm194_vm3, %v9591_v46, %v9584_v61  ;;  %v9507_v41 = vcombine.low %v9499_v47, %v9506_v50  ;;  %v9557_v54 = vrot.slane %v9543_v10, %v14209_v35  ;;  %v15894_v59 = vld [vmem:[#allocation9_spill] sm:$0xff]  ;;  %v15896_v50 = vld [vmem:[#allocation8_spill] sm:$0xff] }
0x142b   :  { %v9600_v27 = vmul.f32 %v14035_v16, %v9599_v53  ;;  %v9598_v3 = vsel %vm194_vm3, %v9584_v61, %v9585_v42  ;;  %v9586_v51 = vrot.slane %v9490_v8, 7  ;;  %v9541_v52 = vcombine.low %v9533_v29, %v9540_v13  ;;  %v15893_v61 = vld [vmem:[#allocation6_spill] sm:$0xff] }
0x142c   :  { %v9587_v43 = vrot.slane %v9507_v41, 7  ;;  %v9588_v38 = vrot.slane %v9524_v11, 7  ;;  %v9558_v37 = vcombine.low %v9550_v48, %v9557_v54  ;;  %v9608_v21 = vrot.slane %v15499_v24, 1  ;;  %v10322_v29 = vld [vmem:[#allocation2 + $0xbf8] sm:$0xff] }
0x142d   :  { %13027 = vmatprep.mubr.msk.f32.mxu0 %vm716_vm8, %v9600_v27  ;;  %v9597_v14 = vsel %vm194_vm3, %v9585_v42, %v9586_v51  ;;  %v9589_v9 = vrot.slane %v9541_v52, 7  ;;  %v9609_v35 = vrot.slane %v9473_v28, 1  ;;  %v9610_v10 = vrot.slane %v9490_v8, 1  ;;  %v15897_v54 = vld [vmem:[#allocation10_spill] sm:$0xff] }
0x142e   :  { %13028 = vmatmul.mubr.msk.f32.vlgmr.msra.gmra.mrb[48].mxu0 %vm716_vm8, %v9598_v3  ;;  %v9596_v40 = vsel %vm194_vm3, %v9586_v51, %v9587_v43  ;;  %v9595_v22 = vsel %vm194_vm3, %v9587_v43, %v9588_v38  ;;  %v9590_v60 = vrot.slane %v9558_v37, 7  ;;  %v9611_v0 = vrot.slane %v9507_v41, 1  ;;  %v15898_v3 = vld [vmem:[#allocation13_spill] sm:$0xff] }
0x142f   :  { %13030 = vmatprep.mubr.msk.f32.mxu0 %vm716_vm8, %v9597_v14  ;;  %13040 = vmatpush3.msra.mxu0 %v15282_v45  ;;  %v9604_v48 = vmul.f32 %v14062_v32, %v9595_v22  ;;  %v9594_v17 = vsel %vm194_vm3, %v9588_v38, %v9589_v9  ;;  %v9622_v55 = vsel %vm219_vm5, %v9608_v21, %v9609_v35  ;;  %v9612_v31 = vrot.slane %v9524_v11, 1 }
0x1430   :  { %v9593_v63 = vsel %vm194_vm3, %v9589_v9, %v9590_v60  ;;  %v9592_v49 = vsel %vm194_vm3, %v9590_v60, %v9591_v46  ;;  %13053 = vmatprep.subr.mxu0 %v9884_v56  ;;  %v9621_v18 = vsel %vm219_vm5, %v9609_v35, %v9610_v10  ;;  %v9620_v45 = vsel %vm219_vm5, %v9610_v10, %v9611_v0  ;;  %v15895_v46 = vld [vmem:[#allocation11_spill] sm:$0xff] }
0x1431   :  { %v9619_v23 = vsel %vm219_vm5, %v9611_v0, %v9612_v31  ;;  %v9613_v5 = vrot.slane %v9541_v52, 1  ;;  %v9614_v12 = vrot.slane %v9558_v37, 1  ;;  %v9615_v62 = vrot.slane %v15576_v2, 1 }
0x1432   :  { %13031 = vmatmul.mubr.msk.f32.gmra.mrb[50].mxu0 %vm716_vm8, %v9596_v40  ;;  %v9627_v15 = vmul.f32 %v14087_v44, %v9619_v23  ;;  %v10029_v20 = vrot.slane %v15890_v19, 7  ;;  %v10022_v58 = vrot.slane %v15891_v57, 7  ;;  %v10024_v7 = vrot.slane %v15894_v59, 7  ;;  %v15749_v23 = vld [vmem:[#allocation2 + $0xc08] sm:$0xff] }
0x1433   :  { %13033 = vmatprep.mubr.msk.f32.mxu0 %vm716_vm8, %v9604_v48  ;;  %v9618_v30 = vsel %vm219_vm5, %v9612_v31, %v9613_v5  ;;  %v9617_v26 = vsel %vm219_vm5, %v9613_v5, %v9614_v12  ;;  %v9616_v25 = vsel %vm219_vm5, %v9614_v12, %v9615_v62  ;;  %v9623_v39 = vsel %vm219_vm5, %v9615_v62, %v9608_v21  ;;  %v11331_v5 = vld [vmem:[#allocation2 + $0xbe0] ss:$0 sm:$0xff] }
0x1434   :  { %v10037_v6 = vsel %vm194_vm3, %v10029_v20, %v10022_v58  ;;  %v10026_v47 = vrot.slane %v15895_v46, 7  ;;  %v10025_v42 = vrot.slane %v15896_v50, 7  ;;  %v10027_v27 = vrot.slane %v15897_v54, 7 }
0x1435   :  { %v10038_v36 = vmul.f32 %v14035_v16, %v10037_v6  ;;  %v10028_v51 = vrot.slane %v15898_v3, 7  ;;  %v10047_v21 = vrot.slane %v15893_v61, 1  ;;  %v10048_v14 = vrot.slane %v15894_v59, 1 }
0x1436   :  { %13034 = vmatmul.mubr.msk.f32.gmra.mrb[52].mxu0 %vm716_vm8, %v9594_v17  ;;  %v10034_v53 = vsel %vm194_vm3, %v10024_v7, %v10025_v42  ;;  %v10050_v9 = vrot.slane %v15895_v46, 1  ;;  %v10049_v35 = vrot.slane %v15896_v50, 1  ;;  %v10051_v60 = vrot.slane %v15897_v54, 1 }
0x1437   :  { %13036 = vmatprep.mubr.msk.f32.mxu0 %vm716_vm8, %v9593_v63  ;;  %v10031_v43 = vsel %vm194_vm3, %v10027_v27, %v10028_v51  ;;  %v10030_v38 = vsel %vm194_vm3, %v10028_v51, %v10029_v20  ;;  %v10059_v10 = vsel %vm219_vm5, %v10047_v21, %v10048_v14  ;;  %v10052_v48 = vrot.slane %v15898_v3, 1 }
0x1438   :  { %v10057_v40 = vsel %vm219_vm5, %v10049_v35, %v10050_v9  ;;  %v10058_v22 = vsel %vm219_vm5, %v10048_v14, %v10049_v35  ;;  %v10053_v17 = vrot.slane %v15890_v19, 1 }
0x1439   :  { %v10065_v0 = vmul.f32 %v14087_v44, %v10057_v40  ;;  %v10055_v31 = vsel %vm219_vm5, %v10051_v60, %v10052_v48 }
0x143a   :  { %13037 = vmatmul.mubr.msk.f32.gmra.mrb[54].mxu0 %vm716_vm8, %v9592_v49  ;;  %v10054_v49 = vsel %vm219_vm5, %v10052_v48, %v10053_v17 }
0x143b   :  { %13041 = vmatprep.mubr.msk.f32.mxu0 %vm716_vm8, %v15499_v24  ;;  %v10070_v24 = vld [vmem:[#allocation2 + $0xbf0] sm:$0xff] }
0x143e   :  { %13042 = vmatmul.mubr.msk.f32.vlgmr.msra.gmra.mrb[48].mxu0 %vm716_vm8, %v9473_v28  ;;  %v10023_v28 = vrot.slane %v15893_v61, 7 }
0x143f   :  { %13044 = vmatprep.mubr.msk.f32.mxu0 %vm716_vm8, %v9490_v8  ;;  %13054 = vmatpush3.msra.mxu0 %v9884_v56 }
0x1440   :  { %13067 = vmatprep.subr.mxu0 %v10071_v33  ;;  %v10036_v8 = vsel %vm194_vm3, %v10022_v58, %v10023_v28  ;;  %v10035_v13 = vsel %vm194_vm3, %v10023_v28, %v10024_v7 }
0x1442   :  { %13045 = vmatmul.mubr.msk.f32.gmra.mrb[50].mxu0 %vm716_vm8, %v9507_v41 }
0x1443   :  { %13047 = vmatprep.mubr.msk.f32.mxu0 %vm716_vm8, %v9524_v11  ;;  %v10033_v11 = vsel %vm194_vm3, %v10025_v42, %v10026_v47 }
0x1444   :  { %v10042_v41 = vmul.f32 %v14062_v32, %v10033_v11 }
0x1446   :  { %13048 = vmatmul.mubr.msk.f32.gmra.mrb[52].mxu0 %vm716_vm8, %v9541_v52  ;;  %v10032_v52 = vsel %vm194_vm3, %v10026_v47, %v10027_v27 }
0x1447   :  { %13050 = vmatprep.mubr.msk.f32.mxu0 %vm716_vm8, %v9558_v37  ;;  %v10046_v37 = vrot.slane %v15891_v57, 1 }
0x1449   :  { %v10060_v56 = vsel %vm219_vm5, %v10046_v37, %v10047_v21  ;;  %v10061_v63 = vsel %vm219_vm5, %v10053_v17, %v10046_v37 }
0x144a   :  { %13051 = vmatmul.mubr.msk.f32.gmra.mrb[54].mxu0 %vm716_vm8, %v15576_v2  ;;  %v9631_v2 = vmul.f32 %v15892_v4, %v9623_v39 }
0x144b   :  { %13055 = vmatprep.mubr.msk.f32.mxu0 %vm716_vm8, %v9622_v55  ;;  %v10056_v55 = vsel %vm219_vm5, %v10050_v9, %v10051_v60 }
0x144e   :  { %13056 = vmatmul.mubr.msk.f32.vlgmr.msra.gmra.mrb[48].mxu0 %vm716_vm8, %v9621_v18  ;;  %v10069_v18 = vmul.f32 %v15892_v4, %v10061_v63 }
0x144f   :  { %13058 = vmatprep.mubr.msk.f32.mxu0 %vm716_vm8, %v9620_v45  ;;  %13068 = vmatpush3.msra.mxu0 %v10071_v33  ;;  %v10538_v45 = vld [vmem:[#allocation2 + $0xc00] sm:$0xff] }
0x1450   :  { %13081 = vmatprep.subr.mxu0 %v10070_v24  ;;  %13109 = vmatprep.subr.mxu1 %v10538_v45 }
0x1451   :  { %13110 = vmatpush3.msra.mxu1 %v10538_v45 }
0x1452   :  { %13059 = vmatmul.mubr.msk.f32.gmra.mrb[50].mxu0 %vm716_vm8, %v9627_v15  ;;  %13123 = vmatprep.subr.mxu1 %v15749_v23 }
0x1453   :  { %13061 = vmatprep.mubr.msk.f32.mxu0 %vm716_vm8, %v9618_v30 }
0x1456   :  { %13062 = vmatmul.mubr.msk.f32.gmra.mrb[52].mxu0 %vm716_vm8, %v9617_v26 }
0x1457   :  { %13064 = vmatprep.mubr.msk.f32.mxu0 %vm716_vm8, %v9616_v25 }
0x145a   :  { %13065 = vmatmul.mubr.msk.f32.gmra.mrb[54].mxu0 %vm716_vm8, %v9631_v2 }
0x145b   :  { %13069 = vmatprep.mubr.msk.f32.mxu0 %vm716_vm8, %v10038_v36 }
0x145e   :  { %13070 = vmatmul.mubr.msk.f32.vlgmr.msra.gmra.mrb[48].mxu0 %vm716_vm8, %v10036_v8 }
0x145f   :  { %13072 = vmatprep.mubr.msk.f32.mxu0 %vm716_vm8, %v10035_v13  ;;  %13082 = vmatpush3.msra.mxu0 %v10070_v24 }
0x1460   :  { %13095 = vmatprep.subr.mxu0 %v10322_v29 }
0x1462   :  { %13073 = vmatmul.mubr.msk.f32.gmra.mrb[50].mxu0 %vm716_vm8, %v10034_v53 }
0x1463   :  { %13075 = vmatprep.mubr.msk.f32.mxu0 %vm716_vm8, %v10042_v41 }
0x1466   :  { %13076 = vmatmul.mubr.msk.f32.gmra.mrb[52].mxu0 %vm716_vm8, %v10032_v52 }
0x1467   :  { %13078 = vmatprep.mubr.msk.f32.mxu0 %vm716_vm8, %v10031_v43 }
0x146a   :  { %13079 = vmatmul.mubr.msk.f32.gmra.mrb[54].mxu0 %vm716_vm8, %v10030_v38 }
0x146b   :  { %13083 = vmatprep.mubr.msk.f32.mxu0 %vm716_vm8, %v15891_v57 }
0x146e   :  { %13084 = vmatmul.mubr.msk.f32.vlgmr.msra.gmra.mrb[48].mxu0 %vm716_vm8, %v15893_v61 }
0x146f   :  { %13086 = vmatprep.mubr.msk.f32.mxu0 %vm716_vm8, %v15894_v59  ;;  %13096 = vmatpush3.msra.mxu0 %v10322_v29 }
0x1472   :  { %13087 = vmatmul.mubr.msk.f32.gmra.mrb[50].mxu0 %vm716_vm8, %v15896_v50 }
0x1473   :  { %13089 = vmatprep.mubr.msk.f32.mxu0 %vm716_vm8, %v15895_v46 }
0x1476   :  { %13090 = vmatmul.mubr.msk.f32.gmra.mrb[52].mxu0 %vm716_vm8, %v15897_v54 }
0x1477   :  { %13092 = vmatprep.mubr.msk.f32.mxu0 %vm716_vm8, %v15898_v3 }
0x147a   :  { %13093 = vmatmul.mubr.msk.f32.gmra.mrb[54].mxu0 %vm716_vm8, %v15890_v19 }
0x147b   :  { %13097 = vmatprep.mubr.msk.f32.mxu0 %vm716_vm8, %v10060_v56 }
0x147e   :  { %13098 = vmatmul.mubr.msk.f32.vlgmr.msra.gmra.mrb[48].mxu0 %vm716_vm8, %v10059_v10 }
0x147f   :  { %13100 = vmatprep.mubr.msk.f32.mxu0 %vm716_vm8, %v10058_v22 }
0x1482   :  { %13101 = vmatmul.mubr.msk.f32.gmra.mrb[50].mxu0 %vm716_vm8, %v10065_v0 }
0x1483   :  { %13103 = vmatprep.mubr.msk.f32.mxu0 %vm716_vm8, %v10056_v55 }
0x1486   :  { %13104 = vmatmul.mubr.msk.f32.gmra.mrb[52].mxu0 %vm716_vm8, %v10055_v31 }
0x1487   :  { %13106 = vmatprep.mubr.msk.f32.mxu0 %vm716_vm8, %v10054_v49 }
0x148a   :  { %13107 = vmatmul.mubr.msk.f32.gmra.mrb[54].mxu0 %vm716_vm8, %v10069_v18 }
0x1551   :  { %v13099_v12 = vpop.f32.mrb[48].mxu0 }
0x1552   :  { %v10474_v62 = vadd.f32 %v13099_v12, %v11331_v5  ;;  %v10413_v30 = vpop.f32.mrb[49].mxu0  ;;  %v10797_v12 = vld [vmem:[#allocation2 + $0xc10] sm:$0xff] }
0x1553   :  { %v10473_v26 = vadd.f32 %v11331_v5, %v10413_v30  ;;  %v13958_v30 = vmov 0  }
0x1554   :  { %v15752_v25 = vmax.f32 %v10474_v62, 0.0  ;;  %v10957_v62 = vld [vmem:[#allocation2 + $0xc28] sm:$0xf]  ;;  %13925 = vset.pattern.permute.xlu0 %v13958_v30 }
0x1555   :  { %v15754_v39 = vmax.f32 %v10473_v26, 0.0  ;;  %v13102_v33 = vpop.f32.mrb[50].mxu0  ;;  %10960 = vperm.xlu0 %13925, %v10957_v62  }
0x1556   :  { %v10490_v24 = vrot.slane %v15752_v25, 7  ;;  %v10514_v15 = vrot.slane %v15752_v25, 1  ;;  %v10476_v19 = vadd.f32 %v13102_v33, %v11331_v5  ;;  %v10423_v20 = vpop.f32.mrb[51].mxu0 }
0x1557   :  { %v10489_v57 = vrot.slane %v15754_v39, 7  ;;  %v10513_v58 = vrot.slane %v15754_v39, 1  ;;  %v10475_v6 = vadd.f32 %v11331_v5, %v10423_v20 }
0x1558   :  { %v10484_v2 = vmax.f32 %v10476_v19, 0.0 }
0x1559   :  { %v10483_v36 = vmax.f32 %v10475_v6, 0.0  ;;  %v13105_v61 = vpop.f32.mrb[52].mxu0  ;;  %v10503_v28 = vsel %vm194_vm3, %v10489_v57, %v10490_v24  ;;  %v10527_v59 = vsel %vm219_vm5, %v10513_v58, %v10514_v15 }
0x155a   :  { %v10492_v7 = vrot.slane %v10484_v2, 7  ;;  %v10516_v46 = vrot.slane %v10484_v2, 1  ;;  %v10478_v47 = vadd.f32 %v13105_v61, %v11331_v5  ;;  %v10433_v50 = vpop.f32.mrb[53].mxu0 }
0x155b   :  { %v10491_v42 = vrot.slane %v10483_v36, 7  ;;  %v10515_v8 = vrot.slane %v10483_v36, 1  ;;  %v10477_v29 = vadd.f32 %v11331_v5, %v10433_v50 }
0x155c   :  { %v10486_v13 = vmax.f32 %v10478_v47, 0.0 }
0x155d   :  { %v10485_v11 = vmax.f32 %v10477_v29, 0.0  ;;  %v13108_v53 = vpop.f32.mrb[54].mxu0  ;;  %v10502_v41 = vsel %vm194_vm3, %v10490_v24, %v10491_v42  ;;  %v10501_v54 = vsel %vm194_vm3, %v10491_v42, %v10492_v7  ;;  %v10526_v27 = vsel %vm219_vm5, %v10514_v15, %v10515_v8 }
0x155e   :  { %v10494_v3 = vrot.slane %v10486_v13, 7  ;;  %v10480_v51 = vadd.f32 %v13108_v53, %v11331_v5  ;;  %v10443_v52 = vpop.f32.mrb[55].mxu0  ;;  %v10525_v43 = vsel %vm219_vm5, %v10515_v8, %v10516_v46  ;;  %v10518_v38 = vrot.slane %v10486_v13, 1 }
0x155f   :  { %v10493_v37 = vrot.slane %v10485_v11, 7  ;;  %v10517_v21 = vrot.slane %v10485_v11, 1  ;;  %v10479_v14 = vadd.f32 %v11331_v5, %v10443_v52 }
0x1560   :  { %v10488_v9 = vmax.f32 %v10480_v51, 0.0 }
0x1561   :  { %v10487_v56 = vmax.f32 %v10479_v14, 0.0  ;;  %v10500_v35 = vsel %vm194_vm3, %v10492_v7, %v10493_v37  ;;  %v10499_v10 = vsel %vm194_vm3, %v10493_v37, %v10494_v3  ;;  %v10524_v40 = vsel %vm219_vm5, %v10516_v46, %v10517_v21 }
0x1562   :  { %v10496_v22 = vrot.slane %v10488_v9, 7  ;;  %v10520_v60 = vrot.slane %v10488_v9, 1  ;;  %v10523_v17 = vsel %vm219_vm5, %v10517_v21, %v10518_v38 }
0x1563   :  { %v10495_v0 = vrot.slane %v10487_v56, 7  ;;  %v10519_v48 = vrot.slane %v10487_v56, 1 }
0x1564   :  { %v10504_v55 = vsel %vm194_vm3, %v10496_v22, %v10489_v57  ;;  %v10528_v31 = vsel %vm219_vm5, %v10520_v60, %v10513_v58 }
0x1565   :  { %v10505_v63 = vmul.f32 %v14035_v16, %v10504_v55  ;;  %v10498_v49 = vsel %vm194_vm3, %v10494_v3, %v10495_v0  ;;  %v10497_v18 = vsel %vm194_vm3, %v10495_v0, %v10496_v22  ;;  %v10522_v45 = vsel %vm219_vm5, %v10518_v38, %v10519_v48 }
0x1566   :  { %v10521_v5 = vsel %vm219_vm5, %v10519_v48, %v10520_v60  ;;  %v10509_v16 = vmul.f32 %v14062_v32, %v10500_v35  ;;  %v10532_v32 = vmul.f32 %v14087_v44, %v10524_v40  ;;  %v11356_v44 = vld [vmem:[#allocation2 + $0xc18] ss:$0 sm:$0xff]  ;;  %vm11060_vm3 = vcmask 519168  }
0x1567   :  { %13111 = vmatprep.mubr.msk.f32.mxu1 %vm716_vm8, %v10505_v63 }
0x1568   :  { %13112 = vmatmul.mubr.msk.f32.vlgmr.msra.gmra.mrb[66].mxu1 %vm716_vm8, %v10503_v28 }
0x1569   :  { %13114 = vmatprep.mubr.msk.f32.mxu1 %vm716_vm8, %v10502_v41  ;;  %13124 = vmatpush3.msra.mxu1 %v15749_v23  ;;  %v10536_v23 = vmul.f32 %v15892_v4, %v10528_v31 }
0x156a   :  { %13137 = vmatprep.subr.mxu1 %v10797_v12 }
0x156c   :  { %13115 = vmatmul.mubr.msk.f32.gmra.mrb[68].mxu1 %vm716_vm8, %v10501_v54  ;;  %v10956_v54 = vld [vmem:[#allocation2 + $0xc20] sm:$0xf] }
0x156d   :  { %13117 = vmatprep.mubr.msk.f32.mxu1 %vm716_vm8, %v10509_v16 }
0x1570   :  { %13118 = vmatmul.mubr.msk.f32.gmra.mrb[70].mxu1 %vm716_vm8, %v10499_v10 }
0x1571   :  { %13120 = vmatprep.mubr.msk.f32.mxu1 %vm716_vm8, %v10498_v49 }
0x1574   :  { %13121 = vmatmul.mubr.msk.f32.gmra.mrb[72].mxu1 %vm716_vm8, %v10497_v18 }
0x1575   :  { %13125 = vmatprep.mubr.msk.f32.mxu1 %vm716_vm8, %v15754_v39 }
0x1578   :  { %13126 = vmatmul.mubr.msk.f32.vlgmr.msra.gmra.mrb[66].mxu1 %vm716_vm8, %v15752_v25 }
0x1579   :  { %13128 = vmatprep.mubr.msk.f32.mxu1 %vm716_vm8, %v10483_v36  ;;  %13138 = vmatpush3.msra.mxu1 %v10797_v12 }
0x157a   :  { %13740 = vmatprep.subr.bf16.mxu1 %v15899_v1 }
0x157c   :  { %13129 = vmatmul.mubr.msk.f32.gmra.mrb[68].mxu1 %vm716_vm8, %v10484_v2 }
0x157d   :  { %13131 = vmatprep.mubr.msk.f32.mxu1 %vm716_vm8, %v10485_v11 }
0x1580   :  { %13132 = vmatmul.mubr.msk.f32.gmra.mrb[70].mxu1 %vm716_vm8, %v10486_v13 }
0x1581   :  { %13134 = vmatprep.mubr.msk.f32.mxu1 %vm716_vm8, %v10487_v56 }
0x1584   :  { %13135 = vmatmul.mubr.msk.f32.gmra.mrb[72].mxu1 %vm716_vm8, %v10488_v9 }
0x1585   :  { %13139 = vmatprep.mubr.msk.f32.mxu1 %vm716_vm8, %v10527_v59 }
0x1588   :  { %13140 = vmatmul.mubr.msk.f32.vlgmr.msra.gmra.mrb[66].mxu1 %vm716_vm8, %v10526_v27 }
0x1589   :  { %13142 = vmatprep.mubr.msk.f32.mxu1 %vm716_vm8, %v10525_v43 }
0x158c   :  { %13143 = vmatmul.mubr.msk.f32.gmra.mrb[68].mxu1 %vm716_vm8, %v10532_v32 }
0x158d   :  { %13145 = vmatprep.mubr.msk.f32.mxu1 %vm716_vm8, %v10523_v17 }
0x1590   :  { %13146 = vmatmul.mubr.msk.f32.gmra.mrb[70].mxu1 %vm716_vm8, %v10522_v45 }
0x1591   :  { %13148 = vmatprep.mubr.msk.f32.mxu1 %vm716_vm8, %v10521_v5 }
0x1594   :  { %13149 = vmatmul.mubr.msk.f32.gmra.mrb[72].mxu1 %vm716_vm8, %v10536_v23 }
0x1595   :  { %13167 = vmatprep.mubr.msk.f32.mxu1 %vm13956_vm6, %v15889_v34 }
0x15d4   :  { %v10961_v27 = vpop.permute.xlu0 %10960 }
0x165b   :  { %v13141_v26 = vpop.f32.mrb[66].mxu1 }
0x165c   :  { %v10941_v25 = vadd.f32 %v13141_v26, %v11356_v44  ;;  %v10888_v39 = vpop.f32.mrb[67].mxu1 }
0x165d   :  { %v10940_v33 = vadd.f32 %v11356_v44, %v10888_v39 }
0x165e   :  { %v10949_v24 = vmax.f32 %v10941_v25, 0.0 }
0x165f   :  { %v10948_v15 = vmax.f32 %v10940_v33, 0.0  ;;  %v13144_v19 = vpop.f32.mrb[68].mxu1 }
0x1660   :  { %v10943_v20 = vadd.f32 %v13144_v19, %v11356_v44  ;;  %v10898_v57 = vpop.f32.mrb[69].mxu1 }
0x1661   :  { %v13741_v34 = vpack.c.bf16 %v10949_v24, %v10948_v15  ;;  %v10942_v58 = vadd.f32 %v11356_v44, %v10898_v57 }
0x1662   :  { %v10951_v6 = vmax.f32 %v10943_v20, 0.0 }
0x1663   :  { %v10950_v2 = vmax.f32 %v10942_v58, 0.0  ;;  %v13147_v36 = vpop.f32.mrb[70].mxu1  ;;  %13743 = vmatpush3.bf16.xpose.msk.msra.mxu1 %vm15828_vm0, %v13741_v34 }
0x1664   :  { %v10945_v61 = vadd.f32 %v13147_v36, %v11356_v44  ;;  %v10908_v28 = vpop.f32.mrb[71].mxu1  ;;  %13744 = vmatprep.subr.bf16.mxu1 %v15899_v1 }
0x1665   :  { %v13745_v59 = vpack.c.bf16 %v10951_v6, %v10950_v2  ;;  %v10944_v7 = vadd.f32 %v11356_v44, %v10908_v28 }
0x1666   :  { %v10953_v46 = vmax.f32 %v10945_v61, 0.0 }
0x1667   :  { %v10952_v47 = vmax.f32 %v10944_v7, 0.0  ;;  %v13150_v50 = vpop.f32.mrb[72].mxu1 }
0x1668   :  { %v10947_v42 = vadd.f32 %v13150_v50, %v11356_v44  ;;  %v10918_v8 = vpop.f32.mrb[73].mxu1 }
0x1669   :  { %v13749_v29 = vpack.c.bf16 %v10953_v46, %v10952_v47  ;;  %v10946_v13 = vadd.f32 %v11356_v44, %v10918_v8 }
0x166a   :  { %v10955_v11 = vmax.f32 %v10947_v42, 0.0 }
0x166b   :  { %v10954_v53 = vmax.f32 %v10946_v13, 0.0  ;;  %13747 = vmatpush3.bf16.xpose.msk.msra.mxu1 %vm15828_vm0, %v13745_v59 }
0x166c   :  { %13748 = vmatprep.subr.bf16.mxu1 %v15899_v1 }
0x166d   :  { %v13753_v41 = vpack.c.bf16 %v10955_v11, %v10954_v53 }
0x1673   :  { %13751 = vmatpush3.bf16.xpose.msk.msra.mxu1 %vm15828_vm0, %v13749_v29 }
0x1674   :  { %13752 = vmatprep.subr.bf16.mxu1 %v15899_v1 }
0x167b   :  { %13755 = vmatpush3.bf16.xpose.msk.msra.mxu1 %vm15828_vm0, %v13753_v41 }
0x1682   :  { %13168 = vmatmul.mubr.msk.f32.vlgmr.msra.gmra.mrb[74].mxu1 %vm716_vm8, %v10956_v54 }
0x1755   :  { %v11056_v3 = vpop.f32.mrb[74].mxu1 }
0x1756   :  { %v11057_v51 = vadd.f32 %v11056_v3, %v10961_v27  ;;  %v13169_v52 = vpop.f32.mrb[75].mxu1 }
0x1758   :  { %11061 = vst.msk [vmem:[%s15849_s2] sm:$0xf] %vm11060_vm3, %v11057_v51 }
0x1759   :  { %11066 = vsyncpa [#allocation3], 1 }

</bundles_post_ra>
